<compile_context>
chip_gen: v5e
topology: v5e:2x2
jax: 0.10.0
libtpu: 0.0.40
codegen_flags: <defaults>
</compile_context>

<pallas_src>
import functools

import jax
import jax.numpy as jnp
from jax.experimental import pallas as pl
from jax.experimental.pallas import tpu as pltpu

HALO = 5  # 5 chained 3x3 convs -> 5-row halo per spatial tile


def _round_up(x, m):
    return (x + m - 1) // m * m


# ------------------------------ fused RDB kernel ---------------------------- #

def _rdb_kernel(xwin_ref,
                w1_ref, w2_ref, w3_ref, w4_ref, w5_ref,
                b1_ref, b2_ref, b3_ref, b4_ref, b5_ref,
                out_ref, feat_ref, sh_ref, *, Wp, TH, C0, gc):
    """One batch element x one H-tile of the whole ResidualDenseBlock.

    xwin_ref : (1, 1, L*Wp, C0+1)  haloed x window in padded row space (bf16);
                                   channel C0 is the {0,1} validity mask.
    w*_ref   : (3, Cin_i, 3*Cout)  per-dh weights, dw taps stacked along N.
    b*_ref   : (1, Cout)           biases (f32).
    out_ref  : (1, TH*Wp, C0)      final tile output in padded row space.
    feat_ref : (L*Wp, Ctot)        VMEM scratch: [x | x1 | x2 | x3 | x4] (bf16).
    sh_ref   : ((L-2)*Wp+16, 2*CM) f32 scratch used for the +-1 row shifts.
    """
    L = TH + 2 * HALO
    CM = sh_ref.shape[1] // 2          # column stride between the two shift banks

    # Stage the haloed x window (channels [0, C0)) into the merged feature
    # scratch.  Grown channels are written by conv1..4 before any conv reads
    # them (true per-conv K), so NO zero-init of the scratch is needed.
    feat_ref[:, 0:C0] = xwin_ref[0, 0, :, 0:C0]

    def conv(i, w_ref, b_ref):
        """3x3 conv over data planes [i, L-i); dw folded into the matmul N dim."""
        nrows = (L - 2 * i) * Wp
        row0 = i * Wp
        Ck = w_ref.shape[1]            # true cin of this conv
        c = w_ref.shape[2] // 3        # cout

        acc = jnp.zeros((nrows, 3 * c), jnp.float32)
        for g in range(3):             # dh = g - 1  -> sublane-aligned LHS shift
            r = row0 + (g - 1) * Wp
            acc = acc + jnp.dot(feat_ref[r:r + nrows, 0:Ck], w_ref[g],
                                preferred_element_type=jnp.float32)

        # Combine the dw = -1 / 0 / +1 column groups with +-1 row-space shifts,
        # staged through the f32 scratch (big store aligned, narrow loads only).
        zrow = jnp.zeros((1, c), jnp.float32)
        sh_ref[8:8 + nrows, 0:c] = acc[:, 0:c]                   # dw = -1 bank
        sh_ref[7:8, 0:c] = zrow
        sh_ref[8:8 + nrows, CM:CM + c] = acc[:, 2 * c:3 * c]     # dw = +1 bank
        sh_ref[8 + nrows:9 + nrows, CM:CM + c] = zrow
        y = (acc[:, c:2 * c]
             + sh_ref[7:7 + nrows, 0:c]          # y[i] += acc[i-1, dw=-1]
             + sh_ref[9:9 + nrows, CM:CM + c]    # y[i] += acc[i+1, dw=+1]
             + b_ref[...])
        return y, row0, nrows

    # ---- conv1..conv4: LeakyReLU(0.2), zero outside the image, store into feat.
    for i, (w_ref, b_ref) in enumerate(
            ((w1_ref, b1_ref), (w2_ref, b2_ref),
             (w3_ref, b3_ref), (w4_ref, b4_ref)), start=1):
        y, row0, nrows = conv(i, w_ref, b_ref)
        y = jnp.where(y > 0, y, 0.2 * y)                         # LeakyReLU(0.2)
        mask = xwin_ref[0, 0, row0:row0 + nrows, C0:C0 + 1].astype(jnp.float32)
        c_lo = C0 + (i - 1) * gc
        feat_ref[row0:row0 + nrows, c_lo:c_lo + gc] = (
            y * mask).astype(feat_ref.dtype)

    # ---- conv5 + 0.2-scaled residual over the tile's TH output planes.
    y5, row0, nrows = conv(5, w5_ref, b5_ref)
    x_res = feat_ref[row0:row0 + nrows, 0:C0].astype(jnp.float32)
    out_ref[0] = (y5 * 0.2 + x_res).astype(out_ref.dtype)


# ----------------------- parameter prep (one-time) -------------------------- #

def prepare_rdb_params(params, num_feat, num_grow_ch, dtype=jnp.bfloat16):
    """PyTorch OIHW weights -> (3 dh groups, Cin, 3*Cout) with the 3 dw taps
    stacked along the output (N) dimension of the matmul.  K is the TRUE cin of
    each conv (no padding to Ctot)."""
    del num_feat, num_grow_ch
    out = {}
    for i in range(1, 6):
        w = params[f"w{i}"]                           # (Cout, Cin, 3, 3) OIHW
        cout, cin = w.shape[0], w.shape[1]
        wt = jnp.transpose(w, (2, 3, 1, 0))           # (kh, kw, Cin, Cout)
        wg = jnp.transpose(wt, (0, 2, 1, 3))          # (kh, Cin, kw, Cout)
        out[f"w{i}"] = wg.reshape(3, cin, 3 * cout).astype(dtype)
        out[f"b{i}"] = params[f"b{i}"].reshape(1, cout).astype(jnp.float32)
    return out


# ------------------------------ public wrapper ------------------------------ #

def residual_dense_block(x_nchw, prepped, num_feat, num_grow_ch, *,
                         tile_h=None, compute_dtype=jnp.bfloat16,
                         vmem_limit_bytes=64 * 1024 * 1024):
    """Forward of ResidualDenseBlock. Input/output NCHW (PyTorch layout).

    tile_h: pick per generation so (L*Wp*Ctot + shift scratch + 2x haloed
    window + 2x out tile + f32 temporaries) fits the per-core VMEM budget
    (~48 MiB on v7x, can be ~2x larger on v5e/v6e).  Prefer N*n_t even so the
    two v7x TensorCores stay balanced.
    """
    N, C0, H, W = x_nchw.shape
    assert C0 == num_feat
    gc = num_grow_ch
    Ctot = C0 + 4 * gc
    TH = tile_h if tile_h is not None else H
    assert H % TH == 0, "tile_h must divide H"
    n_t = H // TH
    Wp = _round_up(W + 2, 8)                 # padded width (>=1 zero col each side)
    L = TH + 2 * HALO

    # NCHW -> NHWC bf16, append a {0,1} validity-mask channel, zero-pad rows by
    # HALO and columns to Wp, flatten to row space, then slice per-tile haloed
    # windows (halo rows duplicated host-side -> kernel VMEM is O(tile)).
    x_nhwc = jnp.transpose(x_nchw, (0, 2, 3, 1)).astype(compute_dtype)
    xm = jnp.concatenate(
        [x_nhwc, jnp.ones((N, H, W, 1), compute_dtype)], axis=-1)
    xm = jnp.pad(xm, ((0, 0), (HALO, HALO), (1, Wp - W - 1), (0, 0)))
    xm_rows = xm.reshape(N, (H + 2 * HALO) * Wp, C0 + 1)
    windows = jnp.stack(
        [xm_rows[:, t * TH * Wp: t * TH * Wp + L * Wp, :] for t in range(n_t)],
        axis=1)                              # (N, n_t, L*Wp, C0+1)

    kernel = functools.partial(_rdb_kernel, Wp=Wp, TH=TH, C0=C0, gc=gc)

    in_specs = [pl.BlockSpec((1, 1, L * Wp, C0 + 1),
                             lambda n, t: (n, t, 0, 0))]
    inputs = [windows]
    for i in range(1, 6):
        w = prepped[f"w{i}"]
        in_specs.append(pl.BlockSpec(w.shape, lambda n, t: (0, 0, 0)))
        inputs.append(w)
    for i in range(1, 6):
        b = prepped[f"b{i}"]
        in_specs.append(pl.BlockSpec(b.shape, lambda n, t: (0, 0)))
        inputs.append(b)

    CM = max(C0, gc)                         # shift-scratch column bank width
    out_rows = pl.pallas_call(
        kernel,
        out_shape=jax.ShapeDtypeStruct((N, H * Wp, C0), compute_dtype),
        grid=(N, n_t),
        in_specs=in_specs,
        out_specs=pl.BlockSpec((1, TH * Wp, C0), lambda n, t: (n, t, 0)),
        scratch_shapes=[
            pltpu.VMEM((L * Wp, Ctot), compute_dtype),            # [x|x1..x4]
            pltpu.VMEM(((L - 2) * Wp + 16, 2 * CM), jnp.float32), # shift banks
        ],
        compiler_params=pltpu.CompilerParams(
            dimension_semantics=("parallel", "parallel"),
            vmem_limit_bytes=vmem_limit_bytes),
    )(*inputs)

    # padded row space -> NHWC -> NCHW (final-output-only reshapes).
    out = out_rows.reshape(N, H, Wp, C0)[:, :, 1:W + 1, :]
    return jnp.transpose(out, (0, 3, 1, 2))


# ------------------------- deterministic parameters ------------------------- #

def init_params(key, num_feat, num_grow_ch):
    """Mimics default_init_weights: kaiming_normal (fan_in) * 0.1, bias = 0."""
    cins = [num_feat,
            num_feat + num_grow_ch,
            num_feat + 2 * num_grow_ch,
            num_feat + 3 * num_grow_ch,
            num_feat + 4 * num_grow_ch]
    couts = [num_grow_ch] * 4 + [num_feat]
    params = {}
    for i, (cin, cout) in enumerate(zip(cins, couts), start=1):
        key, sub = jax.random.split(key)
        fan_in = cin * 3 * 3
        std = (2.0 / fan_in) ** 0.5
        params[f"w{i}"] = (jax.random.normal(sub, (cout, cin, 3, 3),
                                             jnp.float32) * std * 0.1)
        params[f"b{i}"] = jnp.zeros((cout,), jnp.float32)
    return params


# ------------------------------ pure-JAX ref -------------------------------- #

def ref_forward(x, params):
    def conv(v, w, b):
        y = jax.lax.conv_general_dilated(
            v, w, (1, 1), ((1, 1), (1, 1)),
            dimension_numbers=("NCHW", "OIHW", "NCHW"),
            precision=jax.lax.Precision.HIGHEST)
        return y + b.reshape(1, -1, 1, 1)

    lrelu = lambda v: jnp.where(v > 0, v, 0.2 * v)
    x1 = lrelu(conv(x, params["w1"], params["b1"]))
    x2 = lrelu(conv(jnp.concatenate([x, x1], 1), params["w2"], params["b2"]))
    x3 = lrelu(conv(jnp.concatenate([x, x1, x2], 1), params["w3"], params["b3"]))
    x4 = lrelu(conv(jnp.concatenate([x, x1, x2, x3], 1),
                    params["w4"], params["b4"]))
    x5 = conv(jnp.concatenate([x, x1, x2, x3, x4], 1),
              params["w5"], params["b5"])
    return x5 * 0.2 + x


# ----------------------------------- main ----------------------------------- #

if __name__ == "__main__":
    num_feat, num_grow_ch = 16, 8        # same structure as the real (64, 32)
    N, H, W = 2, 16, 16
    TH = 8                               # 2 H-tiles/image -> exercises halo path

    key = jax.random.PRNGKey(0)
    key, kx = jax.random.split(key)
    x = jax.random.normal(kx, (N, num_feat, H, W), jnp.float32)   # NCHW input
    params = init_params(key, num_feat, num_grow_ch)

    x_bf16 = x.astype(jnp.bfloat16)
    prepped = prepare_rdb_params(params, num_feat, num_grow_ch)

    fwd = jax.jit(functools.partial(residual_dense_block,
                                    num_feat=num_feat,
                                    num_grow_ch=num_grow_ch,
                                    tile_h=TH))
    out = jax.block_until_ready(fwd(x_bf16, prepped))
    assert out.shape == x.shape

    ref = ref_forward(x_bf16.astype(jnp.float32), params)
    out_f32 = out.astype(jnp.float32)
    err = float(jnp.max(jnp.abs(out_f32 - ref)))
    assert jnp.allclose(out_f32, ref, atol=3e-2, rtol=3e-2), (
        "max abs err %g" % err)

    print("KERNEL_OK")
</pallas_src>

<mosaic_0001>
module attributes {stable_mosaic.version = 11 : i64} {
  func.func @_rdb_kernel(%arg0: i32, %arg1: i32, %arg2: memref<1x1x432x17xbf16, #tpu.memory_space<vmem>>, %arg3: memref<3x16x24xbf16, #tpu.memory_space<vmem>>, %arg4: memref<3x24x24xbf16, #tpu.memory_space<vmem>>, %arg5: memref<3x32x24xbf16, #tpu.memory_space<vmem>>, %arg6: memref<3x40x24xbf16, #tpu.memory_space<vmem>>, %arg7: memref<3x48x48xbf16, #tpu.memory_space<vmem>>, %arg8: memref<1x8xf32, #tpu.memory_space<vmem>>, %arg9: memref<1x8xf32, #tpu.memory_space<vmem>>, %arg10: memref<1x8xf32, #tpu.memory_space<vmem>>, %arg11: memref<1x8xf32, #tpu.memory_space<vmem>>, %arg12: memref<1x16xf32, #tpu.memory_space<vmem>>, %arg13: memref<1x192x16xbf16, #tpu.memory_space<vmem>>, %arg14: memref<432x48xbf16, #tpu.memory_space<vmem>>, %arg15: memref<400x32xf32, #tpu.memory_space<vmem>>) attributes {dimension_semantics = [#tpu.dimension_semantics<parallel>, #tpu.dimension_semantics<parallel>], iteration_bounds = array<i64: 2, 2>, scalar_prefetch = 0 : i64, scratch_operands = 2 : i64, tpu.core_type = #tpu.core_type<tc>, window_params = [{transform_indices = @transform_0, window_bounds = array<i64: 1, 1, 432, 17>}, {pipeline_mode = #tpu.pipeline_mode<synchronous>, transform_indices = @transform_1, window_bounds = array<i64: 3, 16, 24>}, {pipeline_mode = #tpu.pipeline_mode<synchronous>, transform_indices = @transform_2, window_bounds = array<i64: 3, 24, 24>}, {pipeline_mode = #tpu.pipeline_mode<synchronous>, transform_indices = @transform_3, window_bounds = array<i64: 3, 32, 24>}, {pipeline_mode = #tpu.pipeline_mode<synchronous>, transform_indices = @transform_4, window_bounds = array<i64: 3, 40, 24>}, {pipeline_mode = #tpu.pipeline_mode<synchronous>, transform_indices = @transform_5, window_bounds = array<i64: 3, 48, 48>}, {pipeline_mode = #tpu.pipeline_mode<synchronous>, transform_indices = @transform_6, window_bounds = array<i64: 1, 8>}, {pipeline_mode = #tpu.pipeline_mode<synchronous>, transform_indices = @transform_7, window_bounds = array<i64: 1, 8>}, {pipeline_mode = #tpu.pipeline_mode<synchronous>, transform_indices = @transform_8, window_bounds = array<i64: 1, 8>}, {pipeline_mode = #tpu.pipeline_mode<synchronous>, transform_indices = @transform_9, window_bounds = array<i64: 1, 8>}, {pipeline_mode = #tpu.pipeline_mode<synchronous>, transform_indices = @transform_10, window_bounds = array<i64: 1, 16>}, {transform_indices = @transform_11, window_bounds = array<i64: 1, 192, 16>}]} {
    %c0 = arith.constant 0 : index
    %c0_0 = arith.constant 0 : index
    %c0_1 = arith.constant 0 : index
    %c0_2 = arith.constant 0 : index
    %0 = vector.load %arg2[%c0, %c0_0, %c0_1, %c0_2] : memref<1x1x432x17xbf16, #tpu.memory_space<vmem>>, vector<1x1x432x16xbf16>
    %1 = vector.shape_cast %0 : vector<1x1x432x16xbf16> to vector<432x16xbf16>
    %c0_3 = arith.constant 0 : index
    %c0_4 = arith.constant 0 : index
    %2 = vector.load %arg14[%c0_3, %c0_4] : memref<432x48xbf16, #tpu.memory_space<vmem>>, vector<432x16xbf16>
    tpu.vector_store %arg14[%c0_3, %c0_4], %1 {strides = array<i32>} : memref<432x48xbf16, #tpu.memory_space<vmem>>, vector<432x16xbf16>,
    %cst = arith.constant 0.000000e+00 : f32
    %3 = vector.broadcast %cst : f32 to vector<384x24xf32>
    %c0_5 = arith.constant 0 : index
    %c0_6 = arith.constant 0 : index
    %4 = vector.load %arg14[%c0_5, %c0_6] : memref<432x48xbf16, #tpu.memory_space<vmem>>, vector<384x16xbf16>
    %c0_7 = arith.constant 0 : index
    %c0_8 = arith.constant 0 : index
    %c0_9 = arith.constant 0 : index
    %5 = vector.load %arg3[%c0_7, %c0_8, %c0_9] : memref<3x16x24xbf16, #tpu.memory_space<vmem>>, vector<1x16x24xbf16>
    %6 = vector.shape_cast %5 : vector<1x16x24xbf16> to vector<16x24xbf16>
    %cst_10 = arith.constant dense<0.000000e+00> : vector<384x24xf32>
    %7 = tpu.matmul %4, %6, %cst_10 {dimension_numbers = #tpu.dot_dimension_numbers<[1], [0], [0], [1], [0, 0, 1, 1], [], []>} : vector<384x16xbf16>, vector<16x24xbf16>, vector<384x24xf32> -> vector<384x24xf32>
    %8 = arith.addf %3, %7 : vector<384x24xf32>
    %c24 = arith.constant 24 : index
    %c0_11 = arith.constant 0 : index
    %9 = vector.load %arg14[%c24, %c0_11] : memref<432x48xbf16, #tpu.memory_space<vmem>>, vector<384x16xbf16>
    %c1 = arith.constant 1 : index
    %c0_12 = arith.constant 0 : index
    %c0_13 = arith.constant 0 : index
    %10 = vector.load %arg3[%c1, %c0_12, %c0_13] : memref<3x16x24xbf16, #tpu.memory_space<vmem>>, vector<1x16x24xbf16>
    %11 = vector.shape_cast %10 : vector<1x16x24xbf16> to vector<16x24xbf16>
    %cst_14 = arith.constant dense<0.000000e+00> : vector<384x24xf32>
    %12 = tpu.matmul %9, %11, %cst_14 {dimension_numbers = #tpu.dot_dimension_numbers<[1], [0], [0], [1], [0, 0, 1, 1], [], []>} : vector<384x16xbf16>, vector<16x24xbf16>, vector<384x24xf32> -> vector<384x24xf32>
    %13 = arith.addf %8, %12 : vector<384x24xf32>
    %c48 = arith.constant 48 : index
    %c0_15 = arith.constant 0 : index
    %14 = vector.load %arg14[%c48, %c0_15] : memref<432x48xbf16, #tpu.memory_space<vmem>>, vector<384x16xbf16>
    %c2 = arith.constant 2 : index
    %c0_16 = arith.constant 0 : index
    %c0_17 = arith.constant 0 : index
    %15 = vector.load %arg3[%c2, %c0_16, %c0_17] : memref<3x16x24xbf16, #tpu.memory_space<vmem>>, vector<1x16x24xbf16>
    %16 = vector.shape_cast %15 : vector<1x16x24xbf16> to vector<16x24xbf16>
    %cst_18 = arith.constant dense<0.000000e+00> : vector<384x24xf32>
    %17 = tpu.matmul %14, %16, %cst_18 {dimension_numbers = #tpu.dot_dimension_numbers<[1], [0], [0], [1], [0, 0, 1, 1], [], []>} : vector<384x16xbf16>, vector<16x24xbf16>, vector<384x24xf32> -> vector<384x24xf32>
    %18 = arith.addf %13, %17 : vector<384x24xf32>
    %cst_19 = arith.constant 0.000000e+00 : f32
    %19 = vector.broadcast %cst_19 : f32 to vector<1x8xf32>
    %20 = vector.extract_strided_slice %18 {offsets = [0, 0], sizes = [384, 8], strides = [1, 1]} : vector<384x24xf32> to vector<384x8xf32>
    %c8 = arith.constant 8 : index
    %c0_20 = arith.constant 0 : index
    %21 = vector.load %arg15[%c8, %c0_20] : memref<400x32xf32, #tpu.memory_space<vmem>>, vector<384x8xf32>
    tpu.vector_store %arg15[%c8, %c0_20], %20 {strides = array<i32>} : memref<400x32xf32, #tpu.memory_space<vmem>>, vector<384x8xf32>,
    %c7 = arith.constant 7 : index
    %c0_21 = arith.constant 0 : index
    %22 = vector.load %arg15[%c7, %c0_21] : memref<400x32xf32, #tpu.memory_space<vmem>>, vector<1x8xf32>
    tpu.vector_store %arg15[%c7, %c0_21], %19 {strides = array<i32>} : memref<400x32xf32, #tpu.memory_space<vmem>>, vector<1x8xf32>,
    %23 = vector.extract_strided_slice %18 {offsets = [0, 16], sizes = [384, 8], strides = [1, 1]} : vector<384x24xf32> to vector<384x8xf32>
    %c8_22 = arith.constant 8 : index
    %c16 = arith.constant 16 : index
    %24 = vector.load %arg15[%c8_22, %c16] : memref<400x32xf32, #tpu.memory_space<vmem>>, vector<384x8xf32>
    tpu.vector_store %arg15[%c8_22, %c16], %23 {strides = array<i32>} : memref<400x32xf32, #tpu.memory_space<vmem>>, vector<384x8xf32>,
    %c392 = arith.constant 392 : index
    %c16_23 = arith.constant 16 : index
    %25 = vector.load %arg15[%c392, %c16_23] : memref<400x32xf32, #tpu.memory_space<vmem>>, vector<1x8xf32>
    tpu.vector_store %arg15[%c392, %c16_23], %19 {strides = array<i32>} : memref<400x32xf32, #tpu.memory_space<vmem>>, vector<1x8xf32>,
    %26 = vector.extract_strided_slice %18 {offsets = [0, 8], sizes = [384, 8], strides = [1, 1]} : vector<384x24xf32> to vector<384x8xf32>
    %c7_24 = arith.constant 7 : index
    %c0_25 = arith.constant 0 : index
    %27 = vector.load %arg15[%c7_24, %c0_25] : memref<400x32xf32, #tpu.memory_space<vmem>>, vector<384x8xf32>
    %28 = arith.addf %26, %27 : vector<384x8xf32>
    %c9 = arith.constant 9 : index
    %c16_26 = arith.constant 16 : index
    %29 = vector.load %arg15[%c9, %c16_26] : memref<400x32xf32, #tpu.memory_space<vmem>>, vector<384x8xf32>
    %30 = arith.addf %28, %29 : vector<384x8xf32>
    %c0_27 = arith.constant 0 : index
    %c0_28 = arith.constant 0 : index
    %31 = vector.load %arg8[%c0_27, %c0_28] : memref<1x8xf32, #tpu.memory_space<vmem>>, vector<1x8xf32>
    %32 = vector.broadcast %31 : vector<1x8xf32> to vector<384x8xf32>
    %33 = arith.addf %30, %32 : vector<384x8xf32>
    %cst_29 = arith.constant 0.000000e+00 : f32
    %34 = vector.broadcast %cst_29 : f32 to vector<384x8xf32>
    %35 = arith.cmpf ogt, %33, %34 : vector<384x8xf32>
    %cst_30 = arith.constant 2.000000e-01 : f32
    %36 = vector.broadcast %cst_30 : f32 to vector<384x8xf32>
    %37 = arith.mulf %36, %33 : vector<384x8xf32>
    %38 = arith.select %35, %33, %37 : vector<384x8xi1>, vector<384x8xf32>
    %c0_31 = arith.constant 0 : index
    %c0_32 = arith.constant 0 : index
    %c24_33 = arith.constant 24 : index
    %c16_34 = arith.constant 16 : index
    %39 = vector.load %arg2[%c0_31, %c0_32, %c24_33, %c16_34] : memref<1x1x432x17xbf16, #tpu.memory_space<vmem>>, vector<1x1x384x1xbf16>
    %40 = vector.shape_cast %39 : vector<1x1x384x1xbf16> to vector<384x1xbf16>
    %41 = arith.extf %40 : vector<384x1xbf16> to vector<384x1xf32>
    %42 = vector.broadcast %41 : vector<384x1xf32> to vector<384x8xf32>
    %43 = arith.mulf %38, %42 : vector<384x8xf32>
    %44 = arith.truncf %43 : vector<384x8xf32> to vector<384x8xbf16>
    %c24_35 = arith.constant 24 : index
    %c16_36 = arith.constant 16 : index
    %45 = vector.load %arg14[%c24_35, %c16_36] : memref<432x48xbf16, #tpu.memory_space<vmem>>, vector<384x8xbf16>
    tpu.vector_store %arg14[%c24_35, %c16_36], %44 {strides = array<i32>} : memref<432x48xbf16, #tpu.memory_space<vmem>>, vector<384x8xbf16>,
    %cst_37 = arith.constant 0.000000e+00 : f32
    %46 = vector.broadcast %cst_37 : f32 to vector<336x24xf32>
    %c24_38 = arith.constant 24 : index
    %c0_39 = arith.constant 0 : index
    %47 = vector.load %arg14[%c24_38, %c0_39] : memref<432x48xbf16, #tpu.memory_space<vmem>>, vector<336x24xbf16>
    %c0_40 = arith.constant 0 : index
    %c0_41 = arith.constant 0 : index
    %c0_42 = arith.constant 0 : index
    %48 = vector.load %arg4[%c0_40, %c0_41, %c0_42] : memref<3x24x24xbf16, #tpu.memory_space<vmem>>, vector<1x24x24xbf16>
    %49 = vector.shape_cast %48 : vector<1x24x24xbf16> to vector<24x24xbf16>
    %cst_43 = arith.constant dense<0.000000e+00> : vector<336x24xf32>
    %50 = tpu.matmul %47, %49, %cst_43 {dimension_numbers = #tpu.dot_dimension_numbers<[1], [0], [0], [1], [0, 0, 1, 1], [], []>} : vector<336x24xbf16>, vector<24x24xbf16>, vector<336x24xf32> -> vector<336x24xf32>
    %51 = arith.addf %46, %50 : vector<336x24xf32>
    %c48_44 = arith.constant 48 : index
    %c0_45 = arith.constant 0 : index
    %52 = vector.load %arg14[%c48_44, %c0_45] : memref<432x48xbf16, #tpu.memory_space<vmem>>, vector<336x24xbf16>
    %c1_46 = arith.constant 1 : index
    %c0_47 = arith.constant 0 : index
    %c0_48 = arith.constant 0 : index
    %53 = vector.load %arg4[%c1_46, %c0_47, %c0_48] : memref<3x24x24xbf16, #tpu.memory_space<vmem>>, vector<1x24x24xbf16>
    %54 = vector.shape_cast %53 : vector<1x24x24xbf16> to vector<24x24xbf16>
    %cst_49 = arith.constant dense<0.000000e+00> : vector<336x24xf32>
    %55 = tpu.matmul %52, %54, %cst_49 {dimension_numbers = #tpu.dot_dimension_numbers<[1], [0], [0], [1], [0, 0, 1, 1], [], []>} : vector<336x24xbf16>, vector<24x24xbf16>, vector<336x24xf32> -> vector<336x24xf32>
    %56 = arith.addf %51, %55 : vector<336x24xf32>
    %c72 = arith.constant 72 : index
    %c0_50 = arith.constant 0 : index
    %57 = vector.load %arg14[%c72, %c0_50] : memref<432x48xbf16, #tpu.memory_space<vmem>>, vector<336x24xbf16>
    %c2_51 = arith.constant 2 : index
    %c0_52 = arith.constant 0 : index
    %c0_53 = arith.constant 0 : index
    %58 = vector.load %arg4[%c2_51, %c0_52, %c0_53] : memref<3x24x24xbf16, #tpu.memory_space<vmem>>, vector<1x24x24xbf16>
    %59 = vector.shape_cast %58 : vector<1x24x24xbf16> to vector<24x24xbf16>
    %cst_54 = arith.constant dense<0.000000e+00> : vector<336x24xf32>
    %60 = tpu.matmul %57, %59, %cst_54 {dimension_numbers = #tpu.dot_dimension_numbers<[1], [0], [0], [1], [0, 0, 1, 1], [], []>} : vector<336x24xbf16>, vector<24x24xbf16>, vector<336x24xf32> -> vector<336x24xf32>
    %61 = arith.addf %56, %60 : vector<336x24xf32>
    %cst_55 = arith.constant 0.000000e+00 : f32
    %62 = vector.broadcast %cst_55 : f32 to vector<1x8xf32>
    %63 = vector.extract_strided_slice %61 {offsets = [0, 0], sizes = [336, 8], strides = [1, 1]} : vector<336x24xf32> to vector<336x8xf32>
    %c8_56 = arith.constant 8 : index
    %c0_57 = arith.constant 0 : index
    %64 = vector.load %arg15[%c8_56, %c0_57] : memref<400x32xf32, #tpu.memory_space<vmem>>, vector<336x8xf32>
    tpu.vector_store %arg15[%c8_56, %c0_57], %63 {strides = array<i32>} : memref<400x32xf32, #tpu.memory_space<vmem>>, vector<336x8xf32>,
    %c7_58 = arith.constant 7 : index
    %c0_59 = arith.constant 0 : index
    %65 = vector.load %arg15[%c7_58, %c0_59] : memref<400x32xf32, #tpu.memory_space<vmem>>, vector<1x8xf32>
    tpu.vector_store %arg15[%c7_58, %c0_59], %62 {strides = array<i32>} : memref<400x32xf32, #tpu.memory_space<vmem>>, vector<1x8xf32>,
    %66 = vector.extract_strided_slice %61 {offsets = [0, 16], sizes = [336, 8], strides = [1, 1]} : vector<336x24xf32> to vector<336x8xf32>
    %c8_60 = arith.constant 8 : index
    %c16_61 = arith.constant 16 : index
    %67 = vector.load %arg15[%c8_60, %c16_61] : memref<400x32xf32, #tpu.memory_space<vmem>>, vector<336x8xf32>
    tpu.vector_store %arg15[%c8_60, %c16_61], %66 {strides = array<i32>} : memref<400x32xf32, #tpu.memory_space<vmem>>, vector<336x8xf32>,
    %c344 = arith.constant 344 : index
    %c16_62 = arith.constant 16 : index
    %68 = vector.load %arg15[%c344, %c16_62] : memref<400x32xf32, #tpu.memory_space<vmem>>, vector<1x8xf32>
    tpu.vector_store %arg15[%c344, %c16_62], %62 {strides = array<i32>} : memref<400x32xf32, #tpu.memory_space<vmem>>, vector<1x8xf32>,
    %69 = vector.extract_strided_slice %61 {offsets = [0, 8], sizes = [336, 8], strides = [1, 1]} : vector<336x24xf32> to vector<336x8xf32>
    %c7_63 = arith.constant 7 : index
    %c0_64 = arith.constant 0 : index
    %70 = vector.load %arg15[%c7_63, %c0_64] : memref<400x32xf32, #tpu.memory_space<vmem>>, vector<336x8xf32>
    %71 = arith.addf %69, %70 : vector<336x8xf32>
    %c9_65 = arith.constant 9 : index
    %c16_66 = arith.constant 16 : index
    %72 = vector.load %arg15[%c9_65, %c16_66] : memref<400x32xf32, #tpu.memory_space<vmem>>, vector<336x8xf32>
    %73 = arith.addf %71, %72 : vector<336x8xf32>
    %c0_67 = arith.constant 0 : index
    %c0_68 = arith.constant 0 : index
    %74 = vector.load %arg9[%c0_67, %c0_68] : memref<1x8xf32, #tpu.memory_space<vmem>>, vector<1x8xf32>
    %75 = vector.broadcast %74 : vector<1x8xf32> to vector<336x8xf32>
    %76 = arith.addf %73, %75 : vector<336x8xf32>
    %cst_69 = arith.constant 0.000000e+00 : f32
    %77 = vector.broadcast %cst_69 : f32 to vector<336x8xf32>
    %78 = arith.cmpf ogt, %76, %77 : vector<336x8xf32>
    %cst_70 = arith.constant 2.000000e-01 : f32
    %79 = vector.broadcast %cst_70 : f32 to vector<336x8xf32>
    %80 = arith.mulf %79, %76 : vector<336x8xf32>
    %81 = arith.select %78, %76, %80 : vector<336x8xi1>, vector<336x8xf32>
    %c0_71 = arith.constant 0 : index
    %c0_72 = arith.constant 0 : index
    %c48_73 = arith.constant 48 : index
    %c16_74 = arith.constant 16 : index
    %82 = vector.load %arg2[%c0_71, %c0_72, %c48_73, %c16_74] : memref<1x1x432x17xbf16, #tpu.memory_space<vmem>>, vector<1x1x336x1xbf16>
    %83 = vector.shape_cast %82 : vector<1x1x336x1xbf16> to vector<336x1xbf16>
    %84 = arith.extf %83 : vector<336x1xbf16> to vector<336x1xf32>
    %85 = vector.broadcast %84 : vector<336x1xf32> to vector<336x8xf32>
    %86 = arith.mulf %81, %85 : vector<336x8xf32>
    %87 = arith.truncf %86 : vector<336x8xf32> to vector<336x8xbf16>
    %c48_75 = arith.constant 48 : index
    %c24_76 = arith.constant 24 : index
    %88 = vector.load %arg14[%c48_75, %c24_76] : memref<432x48xbf16, #tpu.memory_space<vmem>>, vector<336x8xbf16>
    tpu.vector_store %arg14[%c48_75, %c24_76], %87 {strides = array<i32>} : memref<432x48xbf16, #tpu.memory_space<vmem>>, vector<336x8xbf16>,
    %cst_77 = arith.constant 0.000000e+00 : f32
    %89 = vector.broadcast %cst_77 : f32 to vector<288x24xf32>
    %c48_78 = arith.constant 48 : index
    %c0_79 = arith.constant 0 : index
    %90 = vector.load %arg14[%c48_78, %c0_79] : memref<432x48xbf16, #tpu.memory_space<vmem>>, vector<288x32xbf16>
    %c0_80 = arith.constant 0 : index
    %c0_81 = arith.constant 0 : index
    %c0_82 = arith.constant 0 : index
    %91 = vector.load %arg5[%c0_80, %c0_81, %c0_82] : memref<3x32x24xbf16, #tpu.memory_space<vmem>>, vector<1x32x24xbf16>
    %92 = vector.shape_cast %91 : vector<1x32x24xbf16> to vector<32x24xbf16>
    %cst_83 = arith.constant dense<0.000000e+00> : vector<288x24xf32>
    %93 = tpu.matmul %90, %92, %cst_83 {dimension_numbers = #tpu.dot_dimension_numbers<[1], [0], [0], [1], [0, 0, 1, 1], [], []>} : vector<288x32xbf16>, vector<32x24xbf16>, vector<288x24xf32> -> vector<288x24xf32>
    %94 = arith.addf %89, %93 : vector<288x24xf32>
    %c72_84 = arith.constant 72 : index
    %c0_85 = arith.constant 0 : index
    %95 = vector.load %arg14[%c72_84, %c0_85] : memref<432x48xbf16, #tpu.memory_space<vmem>>, vector<288x32xbf16>
    %c1_86 = arith.constant 1 : index
    %c0_87 = arith.constant 0 : index
    %c0_88 = arith.constant 0 : index
    %96 = vector.load %arg5[%c1_86, %c0_87, %c0_88] : memref<3x32x24xbf16, #tpu.memory_space<vmem>>, vector<1x32x24xbf16>
    %97 = vector.shape_cast %96 : vector<1x32x24xbf16> to vector<32x24xbf16>
    %cst_89 = arith.constant dense<0.000000e+00> : vector<288x24xf32>
    %98 = tpu.matmul %95, %97, %cst_89 {dimension_numbers = #tpu.dot_dimension_numbers<[1], [0], [0], [1], [0, 0, 1, 1], [], []>} : vector<288x32xbf16>, vector<32x24xbf16>, vector<288x24xf32> -> vector<288x24xf32>
    %99 = arith.addf %94, %98 : vector<288x24xf32>
    %c96 = arith.constant 96 : index
    %c0_90 = arith.constant 0 : index
    %100 = vector.load %arg14[%c96, %c0_90] : memref<432x48xbf16, #tpu.memory_space<vmem>>, vector<288x32xbf16>
    %c2_91 = arith.constant 2 : index
    %c0_92 = arith.constant 0 : index
    %c0_93 = arith.constant 0 : index
    %101 = vector.load %arg5[%c2_91, %c0_92, %c0_93] : memref<3x32x24xbf16, #tpu.memory_space<vmem>>, vector<1x32x24xbf16>
    %102 = vector.shape_cast %101 : vector<1x32x24xbf16> to vector<32x24xbf16>
    %cst_94 = arith.constant dense<0.000000e+00> : vector<288x24xf32>
    %103 = tpu.matmul %100, %102, %cst_94 {dimension_numbers = #tpu.dot_dimension_numbers<[1], [0], [0], [1], [0, 0, 1, 1], [], []>} : vector<288x32xbf16>, vector<32x24xbf16>, vector<288x24xf32> -> vector<288x24xf32>
    %104 = arith.addf %99, %103 : vector<288x24xf32>
    %cst_95 = arith.constant 0.000000e+00 : f32
    %105 = vector.broadcast %cst_95 : f32 to vector<1x8xf32>
    %106 = vector.extract_strided_slice %104 {offsets = [0, 0], sizes = [288, 8], strides = [1, 1]} : vector<288x24xf32> to vector<288x8xf32>
    %c8_96 = arith.constant 8 : index
    %c0_97 = arith.constant 0 : index
    %107 = vector.load %arg15[%c8_96, %c0_97] : memref<400x32xf32, #tpu.memory_space<vmem>>, vector<288x8xf32>
    tpu.vector_store %arg15[%c8_96, %c0_97], %106 {strides = array<i32>} : memref<400x32xf32, #tpu.memory_space<vmem>>, vector<288x8xf32>,
    %c7_98 = arith.constant 7 : index
    %c0_99 = arith.constant 0 : index
    %108 = vector.load %arg15[%c7_98, %c0_99] : memref<400x32xf32, #tpu.memory_space<vmem>>, vector<1x8xf32>
    tpu.vector_store %arg15[%c7_98, %c0_99], %105 {strides = array<i32>} : memref<400x32xf32, #tpu.memory_space<vmem>>, vector<1x8xf32>,
    %109 = vector.extract_strided_slice %104 {offsets = [0, 16], sizes = [288, 8], strides = [1, 1]} : vector<288x24xf32> to vector<288x8xf32>
    %c8_100 = arith.constant 8 : index
    %c16_101 = arith.constant 16 : index
    %110 = vector.load %arg15[%c8_100, %c16_101] : memref<400x32xf32, #tpu.memory_space<vmem>>, vector<288x8xf32>
    tpu.vector_store %arg15[%c8_100, %c16_101], %109 {strides = array<i32>} : memref<400x32xf32, #tpu.memory_space<vmem>>, vector<288x8xf32>,
    %c296 = arith.constant 296 : index
    %c16_102 = arith.constant 16 : index
    %111 = vector.load %arg15[%c296, %c16_102] : memref<400x32xf32, #tpu.memory_space<vmem>>, vector<1x8xf32>
    tpu.vector_store %arg15[%c296, %c16_102], %105 {strides = array<i32>} : memref<400x32xf32, #tpu.memory_space<vmem>>, vector<1x8xf32>,
    %112 = vector.extract_strided_slice %104 {offsets = [0, 8], sizes = [288, 8], strides = [1, 1]} : vector<288x24xf32> to vector<288x8xf32>
    %c7_103 = arith.constant 7 : index
    %c0_104 = arith.constant 0 : index
    %113 = vector.load %arg15[%c7_103, %c0_104] : memref<400x32xf32, #tpu.memory_space<vmem>>, vector<288x8xf32>
    %114 = arith.addf %112, %113 : vector<288x8xf32>
    %c9_105 = arith.constant 9 : index
    %c16_106 = arith.constant 16 : index
    %115 = vector.load %arg15[%c9_105, %c16_106] : memref<400x32xf32, #tpu.memory_space<vmem>>, vector<288x8xf32>
    %116 = arith.addf %114, %115 : vector<288x8xf32>
    %c0_107 = arith.constant 0 : index
    %c0_108 = arith.constant 0 : index
    %117 = vector.load %arg10[%c0_107, %c0_108] : memref<1x8xf32, #tpu.memory_space<vmem>>, vector<1x8xf32>
    %118 = vector.broadcast %117 : vector<1x8xf32> to vector<288x8xf32>
    %119 = arith.addf %116, %118 : vector<288x8xf32>
    %cst_109 = arith.constant 0.000000e+00 : f32
    %120 = vector.broadcast %cst_109 : f32 to vector<288x8xf32>
    %121 = arith.cmpf ogt, %119, %120 : vector<288x8xf32>
    %cst_110 = arith.constant 2.000000e-01 : f32
    %122 = vector.broadcast %cst_110 : f32 to vector<288x8xf32>
    %123 = arith.mulf %122, %119 : vector<288x8xf32>
    %124 = arith.select %121, %119, %123 : vector<288x8xi1>, vector<288x8xf32>
    %c0_111 = arith.constant 0 : index
    %c0_112 = arith.constant 0 : index
    %c72_113 = arith.constant 72 : index
    %c16_114 = arith.constant 16 : index
    %125 = vector.load %arg2[%c0_111, %c0_112, %c72_113, %c16_114] : memref<1x1x432x17xbf16, #tpu.memory_space<vmem>>, vector<1x1x288x1xbf16>
    %126 = vector.shape_cast %125 : vector<1x1x288x1xbf16> to vector<288x1xbf16>
    %127 = arith.extf %126 : vector<288x1xbf16> to vector<288x1xf32>
    %128 = vector.broadcast %127 : vector<288x1xf32> to vector<288x8xf32>
    %129 = arith.mulf %124, %128 : vector<288x8xf32>
    %130 = arith.truncf %129 : vector<288x8xf32> to vector<288x8xbf16>
    %c72_115 = arith.constant 72 : index
    %c32 = arith.constant 32 : index
    %131 = vector.load %arg14[%c72_115, %c32] : memref<432x48xbf16, #tpu.memory_space<vmem>>, vector<288x8xbf16>
    tpu.vector_store %arg14[%c72_115, %c32], %130 {strides = array<i32>} : memref<432x48xbf16, #tpu.memory_space<vmem>>, vector<288x8xbf16>,
    %cst_116 = arith.constant 0.000000e+00 : f32
    %132 = vector.broadcast %cst_116 : f32 to vector<240x24xf32>
    %c72_117 = arith.constant 72 : index
    %c0_118 = arith.constant 0 : index
    %133 = vector.load %arg14[%c72_117, %c0_118] : memref<432x48xbf16, #tpu.memory_space<vmem>>, vector<240x40xbf16>
    %c0_119 = arith.constant 0 : index
    %c0_120 = arith.constant 0 : index
    %c0_121 = arith.constant 0 : index
    %134 = vector.load %arg6[%c0_119, %c0_120, %c0_121] : memref<3x40x24xbf16, #tpu.memory_space<vmem>>, vector<1x40x24xbf16>
    %135 = vector.shape_cast %134 : vector<1x40x24xbf16> to vector<40x24xbf16>
    %cst_122 = arith.constant dense<0.000000e+00> : vector<240x24xf32>
    %136 = tpu.matmul %133, %135, %cst_122 {dimension_numbers = #tpu.dot_dimension_numbers<[1], [0], [0], [1], [0, 0, 1, 1], [], []>} : vector<240x40xbf16>, vector<40x24xbf16>, vector<240x24xf32> -> vector<240x24xf32>
    %137 = arith.addf %132, %136 : vector<240x24xf32>
    %c96_123 = arith.constant 96 : index
    %c0_124 = arith.constant 0 : index
    %138 = vector.load %arg14[%c96_123, %c0_124] : memref<432x48xbf16, #tpu.memory_space<vmem>>, vector<240x40xbf16>
    %c1_125 = arith.constant 1 : index
    %c0_126 = arith.constant 0 : index
    %c0_127 = arith.constant 0 : index
    %139 = vector.load %arg6[%c1_125, %c0_126, %c0_127] : memref<3x40x24xbf16, #tpu.memory_space<vmem>>, vector<1x40x24xbf16>
    %140 = vector.shape_cast %139 : vector<1x40x24xbf16> to vector<40x24xbf16>
    %cst_128 = arith.constant dense<0.000000e+00> : vector<240x24xf32>
    %141 = tpu.matmul %138, %140, %cst_128 {dimension_numbers = #tpu.dot_dimension_numbers<[1], [0], [0], [1], [0, 0, 1, 1], [], []>} : vector<240x40xbf16>, vector<40x24xbf16>, vector<240x24xf32> -> vector<240x24xf32>
    %142 = arith.addf %137, %141 : vector<240x24xf32>
    %c120 = arith.constant 120 : index
    %c0_129 = arith.constant 0 : index
    %143 = vector.load %arg14[%c120, %c0_129] : memref<432x48xbf16, #tpu.memory_space<vmem>>, vector<240x40xbf16>
    %c2_130 = arith.constant 2 : index
    %c0_131 = arith.constant 0 : index
    %c0_132 = arith.constant 0 : index
    %144 = vector.load %arg6[%c2_130, %c0_131, %c0_132] : memref<3x40x24xbf16, #tpu.memory_space<vmem>>, vector<1x40x24xbf16>
    %145 = vector.shape_cast %144 : vector<1x40x24xbf16> to vector<40x24xbf16>
    %cst_133 = arith.constant dense<0.000000e+00> : vector<240x24xf32>
    %146 = tpu.matmul %143, %145, %cst_133 {dimension_numbers = #tpu.dot_dimension_numbers<[1], [0], [0], [1], [0, 0, 1, 1], [], []>} : vector<240x40xbf16>, vector<40x24xbf16>, vector<240x24xf32> -> vector<240x24xf32>
    %147 = arith.addf %142, %146 : vector<240x24xf32>
    %cst_134 = arith.constant 0.000000e+00 : f32
    %148 = vector.broadcast %cst_134 : f32 to vector<1x8xf32>
    %149 = vector.extract_strided_slice %147 {offsets = [0, 0], sizes = [240, 8], strides = [1, 1]} : vector<240x24xf32> to vector<240x8xf32>
    %c8_135 = arith.constant 8 : index
    %c0_136 = arith.constant 0 : index
    %150 = vector.load %arg15[%c8_135, %c0_136] : memref<400x32xf32, #tpu.memory_space<vmem>>, vector<240x8xf32>
    tpu.vector_store %arg15[%c8_135, %c0_136], %149 {strides = array<i32>} : memref<400x32xf32, #tpu.memory_space<vmem>>, vector<240x8xf32>,
    %c7_137 = arith.constant 7 : index
    %c0_138 = arith.constant 0 : index
    %151 = vector.load %arg15[%c7_137, %c0_138] : memref<400x32xf32, #tpu.memory_space<vmem>>, vector<1x8xf32>
    tpu.vector_store %arg15[%c7_137, %c0_138], %148 {strides = array<i32>} : memref<400x32xf32, #tpu.memory_space<vmem>>, vector<1x8xf32>,
    %152 = vector.extract_strided_slice %147 {offsets = [0, 16], sizes = [240, 8], strides = [1, 1]} : vector<240x24xf32> to vector<240x8xf32>
    %c8_139 = arith.constant 8 : index
    %c16_140 = arith.constant 16 : index
    %153 = vector.load %arg15[%c8_139, %c16_140] : memref<400x32xf32, #tpu.memory_space<vmem>>, vector<240x8xf32>
    tpu.vector_store %arg15[%c8_139, %c16_140], %152 {strides = array<i32>} : memref<400x32xf32, #tpu.memory_space<vmem>>, vector<240x8xf32>,
    %c248 = arith.constant 248 : index
    %c16_141 = arith.constant 16 : index
    %154 = vector.load %arg15[%c248, %c16_141] : memref<400x32xf32, #tpu.memory_space<vmem>>, vector<1x8xf32>
    tpu.vector_store %arg15[%c248, %c16_141], %148 {strides = array<i32>} : memref<400x32xf32, #tpu.memory_space<vmem>>, vector<1x8xf32>,
    %155 = vector.extract_strided_slice %147 {offsets = [0, 8], sizes = [240, 8], strides = [1, 1]} : vector<240x24xf32> to vector<240x8xf32>
    %c7_142 = arith.constant 7 : index
    %c0_143 = arith.constant 0 : index
    %156 = vector.load %arg15[%c7_142, %c0_143] : memref<400x32xf32, #tpu.memory_space<vmem>>, vector<240x8xf32>
    %157 = arith.addf %155, %156 : vector<240x8xf32>
    %c9_144 = arith.constant 9 : index
    %c16_145 = arith.constant 16 : index
    %158 = vector.load %arg15[%c9_144, %c16_145] : memref<400x32xf32, #tpu.memory_space<vmem>>, vector<240x8xf32>
    %159 = arith.addf %157, %158 : vector<240x8xf32>
    %c0_146 = arith.constant 0 : index
    %c0_147 = arith.constant 0 : index
    %160 = vector.load %arg11[%c0_146, %c0_147] : memref<1x8xf32, #tpu.memory_space<vmem>>, vector<1x8xf32>
    %161 = vector.broadcast %160 : vector<1x8xf32> to vector<240x8xf32>
    %162 = arith.addf %159, %161 : vector<240x8xf32>
    %cst_148 = arith.constant 0.000000e+00 : f32
    %163 = vector.broadcast %cst_148 : f32 to vector<240x8xf32>
    %164 = arith.cmpf ogt, %162, %163 : vector<240x8xf32>
    %cst_149 = arith.constant 2.000000e-01 : f32
    %165 = vector.broadcast %cst_149 : f32 to vector<240x8xf32>
    %166 = arith.mulf %165, %162 : vector<240x8xf32>
    %167 = arith.select %164, %162, %166 : vector<240x8xi1>, vector<240x8xf32>
    %c0_150 = arith.constant 0 : index
    %c0_151 = arith.constant 0 : index
    %c96_152 = arith.constant 96 : index
    %c16_153 = arith.constant 16 : index
    %168 = vector.load %arg2[%c0_150, %c0_151, %c96_152, %c16_153] : memref<1x1x432x17xbf16, #tpu.memory_space<vmem>>, vector<1x1x240x1xbf16>
    %169 = vector.shape_cast %168 : vector<1x1x240x1xbf16> to vector<240x1xbf16>
    %170 = arith.extf %169 : vector<240x1xbf16> to vector<240x1xf32>
    %171 = vector.broadcast %170 : vector<240x1xf32> to vector<240x8xf32>
    %172 = arith.mulf %167, %171 : vector<240x8xf32>
    %173 = arith.truncf %172 : vector<240x8xf32> to vector<240x8xbf16>
    %c96_154 = arith.constant 96 : index
    %c40 = arith.constant 40 : index
    %174 = vector.load %arg14[%c96_154, %c40] : memref<432x48xbf16, #tpu.memory_space<vmem>>, vector<240x8xbf16>
    tpu.vector_store %arg14[%c96_154, %c40], %173 {strides = array<i32>} : memref<432x48xbf16, #tpu.memory_space<vmem>>, vector<240x8xbf16>,
    %cst_155 = arith.constant 0.000000e+00 : f32
    %175 = vector.broadcast %cst_155 : f32 to vector<192x48xf32>
    %c96_156 = arith.constant 96 : index
    %c0_157 = arith.constant 0 : index
    %176 = vector.load %arg14[%c96_156, %c0_157] : memref<432x48xbf16, #tpu.memory_space<vmem>>, vector<192x48xbf16>
    %c0_158 = arith.constant 0 : index
    %c0_159 = arith.constant 0 : index
    %c0_160 = arith.constant 0 : index
    %177 = vector.load %arg7[%c0_158, %c0_159, %c0_160] : memref<3x48x48xbf16, #tpu.memory_space<vmem>>, vector<1x48x48xbf16>
    %178 = vector.shape_cast %177 : vector<1x48x48xbf16> to vector<48x48xbf16>
    %cst_161 = arith.constant dense<0.000000e+00> : vector<192x48xf32>
    %179 = tpu.matmul %176, %178, %cst_161 {dimension_numbers = #tpu.dot_dimension_numbers<[1], [0], [0], [1], [0, 0, 1, 1], [], []>} : vector<192x48xbf16>, vector<48x48xbf16>, vector<192x48xf32> -> vector<192x48xf32>
    %180 = arith.addf %175, %179 : vector<192x48xf32>
    %c120_162 = arith.constant 120 : index
    %c0_163 = arith.constant 0 : index
    %181 = vector.load %arg14[%c120_162, %c0_163] : memref<432x48xbf16, #tpu.memory_space<vmem>>, vector<192x48xbf16>
    %c1_164 = arith.constant 1 : index
    %c0_165 = arith.constant 0 : index
    %c0_166 = arith.constant 0 : index
    %182 = vector.load %arg7[%c1_164, %c0_165, %c0_166] : memref<3x48x48xbf16, #tpu.memory_space<vmem>>, vector<1x48x48xbf16>
    %183 = vector.shape_cast %182 : vector<1x48x48xbf16> to vector<48x48xbf16>
    %cst_167 = arith.constant dense<0.000000e+00> : vector<192x48xf32>
    %184 = tpu.matmul %181, %183, %cst_167 {dimension_numbers = #tpu.dot_dimension_numbers<[1], [0], [0], [1], [0, 0, 1, 1], [], []>} : vector<192x48xbf16>, vector<48x48xbf16>, vector<192x48xf32> -> vector<192x48xf32>
    %185 = arith.addf %180, %184 : vector<192x48xf32>
    %c144 = arith.constant 144 : index
    %c0_168 = arith.constant 0 : index
    %186 = vector.load %arg14[%c144, %c0_168] : memref<432x48xbf16, #tpu.memory_space<vmem>>, vector<192x48xbf16>
    %c2_169 = arith.constant 2 : index
    %c0_170 = arith.constant 0 : index
    %c0_171 = arith.constant 0 : index
    %187 = vector.load %arg7[%c2_169, %c0_170, %c0_171] : memref<3x48x48xbf16, #tpu.memory_space<vmem>>, vector<1x48x48xbf16>
    %188 = vector.shape_cast %187 : vector<1x48x48xbf16> to vector<48x48xbf16>
    %cst_172 = arith.constant dense<0.000000e+00> : vector<192x48xf32>
    %189 = tpu.matmul %186, %188, %cst_172 {dimension_numbers = #tpu.dot_dimension_numbers<[1], [0], [0], [1], [0, 0, 1, 1], [], []>} : vector<192x48xbf16>, vector<48x48xbf16>, vector<192x48xf32> -> vector<192x48xf32>
    %190 = arith.addf %185, %189 : vector<192x48xf32>
    %cst_173 = arith.constant 0.000000e+00 : f32
    %191 = vector.broadcast %cst_173 : f32 to vector<1x16xf32>
    %192 = vector.extract_strided_slice %190 {offsets = [0, 0], sizes = [192, 16], strides = [1, 1]} : vector<192x48xf32> to vector<192x16xf32>
    %c8_174 = arith.constant 8 : index
    %c0_175 = arith.constant 0 : index
    %193 = vector.load %arg15[%c8_174, %c0_175] : memref<400x32xf32, #tpu.memory_space<vmem>>, vector<192x16xf32>
    tpu.vector_store %arg15[%c8_174, %c0_175], %192 {strides = array<i32>} : memref<400x32xf32, #tpu.memory_space<vmem>>, vector<192x16xf32>,
    %c7_176 = arith.constant 7 : index
    %c0_177 = arith.constant 0 : index
    %194 = vector.load %arg15[%c7_176, %c0_177] : memref<400x32xf32, #tpu.memory_space<vmem>>, vector<1x16xf32>
    tpu.vector_store %arg15[%c7_176, %c0_177], %191 {strides = array<i32>} : memref<400x32xf32, #tpu.memory_space<vmem>>, vector<1x16xf32>,
    %195 = vector.extract_strided_slice %190 {offsets = [0, 32], sizes = [192, 16], strides = [1, 1]} : vector<192x48xf32> to vector<192x16xf32>
    %c8_178 = arith.constant 8 : index
    %c16_179 = arith.constant 16 : index
    %196 = vector.load %arg15[%c8_178, %c16_179] : memref<400x32xf32, #tpu.memory_space<vmem>>, vector<192x16xf32>
    tpu.vector_store %arg15[%c8_178, %c16_179], %195 {strides = array<i32>} : memref<400x32xf32, #tpu.memory_space<vmem>>, vector<192x16xf32>,
    %c200 = arith.constant 200 : index
    %c16_180 = arith.constant 16 : index
    %197 = vector.load %arg15[%c200, %c16_180] : memref<400x32xf32, #tpu.memory_space<vmem>>, vector<1x16xf32>
    tpu.vector_store %arg15[%c200, %c16_180], %191 {strides = array<i32>} : memref<400x32xf32, #tpu.memory_space<vmem>>, vector<1x16xf32>,
    %198 = vector.extract_strided_slice %190 {offsets = [0, 16], sizes = [192, 16], strides = [1, 1]} : vector<192x48xf32> to vector<192x16xf32>
    %c7_181 = arith.constant 7 : index
    %c0_182 = arith.constant 0 : index
    %199 = vector.load %arg15[%c7_181, %c0_182] : memref<400x32xf32, #tpu.memory_space<vmem>>, vector<192x16xf32>
    %200 = arith.addf %198, %199 : vector<192x16xf32>
    %c9_183 = arith.constant 9 : index
    %c16_184 = arith.constant 16 : index
    %201 = vector.load %arg15[%c9_183, %c16_184] : memref<400x32xf32, #tpu.memory_space<vmem>>, vector<192x16xf32>
    %202 = arith.addf %200, %201 : vector<192x16xf32>
    %c0_185 = arith.constant 0 : index
    %c0_186 = arith.constant 0 : index
    %203 = vector.load %arg12[%c0_185, %c0_186] : memref<1x16xf32, #tpu.memory_space<vmem>>, vector<1x16xf32>
    %204 = vector.broadcast %203 : vector<1x16xf32> to vector<192x16xf32>
    %205 = arith.addf %202, %204 : vector<192x16xf32>
    %c120_187 = arith.constant 120 : index
    %c0_188 = arith.constant 0 : index
    %206 = vector.load %arg14[%c120_187, %c0_188] : memref<432x48xbf16, #tpu.memory_space<vmem>>, vector<192x16xbf16>
    %207 = arith.extf %206 : vector<192x16xbf16> to vector<192x16xf32>
    %cst_189 = arith.constant 2.000000e-01 : f32
    %208 = vector.broadcast %cst_189 : f32 to vector<192x16xf32>
    %209 = arith.mulf %205, %208 : vector<192x16xf32>
    %210 = arith.addf %209, %207 : vector<192x16xf32>
    %211 = arith.truncf %210 : vector<192x16xf32> to vector<192x16xbf16>
    %c0_190 = arith.constant 0 : index
    %c0_191 = arith.constant 0 : index
    %c0_192 = arith.constant 0 : index
    %212 = vector.load %arg13[%c0_190, %c0_191, %c0_192] : memref<1x192x16xbf16, #tpu.memory_space<vmem>>, vector<1x192x16xbf16>
    %213 = vector.shape_cast %212 : vector<1x192x16xbf16> to vector<192x16xbf16>
    %214 = vector.shape_cast %211 : vector<192x16xbf16> to vector<1x192x16xbf16>
    tpu.vector_store %arg13[%c0_190, %c0_191, %c0_192], %214 {strides = array<i32>} : memref<1x192x16xbf16, #tpu.memory_space<vmem>>, vector<1x192x16xbf16>,
    return
  }
  func.func @transform_0(%arg0: i32, %arg1: i32) -> (i32, i32, i32, i32) {
    %c0_i32 = arith.constant 0 : i32
    %c0_i32_0 = arith.constant 0 : i32
    %c0_i32_1 = arith.constant 0 : i32
    return %arg0, %arg1, %c0_i32, %c0_i32_0 : i32, i32, i32, i32
  }
  func.func @transform_1(%arg0: i32, %arg1: i32) -> (i32, i32, i32) {
    %c0_i32 = arith.constant 0 : i32
    %c0_i32_0 = arith.constant 0 : i32
    %c0_i32_1 = arith.constant 0 : i32
    %c0_i32_2 = arith.constant 0 : i32
    return %c0_i32, %c0_i32_0, %c0_i32_1 : i32, i32, i32
  }
  func.func @transform_2(%arg0: i32, %arg1: i32) -> (i32, i32, i32) {
    %c0_i32 = arith.constant 0 : i32
    %c0_i32_0 = arith.constant 0 : i32
    %c0_i32_1 = arith.constant 0 : i32
    %c0_i32_2 = arith.constant 0 : i32
    return %c0_i32, %c0_i32_0, %c0_i32_1 : i32, i32, i32
  }
  func.func @transform_3(%arg0: i32, %arg1: i32) -> (i32, i32, i32) {
    %c0_i32 = arith.constant 0 : i32
    %c0_i32_0 = arith.constant 0 : i32
    %c0_i32_1 = arith.constant 0 : i32
    %c0_i32_2 = arith.constant 0 : i32
    return %c0_i32, %c0_i32_0, %c0_i32_1 : i32, i32, i32
  }
  func.func @transform_4(%arg0: i32, %arg1: i32) -> (i32, i32, i32) {
    %c0_i32 = arith.constant 0 : i32
    %c0_i32_0 = arith.constant 0 : i32
    %c0_i32_1 = arith.constant 0 : i32
    %c0_i32_2 = arith.constant 0 : i32
    return %c0_i32, %c0_i32_0, %c0_i32_1 : i32, i32, i32
  }
  func.func @transform_5(%arg0: i32, %arg1: i32) -> (i32, i32, i32) {
    %c0_i32 = arith.constant 0 : i32
    %c0_i32_0 = arith.constant 0 : i32
    %c0_i32_1 = arith.constant 0 : i32
    %c0_i32_2 = arith.constant 0 : i32
    return %c0_i32, %c0_i32_0, %c0_i32_1 : i32, i32, i32
  }
  func.func @transform_6(%arg0: i32, %arg1: i32) -> (i32, i32) {
    %c0_i32 = arith.constant 0 : i32
    %c0_i32_0 = arith.constant 0 : i32
    %c0_i32_1 = arith.constant 0 : i32
    return %c0_i32, %c0_i32_0 : i32, i32
  }
  func.func @transform_7(%arg0: i32, %arg1: i32) -> (i32, i32) {
    %c0_i32 = arith.constant 0 : i32
    %c0_i32_0 = arith.constant 0 : i32
    %c0_i32_1 = arith.constant 0 : i32
    return %c0_i32, %c0_i32_0 : i32, i32
  }
  func.func @transform_8(%arg0: i32, %arg1: i32) -> (i32, i32) {
    %c0_i32 = arith.constant 0 : i32
    %c0_i32_0 = arith.constant 0 : i32
    %c0_i32_1 = arith.constant 0 : i32
    return %c0_i32, %c0_i32_0 : i32, i32
  }
  func.func @transform_9(%arg0: i32, %arg1: i32) -> (i32, i32) {
    %c0_i32 = arith.constant 0 : i32
    %c0_i32_0 = arith.constant 0 : i32
    %c0_i32_1 = arith.constant 0 : i32
    return %c0_i32, %c0_i32_0 : i32, i32
  }
  func.func @transform_10(%arg0: i32, %arg1: i32) -> (i32, i32) {
    %c0_i32 = arith.constant 0 : i32
    %c0_i32_0 = arith.constant 0 : i32
    %c0_i32_1 = arith.constant 0 : i32
    return %c0_i32, %c0_i32_0 : i32, i32
  }
  func.func @transform_11(%arg0: i32, %arg1: i32) -> (i32, i32, i32) {
    %c0_i32 = arith.constant 0 : i32
    %c0_i32_0 = arith.constant 0 : i32
    return %arg0, %arg1, %c0_i32 : i32, i32, i32
  }
}

</mosaic_0001>

<bundles_post_ra>
// kernel: residual_dense_block.1
= control target key start
LH: loop header
LB: loop body
LE: loop exit
PB: predicated region body
PF: predicated region fallthrough
CT: control target
= control target key end

     0   :  { %s13531_s17 = smov 0   ;;  %s13533_s18 = smov 0   ;;  %s17561_s0 = inlined_call_operand.vmem [shape: bf16[2,2,432,17], index: 0, kind: input, shape index: {}]   ;;  %s17562_s1 = inlined_call_operand.vmem [shape: bf16[3,16,24], index: 1, kind: input, shape index: {}]   ;;  %s17563_s2 = inlined_call_operand.vmem [shape: bf16[3,24,24], index: 2, kind: input, shape index: {}]   ;;  %s17564_s3 = inlined_call_operand.vmem [shape: bf16[3,32,24], index: 3, kind: input, shape index: {}]   ;;  %s17565_s4 = inlined_call_operand.vmem [shape: bf16[3,40,24], index: 4, kind: input, shape index: {}]   ;;  %s17566_s5 = inlined_call_operand.vmem [shape: bf16[3,48,48], index: 5, kind: input, shape index: {}]   ;;  %s17567_s6 = inlined_call_operand.vmem [shape: f32[1,8], index: 6, kind: input, shape index: {}]   ;;  %s17568_s7 = inlined_call_operand.vmem [shape: f32[1,8], index: 7, kind: input, shape index: {}]   ;;  %s17569_s8 = inlined_call_operand.vmem [shape: f32[1,8], index: 8, kind: input, shape index: {}]   ;;  %s17570_s9 = inlined_call_operand.vmem [shape: f32[1,8], index: 9, kind: input, shape index: {}]   ;;  %s17571_s10 = inlined_call_operand.vmem [shape: f32[1,16], index: 10, kind: input, shape index: {}]   ;;  %s17572_s11 = inlined_call_operand.vmem [shape: bf16[2,384,16], index: 11, kind: output, shape index: {}]  }
   0x1   :  { %s13535_s19 = smov 0   ;;  %s13537_s20 = smov 0  }
   0x2   :  { %s13539_s21 = smov 0  }
   0x3 LB: > { %s30_s22 = sadd.s32 1, %s13453_s19  ;;  %s33_s23 = sadd.s32 1, %s13457_s20  ;;  %s13461_s21 = sphi %s13539_s21, %s21_s21   ;;  %s13457_s20 = sphi %s13537_s20, %s17724_s20   ;;  %s13453_s19 = sphi %s13535_s19, %s17723_s19   ;;  %s13449_s18 = sphi %s13533_s18, %s17722_s18   ;;  %s13445_s17 = sphi %s13531_s17, %s17721_s17  }
   0x4   : > { %p31_p0 = scmp.ge.s32.totalorder %s30_s22, 2  ;;  %p10514_p1 = scmp.ge.s32.totalorder %s13461_s21, 1 }
   0x5   : > { %p357_p2 = scmp.lt.s32.totalorder %s13461_s21, 5 }
   0x6   : > { %s17726_s22 = smov (%p31_p0, %s30_s22), 0  ;;  %s17728_s23 = smov (!%p31_p0, %s33_s23), %s13457_s20 }
   0x7   : > { %p358_p3 = pnand %p10514_p1, %p357_p2  ;;  %p35_p4 = scmp.ge.s32.totalorder %s17728_s23, 2 }
   0x9   : > { %s17730_s23 = smov (%p35_p4, %s17728_s23), 0  ;;  %361 = sbr.rel (%p358_p3) target bundleno = 3307 (0xceb), region = 64 }
   0xe   : > { %v11340_v0 = vld [vmem:[%s17562_s1 + $0x8] sm:$0xff]  ;;  %p405_p5 = scmp.lt.s32.totalorder %s13449_s18, 1  ;;  %p407_p6 = scmp.lt.s32.totalorder %s13445_s17, 1  ;;  %v11338_v1 = vld [vmem:[%s17562_s1] sm:$0xff]  ;;  %vm479_vm0 = vcmask 125952   ;;  %vm716_vm1 = vcmask 130048  }
   0xf   : > { %12801 = vmatpush.bf16.msra.mxu1 %v11340_v0  ;;  %796 = vmatpush.bf16.msra.mxu0 %v11340_v0  ;;  %v11365_v22 = vld [vmem:[%s17562_s1 + $0x10] sm:$0xff]  ;;  %v13463_v41 = vmov 16   ;;  %vm1581_vm2 = vcmask 64512   ;;  %vm1632_vm3 = vcmask 195712   ;;  %s13467_s24 = smov 16   ;;  %s13469_s26 = smov 32  }
  0x10   : > { %s17732_s18 = smov (!%p405_p5, %s13449_s18), 1  ;;  %12802 = vmatpush.bf16.msra.mxu2 %v11365_v22  ;;  %12958 = vset.pattern.permute.xlu1 %v13463_v41 }
  0x11   : > { %s408_s28 = scalar_select %p407_p6, %s13445_s17, 1  ;;  %12964 = vset.pattern.permute.xlu2 %v13463_v41  ;;  %12970 = vset.pattern.permute.xlu0 %v13463_v41 }
  0x12   : > { %s12908_s29 = smul.u32 108, %s17732_s18 }
  0x13   : > { %1033 = vmatpush.bf16.msrb.mxu1 %v11338_v1  ;;  %s12907_s30 = smul.u32 54, %s408_s28  ;;  %s13464_s28 = smov 8  }
  0x14   : > { %s12909_s14 = smul.u32 48, %s17732_s18 }
  0x15   : > { %s411_s12 = sadd.s32 %s12908_s29, %s12907_s30  ;;  %s13465_s29 = smov 120  }
  0x16   : > { %s10515_s13 = sshll.u32 %s411_s12, 2  ;;  %s13468_s12 = smov 24  }
  0x17   : > { %s13577_s16 = scalar_lea.vmem %s17561_s0, %s10515_s13 }
  0x18   : > { %v468_v2 = vld [vmem:[%s13577_s16 + $0xac] sm:$0xf]  ;;  %v469_v3 = vld [vmem:[%s13577_s16 + $0xb0] sm:$0xf]  ;;  %v470_v4 = vld [vmem:[%s13577_s16 + $0xb4] sm:$0xf] }
  0x19   : > { %523 = vst.msk [vmem:[#allocation2 + $0xac] sm:$0xf] %vm479_vm0, %v468_v2  ;;  %v471_v5 = vld [vmem:[%s13577_s16 + $0xb8] sm:$0xf]  ;;  %v472_v6 = vld [vmem:[%s13577_s16 + $0xbc] sm:$0xf] }
  0x1a   : > { %524 = vst.msk [vmem:[#allocation2 + $0xb0] sm:$0xf] %vm479_vm0, %v469_v3  ;;  %v473_v7 = vld [vmem:[%s13577_s16 + $0xc0] sm:$0xf]  ;;  %v474_v9 = vld [vmem:[%s13577_s16 + $0xc4] sm:$0xf] }
  0x1b   : > { %525 = vst.msk [vmem:[#allocation2 + $0xb4] sm:$0xf] %vm479_vm0, %v470_v4  ;;  %v475_v10 = vld [vmem:[%s13577_s16 + $0xc8] sm:$0xf]  ;;  %v428_v12 = vld [vmem:[%s13577_s16 + $0xc] sm:$0xf] }
  0x1c   : > { %526 = vst.msk [vmem:[#allocation2 + $0xb8] sm:$0xf] %vm479_vm0, %v471_v5  ;;  %v429_v13 = vld [vmem:[%s13577_s16 + $0x10] sm:$0xf]  ;;  %v425_v14 = vld [vmem:[%s13577_s16] sm:$0xf] }
  0x1d   : > { %527 = vst.msk [vmem:[#allocation2 + $0xbc] sm:$0xf] %vm479_vm0, %v472_v6  ;;  %v426_v15 = vld [vmem:[%s13577_s16 + $0x4] sm:$0xf]  ;;  %v433_v17 = vld [vmem:[%s13577_s16 + $0x20] sm:$0xf] }
  0x1e   : > { %528 = vst.msk [vmem:[#allocation2 + $0xc0] sm:$0xf] %vm479_vm0, %v473_v7  ;;  %v434_v18 = vld [vmem:[%s13577_s16 + $0x24] sm:$0xf]  ;;  %v430_v20 = vld [vmem:[%s13577_s16 + $0x14] sm:$0xf] }
  0x1f   : > { %529 = vst.msk [vmem:[#allocation2 + $0xc4] sm:$0xf] %vm479_vm0, %v474_v9  ;;  %v431_v21 = vld [vmem:[%s13577_s16 + $0x18] sm:$0xf]  ;;  %v427_v23 = vld [vmem:[%s13577_s16 + $0x8] sm:$0xf] }
  0x20   : > { %530 = vst.msk [vmem:[#allocation2 + $0xc8] sm:$0xf] %vm479_vm0, %v475_v10  ;;  %v435_v26 = vld [vmem:[%s13577_s16 + $0x28] sm:$0xf]  ;;  %v436_v27 = vld [vmem:[%s13577_s16 + $0x2c] sm:$0xf] }
  0x21   : > { %v12847_v8 = vld [vmem:[#allocation2 + $0xac] sm:$0xff]   ;;  %483 = vst.msk [vmem:[#allocation2 + $0xc] sm:$0xf] %vm479_vm0, %v428_v12  ;;  %v432_v29 = vld [vmem:[%s13577_s16 + $0x1c] sm:$0xf]  ;;  %v13639_v39 = vld [vmem:[%s13577_s16 + $0x20] sm:$0xff]  }
  0x22   : > { %10547 = vmatmul.msk.bf16.vlgmr.msra.gmra.mxu1 %vm716_vm1, %v12847_v8  ;;  %484 = vst.msk [vmem:[#allocation2 + $0x10] sm:$0xf] %vm479_vm0, %v429_v13  ;;  %v437_v32 = vld [vmem:[%s13577_s16 + $0x30] sm:$0xf]  ;;  %v438_v33 = vld [vmem:[%s13577_s16 + $0x34] sm:$0xf]  ;;  %v11567_v44 = vunpack.c.h.bf16 %v13639_v39  ;;  %v11566_v41 = vunpack.c.l.bf16 %v13639_v39 }
  0x23   : > { %v12849_v11 = vld [vmem:[#allocation2 + $0xb4] sm:$0xff]   ;;  %480 = vst.msk [vmem:[#allocation2] sm:$0xf] %vm479_vm0, %v425_v14  ;;  %1411 = vmatpush.bf16.msra.mxu1 %v11365_v22  ;;  %v2457_v35 = vld [vmem:[%s13577_s16 + $0xc] sm:$0xf]  ;;  %v13671_v6 = vld [vmem:[%s13577_s16 + $0x60] sm:$0xff]  }
  0x24   : > { %481 = vst.msk [vmem:[#allocation2 + $0x4] sm:$0xf] %vm479_vm0, %v426_v15  ;;  %v12171_v36 = vld [vmem:[%s13577_s16 + $0x10] sm:$0xff]   ;;  %v2505_v38 = vunpack.c.l.bf16 %v2457_v35  ;;  %v12174_v40 = vld [vmem:[%s13577_s16 + $0x28] sm:$0xff]   ;;  %v439_v48 = vld [vmem:[%s13577_s16 + $0x38] sm:$0xf]  ;;  %v11599_v8 = vunpack.c.h.bf16 %v13671_v6 }
  0x25   : > { %488 = vst.msk [vmem:[#allocation2 + $0x20] sm:$0xf] %vm479_vm0, %v433_v17  ;;  %v12850_v19 = vld [vmem:[#allocation2 + $0xbc] sm:$0xff]  ;;  %v11558_v37 = vunpack.c.l.bf16 %v12171_v36  ;;  %v11570_v45 = vunpack.c.l.bf16 %v12174_v40  ;;  %v12175_v51 = vld [vmem:[%s13577_s16 + $0x30] sm:$0xff]   ;;  %v13653_v55 = vld [vmem:[%s13577_s16 + $0x48] sm:$0xff]   ;;  %v11559_v57 = vunpack.c.h.bf16 %v12171_v36  ;;  %v11571_v10 = vunpack.c.h.bf16 %v12174_v40 }
  0x26   : > { %489 = vst.msk [vmem:[#allocation2 + $0x24] sm:$0xf] %vm479_vm0, %v434_v18  ;;  %v440_v49 = vld [vmem:[%s13577_s16 + $0x3c] sm:$0xf]  ;;  %v11575_v53 = vunpack.c.h.bf16 %v12175_v51  ;;  %v13656_v56 = vld [vmem:[%s13577_s16 + $0x50] sm:$0xff]   ;;  %v11587_v62 = vunpack.c.h.bf16 %v13653_v55  ;;  %v12182_v7 = vld [vmem:[%s13577_s16 + $0x68] sm:$0xff]  }
  0x27   : > { %485 = vst.msk [vmem:[#allocation2 + $0x14] sm:$0xf] %vm479_vm0, %v430_v20  ;;  %v11339_v28 = vld [vmem:[#allocation2 + $0xc4] sm:$0xff]  ;;  %v12959_v42 = vpack.i.bf16 %v11558_v37, %v2505_v38  ;;  %v12976_v47 = vpack.i.bf16 %v11570_v45, %v11567_v44  ;;  %v12176_v52 = vld [vmem:[%s13577_s16 + $0x38] sm:$0xff]   ;;  %v11590_v63 = vunpack.c.l.bf16 %v13656_v56  ;;  %v441_v3 = vld [vmem:[%s13577_s16 + $0x40] sm:$0xf]  ;;  %v11602_v9 = vunpack.c.l.bf16 %v12182_v7 }
  0x28   : > { %486 = vst.msk [vmem:[#allocation2 + $0x18] sm:$0xf] %vm479_vm0, %v431_v21  ;;  %v11578_v54 = vunpack.c.l.bf16 %v12176_v52  ;;  %v13659_v59 = vld [vmem:[%s13577_s16 + $0x18] sm:$0xff]   ;;  %v442_v4 = vld [vmem:[%s13577_s16 + $0x44] sm:$0xf]  ;;  %v11579_v18 = vunpack.c.h.bf16 %v12176_v52  ;;  %v13710_v44 = vld [vmem:[%s13577_s16 + $0xa8] sm:$0xff]  }
  0x29   : > { %v12807_v16 = vld [vmem:[#allocation2 + $0xc] sm:$0xff]   ;;  %482 = vst.msk [vmem:[#allocation2 + $0x8] sm:$0xf] %vm479_vm0, %v427_v23  ;;  %12960 = vperm.xlu1 %12958, %v12959_v42   ;;  %v11562_v60 = vunpack.c.l.bf16 %v13659_v59  ;;  %v13001_v2 = vpack.i.bf16 %v11590_v63, %v11587_v62  ;;  %v13016_v12 = vpack.i.bf16 %v11602_v9, %v11599_v8  ;;  %v13681_v17 = vld [vmem:[%s13577_s16 + $0x80] sm:$0xff]   ;;  %v11563_v35 = vunpack.c.h.bf16 %v13659_v59 }
  0x2a   : > { %10527 = vmatmul.msk.bf16.vlgmr.msra.gmra.mxu0 %vm716_vm1, %v12807_v16  ;;  %490 = vst.msk [vmem:[#allocation2 + $0x28] sm:$0xf] %vm479_vm0, %v435_v26  ;;  %v12986_v58 = vpack.i.bf16 %v11578_v54, %v11575_v53  ;;  %v13678_v16 = vld [vmem:[%s13577_s16 + $0x78] sm:$0xff]   ;;  %v11614_v20 = vunpack.c.l.bf16 %v13681_v17  ;;  %v12177_v21 = vld [vmem:[%s13577_s16 + $0x40] sm:$0xff]   ;;  %v444_v26 = vld [vmem:[%s13577_s16 + $0x4c] sm:$0xf] }
  0x2b   : > { %491 = vst.msk [vmem:[#allocation2 + $0x2c] sm:$0xf] %vm479_vm0, %v436_v27  ;;  %v11337_v34 = vld [vmem:[#allocation2] sm:$0xff]  ;;  %v12965_v0 = vpack.i.bf16 %v11562_v60, %v11559_v57  ;;  %v11582_v22 = vunpack.c.l.bf16 %v12177_v21  ;;  %v12971_v42 = vpack.i.bf16 %v11566_v41, %v11563_v35  ;;  %v13713_v45 = vld [vmem:[%s13577_s16 + $0xb0] sm:$0xff]   ;;  %v11583_v54 = vunpack.c.h.bf16 %v12177_v21 }
  0x2c   : > { %487 = vst.msk [vmem:[#allocation2 + $0x1c] sm:$0xf] %vm479_vm0, %v432_v29  ;;  %v13695_v29 = vld [vmem:[%s13577_s16 + $0x90] sm:$0xff]   ;;  %v13727_v60 = vld [vmem:[%s13577_s16 + $0xc0] sm:$0xff]  }
  0x2d   : > { %v11342_v24 = vld [vmem:[#allocation2 + $0x20] sm:$0xff]  ;;  %492 = vst.msk [vmem:[#allocation2 + $0x30] sm:$0xf] %vm479_vm0, %v437_v32  ;;  %12966 = vperm.xlu2 %12964, %v12965_v0   ;;  %v445_v52 = vld [vmem:[%s13577_s16 + $0x50] sm:$0xf]  ;;  %v11647_v62 = vunpack.c.h.bf16 %v13727_v60  ;;  %v12186_v0 = vld [vmem:[%s13577_s16 + $0x88] sm:$0xff]  }
  0x2e   : > { %10686 = vmatmul.msk.bf16.vlgmr.msra.gmra.mxu2 %vm716_vm1, %v11342_v24  ;;  %493 = vst.msk [vmem:[#allocation2 + $0x34] sm:$0xf] %vm479_vm0, %v438_v33  ;;  %v12149_v5 = vld [vmem:[#allocation2 + $0x10] sm:$0xff]   ;;  %v12991_v24 = vpack.i.bf16 %v11582_v22, %v11579_v18  ;;  %v11591_v33 = vunpack.c.h.bf16 %v13656_v56  ;;  %v11586_v56 = vunpack.c.l.bf16 %v13653_v55  ;;  %v11615_v55 = vunpack.c.h.bf16 %v13681_v17  ;;  %v448_v17 = vld [vmem:[%s13577_s16 + $0x5c] sm:$0xf] }
  0x2f   : > { %v12809_v25 = vld [vmem:[#allocation2 + $0x14] sm:$0xff]   ;;  %494 = vst.msk [vmem:[#allocation2 + $0x38] sm:$0xf] %vm479_vm0, %v439_v48  ;;  %v11638_v48 = vunpack.c.l.bf16 %v13713_v45  ;;  %v11639_v22 = vunpack.c.h.bf16 %v13713_v45 }
  0x30   : > { %495 = vst.msk [vmem:[#allocation2 + $0x3c] sm:$0xf] %vm479_vm0, %v440_v49  ;;  %v12148_v50 = vld [vmem:[#allocation2 + $0x8] sm:$0xff]   ;;  %v12183_v49 = vld [vmem:[%s13577_s16 + $0x70] sm:$0xff]   ;;  %v12996_v59 = vpack.i.bf16 %v11586_v56, %v11583_v54 }
  0x31   : > { %v12813_v46 = vld [vmem:[#allocation2 + $0x24] sm:$0xff]   ;;  %12977 = vperm.xlu1 %12958, %v12976_v47   ;;  %496 = vst.msk [vmem:[#allocation2 + $0x40] sm:$0xf] %vm479_vm0, %v441_v3  ;;  %v11635_v47 = vunpack.c.h.bf16 %v13710_v44  ;;  %v11606_v39 = vunpack.c.l.bf16 %v12183_v49  ;;  %v446_v53 = vld [vmem:[%s13577_s16 + $0x54] sm:$0xf]  ;;  %v11607_v18 = vunpack.c.h.bf16 %v12183_v49 }
  0x32   : > { %10548 = vmatmul.msk.bf16.gmra.mxu1 %vm716_vm1, %v12849_v11  ;;  %v11343_v30 = vld [vmem:[#allocation2 + $0x28] sm:$0xff]  ;;  %497 = vst.msk [vmem:[#allocation2 + $0x44] sm:$0xf] %vm479_vm0, %v442_v4  ;;  %v11574_v11 = vunpack.c.l.bf16 %v12175_v51 }
  0x33   : > { %v12811_v31 = vld [vmem:[#allocation2 + $0x1c] sm:$0xff]   ;;  %499 = vst.msk [vmem:[#allocation2 + $0x4c] sm:$0xf] %vm479_vm0, %v444_v26  ;;  %v11619_v26 = vunpack.c.h.bf16 %v12186_v0  ;;  %v451_v49 = vld [vmem:[%s13577_s16 + $0x68] sm:$0xf] }
  0x34   : > { %v12815_v1 = vld [vmem:[#allocation2 + $0x2c] sm:$0xff]   ;;  %v12981_v13 = vpack.i.bf16 %v11574_v11, %v11571_v10  ;;  %v12150_v27 = vld [vmem:[#allocation2 + $0x18] sm:$0xff]   ;;  %500 = vst.msk [vmem:[#allocation2 + $0x50] sm:$0xf] %vm479_vm0, %v445_v52 }
  0x35   : > { %v11344_v43 = vld [vmem:[#allocation2 + $0x30] sm:$0xff]  ;;  %501 = vst.msk [vmem:[#allocation2 + $0x54] sm:$0xf] %vm479_vm0, %v446_v53 }
  0x36   : > { %12982 = vperm.xlu2 %12964, %v12981_v13   ;;  %v12817_v15 = vld [vmem:[#allocation2 + $0x34] sm:$0xff]   ;;  %503 = vst.msk [vmem:[#allocation2 + $0x5c] sm:$0xf] %vm479_vm0, %v448_v17 }
  0x37   : > { %v11345_v61 = vld [vmem:[#allocation2 + $0x38] sm:$0xff]  ;;  %506 = vst.msk [vmem:[#allocation2 + $0x68] sm:$0xf] %vm479_vm0, %v451_v49  ;;  %v459_v49 = vld [vmem:[%s13577_s16 + $0x88] sm:$0xf] }
  0x38   : > { %514 = vst.msk [vmem:[#allocation2 + $0x88] sm:$0xf] %vm479_vm0, %v459_v49 }
  0x39   : > { %12987 = vperm.xlu1 %12958, %v12986_v58   ;;  %v11346_v14 = vld [vmem:[#allocation2 + $0x40] sm:$0xff] }
  0x3a   : > { %10528 = vmatmul.msk.bf16.gmra.mxu0 %vm716_vm1, %v12809_v25  ;;  %v443_v25 = vld [vmem:[%s13577_s16 + $0x48] sm:$0xf]  ;;  %v12151_v58 = vld [vmem:[#allocation2 + $0x20] sm:$0xff]  }
  0x3b   : > { %498 = vst.msk [vmem:[#allocation2 + $0x48] sm:$0xf] %vm479_vm0, %v443_v25 }
  0x3c   : > { %v11348_v3 = vld [vmem:[#allocation2 + $0x50] sm:$0xff] }
  0x3e   : > { %10687 = vmatmul.msk.bf16.gmra.mxu2 %vm716_vm1, %v11343_v30  ;;  %12992 = vperm.xlu2 %12964, %v12991_v24   ;;  %v13698_v30 = vld [vmem:[%s13577_s16 + $0x98] sm:$0xff]  }
  0x3f   : > { %v11626_v32 = vunpack.c.l.bf16 %v13698_v30  ;;  %v11627_v11 = vunpack.c.h.bf16 %v13698_v30 }
  0x41   : > { %13002 = vperm.xlu1 %12958, %v13001_v2   ;;  %v11618_v2 = vunpack.c.l.bf16 %v12186_v0 }
  0x42   : > { %10549 = vmatmul.msk.bf16.gmra.mxu1 %vm716_vm1, %v12850_v19  ;;  %v11611_v19 = vunpack.c.h.bf16 %v13678_v16  ;;  %v11347_v38 = vld [vmem:[#allocation2 + $0x48] sm:$0xff] }
  0x43   : > { %v13036_v4 = vpack.i.bf16 %v11618_v2, %v11615_v55  ;;  %v12821_v10 = vld [vmem:[#allocation2 + $0x44] sm:$0xff]  }
  0x44   : > { %v13031_v23 = vpack.i.bf16 %v11614_v20, %v11611_v19  ;;  %v12152_v20 = vld [vmem:[#allocation2 + $0x28] sm:$0xff]   ;;  %v12155_v55 = vld [vmem:[#allocation2 + $0x40] sm:$0xff]  }
  0x49   : > { %13017 = vperm.xlu1 %12958, %v13016_v12   ;;  %v12189_v12 = vld [vmem:[%s13577_s16 + $0xa0] sm:$0xff]  }
  0x4a   : > { %10529 = vmatmul.msk.bf16.gmra.mxu0 %vm716_vm1, %v12811_v31  ;;  %v11623_v31 = vunpack.c.h.bf16 %v13695_v29  ;;  %v11630_v13 = vunpack.c.l.bf16 %v12189_v12  ;;  %v11631_v35 = vunpack.c.h.bf16 %v12189_v12  ;;  %v456_v12 = vld [vmem:[%s13577_s16 + $0x7c] sm:$0xf] }
  0x4b   : > { %511 = vst.msk [vmem:[#allocation2 + $0x7c] sm:$0xf] %vm479_vm0, %v456_v12 }
  0x4c   : > { %v13046_v36 = vpack.i.bf16 %v11626_v32, %v11623_v31  ;;  %v12823_v31 = vld [vmem:[#allocation2 + $0x4c] sm:$0xff]  }
  0x4e   : > { %10688 = vmatmul.msk.bf16.gmra.mxu2 %vm716_vm1, %v11344_v43  ;;  %v12819_v43 = vld [vmem:[#allocation2 + $0x3c] sm:$0xff]  }
  0x51   : > { %13032 = vperm.xlu1 %12958, %v13031_v23   ;;  %v12192_v23 = vld [vmem:[%s13577_s16 + $0xb8] sm:$0xff]  }
  0x52   : > { %10550 = vmatmul.msk.bf16.gmra.mxu1 %vm716_vm1, %v11339_v28  ;;  %v13411_v28 = vld [vmem:[%s17567_s6] ss:$0 sm:$0xff]  ;;  %v11642_v24 = vunpack.c.l.bf16 %v12192_v23 }
  0x53   : > { %2262 = vrot.lane.b32.xlu0 %v13411_v28, %s13464_s28 }
  0x59   : > { %13047 = vperm.xlu1 %12958, %v13046_v36   ;;  %v11634_v36 = vunpack.c.l.bf16 %v13710_v44 }
  0x5a   : > { %10530 = vmatmul.msk.bf16.gmra.mxu0 %vm716_vm1, %v12813_v46  ;;  %v11603_v46 = vunpack.c.h.bf16 %v12182_v7  ;;  %v11598_v7 = vunpack.c.l.bf16 %v13671_v6  ;;  %v11610_v6 = vunpack.c.l.bf16 %v13678_v16  ;;  %v13066_v16 = vpack.i.bf16 %v11642_v24, %v11639_v22 }
  0x5b   : > { %12972 = vperm.xlu0 %12970, %v12971_v42   ;;  %v11643_v42 = vunpack.c.h.bf16 %v12192_v23 }
  0x5c   : > { %v13021_v51 = vpack.i.bf16 %v11606_v39, %v11603_v46  ;;  %v13026_v21 = vpack.i.bf16 %v11610_v6, %v11607_v18  ;;  %v452_v39 = vld [vmem:[%s13577_s16 + $0x6c] sm:$0xf] }
  0x5d   : > { %507 = vst.msk [vmem:[#allocation2 + $0x6c] sm:$0xf] %vm479_vm0, %v452_v39  ;;  %v460_v39 = vld [vmem:[%s13577_s16 + $0x8c] sm:$0xf] }
  0x5e   : > { %10689 = vmatmul.msk.bf16.gmra.mxu2 %vm716_vm1, %v11345_v61  ;;  %v2504_v61 = vld [vmem:[%s13577_s16 + $0xc8] sm:$0xf]  ;;  %515 = vst.msk [vmem:[#allocation2 + $0x8c] sm:$0xf] %vm479_vm0, %v460_v39 }
  0x5f   : > { %v2552_v63 = vunpack.c.l.bf16 %v2504_v61  ;;  %v453_v61 = vld [vmem:[%s13577_s16 + $0x70] sm:$0xf] }
  0x60   : > { %508 = vst.msk [vmem:[#allocation2 + $0x70] sm:$0xf] %vm479_vm0, %v453_v61 }
  0x62   : > { %10559 = vmatmul.msk.bf16.vlgmr.msrb.gmra.mxu1 %vm716_vm1, %v11337_v34  ;;  %v12180_v34 = vld [vmem:[%s13577_s16 + $0x58] sm:$0xff]  }
  0x63   : > { %v11594_v37 = vunpack.c.l.bf16 %v12180_v34  ;;  %12997 = vperm.xlu0 %12970, %v12996_v59  }
  0x64   : > { %v11351_v54 = vld [vmem:[#allocation2 + $0x68] sm:$0xff] }
  0x65   : > { %v13006_v40 = vpack.i.bf16 %v11594_v37, %v11591_v33  ;;  %v449_v33 = vld [vmem:[%s13577_s16 + $0x60] sm:$0xf]  ;;  %v12153_v37 = vld [vmem:[#allocation2 + $0x30] sm:$0xff]  }
  0x66   : > { %504 = vst.msk [vmem:[#allocation2 + $0x60] sm:$0xf] %vm479_vm0, %v449_v33 }
  0x67   : > { %13007 = vperm.xlu2 %12964, %v13006_v40   ;;  %v12831_v24 = vld [vmem:[#allocation2 + $0x6c] sm:$0xff]  }
  0x6a   : > { %10531 = vmatmul.msk.bf16.gmra.mxu0 %vm716_vm1, %v12815_v1  ;;  %v13076_v1 = vpack.i.bf16 %v2552_v63, %v11647_v62  ;;  %v454_v62 = vld [vmem:[%s13577_s16 + $0x74] sm:$0xf] }
  0x6b   : > { %509 = vst.msk [vmem:[#allocation2 + $0x74] sm:$0xf] %vm479_vm0, %v454_v62 }
  0x6d   : > { %v12827_v59 = vld [vmem:[#allocation2 + $0x5c] sm:$0xff]  }
  0x6e   : > { %10690 = vmatmul.msk.bf16.gmra.mxu2 %vm716_vm1, %v11346_v14  ;;  %v13051_v14 = vpack.i.bf16 %v11630_v13, %v11627_v11  ;;  %v455_v11 = vld [vmem:[%s13577_s16 + $0x78] sm:$0xf] }
  0x6f   : > { %13022 = vperm.xlu2 %12964, %v13021_v51   ;;  %v12154_v51 = vld [vmem:[#allocation2 + $0x38] sm:$0xff]   ;;  %510 = vst.msk [vmem:[#allocation2 + $0x78] sm:$0xf] %vm479_vm0, %v455_v11 }
  0x72   : > { %10560 = vmatmul.msk.bf16.gmra.mxu1 %vm716_vm1, %v12148_v50  ;;  %v13061_v50 = vpack.i.bf16 %v11638_v48, %v11635_v47 }
  0x74   : > { %13062 = vperm.xlu1 %12958, %v13061_v50  }
  0x77   : > { %13037 = vperm.xlu2 %12964, %v13036_v4  }
  0x7a   : > { %10532 = vmatmul.msk.bf16.gmra.mxu0 %vm716_vm1, %v12817_v15  ;;  %v447_v15 = vld [vmem:[%s13577_s16 + $0x58] sm:$0xf] }
  0x7b   : > { %502 = vst.msk [vmem:[#allocation2 + $0x58] sm:$0xf] %vm479_vm0, %v447_v15 }
  0x7c   : > { %13077 = vperm.xlu1 %12958, %v13076_v1  }
  0x7e   : > { %10691 = vmatmul.msk.bf16.gmra.mxu2 %vm716_vm1, %v11347_v38  ;;  %v13056_v38 = vpack.i.bf16 %v11634_v36, %v11631_v35 }
  0x7f   : > { %13052 = vperm.xlu2 %12964, %v13051_v14   ;;  %v12156_v14 = vld [vmem:[#allocation2 + $0x48] sm:$0xff]  }
  0x82   : > { %10561 = vmatmul.msk.bf16.gmra.mxu1 %vm716_vm1, %v12149_v5  ;;  %v11595_v5 = vunpack.c.h.bf16 %v12180_v34  ;;  %v11349_v25 = vld [vmem:[#allocation2 + $0x58] sm:$0xff]  ;;  %v450_v34 = vld [vmem:[%s13577_s16 + $0x64] sm:$0xf] }
  0x83   : > { %505 = vst.msk [vmem:[#allocation2 + $0x64] sm:$0xf] %vm479_vm0, %v450_v34  ;;  %v12825_v47 = vld [vmem:[#allocation2 + $0x54] sm:$0xff]  }
  0x84   : > { %v13011_v9 = vpack.i.bf16 %v11598_v7, %v11595_v5 }
  0x86   : > { %13012 = vperm.xlu0 %12970, %v13011_v9  }
  0x87   : > { %13067 = vperm.xlu2 %12964, %v13066_v16  }
  0x8a   : > { %10533 = vmatmul.msk.bf16.gmra.mxu0 %vm716_vm1, %v12819_v43  ;;  %v11350_v41 = vld [vmem:[#allocation2 + $0x60] sm:$0xff]  ;;  %v11646_v43 = vunpack.c.l.bf16 %v13727_v60 }
  0x8b   : > { %v12829_v9 = vld [vmem:[#allocation2 + $0x64] sm:$0xff]  }
  0x8c   : > { %v13071_v44 = vpack.i.bf16 %v11646_v43, %v11643_v42  ;;  %v12833_v43 = vld [vmem:[#allocation2 + $0x74] sm:$0xff]  }
  0x8e   : > { %10692 = vmatmul.msk.bf16.gmra.mxu2 %vm716_vm1, %v11348_v3  ;;  %13027 = vperm.xlu0 %12970, %v13026_v21   ;;  %v11352_v3 = vld [vmem:[#allocation2 + $0x70] sm:$0xff] }
  0x92   : > { %10562 = vmatmul.msk.bf16.gmra.mxu1 %vm716_vm1, %v12150_v27  ;;  %v11622_v27 = vunpack.c.l.bf16 %v13695_v29 }
  0x94   : > { %v13041_v30 = vpack.i.bf16 %v11622_v27, %v11619_v26  ;;  %v457_v26 = vld [vmem:[%s13577_s16 + $0x80] sm:$0xf]  ;;  %v458_v27 = vld [vmem:[%s13577_s16 + $0x84] sm:$0xf] }
  0x95   : > { %512 = vst.msk [vmem:[#allocation2 + $0x80] sm:$0xf] %vm479_vm0, %v457_v26 }
  0x96   : > { %13042 = vperm.xlu0 %12970, %v13041_v30   ;;  %513 = vst.msk [vmem:[#allocation2 + $0x84] sm:$0xf] %vm479_vm0, %v458_v27 }
  0x9a   : > { %10534 = vmatmul.msk.bf16.gmra.mxu0 %vm716_vm1, %v12821_v10 }
  0x9e   : > { %10693 = vmatmul.msk.bf16.gmra.mxu2 %vm716_vm1, %v11349_v25  ;;  %13057 = vperm.xlu0 %12970, %v13056_v38   ;;  %v11354_v38 = vld [vmem:[#allocation2 + $0x80] sm:$0xff] }
  0x9f   : > { %v13724_v57 = vpop.f32.mrf.mxu1 }
  0xa2   : > { %10563 = vmatmul.msk.bf16.gmra.mxu1 %vm716_vm1, %v12151_v58 }
  0xa6   : > { %13072 = vperm.xlu0 %12970, %v13071_v44  }
  0xa7   : > { %v13735_v8 = vpop.f32.mrf.mxu1  ;;  %v798_v32 = vpop.f32.mrf.mxu0 }
  0xaa   : > { %10535 = vmatmul.msk.bf16.gmra.mxu0 %vm716_vm1, %v12823_v31  ;;  %v12157_v31 = vld [vmem:[#allocation2 + $0x50] sm:$0xff]  }
  0xae   : > { %10694 = vmatmul.msk.bf16.gmra.mxu2 %vm716_vm1, %v11350_v41 }
  0xaf   : > { %v13746_v19 = vpop.f32.mrf.mxu1  ;;  %v800_v40 = vpop.f32.mrf.mxu0 }
  0xb1   : > { %v1418_v48 = vpop.f32.mrf.mxu2 }
  0xb2   : > { %10564 = vmatmul.msk.bf16.gmra.mxu1 %vm716_vm1, %v12152_v20  ;;  %v11353_v20 = vld [vmem:[#allocation2 + $0x78] sm:$0xff] }
  0xb7   : > { %v13752_v28 = vpop.f32.mrf.mxu1  ;;  %v803_v46 = vpop.f32.mrf.mxu0 }
  0xb9   : > { %v1420_v53 = vpop.f32.mrf.mxu2 }
  0xba   : > { %10536 = vmatmul.msk.bf16.gmra.mxu0 %vm716_vm1, %v12825_v47 }
  0xbe   : > { %10695 = vmatmul.msk.bf16.gmra.mxu2 %vm716_vm1, %v11351_v54 }
  0xbf   : > { %v13761_v29 = vpop.f32.mrf.mxu1  ;;  %v805_v52 = vpop.f32.mrf.mxu0 }
  0xc1   : > { %v1423_v60 = vpop.f32.mrf.mxu2 }
  0xc2   : > { %10565 = vmatmul.msk.bf16.gmra.mxu1 %vm716_vm1, %v12153_v37 }
  0xc7   : > { %v13765_v45 = vpop.f32.mrf.mxu1  ;;  %v808_v58 = vpop.f32.mrf.mxu0 }
  0xc9   : > { %v1425_v2 = vpop.f32.mrf.mxu2 }
  0xca   : > { %10537 = vmatmul.msk.bf16.gmra.mxu0 %vm716_vm1, %v12827_v59 }
  0xce   : > { %10696 = vmatmul.msk.bf16.gmra.mxu2 %vm716_vm1, %v11352_v3  ;;  %v12835_v3 = vld [vmem:[#allocation2 + $0x7c] sm:$0xff]  }
  0xcf   : > { %v13773_v50 = vpop.f32.mrf.mxu1  ;;  %v810_v1 = vpop.f32.mrf.mxu0 }
  0xd0   : > { %17613 = vst [vmem:[#allocation4_spill] sm:$0xff] %v13773_v50 }
  0xd1   : > { %v13792_v10 = vpop.f32.mrf.mxu2 }
  0xd2   : > { %10566 = vmatmul.msk.bf16.gmra.mxu1 %vm716_vm1, %v12154_v51 }
  0xd7   : > { %v13776_v56 = vpop.f32.mrf.mxu1  ;;  %v13790_v7 = vpop.f32.mrf.mxu0 }
  0xd8   : > { %17614 = vst [vmem:[#allocation5_spill] sm:$0xff] %v13776_v56 }
  0xd9   : > { %v13804_v6 = vpop.f32.mrf.mxu2 }
  0xda   : > { %10538 = vmatmul.msk.bf16.gmra.mxu0 %vm716_vm1, %v12829_v9 }
  0xde   : > { %10697 = vmatmul.msk.bf16.gmra.mxu2 %vm716_vm1, %v11353_v20 }
  0xdf   : > { %v1035_v63 = vpop.f32.mrf.mxu1  ;;  %v13799_v17 = vpop.f32.mrf.mxu0 }
  0xe0   : > { %v13784_v0 = vadd.f32 %v1035_v63, %v798_v32  ;;  %v11355_v63 = vld [vmem:[#allocation2 + $0x88] sm:$0xff] }
  0xe1   : > { %v13815_v16 = vpop.f32.mrf.mxu2 }
  0xe2   : > { %17615 = vst [vmem:[#allocation6_spill] sm:$0xff] %v13784_v0  ;;  %10567 = vmatmul.msk.bf16.gmra.mxu1 %vm716_vm1, %v12155_v55 }
  0xe7   : > { %v1037_v4 = vpop.f32.mrf.mxu1  ;;  %v13811_v23 = vpop.f32.mrf.mxu0 }
  0xe8   : > { %v13788_v5 = vadd.f32 %v1037_v4, %v800_v40 }
  0xe9   : > { %v13831_v35 = vpop.f32.mrf.mxu2 }
  0xea   : > { %17616 = vst [vmem:[#allocation7_spill] sm:$0xff] %v13788_v5  ;;  %10539 = vmatmul.msk.bf16.gmra.mxu0 %vm716_vm1, %v12831_v24 }
  0xee   : > { %10698 = vmatmul.msk.bf16.gmra.mxu2 %vm716_vm1, %v11354_v38 }
  0xef   : > { %v1040_v13 = vpop.f32.mrf.mxu1  ;;  %v13826_v33 = vpop.f32.mrf.mxu0 }
  0xf0   : > { %v1041_v15 = vadd.f32 %v1040_v13, %v803_v46  ;;  %v12159_v13 = vld [vmem:[#allocation2 + $0x60] sm:$0xff]  }
  0xf1   : > { %v13844_v46 = vpop.f32.mrf.mxu2 }
  0xf2   : > { %v13801_v18 = vadd.f32 %v1418_v48, %v1041_v15  ;;  %10568 = vmatmul.msk.bf16.gmra.mxu1 %vm716_vm1, %v12156_v14 }
  0xf4   : > { %17617 = vst [vmem:[#allocation8_spill] sm:$0xff] %v13801_v18 }
  0xf5   : > { %1584 = vst.msk [vmem:[#allocation3 + $0x18] sm:$0xff] %vm1581_vm2, %v13801_v18 }
  0xf6   : > { %1635 = vst.msk [vmem:[#allocation3 + $0x18] sm:$0xff] %vm1632_vm3, %v13801_v18 }
  0xf7   : > { %v1042_v21 = vpop.f32.mrf.mxu1  ;;  %v13840_v42 = vpop.f32.mrf.mxu0 }
  0xf8   : > { %v1043_v22 = vadd.f32 %v1042_v21, %v805_v52  ;;  %v12158_v52 = vld [vmem:[#allocation2 + $0x58] sm:$0xff]   ;;  %v461_v21 = vld [vmem:[%s13577_s16 + $0x90] sm:$0xf] }
  0xf9   : > { %516 = vst.msk [vmem:[#allocation2 + $0x90] sm:$0xf] %vm479_vm0, %v461_v21  ;;  %v12161_v21 = vld [vmem:[#allocation2 + $0x70] sm:$0xff]  }
  0xfa   : > { %v13813_v25 = vadd.f32 %v1420_v53, %v1043_v22  ;;  %10540 = vmatmul.msk.bf16.gmra.mxu0 %vm716_vm1, %v12833_v43  ;;  %v462_v22 = vld [vmem:[%s13577_s16 + $0x94] sm:$0xf]  ;;  %v12160_v43 = vld [vmem:[#allocation2 + $0x68] sm:$0xff]  }
  0xfb   : > { %517 = vst.msk [vmem:[#allocation2 + $0x94] sm:$0xf] %vm479_vm0, %v462_v22 }
  0xfc   : > { %1585 = vst.msk [vmem:[#allocation3 + $0x20] sm:$0xff] %vm1581_vm2, %v13813_v25 }
  0xfd   : > { %1636 = vst.msk [vmem:[#allocation3 + $0x20] sm:$0xff] %vm1632_vm3, %v13813_v25 }
  0xfe   : > { %10699 = vmatmul.msk.bf16.gmra.mxu2 %vm716_vm1, %v11355_v63 }
  0xff   : > { %v1045_v30 = vpop.f32.mrf.mxu1  ;;  %v13858_v54 = vpop.f32.mrf.mxu0 }
 0x100   : > { %v1046_v32 = vadd.f32 %v1045_v30, %v808_v58  ;;  %v13860_v58 = vpop.permute.xlu2 %12966 }
 0x102   : > { %v13828_v34 = vadd.f32 %v1423_v60, %v1046_v32  ;;  %10569 = vmatmul.msk.bf16.gmra.mxu1 %vm716_vm1, %v12157_v31  ;;  %v13866_v60 = vpop.f32.mrf.mxu2 }
 0x104   : > { %v1686_v36 = vld [vmem:[#allocation3 + $0x1f] sm:$0xff]  ;;  %1586 = vst.msk [vmem:[#allocation3 + $0x28] sm:$0xff] %vm1581_vm2, %v13828_v34 }
 0x105   : > { %v1973_v37 = vld [vmem:[#allocation3 + $0x19] sm:$0xff]  ;;  %1637 = vst.msk [vmem:[#allocation3 + $0x28] sm:$0xff] %vm1632_vm3, %v13828_v34  ;;  %1785 = vrot.lane.b32.xlu1 %v1686_v36, %s13464_s28 }
 0x106   : > { %2071 = vrot.lane.b32.xlu2 %v1973_v37, %s13465_s29 }
 0x107   : > { %v1047_v40 = vpop.f32.mrf.mxu1 }
 0x108   : > { %v1048_v41 = vadd.f32 %v1047_v40, %v810_v1  ;;  %v13883_v9 = vpop.permute.xlu2 %12982 }
 0x10a   : > { %v13842_v44 = vadd.f32 %v1425_v2, %v1048_v41  ;;  %v13876_v2 = vpop.f32.mrf.mxu0  ;;  %10541 = vmatmul.msk.bf16.gmra.mxu0 %vm716_vm1, %v12835_v3 }
 0x10c   : > { %v1687_v47 = vld [vmem:[#allocation3 + $0x27] sm:$0xff]  ;;  %1587 = vst.msk [vmem:[#allocation3 + $0x30] sm:$0xff] %vm1581_vm2, %v13842_v44 }
 0x10d   : > { %v1974_v48 = vld [vmem:[#allocation3 + $0x21] sm:$0xff]  ;;  %1638 = vst.msk [vmem:[#allocation3 + $0x30] sm:$0xff] %vm1632_vm3, %v13842_v44 }
 0x10e   : > { %2073 = vrot.lane.b32.xlu0 %v1974_v48, %s13465_s29  ;;  %1787 = vrot.lane.b32.xlu2 %v1687_v47, %s13464_s28  ;;  %v13934_v47 = vpop.permute.xlu0 %2262 }
 0x10f   : > { %v1050_v51 = vpop.f32.mrf.mxu1 }
 0x110   : > { %v1051_v53 = vadd.f32 %v1050_v51, %v13790_v7  ;;  %v13881_v7 = vpop.f32.mrf.mxu2 }
 0x112   : > { %v13863_v59 = vadd.f32 %v13792_v10, %v1051_v53  ;;  %10570 = vmatmul.msk.bf16.gmra.mxu1 %vm716_vm1, %v12158_v52  ;;  %v13893_v15 = vpop.f32.mrf.mxu0  ;;  %v463_v52 = vld [vmem:[%s13577_s16 + $0x98] sm:$0xf]  ;;  %v464_v53 = vld [vmem:[%s13577_s16 + $0x9c] sm:$0xf] }
 0x113   : > { %518 = vst.msk [vmem:[#allocation2 + $0x98] sm:$0xf] %vm479_vm0, %v463_v52 }
 0x114   : > { %v1688_v61 = vld [vmem:[#allocation3 + $0x2f] sm:$0xff]  ;;  %1588 = vst.msk [vmem:[#allocation3 + $0x38] sm:$0xff] %vm1581_vm2, %v13863_v59 }
 0x115   : > { %v1975_v62 = vld [vmem:[#allocation3 + $0x29] sm:$0xff]  ;;  %1639 = vst.msk [vmem:[#allocation3 + $0x38] sm:$0xff] %vm1632_vm3, %v13863_v59 }
 0x116   : > { %1789 = vrot.lane.b32.xlu2 %v1688_v61, %s13464_s28  ;;  %2075 = vrot.lane.b32.xlu1 %v1975_v62, %s13465_s29  ;;  %519 = vst.msk [vmem:[#allocation2 + $0x9c] sm:$0xf] %vm479_vm0, %v464_v53  ;;  %v13963_v3 = vpop.permute.xlu0 %12972 }
 0x117   : > { %v1052_v55 = vpop.f32.mrf.mxu1 }
 0x118   : > { %v1053_v1 = vadd.f32 %v1052_v55, %v13799_v17  ;;  %v13895_v17 = vpop.permute.xlu1 %12960  ;;  %v13901_v20 = vpop.f32.mrf.mxu2 }
 0x119   : > { %17618 = vst [vmem:[#allocation9_spill] sm:$0xff] %v13895_v17 }
 0x11a   : > { %v13879_v4 = vadd.f32 %v13804_v6, %v1053_v1  ;;  %v13916_v30 = vpop.f32.mrf.mxu0 }
 0x11c   : > { %v1689_v10 = vld [vmem:[#allocation3 + $0x37] sm:$0xff]  ;;  %1589 = vst.msk [vmem:[#allocation3 + $0x40] sm:$0xff] %vm1581_vm2, %v13879_v4 }
 0x11d   : > { %v1976_v11 = vld [vmem:[#allocation3 + $0x31] sm:$0xff]  ;;  %1640 = vst.msk [vmem:[#allocation3 + $0x40] sm:$0xff] %vm1632_vm3, %v13879_v4  ;;  %1791 = vrot.lane.b32.xlu0 %v1689_v10, %s13464_s28 }
 0x11e   : > { %2077 = vrot.lane.b32.xlu2 %v1976_v11, %s13465_s29 }
 0x11f   : > { %v1055_v12 = vpop.f32.mrf.mxu1 }
 0x120   : > { %v1056_v14 = vadd.f32 %v1055_v12, %v13811_v23  ;;  %v13908_v23 = vpop.permute.xlu2 %12992  ;;  %v13921_v32 = vpop.f32.mrf.mxu2 }
 0x121   : > { %v13923_v36 = vpop.permute.xlu1 %12977 }
 0x122   : > { %v13898_v6 = vadd.f32 %v13815_v16, %v1056_v14  ;;  %10571 = vmatmul.msk.bf16.gmra.mxu1 %vm716_vm1, %v12159_v13  ;;  %v13937_v49 = vpop.f32.mrf.mxu0  ;;  %v12839_v14 = vld [vmem:[#allocation2 + $0x8c] sm:$0xff]  }
 0x124   : > { %v1690_v24 = vld [vmem:[#allocation3 + $0x3f] sm:$0xff]  ;;  %1590 = vst.msk [vmem:[#allocation3 + $0x48] sm:$0xff] %vm1581_vm2, %v13898_v6 }
 0x125   : > { %v1977_v26 = vld [vmem:[#allocation3 + $0x39] sm:$0xff]  ;;  %1641 = vst.msk [vmem:[#allocation3 + $0x48] sm:$0xff] %vm1632_vm3, %v13898_v6  ;;  %1793 = vrot.lane.b32.xlu1 %v1690_v24, %s13464_s28 }
 0x126   : > { %2079 = vrot.lane.b32.xlu0 %v1977_v26, %s13465_s29 }
 0x127   : > { %v1057_v16 = vpop.f32.mrf.mxu1 }
 0x128   : > { %v1058_v27 = vadd.f32 %v1057_v16, %v13826_v33  ;;  %v11356_v33 = vld [vmem:[#allocation2 + $0x90] sm:$0xff]  ;;  %v13931_v40 = vpop.permute.xlu2 %13007  ;;  %v13944_v51 = vpop.f32.mrf.mxu2 }
 0x129   : > { %10700 = vmatmul.msk.bf16.gmra.mxu2 %vm716_vm1, %v11356_v33  ;;  %v466_v33 = vld [vmem:[%s13577_s16 + $0xa4] sm:$0xf] }
 0x12a   : > { %v13919_v31 = vadd.f32 %v13831_v35, %v1058_v27  ;;  %v12837_v35 = vld [vmem:[#allocation2 + $0x84] sm:$0xff]   ;;  %v13959_v55 = vpop.f32.mrf.mxu0  ;;  %521 = vst.msk [vmem:[#allocation2 + $0xa4] sm:$0xf] %vm479_vm0, %v466_v33 }
 0x12b   : > { %10542 = vmatmul.msk.bf16.gmra.mxu0 %vm716_vm1, %v12837_v35  ;;  %v13994_v35 = vpop.permute.xlu0 %12997 }
 0x12c   : > { %v1691_v37 = vld [vmem:[#allocation3 + $0x47] sm:$0xff]  ;;  %1591 = vst.msk [vmem:[#allocation3 + $0x50] sm:$0xff] %vm1581_vm2, %v13919_v31 }
 0x12d   : > { %v1978_v38 = vld [vmem:[#allocation3 + $0x41] sm:$0xff]  ;;  %1642 = vst.msk [vmem:[#allocation3 + $0x50] sm:$0xff] %vm1632_vm3, %v13919_v31  ;;  %1795 = vrot.lane.b32.xlu2 %v1691_v37, %s13464_s28 }
 0x12e   : > { %2081 = vrot.lane.b32.xlu1 %v1978_v38, %s13465_s29  ;;  %v465_v37 = vld [vmem:[%s13577_s16 + $0xa0] sm:$0xf] }
 0x12f   : > { %v1060_v41 = vpop.f32.mrf.mxu1  ;;  %520 = vst.msk [vmem:[#allocation2 + $0xa0] sm:$0xf] %vm479_vm0, %v465_v37  ;;  %v467_v37 = vld [vmem:[%s13577_s16 + $0xa8] sm:$0xf] }
 0x130   : > { %v1061_v48 = vadd.f32 %v1060_v41, %v13840_v42  ;;  %v13955_v42 = vpop.permute.xlu1 %12987  ;;  %v13961_v1 = vpop.permute.xlu2 %13022  ;;  %522 = vst.msk [vmem:[#allocation2 + $0xa8] sm:$0xf] %vm479_vm0, %v467_v37  ;;  %v12163_v37 = vld [vmem:[#allocation2 + $0x80] sm:$0xff]  }
 0x131   : > { %v13968_v11 = vpop.f32.mrf.mxu2 }
 0x132   : > { %v13941_v39 = vadd.f32 %v13844_v46, %v1061_v48  ;;  %10572 = vmatmul.msk.bf16.gmra.mxu1 %vm716_vm1, %v12160_v43  ;;  %v13980_v26 = vpop.f32.mrf.mxu0 }
 0x134   : > { %v1692_v61 = vld [vmem:[#allocation3 + $0x4f] sm:$0xff]  ;;  %1592 = vst.msk [vmem:[#allocation3 + $0x58] sm:$0xff] %vm1581_vm2, %v13941_v39 }
 0x135   : > { %v1979_v62 = vld [vmem:[#allocation3 + $0x49] sm:$0xff]  ;;  %1643 = vst.msk [vmem:[#allocation3 + $0x58] sm:$0xff] %vm1632_vm3, %v13941_v39  ;;  %1797 = vrot.lane.b32.xlu0 %v1692_v61, %s13464_s28 }
 0x136   : > { %2083 = vrot.lane.b32.xlu2 %v1979_v62, %s13465_s29 }
 0x137   : > { %v1062_v46 = vpop.f32.mrf.mxu1 }
 0x138   : > { %v1063_v63 = vadd.f32 %v1062_v46, %v13858_v54  ;;  %v11357_v54 = vld [vmem:[#allocation2 + $0x98] sm:$0xff]  ;;  %v13977_v22 = vpop.permute.xlu1 %13002  ;;  %v13990_v38 = vpop.permute.xlu2 %13037 }
 0x139   : > { %10701 = vmatmul.msk.bf16.gmra.mxu2 %vm716_vm1, %v11357_v54  ;;  %v13987_v27 = vpop.f32.mrf.mxu2  ;;  %17619 = vst [vmem:[#allocation10_spill] sm:$0xff] %v13990_v38  ;;  %v12162_v54 = vld [vmem:[#allocation2 + $0x78] sm:$0xff]  }
 0x13a   : > { %v13966_v10 = vadd.f32 %v13866_v60, %v1063_v63  ;;  %v14004_v48 = vpop.f32.mrf.mxu0 }
 0x13b   : > { %10543 = vmatmul.msk.bf16.gmra.mxu0 %vm716_vm1, %v12839_v14 }
 0x13c   : > { %v1693_v12 = vld [vmem:[#allocation3 + $0x57] sm:$0xff]  ;;  %1593 = vst.msk [vmem:[#allocation3 + $0x60] sm:$0xff] %vm1581_vm2, %v13966_v10 }
 0x13d   : > { %v1980_v13 = vld [vmem:[#allocation3 + $0x51] sm:$0xff]  ;;  %1644 = vst.msk [vmem:[#allocation3 + $0x60] sm:$0xff] %vm1632_vm3, %v13966_v10  ;;  %1799 = vrot.lane.b32.xlu1 %v1693_v12, %s13464_s28  ;;  %v12841_v12 = vld [vmem:[#allocation2 + $0x94] sm:$0xff]  }
 0x13e   : > { %2085 = vrot.lane.b32.xlu0 %v1980_v13, %s13465_s29 }
 0x13f   : > { %v1065_v60 = vpop.f32.mrf.mxu1 }
 0x140   : > { %v1066_v24 = vadd.f32 %v1065_v60, %v13876_v2  ;;  %v14006_v52 = vpop.permute.xlu1 %13017  ;;  %v14015_v63 = vpop.permute.xlu2 %13052 }
 0x141   : > { %v14011_v61 = vpop.f32.mrf.mxu2  ;;  %17620 = vst [vmem:[#allocation11_spill] sm:$0xff] %v14015_v63 }
 0x142   : > { %v13984_v16 = vadd.f32 %v13881_v7, %v1066_v24  ;;  %10573 = vmatmul.msk.bf16.gmra.mxu1 %vm716_vm1, %v12161_v21  ;;  %v14025_v60 = vpop.f32.mrf.mxu0 }
 0x144   : > { %v1694_v2 = vld [vmem:[#allocation3 + $0x5f] sm:$0xff]  ;;  %1594 = vst.msk [vmem:[#allocation3 + $0x68] sm:$0xff] %vm1581_vm2, %v13984_v16 }
 0x145   : > { %v1981_v41 = vld [vmem:[#allocation3 + $0x59] sm:$0xff]  ;;  %1645 = vst.msk [vmem:[#allocation3 + $0x68] sm:$0xff] %vm1632_vm3, %v13984_v16  ;;  %1801 = vrot.lane.b32.xlu2 %v1694_v2, %s13464_s28 }
 0x146   : > { %2087 = vrot.lane.b32.xlu1 %v1981_v41, %s13465_s29 }
 0x147   : > { %v1067_v7 = vpop.f32.mrf.mxu1 }
 0x148   : > { %v1068_v43 = vadd.f32 %v1067_v7, %v13893_v15  ;;  %v11358_v15 = vld [vmem:[#allocation2 + $0xa0] sm:$0xff]  ;;  %v14035_v33 = vpop.permute.xlu1 %13032 }
 0x149   : > { %10702 = vmatmul.msk.bf16.gmra.mxu2 %vm716_vm1, %v11358_v15  ;;  %v14032_v24 = vpop.f32.mrf.mxu2 }
 0x14a   : > { %v14009_v53 = vadd.f32 %v13901_v20, %v1068_v43  ;;  %v14021_v20 = vpop.permute.xlu0 %13012 }
 0x14b   : > { %10544 = vmatmul.msk.bf16.gmra.mxu0 %vm716_vm1, %v12841_v12 }
 0x14c   : > { %v1695_v62 = vld [vmem:[#allocation3 + $0x67] sm:$0xff]  ;;  %1595 = vst.msk [vmem:[#allocation3 + $0x70] sm:$0xff] %vm1581_vm2, %v14009_v53 }
 0x14d   : > { %v1982_v46 = vld [vmem:[#allocation3 + $0x61] sm:$0xff]  ;;  %1646 = vst.msk [vmem:[#allocation3 + $0x70] sm:$0xff] %vm1632_vm3, %v14009_v53  ;;  %1803 = vrot.lane.b32.xlu0 %v1695_v62, %s13464_s28  ;;  %v14049_v62 = vpop.f32.mrf.mxu0 }
 0x14e   : > { %2089 = vrot.lane.b32.xlu2 %v1982_v46, %s13465_s29 }
 0x14f   : > { %v1070_v13 = vpop.f32.mrf.mxu1 }
 0x150   : > { %v1071_v14 = vadd.f32 %v1070_v13, %v13916_v30  ;;  %v14044_v30 = vpop.permute.xlu2 %13067 }
 0x151   : > { %17621 = vst [vmem:[#allocation12_spill] sm:$0xff] %v14044_v30  ;;  %v14054_v15 = vpop.f32.mrf.mxu2 }
 0x152   : > { %v14029_v21 = vadd.f32 %v13921_v32, %v1071_v14  ;;  %10574 = vmatmul.msk.bf16.gmra.mxu1 %vm716_vm1, %v12162_v54  ;;  %v14046_v7 = vpop.permute.xlu0 %13027  ;;  %v14062_v54 = vpop.permute.xlu1 %13047 }
 0x153   : > { %17622 = vst [vmem:[#allocation13_spill] sm:$0xff] %v14062_v54 }
 0x154   : > { %v1696_v2 = vld [vmem:[#allocation3 + $0x6f] sm:$0xff]  ;;  %1596 = vst.msk [vmem:[#allocation3 + $0x78] sm:$0xff] %vm1581_vm2, %v14029_v21 }
 0x155   : > { %v1983_v41 = vld [vmem:[#allocation3 + $0x69] sm:$0xff]  ;;  %1647 = vst.msk [vmem:[#allocation3 + $0x78] sm:$0xff] %vm1632_vm3, %v14029_v21  ;;  %1805 = vrot.lane.b32.xlu1 %v1696_v2, %s13464_s28 }
 0x156   : > { %2091 = vrot.lane.b32.xlu0 %v1983_v41, %s13465_s29  ;;  %v12843_v2 = vld [vmem:[#allocation2 + $0x9c] sm:$0xff]  }
 0x157   : > { %v1072_v32 = vpop.f32.mrf.mxu1 }
 0x158   : > { %v1073_v43 = vadd.f32 %v1072_v32, %v13937_v49  ;;  %v11359_v49 = vld [vmem:[#allocation2 + $0xa8] sm:$0xff] }
 0x159   : > { %10703 = vmatmul.msk.bf16.gmra.mxu2 %vm716_vm1, %v11359_v49 }
 0x15a   : > { %v14052_v46 = vadd.f32 %v13944_v51, %v1073_v43  ;;  %v14069_v32 = vpop.permute.xlu0 %13042  ;;  %v14086_v49 = vpop.permute.xlu1 %13062 }
 0x15b   : > { %10545 = vmatmul.msk.bf16.gmra.mxu0 %vm716_vm1, %v12843_v2  ;;  %17624 = vst [vmem:[#allocation15_spill] sm:$0xff] %v14069_v32 }
 0x15c   : > { %v1697_v12 = vld [vmem:[#allocation3 + $0x77] sm:$0xff]  ;;  %1597 = vst.msk [vmem:[#allocation3 + $0x80] sm:$0xff] %vm1581_vm2, %v14052_v46 }
 0x15d   : > { %v1984_v13 = vld [vmem:[#allocation3 + $0x71] sm:$0xff]  ;;  %1648 = vst.msk [vmem:[#allocation3 + $0x80] sm:$0xff] %vm1632_vm3, %v14052_v46  ;;  %1807 = vrot.lane.b32.xlu2 %v1697_v12, %s13464_s28  ;;  %v14075_v12 = vpop.f32.mrf.mxu2 }
 0x15e   : > { %2093 = vrot.lane.b32.xlu1 %v1984_v13, %s13465_s29  ;;  %v14077_v13 = vpop.f32.mrf.mxu0  ;;  %17625 = vst [vmem:[#allocation16_spill] sm:$0xff] %v14086_v49 }
 0x15f   : > { %v1075_v14 = vpop.f32.mrf.mxu1 }
 0x160   : > { %v14064_v51 = vpop.permute.xlu2 %2071  ;;  %v1076_v41 = vadd.f32 %v1075_v14, %v13959_v55 }
 0x161   : > { %17623 = vst [vmem:[#allocation14_spill] sm:$0xff] %v14064_v51 }
 0x162   : > { %v14072_v43 = vadd.f32 %v13968_v11, %v1076_v41  ;;  %10575 = vmatmul.msk.bf16.gmra.mxu1 %vm716_vm1, %v12163_v37  ;;  %v11360_v41 = vld [vmem:[#allocation2 + $0xb0] sm:$0xff]  ;;  %v14095_v51 = vpop.permute.xlu0 %13057 }
 0x163   : > { %17626 = vst [vmem:[#allocation17_spill] sm:$0xff] %v14095_v51 }
 0x164   : > { %v1698_v30 = vld [vmem:[#allocation3 + $0x7f] sm:$0xff]  ;;  %1598 = vst.msk [vmem:[#allocation3 + $0x88] sm:$0xff] %vm1581_vm2, %v14072_v43 }
 0x165   : > { %v1985_v17 = vld [vmem:[#allocation3 + $0x79] sm:$0xff]  ;;  %1649 = vst.msk [vmem:[#allocation3 + $0x88] sm:$0xff] %vm1632_vm3, %v14072_v43  ;;  %1809 = vrot.lane.b32.xlu0 %v1698_v30, %s13464_s28  ;;  %v14093_v2 = vpop.f32.mrf.mxu2  ;;  %v12845_v30 = vld [vmem:[#allocation2 + $0xa4] sm:$0xff]  }
 0x166   : > { %2095 = vrot.lane.b32.xlu2 %v1985_v17, %s13465_s29  ;;  %v14103_v17 = vpop.f32.mrf.mxu0 }
 0x167   : > { %v1077_v55 = vpop.f32.mrf.mxu1 }
 0x168   : > { %v1078_v11 = vadd.f32 %v1077_v55, %v13980_v26  ;;  %v14088_v14 = vpop.permute.xlu2 %1787 }
 0x169   : > { %10704 = vmatmul.msk.bf16.gmra.mxu2 %vm716_vm1, %v11360_v41 }
 0x16a   : > { %v14091_v37 = vadd.f32 %v13987_v27, %v1078_v11  ;;  %v12164_v27 = vld [vmem:[#allocation2 + $0x88] sm:$0xff]  }
 0x16b   : > { %10546 = vmatmul.msk.bf16.gmra.mxu0 %vm716_vm1, %v12845_v30 }
 0x16c   : > { %v1699_v18 = vld [vmem:[#allocation3 + $0x87] sm:$0xff]  ;;  %1599 = vst.msk [vmem:[#allocation3 + $0x90] sm:$0xff] %vm1581_vm2, %v14091_v37 }
 0x16d   : > { %v1986_v63 = vld [vmem:[#allocation3 + $0x81] sm:$0xff]  ;;  %1650 = vst.msk [vmem:[#allocation3 + $0x90] sm:$0xff] %vm1632_vm3, %v14091_v37  ;;  %1811 = vrot.lane.b32.xlu1 %v1699_v18, %s13464_s28  ;;  %v14112_v49 = vpop.f32.mrf.mxu2 }
 0x16e   : > { %2097 = vrot.lane.b32.xlu0 %v1986_v63, %s13465_s29  ;;  %v14114_v63 = vpop.permute.xlu1 %13077  ;;  %v14124_v41 = vpop.f32.mrf.mxu0 }
 0x16f   : > { %v1080_v26 = vpop.f32.mrf.mxu1  ;;  %17627 = vst [vmem:[#allocation18_spill] sm:$0xff] %v14114_v63  ;;  %v11361_v63 = vld [vmem:[#allocation2 + $0xb8] sm:$0xff] }
 0x170   : > { %v1081_v55 = vadd.f32 %v1080_v26, %v14004_v48  ;;  %v1790_v18 = vpop.permute.xlu2 %1789  ;;  %v14122_v48 = vpop.permute.xlu0 %13072 }
 0x171   : > { %17628 = vst [vmem:[#allocation19_spill] sm:$0xff] %v14122_v48 }
 0x172   : > { %v14109_v11 = vadd.f32 %v14011_v61, %v1081_v55  ;;  %10576 = vmatmul.msk.bf16.gmra.mxu1 %vm716_vm1, %v12164_v27 }
 0x174   : > { %v1700_v51 = vld [vmem:[#allocation3 + $0x8f] sm:$0xff]  ;;  %1600 = vst.msk [vmem:[#allocation3 + $0x98] sm:$0xff] %vm1581_vm2, %v14109_v11 }
 0x175   : > { %v1987_v54 = vld [vmem:[#allocation3 + $0x89] sm:$0xff]  ;;  %1651 = vst.msk [vmem:[#allocation3 + $0x98] sm:$0xff] %vm1632_vm3, %v14109_v11  ;;  %1813 = vrot.lane.b32.xlu2 %v1700_v51, %s13464_s28  ;;  %v14130_v30 = vpop.f32.mrf.mxu2 }
 0x176   : > { %2099 = vrot.lane.b32.xlu1 %v1987_v54, %s13465_s29  ;;  %v14142_v56 = vpop.f32.mrf.mxu0 }
 0x177   : > { %v1082_v61 = vpop.f32.mrf.mxu1  ;;  %v1786_v55 = vpop.permute.xlu1 %1785 }
 0x178   : > { %v1083_v26 = vadd.f32 %v1082_v61, %v14025_v60  ;;  %v2078_v54 = vpop.permute.xlu2 %2077  ;;  %v1928_v60 = vadd.f32 %v1790_v18, %v13842_v44 }
 0x179   : > { %10705 = vmatmul.msk.bf16.gmra.mxu2 %vm716_vm1, %v11361_v63  ;;  %v12969_v63 = vunpack.i.h.bf16 %v13860_v58 }
 0x17a   : > { %v14128_v27 = vadd.f32 %v14032_v24, %v1083_v26  ;;  %v1926_v24 = vadd.f32 %v1786_v55, %v13813_v25  ;;  %v12165_v26 = vld [vmem:[#allocation2 + $0x90] sm:$0xff]   ;;  %v2216_v48 = vadd.f32 %v2078_v54, %v1928_v60 }
 0x17c   : > { %v1701_v32 = vld [vmem:[#allocation3 + $0x97] sm:$0xff]  ;;  %1601 = vst.msk [vmem:[#allocation3 + $0xa0] sm:$0xff] %vm1581_vm2, %v14128_v27  ;;  %v2270_v18 = vadd.f32 %v13934_v47, %v2216_v48 }
 0x17d   : > { %v1988_v5 = vld [vmem:[#allocation3 + $0x91] sm:$0xff]  ;;  %1652 = vst.msk [vmem:[#allocation3 + $0xa0] sm:$0xff] %vm1632_vm3, %v14128_v27  ;;  %1815 = vrot.lane.b32.xlu0 %v1701_v32, %s13464_s28  ;;  %v14149_v44 = vpop.f32.mrf.mxu2 }
 0x17e   : > { %2101 = vrot.lane.b32.xlu2 %v1988_v5, %s13465_s29  ;;  %v2366_v55 = vmul.f32 0.2, %v2270_v18  ;;  %vm2318_vm5 = vcmp.gt.f32.partialorder %v2270_v18, 0.0 }
 0x17f   : > { %v1085_v51 = vpop.f32.mrf.mxu1 }
 0x180   : > { %v2074_v61 = vpop.permute.xlu0 %2073  ;;  %v1086_v38 = vadd.f32 %v1085_v51, %v14049_v62 }
 0x181   : > { %v2214_v0 = vadd.f32 %v2074_v61, %v1926_v24 }
 0x182   : > { %v14145_v50 = vadd.f32 %v14054_v15, %v1086_v38  ;;  %10577 = vmatmul.msk.bf16.gmra.mxu1 %vm716_vm1, %v12165_v26  ;;  %v1927_v38 = vadd.f32 %v14088_v14, %v13828_v34  ;;  %v11362_v34 = vld [vmem:[#allocation2 + $0xc0] sm:$0xff] }
 0x183   : > { %v2268_v5 = vadd.f32 %v13934_v47, %v2214_v0 }
 0x184   : > { %v1702_v25 = vld [vmem:[#allocation3 + $0x9f] sm:$0xff]  ;;  %1602 = vst.msk [vmem:[#allocation3 + $0xa8] sm:$0xff] %vm1581_vm2, %v14145_v50 }
 0x185   : > { %v1989_v32 = vld [vmem:[#allocation3 + $0x99] sm:$0xff]  ;;  %v2364_v62 = vmul.f32 0.2, %v2268_v5  ;;  %vm2316_vm4 = vcmp.gt.f32.partialorder %v2268_v5, 0.0  ;;  %1653 = vst.msk [vmem:[#allocation3 + $0xa8] sm:$0xff] %vm1632_vm3, %v14145_v50  ;;  %1817 = vrot.lane.b32.xlu1 %v1702_v25, %s13464_s28  ;;  %v14171_v25 = vpop.f32.mrf.mxu2 }
 0x186   : > { %2103 = vrot.lane.b32.xlu0 %v1989_v32, %s13465_s29 }
 0x187   : > { %v2412_v0 = vsel %vm2316_vm4, %v2268_v5, %v2364_v62  ;;  %v1087_v15 = vpop.f32.mrf.mxu1  ;;  %v1796_v26 = vpop.permute.xlu2 %1795  ;;  %v12975_v62 = vunpack.i.h.bf16 %v13963_v3  ;;  %vm3081_vm4 = vcmask 191616  }
 0x188   : > { %v2796_v48 = vmul.f32 %v12969_v63, %v2412_v0  ;;  %v1088_v54 = vadd.f32 %v1087_v15, %v14077_v13  ;;  %v2076_v60 = vpop.permute.xlu1 %2075  ;;  %v14167_v5 = vpop.f32.mrf.mxu0  ;;  %v2414_v13 = vsel %vm2318_vm5, %v2270_v18, %v2366_v55  ;;  %v12974_v63 = vunpack.i.l.bf16 %v13963_v3  ;;  %v12166_v15 = vld [vmem:[#allocation2 + $0x98] sm:$0xff]  }
 0x189   : > { %v2215_v24 = vadd.f32 %v2076_v60, %v1927_v38  ;;  %10706 = vmatmul.msk.bf16.gmra.mxu2 %vm716_vm1, %v11362_v34 }
 0x18a   : > { %v2844_v51 = vpack.c.bf16 %v2796_v48, %v2796_v48  ;;  %v14163_v61 = vadd.f32 %v14075_v12, %v1088_v54  ;;  %v2798_v54 = vmul.f32 %v12975_v62, %v2414_v13 }
 0x18b   : > { %v2269_v32 = vadd.f32 %v13934_v47, %v2215_v24 }
 0x18c   : > { %2943 = vrot.lane.b32.xlu2 %v2844_v51, %s13464_s28  ;;  %v1990_v14 = vld [vmem:[#allocation3 + $0xa1] sm:$0xff]  ;;  %1603 = vst.msk [vmem:[#allocation3 + $0xb0] sm:$0xff] %vm1581_vm2, %v14163_v61  ;;  %v2846_v3 = vpack.c.bf16 %v2798_v54, %v2798_v54 }
 0x18d   : > { %1654 = vst.msk [vmem:[#allocation3 + $0xb0] sm:$0xff] %vm1632_vm3, %v14163_v61  ;;  %v2365_v12 = vmul.f32 0.2, %v2269_v32  ;;  %2105 = vrot.lane.b32.xlu1 %v1990_v14, %s13465_s29  ;;  %vm2317_vm6 = vcmp.gt.f32.partialorder %v2269_v32, 0.0  ;;  %v1703_v60 = vld [vmem:[#allocation3 + $0xa7] sm:$0xff]  ;;  %v14196_v13 = vpop.f32.mrf.mxu2 }
 0x18e   : > { %v476_v14 = vld [vmem:[%s13577_s16 + $0xcc] sm:$0xf] }
 0x18f   : > { %v1090_v0 = vpop.f32.mrf.mxu1  ;;  %v1792_v38 = vpop.permute.xlu0 %1791  ;;  %v2413_v48 = vsel %vm2317_vm6, %v2269_v32, %v2365_v12  ;;  %v1931_v32 = vadd.f32 %v1796_v26, %v13898_v6  ;;  %531 = vst.msk [vmem:[#allocation2 + $0xcc] sm:$0xf] %vm479_vm0, %v476_v14  ;;  %v12167_v14 = vld [vmem:[#allocation2 + $0xa0] sm:$0xff]   ;;  %vm3360_vm6 = vcmask 1043456  }
 0x190   : > { %v1091_v18 = vadd.f32 %v1090_v0, %v14103_v17  ;;  %v2797_v55 = vmul.f32 %v12974_v63, %v2413_v48  ;;  %v2084_v17 = vpop.permute.xlu2 %2083  ;;  %v1929_v34 = vadd.f32 %v1792_v38, %v13863_v59 }
 0x191   : > { %v2219_v63 = vadd.f32 %v2084_v17, %v1931_v32 }
 0x192   : > { %v14181_v24 = vadd.f32 %v14093_v2, %v1091_v18  ;;  %10578 = vmatmul.msk.bf16.gmra.mxu1 %vm716_vm1, %v12166_v15  ;;  %v2845_v51 = vpack.c.bf16 %v2797_v55, %v2797_v55  ;;  %v14192_v2 = vpop.f32.mrf.mxu0 }
 0x193   : > { %v2273_v26 = vadd.f32 %v13934_v47, %v2219_v63 }
 0x194   : > { %1819 = vrot.lane.b32.xlu2 %v1703_v60, %s13464_s28  ;;  %1604 = vst.msk [vmem:[#allocation3 + $0xb8] sm:$0xff] %vm1581_vm2, %v14181_v24  ;;  %2945 = vrot.lane.b32.xlu0 %v2845_v51, %s13464_s28  ;;  %v1991_v54 = vld [vmem:[#allocation3 + $0xa9] sm:$0xff] }
 0x195   : > { %1655 = vst.msk [vmem:[#allocation3 + $0xb8] sm:$0xff] %vm1632_vm3, %v14181_v24  ;;  %2947 = vrot.lane.b32.xlu1 %v2846_v3, %s13464_s28  ;;  %v1704_v6 = vld [vmem:[#allocation3 + $0xaf] sm:$0xff]  ;;  %v14218_v63 = vpop.f32.mrf.mxu2  ;;  %vm2321_vm8 = vcmp.gt.f32.partialorder %v2273_v26, 0.0 }
 0x197   : > { %v1092_v62 = vpop.f32.mrf.mxu1  ;;  %v1794_v48 = vpop.permute.xlu1 %1793 }
 0x198   : > { %v2080_v12 = vpop.permute.xlu0 %2079  ;;  %v1093_v0 = vadd.f32 %v1092_v62, %v14124_v41  ;;  %v12979_v41 = vunpack.i.l.bf16 %v13923_v36  ;;  %v1930_v51 = vadd.f32 %v1794_v48, %v13879_v4 }
 0x199   : > { %v2217_v15 = vadd.f32 %v2080_v12, %v1929_v34  ;;  %v2369_v34 = vmul.f32 0.2, %v2273_v26 }
 0x19a   : > { %v14201_v18 = vadd.f32 %v14112_v49, %v1093_v0  ;;  %v11363_v49 = vld [vmem:[#allocation2 + $0xc8] sm:$0xff]  ;;  %v14214_v32 = vpop.f32.mrf.mxu0 }
 0x19b   : > { %v2271_v55 = vadd.f32 %v13934_v47, %v2217_v15  ;;  %10707 = vmatmul.msk.bf16.gmra.mxu2 %vm716_vm1, %v11363_v49  ;;  %v12980_v49 = vunpack.i.h.bf16 %v13923_v36 }
 0x19c   : > { %2107 = vrot.lane.b32.xlu2 %v1991_v54, %s13465_s29  ;;  %v1705_v59 = vld [vmem:[#allocation3 + $0xb7] sm:$0xff]  ;;  %1605 = vst.msk [vmem:[#allocation3 + $0xc0] sm:$0xff] %vm1581_vm2, %v14201_v18  ;;  %1821 = vrot.lane.b32.xlu0 %v1704_v6, %s13464_s28 }
 0x19d   : > { %v2367_v38 = vmul.f32 0.2, %v2271_v55  ;;  %vm2319_vm7 = vcmp.gt.f32.partialorder %v2271_v55, 0.0  ;;  %1656 = vst.msk [vmem:[#allocation3 + $0xc0] sm:$0xff] %vm1632_vm3, %v14201_v18  ;;  %1823 = vrot.lane.b32.xlu1 %v1705_v59, %s13464_s28  ;;  %v1992_v48 = vld [vmem:[#allocation3 + $0xb1] sm:$0xff]  ;;  %v2417_v59 = vsel %vm2321_vm8, %v2273_v26, %v2369_v34 }
 0x19e   : > { %v477_v6 = vld [vmem:[%s13577_s16 + $0xd0] sm:$0xf] }
 0x19f   : > { %v2415_v60 = vsel %vm2319_vm7, %v2271_v55, %v2367_v38  ;;  %v1095_v3 = vpop.f32.mrf.mxu1  ;;  %v1802_v54 = vpop.permute.xlu2 %1801  ;;  %v478_v38 = vld [vmem:[%s13577_s16 + $0xd4] sm:$0xf]  ;;  %532 = vst.msk [vmem:[#allocation2 + $0xd0] sm:$0xf] %vm479_vm0, %v477_v6 }
 0x1a0   : > { %v2799_v17 = vmul.f32 %v12979_v41, %v2415_v60  ;;  %v1096_v62 = vadd.f32 %v1095_v3, %v14142_v56  ;;  %v2082_v12 = vpop.permute.xlu1 %2081  ;;  %533 = vst.msk [vmem:[#allocation2 + $0xd4] sm:$0xf] %vm479_vm0, %v478_v38 }
 0x1a1   : > { %v2218_v0 = vadd.f32 %v2082_v12, %v1930_v51 }
 0x1a2   : > { %v2847_v15 = vpack.c.bf16 %v2799_v17, %v2799_v17  ;;  %v14221_v4 = vadd.f32 %v14130_v30, %v1096_v62  ;;  %10579 = vmatmul.msk.bf16.gmra.mxu1 %vm716_vm1, %v12167_v14  ;;  %v12984_v30 = vunpack.i.l.bf16 %v13883_v9 }
 0x1a3   : > { %v2272_v55 = vadd.f32 %v13934_v47, %v2218_v0  ;;  %v14242_v0 = vpop.f32.mrf.mxu0 }
 0x1a4   : > { %2949 = vrot.lane.b32.xlu2 %v2847_v15, %s13464_s28  ;;  %v1993_v56 = vld [vmem:[#allocation3 + $0xb9] sm:$0xff]  ;;  %1606 = vst.msk [vmem:[#allocation3 + $0xc8] sm:$0xff] %vm1581_vm2, %v14221_v4  ;;  %2109 = vrot.lane.b32.xlu0 %v1992_v48, %s13465_s29  ;;  %v2801_v14 = vmul.f32 %v12984_v30, %v2417_v59  ;;  %v14244_v15 = vpop.f32.mrf.mxu2  ;;  %v12168_v59 = vld [vmem:[#allocation2 + $0xa8] sm:$0xff]  }
 0x1a5   : > { %1657 = vst.msk [vmem:[#allocation3 + $0xc8] sm:$0xff] %vm1632_vm3, %v14221_v4  ;;  %v2368_v41 = vmul.f32 0.2, %v2272_v55  ;;  %2111 = vrot.lane.b32.xlu1 %v1993_v56, %s13465_s29  ;;  %vm2320_vm9 = vcmp.gt.f32.partialorder %v2272_v55, 0.0  ;;  %v1706_v34 = vld [vmem:[#allocation3 + $0xbf] sm:$0xff] }
 0x1a6   : > { %v2849_v36 = vpack.c.bf16 %v2801_v14, %v2801_v14 }
 0x1a7   : > { %v1097_v60 = vpop.f32.mrf.mxu1  ;;  %v1798_v51 = vpop.permute.xlu0 %1797  ;;  %v2416_v3 = vsel %vm2320_vm9, %v2272_v55, %v2368_v41  ;;  %v11364_v55 = vld [vmem:[#allocation2 + $0xd0] sm:$0xff] }
 0x1a8   : > { %v1098_v26 = vadd.f32 %v1097_v60, %v14167_v5  ;;  %v2800_v17 = vmul.f32 %v12980_v49, %v2416_v3  ;;  %v2090_v5 = vpop.permute.xlu2 %2089  ;;  %v1932_v48 = vadd.f32 %v1798_v51, %v13919_v31 }
 0x1aa   : > { %v14240_v62 = vadd.f32 %v14149_v44, %v1098_v26  ;;  %v2848_v12 = vpack.c.bf16 %v2800_v17, %v2800_v17  ;;  %v1934_v44 = vadd.f32 %v1802_v54, %v13966_v10  ;;  %v12985_v26 = vunpack.i.h.bf16 %v13883_v9 }
 0x1ab   : > { %10708 = vmatmul.msk.bf16.gmra.mxu2 %vm716_vm1, %v11364_v55 }
 0x1ac   : > { %1825 = vrot.lane.b32.xlu2 %v1706_v34, %s13464_s28  ;;  %1607 = vst.msk [vmem:[#allocation3 + $0xd0] sm:$0xff] %vm1581_vm2, %v14240_v62  ;;  %2951 = vrot.lane.b32.xlu0 %v2848_v12, %s13464_s28  ;;  %v2222_v38 = vadd.f32 %v2090_v5, %v1934_v44  ;;  %v1994_v60 = vld [vmem:[#allocation3 + $0xc1] sm:$0xff]  ;;  %v14262_v31 = vpop.f32.mrf.mxu2 }
 0x1ad   : > { %1658 = vst.msk [vmem:[#allocation3 + $0xd0] sm:$0xff] %vm1632_vm3, %v14240_v62  ;;  %2953 = vrot.lane.b32.xlu1 %v2849_v36, %s13464_s28  ;;  %v1707_v10 = vld [vmem:[#allocation3 + $0xc7] sm:$0xff] }
 0x1af   : > { %v1100_v6 = vpop.f32.mrf.mxu1  ;;  %v1800_v49 = vpop.permute.xlu1 %1799 }
 0x1b0   : > { %v2086_v56 = vpop.permute.xlu0 %2085  ;;  %v1101_v30 = vadd.f32 %v1100_v6, %v14192_v2  ;;  %v2276_v2 = vadd.f32 %v13934_v47, %v2222_v38  ;;  %v1933_v34 = vadd.f32 %v1800_v49, %v13941_v39  ;;  %v12990_v49 = vunpack.i.h.bf16 %v13955_v42 }
 0x1b1   : > { %v2220_v41 = vadd.f32 %v2086_v56, %v1932_v48 }
 0x1b2   : > { %v14258_v3 = vadd.f32 %v14171_v25, %v1101_v30  ;;  %10580 = vmatmul.msk.bf16.gmra.mxu1 %vm716_vm1, %v12168_v59  ;;  %v870_v25 = vpop.f32.mrf.mxu0  ;;  %v2372_v5 = vmul.f32 0.2, %v2276_v2  ;;  %vm2324_vm11 = vcmp.gt.f32.partialorder %v2276_v2, 0.0 }
 0x1b3   : > { %v2274_v14 = vadd.f32 %v13934_v47, %v2220_v41 }
 0x1b4   : > { %2113 = vrot.lane.b32.xlu2 %v1994_v60, %s13465_s29  ;;  %v1708_v54 = vld [vmem:[#allocation3 + $0xcf] sm:$0xff]  ;;  %1608 = vst.msk [vmem:[#allocation3 + $0xd8] sm:$0xff] %vm1581_vm2, %v14258_v3  ;;  %1827 = vrot.lane.b32.xlu0 %v1707_v10, %s13464_s28  ;;  %v14278_v9 = vpop.f32.mrf.mxu2  ;;  %v12989_v60 = vunpack.i.l.bf16 %v13955_v42 }
 0x1b5   : > { %v2370_v51 = vmul.f32 0.2, %v2274_v14  ;;  %vm2322_vm10 = vcmp.gt.f32.partialorder %v2274_v14, 0.0  ;;  %1659 = vst.msk [vmem:[#allocation3 + $0xd8] sm:$0xff] %vm1632_vm3, %v14258_v3  ;;  %1829 = vrot.lane.b32.xlu1 %v1708_v54, %s13464_s28  ;;  %v1995_v59 = vld [vmem:[#allocation3 + $0xc9] sm:$0xff]  ;;  %v12169_v54 = vld [vmem:[#allocation2 + $0xb0] sm:$0xff]  }
 0x1b7   : > { %v2418_v17 = vsel %vm2322_vm10, %v2274_v14, %v2370_v51  ;;  %v1102_v12 = vpop.f32.mrf.mxu1  ;;  %v1808_v38 = vpop.permute.xlu2 %1807 }
 0x1b8   : > { %v2802_v36 = vmul.f32 %v12985_v26, %v2418_v17  ;;  %v1103_v44 = vadd.f32 %v1102_v12, %v14214_v32  ;;  %v2088_v48 = vpop.permute.xlu1 %2087  ;;  %v2420_v32 = vsel %vm2324_vm11, %v2276_v2, %v2372_v5 }
 0x1b9   : > { %v2221_v55 = vadd.f32 %v2088_v48, %v1933_v34  ;;  %v2804_v26 = vmul.f32 %v12990_v49, %v2420_v32 }
 0x1ba   : > { %v2850_v6 = vpack.c.bf16 %v2802_v36, %v2802_v36  ;;  %v14276_v56 = vadd.f32 %v14196_v13, %v1103_v44  ;;  %v873_v41 = vpop.f32.mrf.mxu0 }
 0x1bb   : > { %v2275_v30 = vadd.f32 %v13934_v47, %v2221_v55  ;;  %v2852_v42 = vpack.c.bf16 %v2804_v26, %v2804_v26  ;;  %v12170_v26 = vld [vmem:[#allocation2 + $0xb8] sm:$0xff]  }
 0x1bc   : > { %2955 = vrot.lane.b32.xlu2 %v2850_v6, %s13464_s28  ;;  %v1996_v39 = vld [vmem:[#allocation3 + $0xd1] sm:$0xff]  ;;  %1609 = vst.msk [vmem:[#allocation3 + $0xe0] sm:$0xff] %vm1581_vm2, %v14276_v56  ;;  %2115 = vrot.lane.b32.xlu0 %v1995_v59, %s13465_s29  ;;  %v14295_v5 = vpop.f32.mrf.mxu2 }
 0x1bd   : > { %1660 = vst.msk [vmem:[#allocation3 + $0xe0] sm:$0xff] %vm1632_vm3, %v14276_v56  ;;  %v2371_v13 = vmul.f32 0.2, %v2275_v30  ;;  %2117 = vrot.lane.b32.xlu1 %v1996_v39, %s13465_s29  ;;  %vm2323_vm12 = vcmp.gt.f32.partialorder %v2275_v30, 0.0  ;;  %v1709_v34 = vld [vmem:[#allocation3 + $0xd7] sm:$0xff] }
 0x1bf   : > { %v1105_v14 = vpop.f32.mrf.mxu1  ;;  %v1804_v10 = vpop.permute.xlu0 %1803  ;;  %v2419_v51 = vsel %vm2323_vm12, %v2275_v30, %v2371_v13  ;;  %vm3296_vm12 = vcmask 195584  }
 0x1c0   : > { %v1106_v17 = vadd.f32 %v1105_v14, %v14242_v0  ;;  %v2803_v2 = vmul.f32 %v12989_v60, %v2419_v51  ;;  %v2096_v0 = vpop.permute.xlu2 %2095  ;;  %v1935_v44 = vadd.f32 %v1804_v10, %v13984_v16 }
 0x1c2   : > { %v14292_v12 = vadd.f32 %v14218_v63, %v1106_v17  ;;  %10581 = vmatmul.msk.bf16.gmra.mxu1 %vm716_vm1, %v12169_v54  ;;  %v2851_v36 = vpack.c.bf16 %v2803_v2, %v2803_v2  ;;  %v1937_v63 = vadd.f32 %v1808_v38, %v14029_v21  ;;  %v875_v48 = vpop.f32.mrf.mxu0 }
 0x1c4   : > { %1831 = vrot.lane.b32.xlu2 %v1709_v34, %s13464_s28  ;;  %1610 = vst.msk [vmem:[#allocation3 + $0xe8] sm:$0xff] %vm1581_vm2, %v14292_v12  ;;  %2957 = vrot.lane.b32.xlu0 %v2851_v36, %s13464_s28  ;;  %v2225_v59 = vadd.f32 %v2096_v0, %v1937_v63  ;;  %v1997_v49 = vld [vmem:[#allocation3 + $0xd9] sm:$0xff] }
 0x1c5   : > { %1661 = vst.msk [vmem:[#allocation3 + $0xe8] sm:$0xff] %vm1632_vm3, %v14292_v12  ;;  %2959 = vrot.lane.b32.xlu1 %v2852_v42, %s13464_s28  ;;  %v1710_v14 = vld [vmem:[#allocation3 + $0xdf] sm:$0xff] }
 0x1c6   : > { %v2279_v21 = vadd.f32 %v13934_v47, %v2225_v59 }
 0x1c7   : > { %v1107_v55 = vpop.f32.mrf.mxu1  ;;  %v1806_v32 = vpop.permute.xlu1 %1805 }
 0x1c8   : > { %v2092_v6 = vpop.permute.xlu0 %2091  ;;  %v1108_v30 = vadd.f32 %v1107_v55, %v870_v25  ;;  %v14315_v25 = vpop.f32.mrf.mxu2  ;;  %v1936_v10 = vadd.f32 %v1806_v32, %v14009_v53  ;;  %v2375_v2 = vmul.f32 0.2, %v2279_v21  ;;  %vm2327_vm14 = vcmp.gt.f32.partialorder %v2279_v21, 0.0 }
 0x1c9   : > { %v2223_v39 = vadd.f32 %v2092_v6, %v1935_v44 }
 0x1ca   : > { %v14307_v13 = vadd.f32 %v14244_v15, %v1108_v30  ;;  %v12994_v15 = vunpack.i.l.bf16 %v13908_v23  ;;  %v878_v42 = vpop.f32.mrf.mxu0  ;;  %v12999_v30 = vunpack.i.l.bf16 %v13994_v35 }
 0x1cb   : > { %v2277_v60 = vadd.f32 %v13934_v47, %v2223_v39  ;;  %v12995_v39 = vunpack.i.h.bf16 %v13908_v23 }
 0x1cc   : > { %2119 = vrot.lane.b32.xlu2 %v1997_v49, %s13465_s29  ;;  %v1711_v54 = vld [vmem:[#allocation3 + $0xe7] sm:$0xff]  ;;  %1611 = vst.msk [vmem:[#allocation3 + $0xf0] sm:$0xff] %vm1581_vm2, %v14307_v13  ;;  %1833 = vrot.lane.b32.xlu0 %v1710_v14, %s13464_s28 }
 0x1cd   : > { %v2373_v16 = vmul.f32 0.2, %v2277_v60  ;;  %vm2325_vm13 = vcmp.gt.f32.partialorder %v2277_v60, 0.0  ;;  %1662 = vst.msk [vmem:[#allocation3 + $0xf0] sm:$0xff] %vm1632_vm3, %v14307_v13  ;;  %1835 = vrot.lane.b32.xlu1 %v1711_v54, %s13464_s28  ;;  %v1998_v55 = vld [vmem:[#allocation3 + $0xe1] sm:$0xff] }
 0x1cf   : > { %v2421_v38 = vsel %vm2325_vm13, %v2277_v60, %v2373_v16  ;;  %v1110_v51 = vpop.f32.mrf.mxu1  ;;  %v1814_v6 = vpop.permute.xlu2 %1813 }
 0x1d0   : > { %v2805_v17 = vmul.f32 %v12994_v15, %v2421_v38  ;;  %v1111_v34 = vadd.f32 %v1110_v51, %v873_v41  ;;  %v2094_v36 = vpop.permute.xlu1 %2093  ;;  %v2423_v41 = vsel %vm2327_vm14, %v2279_v21, %v2375_v2  ;;  %v14336_v32 = vpop.f32.mrf.mxu2 }
 0x1d1   : > { %v2224_v0 = vadd.f32 %v2094_v36, %v1936_v10  ;;  %v2807_v54 = vmul.f32 %v12999_v30, %v2423_v41 }
 0x1d2   : > { %v2853_v63 = vpack.c.bf16 %v2805_v17, %v2805_v17  ;;  %v14323_v44 = vadd.f32 %v14262_v31, %v1111_v34  ;;  %10582 = vmatmul.msk.bf16.gmra.mxu1 %vm716_vm1, %v12170_v26  ;;  %v880_v51 = vpop.f32.mrf.mxu0  ;;  %v11341_v17 = vld [vmem:[#allocation2 + $0x18] sm:$0xff] }
 0x1d3   : > { %v2278_v59 = vadd.f32 %v13934_v47, %v2224_v0  ;;  %v2855_v26 = vpack.c.bf16 %v2807_v54, %v2807_v54 }
 0x1d4   : > { %2961 = vrot.lane.b32.xlu2 %v2853_v63, %s13464_s28  ;;  %v1999_v53 = vld [vmem:[#allocation3 + $0xe9] sm:$0xff]  ;;  %1612 = vst.msk [vmem:[#allocation3 + $0xf8] sm:$0xff] %vm1581_vm2, %v14323_v44  ;;  %2121 = vrot.lane.b32.xlu0 %v1998_v55, %s13465_s29 }
 0x1d5   : > { %1663 = vst.msk [vmem:[#allocation3 + $0xf8] sm:$0xff] %vm1632_vm3, %v14323_v44  ;;  %v2374_v31 = vmul.f32 0.2, %v2278_v59  ;;  %2123 = vrot.lane.b32.xlu1 %v1999_v53, %s13465_s29  ;;  %vm2326_vm15 = vcmp.gt.f32.partialorder %v2278_v59, 0.0  ;;  %v1712_v21 = vld [vmem:[#allocation3 + $0xef] sm:$0xff] }
 0x1d7   : > { %v1112_v49 = vpop.f32.mrf.mxu1  ;;  %v1810_v60 = vpop.permute.xlu0 %1809  ;;  %v2422_v14 = vsel %vm2326_vm15, %v2278_v59, %v2374_v31 }
 0x1d8   : > { %v1113_v16 = vadd.f32 %v1112_v49, %v875_v48  ;;  %v2806_v15 = vmul.f32 %v12995_v39, %v2422_v14  ;;  %v2102_v23 = vpop.permute.xlu2 %2101  ;;  %v1940_v48 = vadd.f32 %v1814_v6, %v14091_v37  ;;  %v14350_v59 = vpop.f32.mrf.mxu2  ;;  %v13000_v49 = vunpack.i.h.bf16 %v13994_v35 }
 0x1da   : > { %v14339_v38 = vadd.f32 %v14278_v9, %v1113_v16  ;;  %v2854_v10 = vpack.c.bf16 %v2806_v15, %v2806_v15  ;;  %v1938_v9 = vadd.f32 %v1810_v60, %v14052_v46  ;;  %v2228_v36 = vadd.f32 %v2102_v23, %v1940_v48  ;;  %v10711_v46 = vld [vmem:[%s17563_s2 + $0x14] sm:$0xf]  ;;  %v883_v39 = vpop.f32.mrf.mxu0 }
 0x1dc   : > { %1837 = vrot.lane.b32.xlu2 %v1712_v21, %s13464_s28  ;;  %1613 = vst.msk [vmem:[#allocation3 + $0x100] sm:$0xff] %vm1581_vm2, %v14339_v38  ;;  %2963 = vrot.lane.b32.xlu0 %v2854_v10, %s13464_s28  ;;  %v2000_v30 = vld [vmem:[#allocation3 + $0xf1] sm:$0xff]  ;;  %v2282_v6 = vadd.f32 %v13934_v47, %v2228_v36 }
 0x1dd   : > { %1664 = vst.msk [vmem:[#allocation3 + $0x100] sm:$0xff] %vm1632_vm3, %v14339_v38  ;;  %2965 = vrot.lane.b32.xlu1 %v2855_v26, %s13464_s28  ;;  %v1713_v37 = vld [vmem:[#allocation3 + $0xf7] sm:$0xff] }
 0x1de   : > { %v2378_v26 = vmul.f32 0.2, %v2282_v6  ;;  %vm2330_vm7 = vcmp.gt.f32.partialorder %v2282_v6, 0.0 }
 0x1df   : > { %v1115_v2 = vpop.f32.mrf.mxu1  ;;  %v1812_v55 = vpop.permute.xlu1 %1811 }
 0x1e0   : > { %v2098_v34 = vpop.permute.xlu0 %2097  ;;  %v1116_v0 = vadd.f32 %v1115_v2, %v878_v42  ;;  %v3292_v42 = vunpack.c.l.b16 %v10711_v46  ;;  %v1939_v16 = vadd.f32 %v1812_v55, %v14072_v43  ;;  %v11369_v2 = vld [vmem:[%s17563_s2 + $0xc] sm:$0xff]  ;;  %v14380_v36 = vpop.f32.mrf.mxu2 }
 0x1e1   : > { %v2226_v63 = vadd.f32 %v2098_v34, %v1938_v9 }
 0x1e2   : > { %v14353_v53 = vadd.f32 %v14295_v5, %v1116_v0  ;;  %10685 = vmatmul.msk.bf16.vlgmr.msra.gmra.mxu1 %vm716_vm1, %v11341_v17  ;;  %v3294_v14 = vpack.c.b16 %v3292_v42, %v3292_v42  ;;  %v2426_v0 = vsel %vm2330_vm7, %v2282_v6, %v2378_v26  ;;  %vm1681_vm7 = vcmask 188544  }
 0x1e3   : > { %v2280_v41 = vadd.f32 %v13934_v47, %v2226_v63 }
 0x1e4   : > { %2125 = vrot.lane.b32.xlu2 %v2000_v30, %s13465_s29  ;;  %1614 = vst.msk [vmem:[#allocation3 + $0x108] sm:$0xff] %vm1581_vm2, %v14353_v53  ;;  %1839 = vrot.lane.b32.xlu0 %v1713_v37, %s13464_s28  ;;  %v1714_v31 = vld [vmem:[#allocation3 + $0xff] sm:$0xff]  ;;  %v3362_v10 = vsel %vm3360_vm6, %v3294_v14, 0  ;;  %v885_v30 = vpop.f32.mrf.mxu0 }
 0x1e5   : > { %v2376_v5 = vmul.f32 0.2, %v2280_v41  ;;  %vm2328_vm5 = vcmp.gt.f32.partialorder %v2280_v41, 0.0  ;;  %1665 = vst.msk [vmem:[#allocation3 + $0x108] sm:$0xff] %vm1632_vm3, %v14353_v53  ;;  %1841 = vrot.lane.b32.xlu1 %v1714_v31, %s13464_s28  ;;  %3370 = vmatpush.bf16.msrb.mxu1 %v3362_v10  ;;  %v2001_v34 = vld [vmem:[#allocation3 + $0xf9] sm:$0xff] }
 0x1e6   : > { %v2944_v60 = vpop.permute.xlu2 %2943  ;;  %12803 = vmatpush.bf16.msra.mxu3 %v3362_v10 }
 0x1e7   : > { %3085 = vst.msk [vmem:[#allocation2 + $0x18] sm:$0xf] %vm3081_vm4, %v2944_v60  ;;  %v2424_v54 = vsel %vm2328_vm5, %v2280_v41, %v2376_v5  ;;  %v1117_v15 = vpop.f32.mrf.mxu1  ;;  %v13004_v41 = vunpack.i.l.bf16 %v13977_v22  ;;  %vm1630_vm5 = vcmask 57344  }
 0x1e8   : > { %v2808_v21 = vmul.f32 %v13000_v49, %v2424_v54  ;;  %v1118_v23 = vadd.f32 %v1117_v15, %v880_v51  ;;  %v2100_v35 = vpop.permute.xlu1 %2099 }
 0x1e9   : > { %v2227_v48 = vadd.f32 %v2100_v35, %v1939_v16  ;;  %3371 = vmatpush.bf16.msrb.mxu1 %v11369_v2 }
 0x1ea   : > { %v2856_v9 = vpack.c.bf16 %v2808_v21, %v2808_v21  ;;  %v14373_v17 = vadd.f32 %v14315_v25, %v1118_v23  ;;  %v13005_v25 = vunpack.i.h.bf16 %v13977_v22  ;;  %12804 = vmatpush.bf16.msra.mxu3 %v11369_v2 }
 0x1eb   : > { %v2281_v43 = vadd.f32 %v13934_v47, %v2227_v48 }
 0x1ec   : > { %2967 = vrot.lane.b32.xlu2 %v2856_v9, %s13464_s28  ;;  %1615 = vst.msk [vmem:[#allocation3 + $0x110] sm:$0xff] %vm1581_vm2, %v14373_v17  ;;  %2127 = vrot.lane.b32.xlu0 %v2001_v34, %s13465_s29  ;;  %v2002_v51 = vld [vmem:[#allocation3 + $0x101] sm:$0xff]  ;;  %v2810_v5 = vmul.f32 %v13005_v25, %v2426_v0  ;;  %v888_v48 = vpop.f32.mrf.mxu0  ;;  %v13009_v25 = vunpack.i.l.bf16 %v13931_v40 }
 0x1ed   : > { %1666 = vst.msk [vmem:[#allocation3 + $0x110] sm:$0xff] %vm1632_vm3, %v14373_v17  ;;  %v2377_v63 = vmul.f32 0.2, %v2281_v43  ;;  %2129 = vrot.lane.b32.xlu1 %v2002_v51, %s13465_s29  ;;  %vm2329_vm8 = vcmp.gt.f32.partialorder %v2281_v43, 0.0  ;;  %v1715_v60 = vld [vmem:[#allocation3 + $0x107] sm:$0xff] }
 0x1ee   : > { %v1820_v55 = vpop.permute.xlu2 %1819  ;;  %v2858_v54 = vpack.c.bf16 %v2810_v5, %v2810_v5 }
 0x1ef   : > { %v1120_v46 = vpop.f32.mrf.mxu1  ;;  %v1816_v37 = vpop.permute.xlu0 %1815  ;;  %v2425_v42 = vsel %vm2329_vm8, %v2281_v43, %v2377_v63 }
 0x1f0   : > { %v1121_v6 = vadd.f32 %v1120_v46, %v883_v39  ;;  %v2809_v31 = vmul.f32 %v13004_v41, %v2425_v42  ;;  %v14400_v39 = vpop.f32.mrf.mxu2  ;;  %v1941_v16 = vadd.f32 %v1816_v37, %v14109_v11 }
 0x1f2   : > { %v14391_v49 = vadd.f32 %v14336_v32, %v1121_v6  ;;  %v2857_v14 = vpack.c.bf16 %v2809_v31, %v2809_v31  ;;  %v1943_v32 = vadd.f32 %v1820_v55, %v14145_v50  ;;  %v10772_v50 = vld [vmem:[%s17563_s2 + $0x20] sm:$0xf] }
 0x1f3   : > { %v3850_v0 = vunpack.c.l.b16 %v10772_v50 }
 0x1f4   : > { %1843 = vrot.lane.b32.xlu2 %v1715_v60, %s13464_s28  ;;  %1616 = vst.msk [vmem:[#allocation3 + $0x118] sm:$0xff] %vm1581_vm2, %v14391_v49  ;;  %2969 = vrot.lane.b32.xlu0 %v2857_v14, %s13464_s28  ;;  %v2003_v43 = vld [vmem:[#allocation3 + $0x109] sm:$0xff] }
 0x1f5   : > { %1667 = vst.msk [vmem:[#allocation3 + $0x118] sm:$0xff] %vm1632_vm3, %v14391_v49  ;;  %2971 = vrot.lane.b32.xlu1 %v2858_v54, %s13464_s28  ;;  %v1716_v34 = vld [vmem:[#allocation3 + $0x10f] sm:$0xff]  ;;  %v3852_v41 = vpack.c.b16 %v3850_v0, %v3850_v0 }
 0x1f6   : > { %v2108_v22 = vpop.permute.xlu2 %2107 }
 0x1f7   : > { %v1122_v15 = vpop.f32.mrf.mxu1  ;;  %v2231_v10 = vadd.f32 %v2108_v22, %v1943_v32  ;;  %v1818_v35 = vpop.permute.xlu1 %1817  ;;  %v3918_v60 = vsel %vm3360_vm6, %v3852_v41, 0 }
 0x1f8   : > { %v2104_v21 = vpop.permute.xlu0 %2103  ;;  %v1123_v26 = vadd.f32 %v1122_v15, %v885_v30  ;;  %v1942_v30 = vadd.f32 %v1818_v35, %v14128_v27  ;;  %v1508_v42 = vpop.f32.mrf.mxu2  ;;  %3926 = vmatpush.bf16.msrb.mxu0 %v3918_v60  ;;  %v11391_v15 = vld [vmem:[%s17563_s2 + $0x18] sm:$0xff]  ;;  %v13010_v35 = vunpack.i.h.bf16 %v13931_v40 }
 0x1f9   : > { %v2229_v23 = vadd.f32 %v2104_v21, %v1941_v16  ;;  %v2285_v11 = vadd.f32 %v13934_v47, %v2231_v10  ;;  %v890_v16 = vpop.f32.mrf.mxu0 }
 0x1fa   : > { %v14405_v9 = vadd.f32 %v14350_v59, %v1123_v26 }
 0x1fb   : > { %v2283_v2 = vadd.f32 %v13934_v47, %v2229_v23  ;;  %v2381_v5 = vmul.f32 0.2, %v2285_v11  ;;  %vm2333_vm10 = vcmp.gt.f32.partialorder %v2285_v11, 0.0 }
 0x1fc   : > { %2131 = vrot.lane.b32.xlu2 %v2003_v43, %s13465_s29  ;;  %1617 = vst.msk [vmem:[#allocation3 + $0x120] sm:$0xff] %vm1581_vm2, %v14405_v9  ;;  %1845 = vrot.lane.b32.xlu0 %v1716_v34, %s13464_s28  ;;  %v1717_v59 = vld [vmem:[#allocation3 + $0x117] sm:$0xff] }
 0x1fd   : > { %v2379_v51 = vmul.f32 0.2, %v2283_v2  ;;  %vm2331_vm9 = vcmp.gt.f32.partialorder %v2283_v2, 0.0  ;;  %1668 = vst.msk [vmem:[#allocation3 + $0x120] sm:$0xff] %vm1632_vm3, %v14405_v9  ;;  %1847 = vrot.lane.b32.xlu1 %v1717_v59, %s13464_s28  ;;  %v2004_v27 = vld [vmem:[#allocation3 + $0x111] sm:$0xff]  ;;  %v2429_v10 = vsel %vm2333_vm10, %v2285_v11, %v2381_v5  ;;  %3927 = vmatpush.bf16.msrb.mxu0 %v11391_v15 }
 0x1fe   : > { %v2950_v63 = vpop.permute.xlu2 %2949 }
 0x1ff   : > { %3088 = vst.msk [vmem:[#allocation2 + $0x24] sm:$0xf] %vm3081_vm4, %v2950_v63  ;;  %v2427_v55 = vsel %vm2331_vm9, %v2283_v2, %v2379_v51  ;;  %v1125_v46 = vpop.f32.mrf.mxu1  ;;  %v2106_v31 = vpop.permute.xlu1 %2105 }
 0x200   : > { %v2811_v37 = vmul.f32 %v13009_v25, %v2427_v55  ;;  %v1126_v6 = vadd.f32 %v1125_v46, %v888_v48  ;;  %v2230_v14 = vadd.f32 %v2106_v31, %v1942_v30  ;;  %v1510_v59 = vpop.f32.mrf.mxu2 }
 0x201   : > { %v893_v55 = vpop.f32.mrf.mxu0 }
 0x202   : > { %v2859_v54 = vpack.c.bf16 %v2811_v37, %v2811_v37  ;;  %v14424_v22 = vadd.f32 %v14380_v36, %v1126_v6  ;;  %v2284_v32 = vadd.f32 %v13934_v47, %v2230_v14  ;;  %v13014_v36 = vunpack.i.l.bf16 %v14021_v20 }
 0x204   : > { %2973 = vrot.lane.b32.xlu2 %v2859_v54, %s13464_s28  ;;  %1618 = vst.msk [vmem:[#allocation3 + $0x128] sm:$0xff] %vm1581_vm2, %v14424_v22  ;;  %2133 = vrot.lane.b32.xlu0 %v2004_v27, %s13465_s29  ;;  %v2005_v21 = vld [vmem:[#allocation3 + $0x119] sm:$0xff]  ;;  %v2380_v26 = vmul.f32 0.2, %v2284_v32  ;;  %vm2332_vm11 = vcmp.gt.f32.partialorder %v2284_v32, 0.0  ;;  %v2813_v34 = vmul.f32 %v13014_v36, %v2429_v10 }
 0x205   : > { %1669 = vst.msk [vmem:[#allocation3 + $0x128] sm:$0xff] %vm1632_vm3, %v14424_v22  ;;  %2135 = vrot.lane.b32.xlu1 %v2005_v21, %s13465_s29  ;;  %v1718_v25 = vld [vmem:[#allocation3 + $0x11f] sm:$0xff] }
 0x206   : > { %v1826_v23 = vpop.permute.xlu2 %1825  ;;  %v2946_v48 = vpop.permute.xlu0 %2945  ;;  %v2428_v43 = vsel %vm2332_vm11, %v2284_v32, %v2380_v26  ;;  %v2861_v40 = vpack.c.bf16 %v2813_v34, %v2813_v34 }
 0x207   : > { %3086 = vst.msk [vmem:[#allocation2 + $0x1c] sm:$0xf] %vm3081_vm4, %v2946_v48  ;;  %v1127_v2 = vpop.f32.mrf.mxu1  ;;  %v2948_v11 = vpop.permute.xlu1 %2947  ;;  %v2812_v51 = vmul.f32 %v13010_v35, %v2428_v43 }
 0x208   : > { %v1128_v50 = vadd.f32 %v1127_v2, %v890_v16  ;;  %3087 = vst.msk [vmem:[#allocation2 + $0x20] sm:$0xf] %vm3081_vm4, %v2948_v11  ;;  %v1513_v27 = vpop.f32.mrf.mxu2 }
 0x209   : > { %v2860_v63 = vpack.c.bf16 %v2812_v51, %v2812_v51  ;;  %v895_v36 = vpop.f32.mrf.mxu0 }
 0x20a   : > { %v14442_v0 = vadd.f32 %v14400_v39, %v1128_v50  ;;  %v1946_v39 = vadd.f32 %v1826_v23, %v14201_v18 }
 0x20c   : > { %1849 = vrot.lane.b32.xlu2 %v1718_v25, %s13464_s28  ;;  %1619 = vst.msk [vmem:[#allocation3 + $0x130] sm:$0xff] %vm1581_vm2, %v14442_v0  ;;  %2975 = vrot.lane.b32.xlu0 %v2860_v63, %s13464_s28  ;;  %v2006_v54 = vld [vmem:[#allocation3 + $0x121] sm:$0xff]  ;;  %v13015_v25 = vunpack.i.h.bf16 %v14021_v20  ;;  %v13019_v20 = vunpack.i.l.bf16 %v14006_v52 }
 0x20d   : > { %1670 = vst.msk [vmem:[#allocation3 + $0x130] sm:$0xff] %vm1632_vm3, %v14442_v0  ;;  %2977 = vrot.lane.b32.xlu1 %v2861_v40, %s13464_s28  ;;  %v1719_v32 = vld [vmem:[#allocation3 + $0x127] sm:$0xff]  ;;  %v13020_v40 = vunpack.i.h.bf16 %v14006_v52 }
 0x20e   : > { %v2114_v41 = vpop.permute.xlu2 %2113  ;;  %v1822_v30 = vpop.permute.xlu0 %1821  ;;  %v12194_v46 = vld [vmem:[#allocation2 + $0x18] sm:$0xff]  }
 0x20f   : > { %10720 = vmatmul.msk.bf16.vlgmr.msrb.gmra.mxu1 %vm3296_vm12, %v12194_v46  ;;  %v1130_v37 = vpop.f32.mrf.mxu1  ;;  %v2234_v5 = vadd.f32 %v2114_v41, %v1946_v39  ;;  %v1824_v31 = vpop.permute.xlu1 %1823  ;;  %v12195_v60 = vld [vmem:[#allocation2 + $0x20] sm:$0xff]   ;;  %v1944_v15 = vadd.f32 %v1822_v30, %v14163_v61 }
 0x210   : > { %v1131_v6 = vadd.f32 %v1130_v37, %v893_v55  ;;  %10721 = vmatmul.msk.bf16.vlgmr.msra.gmra.mxu3 %vm3296_vm12, %v12195_v60  ;;  %v1945_v10 = vadd.f32 %v1824_v31, %v14181_v24  ;;  %v1515_v39 = vpop.f32.mrf.mxu2 }
 0x211   : > { %v2288_v18 = vadd.f32 %v13934_v47, %v2234_v5 }
 0x212   : > { %v14454_v14 = vadd.f32 %v1508_v42, %v1131_v6 }
 0x213   : > { %v2384_v35 = vmul.f32 0.2, %v2288_v18  ;;  %vm2336_vm13 = vcmp.gt.f32.partialorder %v2288_v18, 0.0 }
 0x214   : > { %2137 = vrot.lane.b32.xlu2 %v2006_v54, %s13465_s29  ;;  %1620 = vst.msk [vmem:[#allocation3 + $0x138] sm:$0xff] %vm1581_vm2, %v14454_v14  ;;  %1851 = vrot.lane.b32.xlu0 %v1719_v32, %s13464_s28  ;;  %v1720_v16 = vld [vmem:[#allocation3 + $0x12f] sm:$0xff] }
 0x215   : > { %1671 = vst.msk [vmem:[#allocation3 + $0x138] sm:$0xff] %vm1632_vm3, %v14454_v14  ;;  %1853 = vrot.lane.b32.xlu1 %v1720_v16, %s13464_s28  ;;  %v2007_v51 = vld [vmem:[#allocation3 + $0x129] sm:$0xff]  ;;  %v2432_v63 = vsel %vm2336_vm13, %v2288_v18, %v2384_v35 }
 0x216   : > { %v2956_v42 = vpop.permute.xlu2 %2955  ;;  %v2110_v21 = vpop.permute.xlu0 %2109  ;;  %v2816_v6 = vmul.f32 %v13020_v40, %v2432_v63  ;;  %v17584_v63 = vmov 0.0  }
 0x217   : > { %3091 = vst.msk [vmem:[#allocation2 + $0x30] sm:$0xf] %vm3081_vm4, %v2956_v42  ;;  %v2232_v26 = vadd.f32 %v2110_v21, %v1944_v15  ;;  %v1132_v23 = vpop.f32.mrf.mxu1  ;;  %v2112_v2 = vpop.permute.xlu1 %2111 }
 0x218   : > { %v1133_v48 = vadd.f32 %v1132_v23, %v895_v36  ;;  %v2233_v61 = vadd.f32 %v2112_v2, %v1945_v10  ;;  %v2864_v52 = vpack.c.bf16 %v2816_v6, %v2816_v6  ;;  %v1518_v10 = vpop.f32.mrf.mxu2  ;;  %1631 = vst.msk [vmem:[#allocation3 + $0x7] sm:$0x1] %vm1630_vm5, %v17584_v63 }
 0x219   : > { %v2286_v43 = vadd.f32 %v13934_v47, %v2232_v26  ;;  %1682 = vst.msk [vmem:[#allocation3 + $0x188] sm:$0x1] %vm1681_vm7, %v17584_v63 }
 0x21a   : > { %v14468_v34 = vadd.f32 %v1510_v59, %v1133_v48  ;;  %v2287_v11 = vadd.f32 %v13934_v47, %v2233_v61 }
 0x21b   : > { %v2382_v50 = vmul.f32 0.2, %v2286_v43  ;;  %vm2334_vm14 = vcmp.gt.f32.partialorder %v2286_v43, 0.0 }
 0x21c   : > { %1621 = vst.msk [vmem:[#allocation3 + $0x140] sm:$0xff] %vm1581_vm2, %v14468_v34  ;;  %2139 = vrot.lane.b32.xlu0 %v2007_v51, %s13465_s29  ;;  %v2008_v24 = vld [vmem:[#allocation3 + $0x131] sm:$0xff]  ;;  %v2383_v59 = vmul.f32 0.2, %v2287_v11  ;;  %vm2335_vm15 = vcmp.gt.f32.partialorder %v2287_v11, 0.0 }
 0x21d   : > { %1672 = vst.msk [vmem:[#allocation3 + $0x140] sm:$0xff] %vm1632_vm3, %v14468_v34  ;;  %2141 = vrot.lane.b32.xlu1 %v2008_v24, %s13465_s29  ;;  %v2430_v41 = vsel %vm2334_vm14, %v2286_v43, %v2382_v50  ;;  %v1721_v48 = vld [vmem:[#allocation3 + $0x137] sm:$0xff] }
 0x21e   : > { %v1832_v55 = vpop.permute.xlu2 %1831  ;;  %v2952_v30 = vpop.permute.xlu0 %2951  ;;  %v2814_v46 = vmul.f32 %v13015_v25, %v2430_v41  ;;  %v2431_v5 = vsel %vm2335_vm15, %v2287_v11, %v2383_v59 }
 0x21f   : > { %3089 = vst.msk [vmem:[#allocation2 + $0x28] sm:$0xf] %vm3081_vm4, %v2952_v30  ;;  %v1135_v37 = vpop.f32.mrf.mxu1  ;;  %v2954_v60 = vpop.permute.xlu1 %2953  ;;  %v2815_v32 = vmul.f32 %v13019_v20, %v2431_v5  ;;  %v1949_v15 = vadd.f32 %v1832_v55, %v14258_v3 }
 0x220   : > { %v1136_v31 = vadd.f32 %v1135_v37, %v13724_v57  ;;  %v2862_v54 = vpack.c.bf16 %v2814_v46, %v2814_v46  ;;  %3090 = vst.msk [vmem:[#allocation2 + $0x2c] sm:$0xf] %vm3081_vm4, %v2954_v60  ;;  %v1520_v20 = vpop.f32.mrf.mxu2 }
 0x221   : > { %v2863_v16 = vpack.c.bf16 %v2815_v32, %v2815_v32 }
 0x222   : > { %v14483_v18 = vadd.f32 %v1513_v27, %v1136_v31  ;;  %2979 = vrot.lane.b32.xlu2 %v2862_v54, %s13464_s28  ;;  %v13029_v31 = vunpack.i.l.bf16 %v14046_v7 }
 0x224   : > { %1622 = vst.msk [vmem:[#allocation3 + $0x148] sm:$0xff] %vm1581_vm2, %v14483_v18  ;;  %2981 = vrot.lane.b32.xlu0 %v2863_v16, %s13464_s28  ;;  %v1722_v43 = vld [vmem:[#allocation3 + $0x13f] sm:$0xff]  ;;  %v3174_v16 = vld [vmem:[%s17563_s2 + $0x8] sm:$0xf] }
 0x225   : > { %1673 = vst.msk [vmem:[#allocation3 + $0x148] sm:$0xff] %vm1632_vm3, %v14483_v18  ;;  %2983 = vrot.lane.b32.xlu1 %v2864_v52, %s13464_s28  ;;  %v13025_v52 = vunpack.i.h.bf16 %v13961_v1 }
 0x226   : > { %v2120_v57 = vpop.permute.xlu2 %2119  ;;  %v1828_v42 = vpop.permute.xlu0 %1827  ;;  %v11370_v27 = vld [vmem:[#allocation2 + $0x24] sm:$0xff] }
 0x227   : > { %v1137_v21 = vpop.f32.mrf.mxu1  ;;  %v2237_v36 = vadd.f32 %v2120_v57, %v1949_v15  ;;  %v1830_v23 = vpop.permute.xlu1 %1829  ;;  %v12196_v35 = vld [vmem:[#allocation2 + $0x28] sm:$0xff]   ;;  %10861 = vmatmul.msk.bf16.vlgmr.msrb.gmra.mxu0 %vm3296_vm12, %v11370_v27  ;;  %v1947_v61 = vadd.f32 %v1828_v42, %v14221_v4  ;;  %v3510_v27 = vunpack.c.l.b16 %v3174_v16 }
 0x228   : > { %v1138_v26 = vadd.f32 %v1137_v21, %v13735_v8  ;;  %10722 = vmatmul.msk.bf16.gmra.mxu3 %vm3296_vm12, %v12196_v35  ;;  %v1948_v51 = vadd.f32 %v1830_v23, %v14240_v62  ;;  %v11371_v15 = vld [vmem:[#allocation2 + $0x2c] sm:$0xff] }
 0x229   : > { %v2291_v3 = vadd.f32 %v13934_v47, %v2237_v36 }
 0x22a   : > { %v14496_v2 = vadd.f32 %v1515_v39, %v1138_v26  ;;  %1855 = vrot.lane.b32.xlu2 %v1721_v48, %s13464_s28  ;;  %v2009_v39 = vld [vmem:[#allocation3 + $0x139] sm:$0xff] }
 0x22b   : > { %v2387_v4 = vmul.f32 0.2, %v2291_v3  ;;  %vm2339_vm8 = vcmp.gt.f32.partialorder %v2291_v3, 0.0 }
 0x22c   : > { %1623 = vst.msk [vmem:[#allocation3 + $0x150] sm:$0xff] %vm1581_vm2, %v14496_v2  ;;  %1857 = vrot.lane.b32.xlu0 %v1722_v43, %s13464_s28  ;;  %v1723_v8 = vld [vmem:[#allocation3 + $0x147] sm:$0xff]  ;;  %v3512_v43 = vpack.c.b16 %v3510_v27, %v3510_v27  ;;  %v13030_v27 = vunpack.i.h.bf16 %v14046_v7  ;;  %v13034_v7 = vunpack.i.l.bf16 %v14035_v33 }
 0x22d   : > { %1674 = vst.msk [vmem:[#allocation3 + $0x150] sm:$0xff] %vm1632_vm3, %v14496_v2  ;;  %1859 = vrot.lane.b32.xlu1 %v1723_v8, %s13464_s28  ;;  %v2010_v37 = vld [vmem:[#allocation3 + $0x141] sm:$0xff]  ;;  %v2435_v6 = vsel %vm2339_vm8, %v2291_v3, %v2387_v4 }
 0x22e   : > { %v2962_v50 = vpop.permute.xlu2 %2961  ;;  %v2116_v11 = vpop.permute.xlu0 %2115  ;;  %v2819_v36 = vmul.f32 %v13029_v31, %v2435_v6  ;;  %v3578_v8 = vsel %vm3360_vm6, %v3512_v43, 0 }
 0x22f   : > { %3094 = vst.msk [vmem:[#allocation2 + $0x3c] sm:$0xf] %vm3081_vm4, %v2962_v50  ;;  %v2235_v25 = vadd.f32 %v2116_v11, %v1947_v61  ;;  %v1140_v24 = vpop.f32.mrf.mxu1  ;;  %v2118_v59 = vpop.permute.xlu1 %2117  ;;  %3586 = vmatpush.bf16.msrb.mxu3 %v3578_v8 }
 0x230   : > { %v1141_v40 = vadd.f32 %v1140_v24, %v13746_v19  ;;  %v2236_v41 = vadd.f32 %v2118_v59, %v1948_v51  ;;  %v13024_v19 = vunpack.i.l.bf16 %v13961_v1  ;;  %v2867_v61 = vpack.c.bf16 %v2819_v36, %v2819_v36  ;;  %v1523_v50 = vpop.f32.mrf.mxu2 }
 0x231   : > { %v2289_v55 = vadd.f32 %v13934_v47, %v2235_v25 }
 0x232   : > { %v14515_v62 = vadd.f32 %v1518_v10, %v1141_v40  ;;  %2143 = vrot.lane.b32.xlu2 %v2009_v39, %s13465_s29  ;;  %v2290_v46 = vadd.f32 %v13934_v47, %v2236_v41 }
 0x233   : > { %v2385_v30 = vmul.f32 0.2, %v2289_v55  ;;  %vm2337_vm9 = vcmp.gt.f32.partialorder %v2289_v55, 0.0 }
 0x234   : > { %1624 = vst.msk [vmem:[#allocation3 + $0x158] sm:$0xff] %vm1581_vm2, %v14515_v62  ;;  %2145 = vrot.lane.b32.xlu0 %v2010_v37, %s13465_s29  ;;  %v2011_v5 = vld [vmem:[#allocation3 + $0x149] sm:$0xff]  ;;  %v2386_v60 = vmul.f32 0.2, %v2290_v46  ;;  %vm2338_vm10 = vcmp.gt.f32.partialorder %v2290_v46, 0.0 }
 0x235   : > { %1675 = vst.msk [vmem:[#allocation3 + $0x158] sm:$0xff] %vm1632_vm3, %v14515_v62  ;;  %2147 = vrot.lane.b32.xlu1 %v2011_v5, %s13465_s29  ;;  %v2433_v32 = vsel %vm2337_vm9, %v2289_v55, %v2385_v30  ;;  %v1724_v39 = vld [vmem:[#allocation3 + $0x14f] sm:$0xff] }
 0x236   : > { %v1838_v54 = vpop.permute.xlu2 %1837  ;;  %v2958_v57 = vpop.permute.xlu0 %2957  ;;  %v2817_v42 = vmul.f32 %v13024_v19, %v2433_v32  ;;  %v2434_v10 = vsel %vm2338_vm10, %v2290_v46, %v2386_v60 }
 0x237   : > { %3092 = vst.msk [vmem:[#allocation2 + $0x34] sm:$0xf] %vm3081_vm4, %v2958_v57  ;;  %v1142_v21 = vpop.f32.mrf.mxu1  ;;  %v2960_v23 = vpop.permute.xlu1 %2959  ;;  %10862 = vmatmul.msk.bf16.gmra.mxu0 %vm3296_vm12, %v11371_v15  ;;  %v2818_v48 = vmul.f32 %v13025_v52, %v2434_v10  ;;  %v1952_v25 = vadd.f32 %v1838_v54, %v14307_v13  ;;  %v13035_v10 = vunpack.i.h.bf16 %v14035_v33 }
 0x238   : > { %v1143_v26 = vadd.f32 %v1142_v21, %v13752_v28  ;;  %v2865_v35 = vpack.c.bf16 %v2817_v42, %v2817_v42  ;;  %3093 = vst.msk [vmem:[#allocation2 + $0x38] sm:$0xf] %vm3081_vm4, %v2960_v23  ;;  %v1525_v37 = vpop.f32.mrf.mxu2 }
 0x239   : > { %v2866_v3 = vpack.c.bf16 %v2818_v48, %v2818_v48 }
 0x23a   : > { %v14535_v1 = vadd.f32 %v1520_v20, %v1143_v26  ;;  %2985 = vrot.lane.b32.xlu2 %v2865_v35, %s13464_s28 }
 0x23c   : > { %1625 = vst.msk [vmem:[#allocation3 + $0x160] sm:$0xff] %vm1581_vm2, %v14535_v1  ;;  %2987 = vrot.lane.b32.xlu0 %v2866_v3, %s13464_s28  ;;  %v1725_v11 = vld [vmem:[#allocation3 + $0x157] sm:$0xff] }
 0x23d   : > { %1676 = vst.msk [vmem:[#allocation3 + $0x160] sm:$0xff] %vm1632_vm3, %v14535_v1  ;;  %2989 = vrot.lane.b32.xlu1 %v2867_v61, %s13464_s28  ;;  %v2012_v51 = vld [vmem:[#allocation3 + $0x151] sm:$0xff] }
 0x23e   : > { %v2126_v28 = vpop.permute.xlu2 %2125  ;;  %v1834_v24 = vpop.permute.xlu0 %1833  ;;  %v12197_v4 = vld [vmem:[#allocation2 + $0x30] sm:$0xff]   ;;  %4161 = vst.msk [vmem:[#allocation3 + $0x158] sm:$0x1] %vm1681_vm7, %v17584_v63 }
 0x23f   : > { %10723 = vmatmul.msk.bf16.gmra.mxu3 %vm3296_vm12, %v12197_v4  ;;  %v1145_v40 = vpop.f32.mrf.mxu1  ;;  %v2240_v59 = vadd.f32 %v2126_v28, %v1952_v25  ;;  %v1836_v41 = vpop.permute.xlu1 %1835  ;;  %v1950_v46 = vadd.f32 %v1834_v24, %v14276_v56  ;;  %v11372_v5 = vld [vmem:[#allocation2 + $0x34] sm:$0xff]  ;;  %v17629_v28 = vld [vmem:[#allocation4_spill] sm:$0xff] }
 0x240   : > { %v1146_v55 = vadd.f32 %v1145_v40, %v13761_v29  ;;  %v1951_v6 = vadd.f32 %v1836_v41, %v14292_v12  ;;  %v12198_v48 = vld [vmem:[#allocation2 + $0x38] sm:$0xff]   ;;  %v1528_v8 = vpop.f32.mrf.mxu2 }
 0x241   : > { %v2294_v30 = vadd.f32 %v13934_v47, %v2240_v59 }
 0x242   : > { %v14550_v20 = vadd.f32 %v1523_v50, %v1146_v55  ;;  %1861 = vrot.lane.b32.xlu2 %v1724_v39, %s13464_s28 }
 0x243   : > { %v2390_v54 = vmul.f32 0.2, %v2294_v30  ;;  %vm2342_vm11 = vcmp.gt.f32.partialorder %v2294_v30, 0.0 }
 0x244   : > { %1626 = vst.msk [vmem:[#allocation3 + $0x168] sm:$0xff] %vm1581_vm2, %v14550_v20  ;;  %1863 = vrot.lane.b32.xlu0 %v1725_v11, %s13464_s28  ;;  %v1726_v13 = vld [vmem:[#allocation3 + $0x15f] sm:$0xff] }
 0x245   : > { %1677 = vst.msk [vmem:[#allocation3 + $0x168] sm:$0xff] %vm1632_vm3, %v14550_v20  ;;  %1865 = vrot.lane.b32.xlu1 %v1726_v13, %s13464_s28  ;;  %v2013_v12 = vld [vmem:[#allocation3 + $0x159] sm:$0xff]  ;;  %v2438_v21 = vsel %vm2342_vm11, %v2294_v30, %v2390_v54 }
 0x246   : > { %v2968_v29 = vpop.permute.xlu2 %2967  ;;  %v2122_v19 = vpop.permute.xlu0 %2121  ;;  %v2822_v50 = vmul.f32 %v13035_v10, %v2438_v21  ;;  %v17630_v30 = vld [vmem:[#allocation5_spill] sm:$0xff] }
 0x247   : > { %3097 = vst.msk [vmem:[#allocation2 + $0x48] sm:$0xf] %vm3081_vm4, %v2968_v29  ;;  %v2238_v31 = vadd.f32 %v2122_v19, %v1950_v46  ;;  %v1147_v60 = vpop.f32.mrf.mxu1  ;;  %v2124_v16 = vpop.permute.xlu1 %2123  ;;  %10863 = vmatmul.msk.bf16.gmra.mxu0 %vm3296_vm12, %v11372_v5 }
 0x248   : > { %v1148_v32 = vadd.f32 %v1147_v60, %v13765_v45  ;;  %v2239_v52 = vadd.f32 %v2124_v16, %v1951_v6  ;;  %v2870_v40 = vpack.c.bf16 %v2822_v50, %v2822_v50  ;;  %v1530_v29 = vpop.f32.mrf.mxu2  ;;  %v17633_v50 = vld [vmem:[#allocation7_spill] sm:$0xff] }
 0x249   : > { %v2292_v56 = vadd.f32 %v13934_v47, %v2238_v31 }
 0x24a   : > { %v14566_v57 = vadd.f32 %v1525_v37, %v1148_v32  ;;  %2149 = vrot.lane.b32.xlu2 %v2012_v51, %s13465_s29  ;;  %v2293_v42 = vadd.f32 %v13934_v47, %v2239_v52 }
 0x24b   : > { %v2388_v15 = vmul.f32 0.2, %v2292_v56  ;;  %vm2340_vm13 = vcmp.gt.f32.partialorder %v2292_v56, 0.0 }
 0x24c   : > { %1627 = vst.msk [vmem:[#allocation3 + $0x170] sm:$0xff] %vm1581_vm2, %v14566_v57  ;;  %2151 = vrot.lane.b32.xlu0 %v2013_v12, %s13465_s29  ;;  %v2014_v45 = vld [vmem:[#allocation3 + $0x161] sm:$0xff]  ;;  %v2389_v36 = vmul.f32 0.2, %v2293_v42  ;;  %vm2341_vm14 = vcmp.gt.f32.partialorder %v2293_v42, 0.0 }
 0x24d   : > { %1678 = vst.msk [vmem:[#allocation3 + $0x170] sm:$0xff] %vm1632_vm3, %v14566_v57  ;;  %2153 = vrot.lane.b32.xlu1 %v2014_v45, %s13465_s29  ;;  %v2436_v23 = vsel %vm2340_vm13, %v2292_v56, %v2388_v15  ;;  %v1727_v37 = vld [vmem:[#allocation3 + $0x167] sm:$0xff] }
 0x24e   : > { %v14578_v26 = vpop.permute.xlu2 %1843  ;;  %v2964_v35 = vpop.permute.xlu0 %2963  ;;  %v2820_v43 = vmul.f32 %v13030_v27, %v2436_v23  ;;  %v2437_v61 = vsel %vm2341_vm14, %v2293_v42, %v2389_v36  ;;  %v17631_v15 = vld [vmem:[#allocation6_spill] sm:$0xff] }
 0x24f   : > { %3095 = vst.msk [vmem:[#allocation2 + $0x40] sm:$0xf] %vm3081_vm4, %v2964_v35  ;;  %10724 = vmatmul.msk.bf16.gmra.mxu3 %vm3296_vm12, %v12198_v48  ;;  %v1150_v3 = vpop.f32.mrf.mxu1  ;;  %v2966_v51 = vpop.permute.xlu1 %2965  ;;  %v2821_v24 = vmul.f32 %v13034_v7, %v2437_v61  ;;  %v17632_v36 = vld [vmem:[#allocation10_spill] sm:$0xff] }
 0x250   : > { %v1151_v11 = vadd.f32 %v1150_v3, %v17629_v28  ;;  %v2868_v25 = vpack.c.bf16 %v2820_v43, %v2820_v43  ;;  %3096 = vst.msk [vmem:[#allocation2 + $0x44] sm:$0xf] %vm3081_vm4, %v2966_v51  ;;  %v13039_v23 = vunpack.i.l.bf16 %v17632_v36 }
 0x251   : > { %v2869_v33 = vpack.c.bf16 %v2821_v24, %v2821_v24 }
 0x252   : > { %v14585_v4 = vadd.f32 %v1528_v8, %v1151_v11  ;;  %2991 = vrot.lane.b32.xlu2 %v2868_v25, %s13464_s28 }
 0x254   : > { %1628 = vst.msk [vmem:[#allocation3 + $0x178] sm:$0xff] %vm1581_vm2, %v14585_v4  ;;  %2993 = vrot.lane.b32.xlu0 %v2869_v33, %s13464_s28  ;;  %v1728_v5 = vld [vmem:[#allocation3 + $0x16f] sm:$0xff] }
 0x255   : > { %1679 = vst.msk [vmem:[#allocation3 + $0x178] sm:$0xff] %vm1632_vm3, %v14585_v4  ;;  %2995 = vrot.lane.b32.xlu1 %v2870_v40, %s13464_s28  ;;  %v2015_v45 = vld [vmem:[#allocation3 + $0x169] sm:$0xff]  ;;  %v13040_v40 = vunpack.i.h.bf16 %v17632_v36 }
 0x256   : > { %v14594_v59 = vpop.permute.xlu2 %2131  ;;  %v1840_v55 = vpop.permute.xlu0 %1839  ;;  %v11373_v41 = vld [vmem:[#allocation2 + $0x3c] sm:$0xff] }
 0x257   : > { %v1152_v39 = vpop.f32.mrf.mxu1  ;;  %v1842_v46 = vpop.permute.xlu1 %1841  ;;  %10864 = vmatmul.msk.bf16.gmra.mxu0 %vm3296_vm12, %v11373_v41  ;;  %v1953_v31 = vadd.f32 %v1840_v55, %v14323_v44  ;;  %v12199_v32 = vld [vmem:[#allocation2 + $0x40] sm:$0xff]   ;;  %v1955_v55 = vadd.f32 %v14578_v26, %v14353_v53 }
 0x258   : > { %v1153_v13 = vadd.f32 %v1152_v39, %v17630_v30  ;;  %v1954_v16 = vadd.f32 %v1842_v46, %v14339_v38  ;;  %v11374_v43 = vld [vmem:[#allocation2 + $0x44] sm:$0xff] }
 0x259   : > { %v2243_v41 = vadd.f32 %v14594_v59, %v1955_v55 }
 0x25a   : > { %v14598_v19 = vadd.f32 %v1530_v29, %v1153_v13  ;;  %1867 = vrot.lane.b32.xlu2 %v1727_v37, %s13464_s28 }
 0x25b   : > { %v2297_v37 = vadd.f32 %v13934_v47, %v2243_v41 }
 0x25c   : > { %1629 = vst.msk [vmem:[#allocation3 + $0x180] sm:$0xff] %vm1581_vm2, %v14598_v19  ;;  %1869 = vrot.lane.b32.xlu0 %v1728_v5, %s13464_s28  ;;  %v1729_v6 = vld [vmem:[#allocation3 + $0x177] sm:$0xff] }
 0x25d   : > { %1680 = vst.msk [vmem:[#allocation3 + $0x180] sm:$0xff] %vm1632_vm3, %v14598_v19  ;;  %1871 = vrot.lane.b32.xlu1 %v1729_v6, %s13464_s28  ;;  %v2016_v10 = vld [vmem:[#allocation3 + $0x171] sm:$0xff]  ;;  %vm2345_vm9 = vcmp.gt.f32.partialorder %v2297_v37, 0.0 }
 0x25e   : > { %v2974_v60 = vpop.permute.xlu2 %2973  ;;  %v2128_v54 = vpop.permute.xlu0 %2127 }
 0x25f   : > { %3100 = vst.msk [vmem:[#allocation2 + $0x54] sm:$0xf] %vm3081_vm4, %v2974_v60  ;;  %v2241_v56 = vadd.f32 %v2128_v54, %v1953_v31  ;;  %10725 = vmatmul.msk.bf16.gmra.mxu3 %vm3296_vm12, %v12199_v32  ;;  %v1413_v52 = vpop.f32.mrf.mxu1  ;;  %v2130_v44 = vpop.permute.xlu1 %2129  ;;  %v2393_v31 = vmul.f32 0.2, %v2297_v37 }
 0x260   : > { %v14612_v42 = vadd.f32 %v1413_v52, %v17631_v15  ;;  %v2242_v27 = vadd.f32 %v2130_v44, %v1954_v16 }
 0x261   : > { %v2295_v12 = vadd.f32 %v13934_v47, %v2241_v56 }
 0x262   : > { %1582 = vst.msk [vmem:[#allocation3 + $0x8] sm:$0xff] %vm1581_vm2, %v14612_v42  ;;  %2155 = vrot.lane.b32.xlu2 %v2015_v45, %s13465_s29  ;;  %v2296_v38 = vadd.f32 %v13934_v47, %v2242_v27  ;;  %v2441_v27 = vsel %vm2345_vm9, %v2297_v37, %v2393_v31 }
 0x263   : > { %v2391_v21 = vmul.f32 0.2, %v2295_v12  ;;  %1633 = vst.msk [vmem:[#allocation3 + $0x8] sm:$0xff] %vm1632_vm3, %v14612_v42  ;;  %vm2343_vm15 = vcmp.gt.f32.partialorder %v2295_v12, 0.0 }
 0x264   : > { %2157 = vrot.lane.b32.xlu0 %v2016_v10, %s13465_s29  ;;  %v2017_v7 = vld [vmem:[#allocation3 + $0x179] sm:$0xff]  ;;  %v2392_v8 = vmul.f32 0.2, %v2296_v38  ;;  %vm2344_vm8 = vcmp.gt.f32.partialorder %v2296_v38, 0.0 }
 0x265   : > { %2159 = vrot.lane.b32.xlu1 %v2017_v7, %s13465_s29  ;;  %v2439_v35 = vsel %vm2343_vm15, %v2295_v12, %v2391_v21  ;;  %v1730_v29 = vld [vmem:[#allocation3 + $0x17f] sm:$0xff] }
 0x266   : > { %v2970_v48 = vpop.permute.xlu0 %2969  ;;  %v2823_v3 = vmul.f32 %v13039_v23, %v2439_v35  ;;  %v1850_v24 = vpop.permute.xlu2 %1849  ;;  %v2440_v33 = vsel %vm2344_vm8, %v2296_v38, %v2392_v8  ;;  %v2018_v12 = vld [vmem:[#allocation3 + $0x181] sm:$0xff] }
 0x267   : > { %3098 = vst.msk [vmem:[#allocation2 + $0x4c] sm:$0xf] %vm3081_vm4, %v2970_v48  ;;  %v1415_v61 = vpop.f32.mrf.mxu1  ;;  %v2972_v11 = vpop.permute.xlu1 %2971  ;;  %10865 = vmatmul.msk.bf16.gmra.mxu0 %vm3296_vm12, %v11374_v43  ;;  %v2824_v13 = vmul.f32 %v13040_v40, %v2440_v33  ;;  %v1958_v59 = vadd.f32 %v1850_v24, %v14405_v9  ;;  %v17635_v40 = vld [vmem:[#allocation13_spill] sm:$0xff] }
 0x268   : > { %v14626_v28 = vadd.f32 %v1415_v61, %v17633_v50  ;;  %v2871_v51 = vpack.c.bf16 %v2823_v3, %v2823_v3  ;;  %3099 = vst.msk [vmem:[#allocation2 + $0x50] sm:$0xf] %vm3081_vm4, %v2972_v11  ;;  %v13050_v55 = vunpack.i.h.bf16 %v17635_v40  ;;  %v13049_v41 = vunpack.i.l.bf16 %v17635_v40 }
 0x269   : > { %v2872_v5 = vpack.c.bf16 %v2824_v13, %v2824_v13 }
 0x26a   : > { %v1683_v25 = vld [vmem:[#allocation3 + $0x7] sm:$0xff]  ;;  %1583 = vst.msk [vmem:[#allocation3 + $0x10] sm:$0xff] %vm1581_vm2, %v14626_v28  ;;  %2997 = vrot.lane.b32.xlu2 %v2871_v51, %s13464_s28 }
 0x26b   : > { %4118 = vst.msk [vmem:[#allocation3 + $0x7] sm:$0x1] %vm1630_vm5, %v17584_v63 }
 0x26c   : > { %1634 = vst.msk [vmem:[#allocation3 + $0x10] sm:$0xff] %vm1632_vm3, %v14626_v28  ;;  %1779 = vrot.lane.b32.xlu0 %v1683_v25, %s13464_s28 }
 0x26e   : > { %v1846_v39 = vpop.permute.xlu0 %1845  ;;  %v12200_v30 = vld [vmem:[#allocation2 + $0x48] sm:$0xff]   ;;  %v2138_v26 = vpop.permute.xlu2 %2137 }
 0x26f   : > { %10726 = vmatmul.msk.bf16.gmra.mxu3 %vm3296_vm12, %v12200_v30  ;;  %v1848_v46 = vpop.permute.xlu1 %1847  ;;  %v1956_v6 = vadd.f32 %v1846_v39, %v14373_v17  ;;  %v11375_v54 = vld [vmem:[#allocation2 + $0x4c] sm:$0xff]  ;;  %v2246_v32 = vadd.f32 %v2138_v26, %v1958_v59 }
 0x270   : > { %v1957_v16 = vadd.f32 %v1848_v46, %v14391_v49  ;;  %v17634_v49 = vld [vmem:[#allocation15_spill] sm:$0xff]  ;;  %v12201_v48 = vld [vmem:[#allocation2 + $0x50] sm:$0xff]  }
 0x271   : > { %v2300_v45 = vadd.f32 %v13934_v47, %v2246_v32  ;;  %v13045_v10 = vunpack.i.h.bf16 %v17634_v49  ;;  %v13044_v36 = vunpack.i.l.bf16 %v17634_v49 }
 0x272   : > { %1873 = vrot.lane.b32.xlu2 %v1730_v29, %s13464_s28 }
 0x273   : > { %v1685_v53 = vld [vmem:[#allocation3 + $0x17] sm:$0xff]  ;;  %v1684_v9 = vld [vmem:[#allocation3 + $0xf] sm:$0xff]  ;;  %v2825_v3 = vmul.f32 %v13044_v36, %v2441_v27  ;;  %v2396_v8 = vmul.f32 0.2, %v2300_v45  ;;  %vm2348_vm11 = vcmp.gt.f32.partialorder %v2300_v45, 0.0 }
 0x274   : > { %1783 = vrot.lane.b32.xlu1 %v1685_v53, %s13464_s28  ;;  %2999 = vrot.lane.b32.xlu0 %v2872_v5, %s13464_s28  ;;  %v1972_v17 = vld [vmem:[#allocation3 + $0x11] sm:$0xff]  ;;  %v1971_v25 = vld [vmem:[#allocation3 + $0x9] sm:$0xff] }
 0x275   : > { %v2873_v51 = vpack.c.bf16 %v2825_v3, %v2825_v3  ;;  %v2444_v24 = vsel %vm2348_vm11, %v2300_v45, %v2396_v8  ;;  %v17637_v45 = vld [vmem:[#allocation11_spill] sm:$0xff] }
 0x276   : > { %v2134_v60 = vpop.permute.xlu0 %2133  ;;  %v2828_v46 = vmul.f32 %v13050_v55, %v2444_v24  ;;  %v13055_v36 = vunpack.i.h.bf16 %v17637_v45 }
 0x277   : > { %v2244_v56 = vadd.f32 %v2134_v60, %v1956_v6  ;;  %v2136_v52 = vpop.permute.xlu1 %2135  ;;  %10866 = vmatmul.msk.bf16.gmra.mxu0 %vm3296_vm12, %v11375_v54 }
 0x278   : > { %v2245_v44 = vadd.f32 %v2136_v52, %v1957_v16  ;;  %v2876_v5 = vpack.c.bf16 %v2828_v46, %v2828_v46 }
 0x279   : > { %v2298_v15 = vadd.f32 %v13934_v47, %v2244_v56 }
 0x27a   : > { %2161 = vrot.lane.b32.xlu2 %v2018_v12, %s13465_s29  ;;  %v2299_v38 = vadd.f32 %v13934_v47, %v2245_v44  ;;  %v17636_v12 = vld [vmem:[#allocation17_spill] sm:$0xff] }
 0x27b   : > { %vm2346_vm10 = vcmp.gt.f32.partialorder %v2298_v15, 0.0  ;;  %v2394_v21 = vmul.f32 0.2, %v2298_v15  ;;  %v13059_v27 = vunpack.i.l.bf16 %v17636_v12 }
 0x27c   : > { %v2980_v23 = vpop.permute.xlu2 %2979  ;;  %2069 = vrot.lane.b32.xlu1 %v1972_v17, %s13465_s29  ;;  %1781 = vrot.lane.b32.xlu0 %v1684_v9, %s13464_s28  ;;  %v2395_v61 = vmul.f32 0.2, %v2299_v38  ;;  %vm2347_vm13 = vcmp.gt.f32.partialorder %v2299_v38, 0.0 }
 0x27d   : > { %v2442_v7 = vsel %vm2346_vm10, %v2298_v15, %v2394_v21  ;;  %3103 = vst.msk [vmem:[#allocation2 + $0x60] sm:$0xf] %vm3081_vm4, %v2980_v23 }
 0x27e   : > { %v2976_v35 = vpop.permute.xlu0 %2975  ;;  %v2826_v43 = vmul.f32 %v13045_v10, %v2442_v7  ;;  %v2443_v33 = vsel %vm2347_vm13, %v2299_v38, %v2395_v61 }
 0x27f   : > { %3101 = vst.msk [vmem:[#allocation2 + $0x58] sm:$0xf] %vm3081_vm4, %v2976_v35  ;;  %10727 = vmatmul.msk.bf16.gmra.mxu3 %vm3296_vm12, %v12201_v48  ;;  %v2978_v50 = vpop.permute.xlu1 %2977  ;;  %v2827_v29 = vmul.f32 %v13049_v41, %v2443_v33 }
 0x280   : > { %v2874_v11 = vpack.c.bf16 %v2826_v43, %v2826_v43  ;;  %3102 = vst.msk [vmem:[#allocation2 + $0x5c] sm:$0xf] %vm3081_vm4, %v2978_v50 }
 0x281   : > { %v2875_v53 = vpack.c.bf16 %v2827_v29, %v2827_v29 }
 0x282   : > { %3003 = vrot.lane.b32.xlu2 %v2874_v11, %s13464_s28 }
 0x284   : > { %v1856_v39 = vpop.permute.xlu2 %1855  ;;  %3001 = vrot.lane.b32.xlu1 %v2873_v51, %s13464_s28  ;;  %2067 = vrot.lane.b32.xlu0 %v1971_v25, %s13465_s29 }
 0x285   : > { %v1961_v26 = vadd.f32 %v1856_v39, %v14454_v14 }
 0x286   : > { %v1852_v30 = vpop.permute.xlu0 %1851  ;;  %v11376_v13 = vld [vmem:[#allocation2 + $0x54] sm:$0xff] }
 0x287   : > { %v1854_v37 = vpop.permute.xlu1 %1853  ;;  %10867 = vmatmul.msk.bf16.gmra.mxu0 %vm3296_vm12, %v11376_v13  ;;  %v1959_v6 = vadd.f32 %v1852_v30, %v14424_v22  ;;  %v12202_v54 = vld [vmem:[#allocation2 + $0x58] sm:$0xff]  }
 0x288   : > { %v1960_v32 = vadd.f32 %v1854_v37, %v14442_v0  ;;  %v13054_v0 = vunpack.i.l.bf16 %v17637_v45  ;;  %v11377_v35 = vld [vmem:[#allocation2 + $0x5c] sm:$0xff] }
 0x28c   : > { %v2144_v59 = vpop.permute.xlu2 %2143  ;;  %3007 = vrot.lane.b32.xlu1 %v2876_v5, %s13464_s28  ;;  %3005 = vrot.lane.b32.xlu0 %v2875_v53, %s13464_s28 }
 0x28d   : > { %v2249_v31 = vadd.f32 %v2144_v59, %v1961_v26 }
 0x28e   : > { %v2140_v60 = vpop.permute.xlu0 %2139 }
 0x28f   : > { %v2303_v16 = vadd.f32 %v13934_v47, %v2249_v31  ;;  %v2247_v56 = vadd.f32 %v2140_v60, %v1959_v6  ;;  %10728 = vmatmul.msk.bf16.gmra.mxu3 %vm3296_vm12, %v12202_v54  ;;  %v2142_v52 = vpop.permute.xlu1 %2141  ;;  %v17638_v6 = vld [vmem:[#allocation16_spill] sm:$0xff]  ;;  %v13060_v54 = vunpack.i.h.bf16 %v17636_v12 }
 0x290   : > { %v2248_v44 = vadd.f32 %v2142_v52, %v1960_v32 }
 0x291   : > { %vm2351_vm14 = vcmp.gt.f32.partialorder %v2303_v16, 0.0  ;;  %v2399_v14 = vmul.f32 0.2, %v2303_v16  ;;  %v2301_v15 = vadd.f32 %v13934_v47, %v2247_v56 }
 0x292   : > { %v2302_v17 = vadd.f32 %v13934_v47, %v2248_v44 }
 0x293   : > { %v2447_v9 = vsel %vm2351_vm14, %v2303_v16, %v2399_v14  ;;  %vm2349_vm15 = vcmp.gt.f32.partialorder %v2301_v15, 0.0  ;;  %v2397_v22 = vmul.f32 0.2, %v2301_v15  ;;  %v14688_v51 = vpop.f32.mrf.mxu3  ;;  %v13064_v14 = vunpack.i.l.bf16 %v17638_v6 }
 0x294   : > { %v2986_v21 = vpop.permute.xlu2 %2985  ;;  %v2831_v38 = vmul.f32 %v13059_v27, %v2447_v9  ;;  %vm2350_vm8 = vcmp.gt.f32.partialorder %v2302_v17, 0.0  ;;  %v2398_v10 = vmul.f32 0.2, %v2302_v17 }
 0x295   : > { %v2445_v49 = vsel %vm2349_vm15, %v2301_v15, %v2397_v22  ;;  %3106 = vst.msk [vmem:[#allocation2 + $0x6c] sm:$0xf] %vm3081_vm4, %v2986_v21 }
 0x296   : > { %v2982_v23 = vpop.permute.xlu0 %2981  ;;  %v2879_v7 = vpack.c.bf16 %v2831_v38, %v2831_v38  ;;  %v2829_v48 = vmul.f32 %v13054_v0, %v2445_v49  ;;  %v2446_v43 = vsel %vm2350_vm8, %v2302_v17, %v2398_v10 }
 0x297   : > { %3104 = vst.msk [vmem:[#allocation2 + $0x64] sm:$0xf] %vm3081_vm4, %v2982_v23  ;;  %v2984_v3 = vpop.permute.xlu1 %2983  ;;  %10868 = vmatmul.msk.bf16.gmra.mxu0 %vm3296_vm12, %v11377_v35  ;;  %v2830_v61 = vmul.f32 %v13055_v36, %v2446_v43 }
 0x298   : > { %3013 = vrot.lane.b32.xlu1 %v2879_v7, %s13464_s28  ;;  %v2877_v8 = vpack.c.bf16 %v2829_v48, %v2829_v48  ;;  %3105 = vst.msk [vmem:[#allocation2 + $0x68] sm:$0xf] %vm3081_vm4, %v2984_v3 }
 0x299   : > { %v2878_v50 = vpack.c.bf16 %v2830_v61, %v2830_v61 }
 0x29a   : > { %3009 = vrot.lane.b32.xlu2 %v2877_v8, %s13464_s28 }
 0x29b   : > { %3011 = vrot.lane.b32.xlu0 %v2878_v50, %s13464_s28  ;;  %v14695_v5 = vpop.f32.mrf.mxu3 }
 0x29c   : > { %v1862_v11 = vpop.permute.xlu2 %1861 }
 0x29d   : > { %v1964_v40 = vadd.f32 %v1862_v11, %v14496_v2 }
 0x29e   : > { %v1858_v25 = vpop.permute.xlu0 %1857  ;;  %v12203_v24 = vld [vmem:[#allocation2 + $0x60] sm:$0xff]  }
 0x29f   : > { %10729 = vmatmul.msk.bf16.gmra.mxu3 %vm3296_vm12, %v12203_v24  ;;  %v1860_v33 = vpop.permute.xlu1 %1859  ;;  %v1962_v41 = vadd.f32 %v1858_v25, %v14468_v34  ;;  %v11378_v13 = vld [vmem:[#allocation2 + $0x64] sm:$0xff]  ;;  %v13065_v34 = vunpack.i.h.bf16 %v17638_v6 }
 0x2a0   : > { %v1963_v46 = vadd.f32 %v1860_v33, %v14483_v18  ;;  %v12204_v44 = vld [vmem:[#allocation2 + $0x68] sm:$0xff]  }
 0x2a4   : > { %v2150_v55 = vpop.permute.xlu2 %2149 }
 0x2a5   : > { %v2252_v39 = vadd.f32 %v2150_v55, %v1964_v40  ;;  %v14731_v55 = vpop.f32.mrf.mxu0 }
 0x2a6   : > { %v2146_v30 = vpop.permute.xlu0 %2145 }
 0x2a7   : > { %v2306_v29 = vadd.f32 %v13934_v47, %v2252_v39  ;;  %v2250_v37 = vadd.f32 %v2146_v30, %v1962_v41  ;;  %v2148_v53 = vpop.permute.xlu1 %2147  ;;  %10869 = vmatmul.msk.bf16.gmra.mxu0 %vm3296_vm12, %v11378_v13  ;;  %v11367_v13 = vld [vmem:[%s17563_s2] sm:$0xff] }
 0x2a8   : > { %v2251_v59 = vadd.f32 %v2148_v53, %v1963_v46  ;;  %3587 = vmatpush.bf16.msrb.mxu3 %v11367_v13 }
 0x2a9   : > { %vm2354_vm9 = vcmp.gt.f32.partialorder %v2306_v29, 0.0  ;;  %v2402_v26 = vmul.f32 0.2, %v2306_v29  ;;  %v2304_v2 = vadd.f32 %v13934_v47, %v2250_v37 }
 0x2aa   : > { %v2305_v18 = vadd.f32 %v13934_v47, %v2251_v59 }
 0x2ab   : > { %v2450_v31 = vsel %vm2354_vm9, %v2306_v29, %v2402_v26  ;;  %vm2352_vm10 = vcmp.gt.f32.partialorder %v2304_v2, 0.0  ;;  %v2400_v60 = vmul.f32 0.2, %v2304_v2  ;;  %v14706_v17 = vpop.f32.mrf.mxu3 }
 0x2ac   : > { %v2992_v32 = vpop.permute.xlu2 %2991  ;;  %v2834_v16 = vmul.f32 %v13065_v34, %v2450_v31  ;;  %vm2353_vm11 = vcmp.gt.f32.partialorder %v2305_v18, 0.0  ;;  %v2401_v52 = vmul.f32 0.2, %v2305_v18 }
 0x2ad   : > { %v2448_v56 = vsel %vm2352_vm10, %v2304_v2, %v2400_v60  ;;  %3109 = vst.msk [vmem:[#allocation2 + $0x78] sm:$0xf] %vm3081_vm4, %v2992_v32  ;;  %v14743_v53 = vpop.f32.mrf.mxu0 }
 0x2ae   : > { %v2988_v15 = vpop.permute.xlu0 %2987  ;;  %v2882_v27 = vpack.c.bf16 %v2834_v16, %v2834_v16  ;;  %v2832_v9 = vmul.f32 %v13060_v54, %v2448_v56  ;;  %v2449_v22 = vsel %vm2353_vm11, %v2305_v18, %v2401_v52  ;;  %v17639_v16 = vld [vmem:[#allocation8_spill] sm:$0xff]  ;;  %v17640_v52 = vld [vmem:[#allocation14_spill] sm:$0xff] }
 0x2af   : > { %3107 = vst.msk [vmem:[#allocation2 + $0x70] sm:$0xf] %vm3081_vm4, %v2988_v15  ;;  %10730 = vmatmul.msk.bf16.gmra.mxu3 %vm3296_vm12, %v12204_v44  ;;  %v2990_v12 = vpop.permute.xlu1 %2989  ;;  %v2833_v0 = vmul.f32 %v13064_v14, %v2449_v22 }
 0x2b0   : > { %3019 = vrot.lane.b32.xlu1 %v2882_v27, %s13464_s28  ;;  %v2880_v45 = vpack.c.bf16 %v2832_v9, %v2832_v9  ;;  %3108 = vst.msk [vmem:[#allocation2 + $0x74] sm:$0xf] %vm3081_vm4, %v2990_v12  ;;  %v12968_v12 = vunpack.i.l.bf16 %v13860_v58 }
 0x2b1   : > { %v2881_v21 = vpack.c.bf16 %v2833_v0, %v2833_v0 }
 0x2b2   : > { %3015 = vrot.lane.b32.xlu2 %v2880_v45, %s13464_s28 }
 0x2b3   : > { %3017 = vrot.lane.b32.xlu0 %v2881_v21, %s13464_s28  ;;  %v14715_v23 = vpop.f32.mrf.mxu3 }
 0x2b4   : > { %v1868_v38 = vpop.permute.xlu2 %1867 }
 0x2b5   : > { %v1967_v31 = vadd.f32 %v1868_v38, %v14550_v20  ;;  %v14750_v60 = vpop.f32.mrf.mxu0 }
 0x2b6   : > { %v14712_v49 = vpop.permute.xlu0 %1863  ;;  %v11379_v10 = vld [vmem:[#allocation2 + $0x6c] sm:$0xff] }
 0x2b7   : > { %v1866_v36 = vpop.permute.xlu1 %1865  ;;  %10870 = vmatmul.msk.bf16.gmra.mxu0 %vm3296_vm12, %v11379_v10  ;;  %v12205_v48 = vld [vmem:[#allocation2 + $0x70] sm:$0xff]  }
 0x2b8   : > { %v11380_v50 = vld [vmem:[#allocation2 + $0x74] sm:$0xff]  ;;  %v1966_v9 = vadd.f32 %v1866_v36, %v14535_v1  ;;  %v1965_v36 = vadd.f32 %v14712_v49, %v14515_v62 }
 0x2bc   : > { %v2156_v7 = vpop.permute.xlu2 %2155 }
 0x2bd   : > { %v2255_v32 = vadd.f32 %v2156_v7, %v1967_v31 }
 0x2be   : > { %v14717_v35 = vpop.permute.xlu0 %2151 }
 0x2bf   : > { %10731 = vmatmul.msk.bf16.gmra.mxu3 %vm3296_vm12, %v12205_v48  ;;  %v2154_v43 = vpop.permute.xlu1 %2153  ;;  %v2309_v44 = vadd.f32 %v13934_v47, %v2255_v32  ;;  %v2253_v13 = vadd.f32 %v14717_v35, %v1965_v36 }
 0x2c0   : > { %v2254_v45 = vadd.f32 %v2154_v43, %v1966_v9 }
 0x2c1   : > { %v2405_v10 = vmul.f32 0.2, %v2309_v44  ;;  %vm2357_vm14 = vcmp.gt.f32.partialorder %v2309_v44, 0.0 }
 0x2c2   : > { %v14720_v3 = vpop.f32.mrf.mxu3  ;;  %v2308_v58 = vadd.f32 %v13934_v47, %v2254_v45 }
 0x2c4   : > { %v2998_v8 = vpop.permute.xlu2 %2997  ;;  %vm2356_vm8 = vcmp.gt.f32.partialorder %v2308_v58, 0.0 }
 0x2c5   : > { %3112 = vst.msk [vmem:[#allocation2 + $0x84] sm:$0xf] %vm3081_vm4, %v2998_v8 }
 0x2c6   : > { %v2994_v61 = vpop.permute.xlu0 %2993 }
 0x2c7   : > { %3110 = vst.msk [vmem:[#allocation2 + $0x7c] sm:$0xf] %vm3081_vm4, %v2994_v61  ;;  %v2996_v11 = vpop.permute.xlu1 %2995  ;;  %10871 = vmatmul.msk.bf16.gmra.mxu0 %vm3296_vm12, %v11380_v50  ;;  %v14763_v61 = vpop.f32.mrf.mxu0 }
 0x2c8   : > { %3111 = vst.msk [vmem:[#allocation2 + $0x80] sm:$0xf] %vm3081_vm4, %v2996_v11  ;;  %v2453_v11 = vsel %vm2357_vm14, %v2309_v44, %v2405_v10 }
 0x2ca   : > { %v14726_v25 = vpop.f32.mrf.mxu3 }
 0x2cc   : > { %v1874_v24 = vpop.permute.xlu2 %1873 }
 0x2cd   : > { %v1970_v20 = vadd.f32 %v1874_v24, %v14598_v19 }
 0x2ce   : > { %v14728_v33 = vpop.permute.xlu0 %1869  ;;  %v12206_v40 = vld [vmem:[#allocation2 + $0x78] sm:$0xff]  }
 0x2cf   : > { %10732 = vmatmul.msk.bf16.gmra.mxu3 %vm3296_vm12, %v12206_v40  ;;  %v1872_v39 = vpop.permute.xlu1 %1871  ;;  %v11381_v29 = vld [vmem:[#allocation2 + $0x7c] sm:$0xff]  ;;  %v14783_v44 = vpop.f32.mrf.mxu0 }
 0x2d0   : > { %v12207_v6 = vld [vmem:[#allocation2 + $0x80] sm:$0xff]  }
 0x2d1   : > { %v17641_v40 = vld [vmem:[#allocation19_spill] sm:$0xff] }
 0x2d2   : > { %v14733_v41 = vpop.f32.mrf.mxu3 }
 0x2d4   : > { %v2162_v30 = vpop.permute.xlu2 %2161 }
 0x2d5   : > { %v2258_v7 = vadd.f32 %v2162_v30, %v1970_v20  ;;  %v13074_v30 = vunpack.i.l.bf16 %v17641_v40 }
 0x2d6   : > { %v14738_v46 = vpop.permute.xlu0 %2157 }
 0x2d7   : > { %10872 = vmatmul.msk.bf16.gmra.mxu0 %vm3296_vm12, %v11381_v29  ;;  %v2160_v2 = vpop.permute.xlu1 %2159  ;;  %v2312_v24 = vadd.f32 %v13934_v47, %v2258_v7 }
 0x2d9   : > { %vm2360_vm9 = vcmp.gt.f32.partialorder %v2312_v24, 0.0 }
 0x2da   : > { %v14741_v37 = vpop.f32.mrf.mxu3 }
 0x2dc   : > { %v3004_v26 = vpop.permute.xlu2 %3003 }
 0x2dd   : > { %3115 = vst.msk [vmem:[#allocation2 + $0x90] sm:$0xf] %vm3081_vm4, %v3004_v26  ;;  %v1969_v26 = vadd.f32 %v1872_v39, %v14585_v4 }
 0x2de   : > { %v1780_v59 = vpop.permute.xlu0 %1779 }
 0x2df   : > { %10733 = vmatmul.msk.bf16.gmra.mxu3 %vm3296_vm12, %v12207_v6  ;;  %v1923_v62 = vadd.f32 %v1780_v59, %v14612_v42  ;;  %v17642_v6 = vld [vmem:[#allocation9_spill] sm:$0xff]  ;;  %v2257_v35 = vadd.f32 %v2160_v2, %v1969_v26  ;;  %v2307_v42 = vadd.f32 %v13934_v47, %v2253_v13  ;;  %v12314_v13 = vld [vmem:[%s13577_s16 + $0x20] sm:$0xff]  }
 0x2e0   : > { %v12963_v31 = vunpack.i.h.bf16 %v17642_v6  ;;  %v12962_v45 = vunpack.i.l.bf16 %v17642_v6 }
 0x2e1   : > { %v2311_v2 = vadd.f32 %v13934_v47, %v2257_v35  ;;  %vm2355_vm11 = vcmp.gt.f32.partialorder %v2307_v42, 0.0 }
 0x2e2   : > { %v14747_v34 = vpop.f32.mrf.mxu3 }
 0x2e6   : > { %v1784_v18 = vpop.permute.xlu1 %1783  ;;  %v3000_v54 = vpop.permute.xlu0 %2999 }
 0x2e7   : > { %v1925_v56 = vadd.f32 %v1784_v18, %v17639_v16  ;;  %3113 = vst.msk [vmem:[#allocation2 + $0x88] sm:$0xf] %vm3081_vm4, %v3000_v54  ;;  %v2404_v18 = vmul.f32 0.2, %v2308_v58  ;;  %v2837_v16 = vmul.f32 %v13074_v30, %v2453_v11 }
 0x2e9   : > { %v2213_v14 = vadd.f32 %v17640_v52, %v1925_v56  ;;  %v2408_v56 = vmul.f32 0.2, %v2312_v24  ;;  %v2452_v59 = vsel %vm2356_vm8, %v2308_v58, %v2404_v18  ;;  %v2885_v9 = vpack.c.bf16 %v2837_v16, %v2837_v16 }
 0x2ea   : > { %v14755_v15 = vpop.f32.mrf.mxu3 }
 0x2eb   : > { %v2267_v27 = vadd.f32 %v13934_v47, %v2213_v14 }
 0x2ed   : > { %vm2315_vm13 = vcmp.gt.f32.partialorder %v2267_v27, 0.0  ;;  %v2363_v22 = vmul.f32 0.2, %v2267_v27 }
 0x2ee   : > { %v2070_v0 = vpop.permute.xlu1 %2069  ;;  %v1782_v21 = vpop.permute.xlu0 %1781  ;;  %v11382_v38 = vld [vmem:[#allocation2 + $0x84] sm:$0xff] }
 0x2ef   : > { %v1924_v48 = vadd.f32 %v1782_v21, %v14626_v28  ;;  %v2411_v8 = vsel %vm2315_vm13, %v2267_v27, %v2363_v22  ;;  %10873 = vmatmul.msk.bf16.gmra.mxu0 %vm3296_vm12, %v11382_v38  ;;  %v1968_v27 = vadd.f32 %v14728_v33, %v14566_v57  ;;  %v2456_v22 = vsel %vm2360_vm9, %v2312_v24, %v2408_v56  ;;  %v17644_v38 = vld [vmem:[#allocation18_spill] sm:$0xff] }
 0x2f0   : > { %v2795_v1 = vmul.f32 %v12968_v12, %v2411_v8  ;;  %v13080_v10 = vunpack.i.h.bf16 %v17644_v38  ;;  %v2403_v57 = vmul.f32 0.2, %v2307_v42  ;;  %v2407_v24 = vmul.f32 0.2, %v2311_v2 }
 0x2f1   : > { %v2212_v19 = vadd.f32 %v2070_v0, %v1924_v48  ;;  %v17643_v0 = vld [vmem:[#allocation12_spill] sm:$0xff]  ;;  %v2256_v7 = vadd.f32 %v14738_v46, %v1968_v27  ;;  %vm2359_vm13 = vcmp.gt.f32.partialorder %v2311_v2, 0.0 }
 0x2f2   : > { %v14769_v43 = vpop.f32.mrf.mxu3  ;;  %v2843_v50 = vpack.c.bf16 %v2795_v1, %v2795_v1  ;;  %v13070_v21 = vunpack.i.h.bf16 %v17643_v0  ;;  %v2451_v30 = vsel %vm2355_vm11, %v2307_v42, %v2403_v57  ;;  %v2455_v6 = vsel %vm2359_vm13, %v2311_v2, %v2407_v24  ;;  %v12317_v42 = vld [vmem:[%s13577_s16 + $0x38] sm:$0xff]   ;;  %v12315_v24 = vld [vmem:[%s13577_s16 + $0x28] sm:$0xff]  }
 0x2f3   : > { %v2266_v28 = vadd.f32 %v13934_v47, %v2212_v19  ;;  %v2310_v46 = vadd.f32 %v13934_v47, %v2256_v7  ;;  %v11747_v2 = vunpack.c.h.bf16 %v12317_v42 }
 0x2f4   : > { %v3010_v29 = vpop.permute.xlu2 %3009  ;;  %2941 = vrot.lane.b32.xlu1 %v2843_v50, %s13464_s28  ;;  %v2840_v50 = vmul.f32 %v13080_v10, %v2456_v22  ;;  %v2836_v11 = vmul.f32 %v13070_v21, %v2452_v59  ;;  %v11746_v22 = vunpack.c.l.bf16 %v12317_v42  ;;  %v12326_v42 = vld [vmem:[%s13577_s16 + $0x80] sm:$0xff]  }
 0x2f5   : > { %vm2314_vm15 = vcmp.gt.f32.partialorder %v2266_v28, 0.0  ;;  %v2362_v49 = vmul.f32 0.2, %v2266_v28  ;;  %3118 = vst.msk [vmem:[#allocation2 + $0x9c] sm:$0xf] %vm3081_vm4, %v3010_v29  ;;  %v13069_v29 = vunpack.i.l.bf16 %v17643_v0  ;;  %vm2358_vm14 = vcmp.gt.f32.partialorder %v2310_v46, 0.0 }
 0x2f6   : > { %v3002_v54 = vpop.permute.xlu1 %3001  ;;  %v2068_v32 = vpop.permute.xlu0 %2067  ;;  %v2888_v26 = vpack.c.bf16 %v2840_v50, %v2840_v50  ;;  %v13101_v57 = vpack.i.bf16 %v11747_v2, %v11746_v22  ;;  %v11782_v2 = vunpack.c.l.bf16 %v12326_v42 }
 0x2f7   : > { %3114 = vst.msk [vmem:[#allocation2 + $0x8c] sm:$0xf] %vm3081_vm4, %v3002_v54  ;;  %v2211_v52 = vadd.f32 %v2068_v32, %v1923_v62  ;;  %v2410_v14 = vsel %vm2314_vm15, %v2266_v28, %v2362_v49  ;;  %v2884_v62 = vpack.c.bf16 %v2836_v11, %v2836_v11  ;;  %v13079_v49 = vunpack.i.l.bf16 %v17644_v38  ;;  %v13412_v11 = vld [vmem:[%s17568_s7] ss:$0 sm:$0xff] }
 0x2f8   : > { %v2794_v4 = vmul.f32 %v12963_v31, %v2410_v14  ;;  %v2406_v31 = vmul.f32 0.2, %v2310_v46  ;;  %v2835_v18 = vmul.f32 %v13069_v29, %v2451_v30  ;;  %v11734_v54 = vunpack.c.l.bf16 %v12314_v13  ;;  %v12319_v29 = vld [vmem:[%s13577_s16 + $0x48] sm:$0xff]  }
 0x2f9   : > { %v2265_v39 = vadd.f32 %v13934_v47, %v2211_v52  ;;  %v14806_v47 = vpop.f32.mrf.mxu0  ;;  %v11735_v32 = vunpack.c.h.bf16 %v12314_v13  ;;  %v2839_v56 = vmul.f32 %v13079_v49, %v2455_v6  ;;  %v12323_v13 = vld [vmem:[%s13577_s16 + $0x68] sm:$0xff]   ;;  %v11739_v49 = vunpack.c.h.bf16 %v12315_v24 }
 0x2fa   : > { %v2842_v20 = vpack.c.bf16 %v2794_v4, %v2794_v4  ;;  %v14792_v48 = vpop.f32.mrf.mxu3  ;;  %v2454_v35 = vsel %vm2358_vm14, %v2310_v46, %v2406_v31  ;;  %v2883_v52 = vpack.c.bf16 %v2835_v18, %v2835_v18  ;;  %v13075_v4 = vunpack.i.h.bf16 %v17641_v40 }
 0x2fb   : > { %vm2313_vm10 = vcmp.gt.f32.partialorder %v2265_v39, 0.0  ;;  %v2361_v12 = vmul.f32 0.2, %v2265_v39  ;;  %v13086_v14 = vpack.i.bf16 %v11735_v32, %v11734_v54  ;;  %v2887_v27 = vpack.c.bf16 %v2839_v56, %v2839_v56 }
 0x2fc   : > { %3025 = vrot.lane.b32.xlu1 %v2885_v9, %s13464_s28  ;;  %2939 = vrot.lane.b32.xlu0 %v2842_v20, %s13464_s28  ;;  %v2838_v9 = vmul.f32 %v13075_v4, %v2454_v35  ;;  %v11770_v6 = vunpack.c.l.bf16 %v12323_v13  ;;  %v11771_v31 = vunpack.c.h.bf16 %v12323_v13  ;;  %v11754_v18 = vunpack.c.l.bf16 %v12319_v29 }
 0x2fd   : > { %v2409_v33 = vsel %vm2313_vm10, %v2265_v39, %v2361_v12  ;;  %v12313_v39 = vld [vmem:[%s13577_s16 + $0x18] sm:$0xff]   ;;  %v11755_v54 = vunpack.c.h.bf16 %v12319_v29 }
 0x2fe   : > { %v3008_v8 = vpop.permute.xlu1 %3007  ;;  %v3006_v1 = vpop.permute.xlu0 %3005  ;;  %v12208_v19 = vld [vmem:[#allocation2 + $0x88] sm:$0xff]   ;;  %v2793_v58 = vmul.f32 %v12962_v45, %v2409_v33  ;;  %v11730_v12 = vunpack.c.l.bf16 %v12313_v39  ;;  %v11731_v45 = vunpack.c.h.bf16 %v12313_v39  ;;  %v2886_v7 = vpack.c.bf16 %v2838_v9, %v2838_v9  ;;  %v12322_v39 = vld [vmem:[%s13577_s16 + $0x60] sm:$0xff]  }
 0x2ff   : > { %v11383_v36 = vld [vmem:[#allocation2 + $0x8c] sm:$0xff]  ;;  %3117 = vst.msk [vmem:[#allocation2 + $0x98] sm:$0xf] %vm3081_vm4, %v3008_v8  ;;  %10734 = vmatmul.msk.bf16.gmra.mxu3 %vm3296_vm12, %v12208_v19  ;;  %v13111_v4 = vpack.i.bf16 %v11755_v54, %v11754_v18 }
 0x300   : > { %3116 = vst.msk [vmem:[#allocation2 + $0x94] sm:$0xf] %vm3081_vm4, %v3006_v1  ;;  %10874 = vmatmul.msk.bf16.gmra.mxu0 %vm3296_vm12, %v11383_v36  ;;  %v2841_v28 = vpack.c.bf16 %v2793_v58, %v2793_v58  ;;  %v13081_v33 = vpack.i.bf16 %v11731_v45, %v11730_v12  ;;  %v12320_v8 = vld [vmem:[%s13577_s16 + $0x50] sm:$0xff]   ;;  %v11783_v12 = vunpack.c.h.bf16 %v12326_v42  ;;  %v11766_v45 = vunpack.c.l.bf16 %v12322_v39 }
 0x301   : > { %v14819_v40 = vpop.f32.mrf.mxu0  ;;  %v12316_v1 = vld [vmem:[%s13577_s16 + $0x30] sm:$0xff]   ;;  %v11758_v19 = vunpack.c.l.bf16 %v12320_v8  ;;  %v11759_v36 = vunpack.c.h.bf16 %v12320_v8  ;;  %v12329_v8 = vld [vmem:[%s13577_s16 + $0x98] sm:$0xff]  }
 0x302   : > { %2937 = vrot.lane.b32.xlu2 %v2841_v28, %s13464_s28  ;;  %v14810_v16 = vpop.f32.mrf.mxu3  ;;  %v11742_v58 = vunpack.c.l.bf16 %v12316_v1  ;;  %v11743_v50 = vunpack.c.h.bf16 %v12316_v1  ;;  %v12325_v1 = vld [vmem:[%s13577_s16 + $0x78] sm:$0xff]   ;;  %v12332_v18 = vld [vmem:[%s13577_s16 + $0xb0] sm:$0xff]  }
 0x303   : > { %v13116_v28 = vpack.i.bf16 %v11759_v36, %v11758_v19  ;;  %v12328_v54 = vld [vmem:[%s13577_s16 + $0x90] sm:$0xff]  }
 0x304   : > { %3031 = vrot.lane.b32.xlu1 %v2888_v26, %s13464_s28  ;;  %3023 = vrot.lane.b32.xlu0 %v2884_v62, %s13464_s28  ;;  %v13096_v30 = vpack.i.bf16 %v11743_v50, %v11742_v58  ;;  %v11738_v62 = vunpack.c.l.bf16 %v12315_v24  ;;  %v11794_v50 = vunpack.c.l.bf16 %v12329_v8  ;;  %v11778_v24 = vunpack.c.l.bf16 %v12325_v1 }
 0x306   : > { %v12210_v32 = vld [vmem:[#allocation2 + $0x98] sm:$0xff]   ;;  %v13091_v35 = vpack.i.bf16 %v11739_v49, %v11738_v62  ;;  %v12324_v49 = vld [vmem:[%s13577_s16 + $0x70] sm:$0xff]  }
 0x307   : > { %v12209_v21 = vld [vmem:[#allocation2 + $0x90] sm:$0xff]  }
 0x308   : > { %v11384_v38 = vld [vmem:[#allocation2 + $0x94] sm:$0xff] }
 0x309   : > { %v14833_v46 = vpop.f32.mrf.mxu0 }
 0x30a   : > { %v3014_v59 = vpop.permute.xlu1 %3013  ;;  %3021 = vrot.lane.b32.xlu2 %v2883_v52, %s13464_s28  ;;  %v14823_v10 = vpop.f32.mrf.mxu3  ;;  %v12318_v52 = vld [vmem:[%s13577_s16 + $0x40] sm:$0xff]  }
 0x30b   : > { %3120 = vst.msk [vmem:[#allocation2 + $0xa4] sm:$0xf] %vm3081_vm4, %v3014_v59  ;;  %v11750_v9 = vunpack.c.l.bf16 %v12318_v52 }
 0x30c   : > { %v3016_v20 = vpop.permute.xlu2 %3015  ;;  %13087 = vperm.xlu1 %12958, %v13086_v14   ;;  %3029 = vrot.lane.b32.xlu0 %v2887_v27, %s13464_s28  ;;  %v13131_v14 = vpack.i.bf16 %v11771_v31, %v11770_v6 }
 0x30d   : > { %3121 = vst.msk [vmem:[#allocation2 + $0xa8] sm:$0xf] %vm3081_vm4, %v3016_v20  ;;  %v3012_v0 = vpop.permute.xlu0 %3011  ;;  %v11751_v20 = vunpack.c.h.bf16 %v12318_v52  ;;  %v11807_v52 = vunpack.c.h.bf16 %v12332_v18 }
 0x30e   : > { %3119 = vst.msk [vmem:[#allocation2 + $0xa0] sm:$0xf] %vm3081_vm4, %v3012_v0  ;;  %v11767_v0 = vunpack.c.h.bf16 %v12322_v39 }
 0x30f   : > { %10735 = vmatmul.msk.bf16.gmra.mxu3 %vm3296_vm12, %v12209_v21 }
 0x310   : > { %10875 = vmatmul.msk.bf16.gmra.mxu0 %vm3296_vm12, %v11384_v38  ;;  %v13106_v38 = vpack.i.bf16 %v11751_v20, %v11750_v9 }
 0x311   : > { %v14845_v59 = vpop.f32.mrf.mxu0 }
 0x312   : > { %3027 = vrot.lane.b32.xlu2 %v2886_v7, %s13464_s28  ;;  %v14837_v26 = vpop.f32.mrf.mxu3  ;;  %v12321_v7 = vld [vmem:[%s13577_s16 + $0x58] sm:$0xff]  }
 0x313   : > { %v11762_v19 = vunpack.c.l.bf16 %v12321_v7  ;;  %v11763_v36 = vunpack.c.h.bf16 %v12321_v7 }
 0x314   : > { %13102 = vperm.xlu1 %12958, %v13101_v57   ;;  %13082 = vperm.xlu0 %12970, %v13081_v33   ;;  %v13146_v57 = vpack.i.bf16 %v11783_v12, %v11782_v2  ;;  %v13126_v33 = vpack.i.bf16 %v11767_v0, %v11766_v45  ;;  %v11386_v29 = vld [vmem:[#allocation2 + $0xa4] sm:$0xff] }
 0x315   : > { %v11385_v56 = vld [vmem:[#allocation2 + $0x9c] sm:$0xff]  ;;  %v13121_v62 = vpack.i.bf16 %v11763_v36, %v11762_v19  ;;  %v12331_v12 = vld [vmem:[%s13577_s16 + $0xa8] sm:$0xff]  }
 0x316   : > { %v12211_v13 = vld [vmem:[#allocation2 + $0xa0] sm:$0xff]  }
 0x319   : > { %v14854_v58 = vpop.f32.mrf.mxu0 }
 0x31a   : > { %4669 = vrot.lane.b32.xlu2 %v13412_v11, %s13464_s28  ;;  %v14848_v22 = vpop.f32.mrf.mxu3  ;;  %v11795_v11 = vunpack.c.h.bf16 %v12329_v8  ;;  %v12330_v8 = vld [vmem:[%s13577_s16 + $0xa0] sm:$0xff]  }
 0x31c   : > { %13117 = vperm.xlu1 %12958, %v13116_v28   ;;  %13097 = vperm.xlu0 %12970, %v13096_v30   ;;  %v11779_v28 = vunpack.c.h.bf16 %v12325_v1  ;;  %v13161_v6 = vpack.i.bf16 %v11795_v11, %v11794_v50  ;;  %v11798_v50 = vunpack.c.l.bf16 %v12330_v8  ;;  %v11799_v11 = vunpack.c.h.bf16 %v12330_v8 }
 0x31e   : > { %v13141_v31 = vpack.i.bf16 %v11779_v28, %v11778_v24  ;;  %v13166_v24 = vpack.i.bf16 %v11799_v11, %v11798_v50  ;;  %v12333_v28 = vld [vmem:[%s13577_s16 + $0xb8] sm:$0xff]  }
 0x31f   : > { %10736 = vmatmul.msk.bf16.gmra.mxu3 %vm3296_vm12, %v12210_v32  ;;  %v11774_v32 = vunpack.c.l.bf16 %v12324_v49 }
 0x320   : > { %10876 = vmatmul.msk.bf16.gmra.mxu0 %vm3296_vm12, %v11385_v56  ;;  %v11775_v56 = vunpack.c.h.bf16 %v12324_v49 }
 0x321   : > { %v14863_v42 = vpop.f32.mrf.mxu0 }
 0x322   : > { %v3020_v27 = vpop.permute.xlu1 %3019  ;;  %13092 = vperm.xlu2 %12964, %v13091_v35   ;;  %v14856_v30 = vpop.f32.mrf.mxu3  ;;  %v11806_v35 = vunpack.c.l.bf16 %v12332_v18  ;;  %v13136_v39 = vpack.i.bf16 %v11775_v56, %v11774_v32 }
 0x323   : > { %3123 = vst.msk [vmem:[#allocation2 + $0xb0] sm:$0xf] %vm3081_vm4, %v3020_v27  ;;  %v12327_v27 = vld [vmem:[%s13577_s16 + $0x88] sm:$0xff]  }
 0x324   : > { %13132 = vperm.xlu1 %12958, %v13131_v14   ;;  %13112 = vperm.xlu0 %12970, %v13111_v4   ;;  %v11790_v14 = vunpack.c.l.bf16 %v12328_v54  ;;  %v11791_v4 = vunpack.c.h.bf16 %v12328_v54  ;;  %v13176_v20 = vpack.i.bf16 %v11807_v52, %v11806_v35  ;;  %v11786_v45 = vunpack.c.l.bf16 %v12327_v27 }
 0x325   : > { %v3018_v21 = vpop.permute.xlu0 %3017  ;;  %v11787_v0 = vunpack.c.h.bf16 %v12327_v27 }
 0x326   : > { %3122 = vst.msk [vmem:[#allocation2 + $0xac] sm:$0xf] %vm3081_vm4, %v3018_v21  ;;  %v13156_v2 = vpack.i.bf16 %v11791_v4, %v11790_v14  ;;  %v11802_v21 = vunpack.c.l.bf16 %v12331_v12 }
 0x329   : > { %v14871_v1 = vpop.f32.mrf.mxu0 }
 0x32a   : > { %13107 = vperm.xlu2 %12964, %v13106_v38   ;;  %v14866_v9 = vpop.f32.mrf.mxu3  ;;  %v11803_v38 = vunpack.c.h.bf16 %v12331_v12 }
 0x32c   : > { %13147 = vperm.xlu1 %12958, %v13146_v57   ;;  %13127 = vperm.xlu0 %12970, %v13126_v33   ;;  %v13151_v33 = vpack.i.bf16 %v11787_v0, %v11786_v45  ;;  %v13171_v19 = vpack.i.bf16 %v11803_v38, %v11802_v21 }
 0x32d   : > { %v12212_v7 = vld [vmem:[#allocation2 + $0xa8] sm:$0xff]  }
 0x32e   : > { %v11387_v57 = vld [vmem:[#allocation2 + $0xac] sm:$0xff] }
 0x32f   : > { %10737 = vmatmul.msk.bf16.gmra.mxu3 %vm3296_vm12, %v12211_v13  ;;  %v11810_v13 = vunpack.c.l.bf16 %v12333_v28 }
 0x330   : > { %10877 = vmatmul.msk.bf16.gmra.mxu0 %vm3296_vm12, %v11386_v29  ;;  %v11811_v29 = vunpack.c.h.bf16 %v12333_v28 }
 0x332   : > { %13122 = vperm.xlu2 %12964, %v13121_v62   ;;  %v14874_v36 = vpop.f32.mrf.mxu3  ;;  %v13181_v49 = vpack.i.bf16 %v11811_v29, %v11810_v13 }
 0x334   : > { %13162 = vperm.xlu1 %12958, %v13161_v6   ;;  %13142 = vperm.xlu0 %12970, %v13141_v31  }
 0x33a   : > { %13137 = vperm.xlu2 %12964, %v13136_v39   ;;  %v14877_v62 = vpop.f32.mrf.mxu3  ;;  %v14890_v39 = vpop.f32.mrf.mxu0 }
 0x33c   : > { %13177 = vperm.xlu1 %12958, %v13176_v20   ;;  %13157 = vperm.xlu0 %12970, %v13156_v2  }
 0x33f   : > { %10738 = vmatmul.msk.bf16.gmra.mxu3 %vm3296_vm12, %v12212_v7 }
 0x340   : > { %10878 = vmatmul.msk.bf16.gmra.mxu0 %vm3296_vm12, %v11387_v57 }
 0x342   : > { %13152 = vperm.xlu2 %12964, %v13151_v33   ;;  %v14879_v6 = vpop.f32.mrf.mxu3  ;;  %v14898_v12 = vpop.f32.mrf.mxu0 }
 0x344   : > { %13172 = vperm.xlu0 %12970, %v13171_v19  }
 0x34a   : > { %13167 = vperm.xlu2 %12964, %v13166_v24   ;;  %v14882_v18 = vpop.f32.mrf.mxu3  ;;  %v14905_v7 = vpop.f32.mrf.mxu0 }
 0x352   : > { %13182 = vperm.xlu2 %12964, %v13181_v49   ;;  %v14886_v56 = vpop.f32.mrf.mxu3  ;;  %v14909_v33 = vpop.f32.mrf.mxu0 }
 0x35a   : > { %v14894_v27 = vpop.f32.mrf.mxu3  ;;  %v14915_v11 = vpop.f32.mrf.mxu0 }
 0x35c   : > { %v2938_v31 = vpop.permute.xlu2 %2937 }
 0x35d   : > { %3082 = vst.msk [vmem:[#allocation2 + $0xc] sm:$0xf] %vm3081_vm4, %v2938_v31 }
 0x362   : > { %v14900_v45 = vpop.f32.mrf.mxu3  ;;  %v14919_v29 = vpop.f32.mrf.mxu0 }
 0x364   : > { %v3022_v54 = vpop.permute.xlu2 %3021 }
 0x365   : > { %3124 = vst.msk [vmem:[#allocation2 + $0xb4] sm:$0xf] %vm3081_vm4, %v3022_v54  ;;  %v12600_v54 = vld [vmem:[#allocation2 + $0x1c] sm:$0xff]  }
 0x366   : > { %v2942_v32 = vpop.permute.xlu1 %2941 }
 0x367   : > { %3084 = vst.msk [vmem:[#allocation2 + $0x14] sm:$0xf] %vm3081_vm4, %v2942_v32 }
 0x36a   : > { %v14907_v57 = vpop.f32.mrf.mxu3 }
 0x36c   : > { %v3028_v35 = vpop.permute.xlu2 %3027  ;;  %v12213_v52 = vld [vmem:[#allocation2 + $0xb0] sm:$0xff]  }
 0x36d   : > { %3127 = vst.msk [vmem:[#allocation2 + $0xc0] sm:$0xf] %vm3081_vm4, %v3028_v35  ;;  %10739 = vmatmul.msk.bf16.gmra.mxu3 %vm3296_vm12, %v12213_v52  ;;  %v12602_v35 = vld [vmem:[#allocation2 + $0x24] sm:$0xff]  }
 0x36e   : > { %v3026_v14 = vpop.permute.xlu1 %3025  ;;  %v2940_v4 = vpop.permute.xlu0 %2939  ;;  %v12598_v28 = vld [vmem:[#allocation2 + $0x14] sm:$0xff]  }
 0x36f   : > { %3126 = vst.msk [vmem:[#allocation2 + $0xbc] sm:$0xf] %vm3081_vm4, %v3026_v14 }
 0x370   : > { %3083 = vst.msk [vmem:[#allocation2 + $0x10] sm:$0xf] %vm3081_vm4, %v2940_v4  ;;  %v12604_v4 = vld [vmem:[#allocation2 + $0x2c] sm:$0xff]  }
 0x376   : > { %v3032_v20 = vpop.permute.xlu1 %3031  ;;  %v3024_v2 = vpop.permute.xlu0 %3023  ;;  %v11389_v19 = vld [vmem:[#allocation2 + $0xbc] sm:$0xff] }
 0x377   : > { %3129 = vst.msk [vmem:[#allocation2 + $0xc8] sm:$0xf] %vm3081_vm4, %v3032_v20  ;;  %v11366_v8 = vld [vmem:[#allocation2 + $0xc] sm:$0xff] }
 0x378   : > { %3125 = vst.msk [vmem:[#allocation2 + $0xb8] sm:$0xf] %vm3081_vm4, %v3024_v2  ;;  %v12606_v2 = vld [vmem:[#allocation2 + $0x34] sm:$0xff]  }
 0x37e   : > { %v3030_v0 = vpop.permute.xlu0 %3029 }
 0x37f   : > { %3128 = vst.msk [vmem:[#allocation2 + $0xc4] sm:$0xf] %vm3081_vm4, %v3030_v0  ;;  %v11368_v21 = vld [vmem:[#allocation2 + $0xb8] sm:$0xff] }
 0x380   : > { %v11388_v38 = vld [vmem:[#allocation2 + $0xb4] sm:$0xff]  ;;  %10740 = vmatmul.msk.bf16.gmra.mxu3 %vm3296_vm12, %v11368_v21 }
 0x381   : > { %10879 = vmatmul.msk.bf16.gmra.mxu0 %vm3296_vm12, %v11388_v38  ;;  %v12608_v38 = vld [vmem:[#allocation2 + $0x3c] sm:$0xff]  }
 0x382   : > { %v14911_v50 = vpop.f32.mrf.mxu3 }
 0x386   : > { %v11390_v13 = vld [vmem:[#allocation2 + $0xc4] sm:$0xff] }
 0x38a   : > { %v14917_v24 = vpop.f32.mrf.mxu3 }
 0x390   : > { %10749 = vmatmul.msk.bf16.vlgmr.msrb.gmra.mxu3 %vm3296_vm12, %v11366_v8 }
 0x391   : > { %10880 = vmatmul.msk.bf16.gmra.mxu0 %vm3296_vm12, %v11389_v19 }
 0x392   : > { %v14923_v49 = vpop.f32.mrf.mxu3 }
 0x39a   : > { %v14925_v31 = vpop.f32.mrf.mxu3 }
 0x3a0   : > { %10750 = vmatmul.msk.bf16.gmra.mxu3 %vm3296_vm12, %v12598_v28  ;;  %v12610_v28 = vld [vmem:[#allocation2 + $0x44] sm:$0xff]  }
 0x3a1   : > { %10881 = vmatmul.msk.bf16.gmra.mxu0 %vm3296_vm12, %v11390_v13 }
 0x3a2   : > { %v14928_v32 = vpop.f32.mrf.mxu3 }
 0x3aa   : > { %v14931_v52 = vpop.f32.mrf.mxu3 }
 0x3b0   : > { %10751 = vmatmul.msk.bf16.gmra.mxu3 %vm3296_vm12, %v12600_v54 }
 0x3b2   : > { %v14933_v14 = vpop.f32.mrf.mxu3 }
 0x3ba   : > { %v14936_v20 = vpop.f32.mrf.mxu3 }
 0x3bb   : > { %17645 = vst [vmem:[#allocation4_spill] sm:$0xff] %v14936_v20 }
 0x3c0   : > { %10752 = vmatmul.msk.bf16.gmra.mxu3 %vm3296_vm12, %v12602_v35  ;;  %v12612_v35 = vld [vmem:[#allocation2 + $0x4c] sm:$0xff]  }
 0x3c2   : > { %v14938_v0 = vpop.f32.mrf.mxu3 }
 0x3c3   : > { %17646 = vst [vmem:[#allocation5_spill] sm:$0xff] %v14938_v0 }
 0x3ca   : > { %v14941_v21 = vpop.f32.mrf.mxu3 }
 0x3cb   : > { %17647 = vst [vmem:[#allocation6_spill] sm:$0xff] %v14941_v21 }
 0x3d0   : > { %10753 = vmatmul.msk.bf16.gmra.mxu3 %vm3296_vm12, %v12604_v4  ;;  %v3373_v4 = vpop.f32.mrf.mxu1 }
 0x3e0   : > { %10754 = vmatmul.msk.bf16.gmra.mxu3 %vm3296_vm12, %v12606_v2 }
 0x3f0   : > { %10755 = vmatmul.msk.bf16.gmra.mxu3 %vm3296_vm12, %v12608_v38  ;;  %v14944_v8 = vpop.f32.mrf.mxu3  ;;  %v3375_v38 = vpop.f32.mrf.mxu1 }
 0x3f1   : > { %17648 = vst [vmem:[#allocation10_spill] sm:$0xff] %v14944_v8 }
 0x3f8   : > { %v14946_v19 = vpop.f32.mrf.mxu3 }
 0x3f9   : > { %17649 = vst [vmem:[#allocation7_spill] sm:$0xff] %v14946_v19  ;;  %v12614_v19 = vld [vmem:[#allocation2 + $0x54] sm:$0xff]  }
 0x400   : > { %10756 = vmatmul.msk.bf16.gmra.mxu3 %vm3296_vm12, %v12610_v28 }
 0x403   : > { %v14949_v13 = vpop.f32.mrf.mxu3 }
 0x404   : > { %17650 = vst [vmem:[#allocation15_spill] sm:$0xff] %v14949_v13 }
 0x40b   : > { %v14951_v54 = vpop.f32.mrf.mxu3 }
 0x40c   : > { %17651 = vst [vmem:[#allocation13_spill] sm:$0xff] %v14951_v54 }
 0x410   : > { %10757 = vmatmul.msk.bf16.gmra.mxu3 %vm3296_vm12, %v12612_v35 }
 0x413   : > { %v3589_v2 = vpop.f32.mrf.mxu3 }
 0x414   : > { %v3590_v63 = vadd.f32 %v3589_v2, %v3373_v4 }
 0x416   : > { %v14955_v21 = vadd.f32 %v14731_v55, %v3590_v63  ;;  %v17652_v55 = vmov 0.0  }
 0x418   : > { %4076 = vst.msk [vmem:[#allocation3 + $0x8] sm:$0xff] %vm1581_vm2, %v14955_v21 }
 0x419   : > { %4119 = vst.msk [vmem:[#allocation3 + $0x8] sm:$0xff] %vm1632_vm3, %v14955_v21 }
 0x41b   : > { %v3591_v28 = vpop.f32.mrf.mxu3 }
 0x41c   : > { %v3592_v13 = vadd.f32 %v3591_v28, %v3375_v38 }
 0x41e   : > { %v14962_v54 = vadd.f32 %v14743_v53, %v3592_v13 }
 0x420   : > { %4077 = vst.msk [vmem:[#allocation3 + $0x10] sm:$0xff] %vm1581_vm2, %v14962_v54  ;;  %10758 = vmatmul.msk.bf16.gmra.mxu3 %vm3296_vm12, %v12614_v19  ;;  %v4162_v63 = vld [vmem:[#allocation3 + $0x7] sm:$0xff] }
 0x421   : > { %4120 = vst.msk [vmem:[#allocation3 + $0x10] sm:$0xff] %vm1632_vm3, %v14962_v54  ;;  %4246 = vrot.lane.b32.xlu2 %v4162_v63, %s13464_s28 }
 0x422   : > { %6290 = vst.msk [vmem:[#allocation3 + $0x7] sm:$0x1] %vm1630_vm5, %v17652_v55 }
 0x423   : > { %v3594_v35 = vpop.f32.mrf.mxu3 }
 0x424   : > { %v3595_v4 = vadd.f32 %v3594_v35, %v14688_v51 }
 0x426   : > { %v14974_v53 = vadd.f32 %v14750_v60, %v3595_v4  ;;  %v12616_v60 = vld [vmem:[#allocation2 + $0x5c] sm:$0xff]  }
 0x428   : > { %4078 = vst.msk [vmem:[#allocation3 + $0x18] sm:$0xff] %vm1581_vm2, %v14974_v53  ;;  %v4163_v13 = vld [vmem:[#allocation3 + $0xf] sm:$0xff] }
 0x429   : > { %v4414_v19 = vld [vmem:[#allocation3 + $0x9] sm:$0xff]  ;;  %4121 = vst.msk [vmem:[#allocation3 + $0x18] sm:$0xff] %vm1632_vm3, %v14974_v53  ;;  %4248 = vrot.lane.b32.xlu0 %v4163_v13, %s13464_s28 }
 0x42a   : > { %4498 = vrot.lane.b32.xlu2 %v4414_v19, %s13465_s29  ;;  %v14999_v19 = vpop.permute.xlu2 %4669 }
 0x42b   : > { %v3596_v2 = vpop.f32.mrf.mxu3 }
 0x42c   : > { %v3597_v38 = vadd.f32 %v3596_v2, %v14695_v5 }
 0x42e   : > { %v14984_v51 = vadd.f32 %v14763_v61, %v3597_v38  ;;  %v12618_v38 = vld [vmem:[#allocation2 + $0x64] sm:$0xff]  }
 0x430   : > { %4079 = vst.msk [vmem:[#allocation3 + $0x20] sm:$0xff] %vm1581_vm2, %v14984_v51  ;;  %10759 = vmatmul.msk.bf16.gmra.mxu3 %vm3296_vm12, %v12616_v60  ;;  %v4164_v28 = vld [vmem:[#allocation3 + $0x17] sm:$0xff] }
 0x431   : > { %v4415_v63 = vld [vmem:[#allocation3 + $0x11] sm:$0xff]  ;;  %4122 = vst.msk [vmem:[#allocation3 + $0x20] sm:$0xff] %vm1632_vm3, %v14984_v51  ;;  %4250 = vrot.lane.b32.xlu1 %v4164_v28, %s13464_s28 }
 0x432   : > { %4500 = vrot.lane.b32.xlu0 %v4415_v63, %s13465_s29  ;;  %v15016_v63 = vpop.permute.xlu2 %13092 }
 0x433   : > { %v3599_v35 = vpop.f32.mrf.mxu3 }
 0x434   : > { %v3600_v5 = vadd.f32 %v3599_v35, %v14706_v17 }
 0x436   : > { %v14995_v61 = vadd.f32 %v14783_v44, %v3600_v5 }
 0x438   : > { %4080 = vst.msk [vmem:[#allocation3 + $0x28] sm:$0xff] %vm1581_vm2, %v14995_v61  ;;  %v4416_v4 = vld [vmem:[#allocation3 + $0x19] sm:$0xff] }
 0x439   : > { %v4165_v13 = vld [vmem:[#allocation3 + $0x1f] sm:$0xff]  ;;  %4123 = vst.msk [vmem:[#allocation3 + $0x28] sm:$0xff] %vm1632_vm3, %v14995_v61  ;;  %4502 = vrot.lane.b32.xlu1 %v4416_v4, %s13465_s29 }
 0x43a   : > { %4252 = vrot.lane.b32.xlu2 %v4165_v13, %s13464_s28 }
 0x43b   : > { %v3601_v2 = vpop.f32.mrf.mxu3 }
 0x43c   : > { %v3602_v17 = vadd.f32 %v3601_v2, %v14715_v23 }
 0x43e   : > { %v15007_v44 = vadd.f32 %v14806_v47, %v3602_v17  ;;  %v15029_v17 = vpop.permute.xlu2 %13107 }
 0x440   : > { %4081 = vst.msk [vmem:[#allocation3 + $0x30] sm:$0xff] %vm1581_vm2, %v15007_v44  ;;  %10760 = vmatmul.msk.bf16.gmra.mxu3 %vm3296_vm12, %v12618_v38  ;;  %v4166_v60 = vld [vmem:[#allocation3 + $0x27] sm:$0xff] }
 0x441   : > { %v4417_v28 = vld [vmem:[#allocation3 + $0x21] sm:$0xff]  ;;  %4124 = vst.msk [vmem:[#allocation3 + $0x30] sm:$0xff] %vm1632_vm3, %v15007_v44  ;;  %4254 = vrot.lane.b32.xlu0 %v4166_v60, %s13464_s28 }
 0x442   : > { %4504 = vrot.lane.b32.xlu2 %v4417_v28, %s13465_s29 }
 0x443   : > { %v3604_v23 = vpop.f32.mrf.mxu3 }
 0x444   : > { %v3605_v47 = vadd.f32 %v3604_v23, %v14720_v3 }
 0x446   : > { %v15020_v35 = vadd.f32 %v14819_v40, %v3605_v47  ;;  %v12620_v40 = vld [vmem:[#allocation2 + $0x6c] sm:$0xff]   ;;  %v15047_v47 = vpop.permute.xlu2 %13122 }
 0x447   : > { %17653 = vst [vmem:[#allocation17_spill] sm:$0xff] %v15047_v47 }
 0x448   : > { %4082 = vst.msk [vmem:[#allocation3 + $0x38] sm:$0xff] %vm1581_vm2, %v15020_v35  ;;  %v4167_v5 = vld [vmem:[#allocation3 + $0x2f] sm:$0xff] }
 0x449   : > { %v4418_v4 = vld [vmem:[#allocation3 + $0x29] sm:$0xff]  ;;  %4125 = vst.msk [vmem:[#allocation3 + $0x38] sm:$0xff] %vm1632_vm3, %v15020_v35  ;;  %4256 = vrot.lane.b32.xlu1 %v4167_v5, %s13464_s28 }
 0x44a   : > { %4506 = vrot.lane.b32.xlu0 %v4418_v4, %s13465_s29 }
 0x44b   : > { %v3606_v13 = vpop.f32.mrf.mxu3 }
 0x44c   : > { %v3607_v2 = vadd.f32 %v3606_v13, %v14726_v25 }
 0x44e   : > { %v15032_v3 = vadd.f32 %v14833_v46, %v3607_v2  ;;  %v15042_v46 = vpop.permute.xlu0 %13082  ;;  %v15056_v2 = vpop.permute.xlu1 %13087 }
 0x450   : > { %4083 = vst.msk [vmem:[#allocation3 + $0x40] sm:$0xff] %vm1581_vm2, %v15032_v3  ;;  %10761 = vmatmul.msk.bf16.gmra.mxu3 %vm3296_vm12, %v12620_v40  ;;  %v4419_v38 = vld [vmem:[#allocation3 + $0x31] sm:$0xff]  ;;  %v12622_v40 = vld [vmem:[#allocation2 + $0x74] sm:$0xff]  }
 0x451   : > { %v4168_v60 = vld [vmem:[#allocation3 + $0x37] sm:$0xff]  ;;  %4126 = vst.msk [vmem:[#allocation3 + $0x40] sm:$0xff] %vm1632_vm3, %v15032_v3  ;;  %4508 = vrot.lane.b32.xlu1 %v4419_v38, %s13465_s29 }
 0x452   : > { %4258 = vrot.lane.b32.xlu2 %v4168_v60, %s13464_s28 }
 0x453   : > { %v3609_v25 = vpop.f32.mrf.mxu3 }
 0x454   : > { %v3610_v28 = vadd.f32 %v3609_v25, %v14733_v41 }
 0x456   : > { %v15045_v23 = vadd.f32 %v14845_v59, %v3610_v28  ;;  %v15061_v38 = vpop.permute.xlu0 %13097  ;;  %v15066_v28 = vpop.permute.xlu2 %13137 }
 0x457   : > { %17654 = vst [vmem:[#allocation11_spill] sm:$0xff] %v15066_v28 }
 0x458   : > { %4084 = vst.msk [vmem:[#allocation3 + $0x48] sm:$0xff] %vm1581_vm2, %v15045_v23  ;;  %v4169_v5 = vld [vmem:[#allocation3 + $0x3f] sm:$0xff] }
 0x459   : > { %v4420_v4 = vld [vmem:[#allocation3 + $0x39] sm:$0xff]  ;;  %4127 = vst.msk [vmem:[#allocation3 + $0x48] sm:$0xff] %vm1632_vm3, %v15045_v23  ;;  %4260 = vrot.lane.b32.xlu0 %v4169_v5, %s13464_s28 }
 0x45a   : > { %4510 = vrot.lane.b32.xlu2 %v4420_v4, %s13465_s29  ;;  %v15076_v4 = vpop.permute.xlu1 %13102 }
 0x45b   : > { %v3611_v41 = vpop.f32.mrf.mxu3 }
 0x45c   : > { %v3612_v13 = vadd.f32 %v3611_v41, %v14741_v37 }
 0x45e   : > { %v15059_v59 = vadd.f32 %v14854_v58, %v3612_v13 }
 0x460   : > { %4085 = vst.msk [vmem:[#allocation3 + $0x50] sm:$0xff] %vm1581_vm2, %v15059_v59  ;;  %10762 = vmatmul.msk.bf16.gmra.mxu3 %vm3296_vm12, %v12622_v40  ;;  %v4170_v60 = vld [vmem:[#allocation3 + $0x47] sm:$0xff]  ;;  %v15084_v40 = vpop.permute.xlu0 %13112 }
 0x461   : > { %v4421_v25 = vld [vmem:[#allocation3 + $0x41] sm:$0xff]  ;;  %4128 = vst.msk [vmem:[#allocation3 + $0x50] sm:$0xff] %vm1632_vm3, %v15059_v59  ;;  %4262 = vrot.lane.b32.xlu1 %v4170_v60, %s13464_s28 }
 0x462   : > { %4512 = vrot.lane.b32.xlu0 %v4421_v25, %s13465_s29 }
 0x463   : > { %v3614_v37 = vpop.f32.mrf.mxu3 }
 0x464   : > { %v3615_v58 = vadd.f32 %v3614_v37, %v14747_v34  ;;  %v15086_v34 = vpop.permute.xlu2 %13152  ;;  %v12624_v37 = vld [vmem:[#allocation2 + $0x7c] sm:$0xff]  }
 0x465   : > { %17655 = vst [vmem:[#allocation16_spill] sm:$0xff] %v15086_v34  ;;  %v15109_v34 = vpop.f32.mrf.mxu0 }
 0x466   : > { %v15074_v5 = vadd.f32 %v14863_v42, %v3615_v58 }
 0x468   : > { %4086 = vst.msk [vmem:[#allocation3 + $0x58] sm:$0xff] %vm1581_vm2, %v15074_v5  ;;  %v4422_v41 = vld [vmem:[#allocation3 + $0x49] sm:$0xff] }
 0x469   : > { %v4171_v13 = vld [vmem:[#allocation3 + $0x4f] sm:$0xff]  ;;  %4129 = vst.msk [vmem:[#allocation3 + $0x58] sm:$0xff] %vm1632_vm3, %v15074_v5  ;;  %4514 = vrot.lane.b32.xlu1 %v4422_v41, %s13465_s29 }
 0x46a   : > { %4264 = vrot.lane.b32.xlu2 %v4171_v13, %s13464_s28  ;;  %v15099_v13 = vpop.permute.xlu1 %13117 }
 0x46b   : > { %v3616_v42 = vpop.f32.mrf.mxu3 }
 0x46c   : > { %v3617_v60 = vadd.f32 %v3616_v42, %v14755_v15  ;;  %v15102_v42 = vpop.permute.xlu0 %13127 }
 0x46d   : > { %17656 = vst [vmem:[#allocation8_spill] sm:$0xff] %v15102_v42 }
 0x46e   : > { %v15090_v25 = vadd.f32 %v14871_v1, %v3617_v60  ;;  %v15104_v60 = vpop.permute.xlu2 %13167 }
 0x46f   : > { %17657 = vst [vmem:[#allocation14_spill] sm:$0xff] %v15104_v60 }
 0x470   : > { %4087 = vst.msk [vmem:[#allocation3 + $0x60] sm:$0xff] %vm1581_vm2, %v15090_v25  ;;  %10763 = vmatmul.msk.bf16.gmra.mxu3 %vm3296_vm12, %v12624_v37  ;;  %v4172_v58 = vld [vmem:[#allocation3 + $0x57] sm:$0xff] }
 0x471   : > { %v4423_v41 = vld [vmem:[#allocation3 + $0x51] sm:$0xff]  ;;  %4130 = vst.msk [vmem:[#allocation3 + $0x60] sm:$0xff] %vm1632_vm3, %v15090_v25  ;;  %4266 = vrot.lane.b32.xlu0 %v4172_v58, %s13464_s28 }
 0x472   : > { %4516 = vrot.lane.b32.xlu2 %v4423_v41, %s13465_s29  ;;  %v15117_v41 = vpop.permute.xlu1 %13132 }
 0x473   : > { %v3619_v15 = vpop.f32.mrf.mxu3  ;;  %17658 = vst [vmem:[#allocation19_spill] sm:$0xff] %v15117_v41 }
 0x474   : > { %v3620_v1 = vadd.f32 %v3619_v15, %v14769_v43  ;;  %v15123_v60 = vpop.permute.xlu0 %13142 }
 0x475   : > { %17659 = vst [vmem:[#allocation9_spill] sm:$0xff] %v15123_v60 }
 0x476   : > { %v15107_v37 = vadd.f32 %v14890_v39, %v3620_v1  ;;  %v12626_v1 = vld [vmem:[#allocation2 + $0x84] sm:$0xff]   ;;  %v15125_v8 = vpop.permute.xlu2 %13182 }
 0x477   : > { %17660 = vst [vmem:[#allocation12_spill] sm:$0xff] %v15125_v8 }
 0x478   : > { %4088 = vst.msk [vmem:[#allocation3 + $0x68] sm:$0xff] %vm1581_vm2, %v15107_v37  ;;  %v4173_v58 = vld [vmem:[#allocation3 + $0x5f] sm:$0xff] }
 0x479   : > { %v4424_v28 = vld [vmem:[#allocation3 + $0x59] sm:$0xff]  ;;  %4131 = vst.msk [vmem:[#allocation3 + $0x68] sm:$0xff] %vm1632_vm3, %v15107_v37  ;;  %4268 = vrot.lane.b32.xlu1 %v4173_v58, %s13464_s28 }
 0x47a   : > { %4518 = vrot.lane.b32.xlu0 %v4424_v28, %s13465_s29 }
 0x47b   : > { %v3621_v43 = vpop.f32.mrf.mxu3 }
 0x47c   : > { %v3622_v39 = vadd.f32 %v3621_v43, %v14792_v48  ;;  %v15134_v48 = vpop.f32.mrf.mxu0  ;;  %v15144_v55 = vpop.permute.xlu0 %13157 }
 0x47d   : > { %17662 = vst [vmem:[#allocation20_spill] sm:$0xff] %v15144_v55 }
 0x47e   : > { %v15121_v15 = vadd.f32 %v14898_v12, %v3622_v39  ;;  %v15137_v39 = vpop.permute.xlu1 %13147 }
 0x47f   : > { %17661 = vst [vmem:[#allocation18_spill] sm:$0xff] %v15137_v39 }
 0x480   : > { %4089 = vst.msk [vmem:[#allocation3 + $0x70] sm:$0xff] %vm1581_vm2, %v15121_v15  ;;  %10764 = vmatmul.msk.bf16.gmra.mxu3 %vm3296_vm12, %v12626_v1  ;;  %v4425_v58 = vld [vmem:[#allocation3 + $0x61] sm:$0xff]  ;;  %v4247_v1 = vpop.permute.xlu2 %4246 }
 0x481   : > { %v4174_v28 = vld [vmem:[#allocation3 + $0x67] sm:$0xff]  ;;  %4132 = vst.msk [vmem:[#allocation3 + $0x70] sm:$0xff] %vm1632_vm3, %v15121_v15  ;;  %4520 = vrot.lane.b32.xlu1 %v4425_v58, %s13465_s29 }
 0x482   : > { %4270 = vrot.lane.b32.xlu2 %v4174_v28, %s13464_s28 }
 0x483   : > { %v3624_v12 = vpop.f32.mrf.mxu3 }
 0x484   : > { %v3625_v43 = vadd.f32 %v3624_v12, %v14810_v16  ;;  %v15150_v58 = vpop.f32.mrf.mxu0  ;;  %v12628_v12 = vld [vmem:[#allocation2 + $0x8c] sm:$0xff]  }
 0x486   : > { %v15140_v8 = vadd.f32 %v14905_v7, %v3625_v43  ;;  %v15156_v43 = vpop.permute.xlu1 %13162 }
 0x487   : > { %17663 = vst [vmem:[#allocation21_spill] sm:$0xff] %v15156_v43 }
 0x488   : > { %4090 = vst.msk [vmem:[#allocation3 + $0x78] sm:$0xff] %vm1581_vm2, %v15140_v8  ;;  %v4175_v60 = vld [vmem:[#allocation3 + $0x6f] sm:$0xff]  ;;  %v4499_v39 = vpop.permute.xlu2 %4498 }
 0x489   : > { %v4426_v41 = vld [vmem:[#allocation3 + $0x69] sm:$0xff]  ;;  %4133 = vst.msk [vmem:[#allocation3 + $0x78] sm:$0xff] %vm1632_vm3, %v15140_v8  ;;  %4272 = vrot.lane.b32.xlu0 %v4175_v60, %s13464_s28 }
 0x48a   : > { %4522 = vrot.lane.b32.xlu2 %v4426_v41, %s13465_s29 }
 0x48b   : > { %v3626_v16 = vpop.f32.mrf.mxu3 }
 0x48c   : > { %v3627_v7 = vadd.f32 %v3626_v16, %v14823_v10  ;;  %v4372_v10 = vadd.f32 %v4247_v1, %v14955_v21  ;;  %v15169_v43 = vpop.f32.mrf.mxu0 }
 0x48e   : > { %v15154_v28 = vadd.f32 %v14909_v33, %v3627_v7  ;;  %v15166_v33 = vpop.permute.xlu0 %13172  ;;  %v4624_v16 = vadd.f32 %v4499_v39, %v4372_v10 }
 0x48f   : > { %17664 = vst [vmem:[#allocation22_spill] sm:$0xff] %v15166_v33 }
 0x490   : > { %4091 = vst.msk [vmem:[#allocation3 + $0x80] sm:$0xff] %vm1581_vm2, %v15154_v28  ;;  %10765 = vmatmul.msk.bf16.gmra.mxu3 %vm3296_vm12, %v12628_v12  ;;  %v4176_v55 = vld [vmem:[#allocation3 + $0x77] sm:$0xff]  ;;  %v4672_v0 = vadd.f32 %v14999_v19, %v4624_v16 }
 0x491   : > { %v4427_v60 = vld [vmem:[#allocation3 + $0x71] sm:$0xff]  ;;  %4134 = vst.msk [vmem:[#allocation3 + $0x80] sm:$0xff] %vm1632_vm3, %v15154_v28  ;;  %4274 = vrot.lane.b32.xlu1 %v4176_v55, %s13464_s28 }
 0x492   : > { %4524 = vrot.lane.b32.xlu0 %v4427_v60, %s13465_s29  ;;  %vm4714_vm4 = vcmp.gt.f32.partialorder %v4672_v0, 0.0 }
 0x493   : > { %v3629_v41 = vpop.f32.mrf.mxu3 }
 0x494   : > { %v3630_v7 = vadd.f32 %v3629_v41, %v14837_v26  ;;  %v15181_v26 = vpop.permute.xlu1 %13177  ;;  %v12630_v41 = vld [vmem:[#allocation2 + $0x94] sm:$0xff]   ;;  %v15187_v16 = vpop.f32.mrf.mxu0 }
 0x495   : > { %17665 = vst [vmem:[#allocation23_spill] sm:$0xff] %v15181_v26  ;;  %v4253_v33 = vpop.permute.xlu2 %4252  ;;  %v13084_v26 = vunpack.i.l.bf16 %v15042_v46 }
 0x496   : > { %v15172_v12 = vadd.f32 %v14915_v11, %v3630_v7  ;;  %v4756_v11 = vmul.f32 0.2, %v4672_v0 }
 0x498   : > { %4092 = vst.msk [vmem:[#allocation3 + $0x88] sm:$0xff] %vm1581_vm2, %v15172_v12  ;;  %v4428_v55 = vld [vmem:[#allocation3 + $0x79] sm:$0xff]  ;;  %v4798_v7 = vsel %vm4714_vm4, %v4672_v0, %v4756_v11 }
 0x499   : > { %v4177_v60 = vld [vmem:[#allocation3 + $0x7f] sm:$0xff]  ;;  %4135 = vst.msk [vmem:[#allocation3 + $0x88] sm:$0xff] %vm1632_vm3, %v15172_v12  ;;  %4526 = vrot.lane.b32.xlu1 %v4428_v55, %s13465_s29 }
 0x49a   : > { %4276 = vrot.lane.b32.xlu2 %v4177_v60, %s13464_s28 }
 0x49b   : > { %v3631_v21 = vpop.f32.mrf.mxu3  ;;  %v4249_v39 = vpop.permute.xlu0 %4248 }
 0x49c   : > { %v3632_v1 = vadd.f32 %v3631_v21, %v14848_v22  ;;  %v4373_v22 = vadd.f32 %v4249_v39, %v14962_v54  ;;  %v5134_v21 = vmul.f32 %v13084_v26, %v4798_v7  ;;  %v4375_v7 = vadd.f32 %v4253_v33, %v14984_v51 }
 0x49d   : > { %v4505_v26 = vpop.permute.xlu2 %4504 }
 0x49e   : > { %v15185_v10 = vadd.f32 %v14919_v29, %v3632_v1  ;;  %v5176_v47 = vpack.c.bf16 %v5134_v21, %v5134_v21 }
 0x4a0   : > { %17666 = vst [vmem:[#allocation24_spill] sm:$0xff] %v15185_v10  ;;  %10766 = vmatmul.msk.bf16.gmra.mxu3 %vm3296_vm12, %v12630_v41  ;;  %v4178_v55 = vld [vmem:[#allocation3 + $0x87] sm:$0xff] }
 0x4a1   : > { %4093 = vst.msk [vmem:[#allocation3 + $0x90] sm:$0xff] %vm1581_vm2, %v15185_v10  ;;  %v4429_v60 = vld [vmem:[#allocation3 + $0x81] sm:$0xff]  ;;  %4278 = vrot.lane.b32.xlu0 %v4178_v55, %s13464_s28 }
 0x4a2   : > { %4136 = vst.msk [vmem:[#allocation3 + $0x90] sm:$0xff] %vm1632_vm3, %v15185_v10  ;;  %4528 = vrot.lane.b32.xlu2 %v4429_v60, %s13465_s29  ;;  %v12632_v10 = vld [vmem:[#allocation2 + $0x9c] sm:$0xff]  }
 0x4a3   : > { %v3634_v29 = vpop.f32.mrf.mxu3  ;;  %v4251_v0 = vpop.permute.xlu1 %4250 }
 0x4a4   : > { %v3635_v11 = vadd.f32 %v3634_v29, %v14856_v30  ;;  %v4501_v1 = vpop.permute.xlu0 %4500  ;;  %v15209_v30 = vpop.f32.mrf.mxu0  ;;  %v4374_v39 = vadd.f32 %v4251_v0, %v14974_v53 }
 0x4a5   : > { %v4625_v41 = vadd.f32 %v4501_v1, %v4373_v22 }
 0x4a6   : > { %v15200_v42 = vadd.f32 %v15109_v34, %v3635_v11  ;;  %v13085_v34 = vunpack.i.h.bf16 %v15042_v46 }
 0x4a7   : > { %v4673_v20 = vadd.f32 %v14999_v19, %v4625_v41  ;;  %v4627_v41 = vadd.f32 %v4505_v26, %v4375_v7 }
 0x4a8   : > { %4094 = vst.msk [vmem:[#allocation3 + $0x98] sm:$0xff] %vm1581_vm2, %v15200_v42 }
 0x4a9   : > { %v4179_v55 = vld [vmem:[#allocation3 + $0x8f] sm:$0xff]  ;;  %4137 = vst.msk [vmem:[#allocation3 + $0x98] sm:$0xff] %vm1632_vm3, %v15200_v42  ;;  %vm4715_vm15 = vcmp.gt.f32.partialorder %v4673_v20, 0.0  ;;  %v4757_v54 = vmul.f32 0.2, %v4673_v20  ;;  %5260 = vrot.lane.b32.xlu0 %v5176_v47, %s13467_s24  ;;  %v4675_v51 = vadd.f32 %v14999_v19, %v4627_v41 }
 0x4aa   : > { %4280 = vrot.lane.b32.xlu1 %v4179_v55, %s13464_s28 }
 0x4ab   : > { %v4799_v60 = vsel %vm4715_vm15, %v4673_v20, %v4757_v54  ;;  %v3636_v22 = vpop.f32.mrf.mxu3  ;;  %v4503_v29 = vpop.permute.xlu1 %4502  ;;  %vm4717_vm9 = vcmp.gt.f32.partialorder %v4675_v51, 0.0 }
 0x4ac   : > { %v3637_v21 = vadd.f32 %v3636_v22, %v14866_v9  ;;  %v4626_v11 = vadd.f32 %v4503_v29, %v4374_v39  ;;  %v5135_v1 = vmul.f32 %v13085_v34, %v4799_v60  ;;  %v13089_v9 = vunpack.i.l.bf16 %v15056_v2  ;;  %v15228_v33 = vpop.f32.mrf.mxu0  ;;  %v4259_v22 = vpop.permute.xlu2 %4258 }
 0x4ad   : > { %v4759_v39 = vmul.f32 0.2, %v4675_v51 }
 0x4ae   : > { %v15216_v55 = vadd.f32 %v15134_v48, %v3637_v21  ;;  %v4674_v47 = vadd.f32 %v14999_v19, %v4626_v11  ;;  %v5177_v46 = vpack.c.bf16 %v5135_v1, %v5135_v1  ;;  %v4430_v48 = vld [vmem:[#allocation3 + $0x89] sm:$0xff] }
 0x4af   : > { %v4801_v11 = vsel %vm4717_vm9, %v4675_v51, %v4759_v39 }
 0x4b0   : > { %4095 = vst.msk [vmem:[#allocation3 + $0xa0] sm:$0xff] %vm1581_vm2, %v15216_v55  ;;  %vm4716_vm8 = vcmp.gt.f32.partialorder %v4674_v47, 0.0  ;;  %v4758_v53 = vmul.f32 0.2, %v4674_v47  ;;  %10767 = vmatmul.msk.bf16.gmra.mxu3 %vm3296_vm12, %v12632_v10  ;;  %v4180_v20 = vld [vmem:[#allocation3 + $0x97] sm:$0xff] }
 0x4b1   : > { %4138 = vst.msk [vmem:[#allocation3 + $0xa0] sm:$0xff] %vm1632_vm3, %v15216_v55  ;;  %4282 = vrot.lane.b32.xlu2 %v4180_v20, %s13464_s28  ;;  %4530 = vrot.lane.b32.xlu0 %v4430_v48, %s13465_s29  ;;  %v4431_v29 = vld [vmem:[#allocation3 + $0x91] sm:$0xff] }
 0x4b2   : > { %5262 = vrot.lane.b32.xlu1 %v5177_v46, %s13467_s24  ;;  %v4800_v0 = vsel %vm4716_vm8, %v4674_v47, %v4758_v53  ;;  %v12634_v48 = vld [vmem:[#allocation2 + $0xa4] sm:$0xff]  }
 0x4b3   : > { %v3639_v54 = vpop.f32.mrf.mxu3  ;;  %v4255_v10 = vpop.permute.xlu0 %4254  ;;  %v5136_v34 = vmul.f32 %v13089_v9, %v4800_v0 }
 0x4b4   : > { %v3640_v26 = vadd.f32 %v3639_v54, %v14874_v36  ;;  %v13090_v36 = vunpack.i.h.bf16 %v15056_v2  ;;  %v15244_v47 = vpop.f32.mrf.mxu0 }
 0x4b5   : > { %v5178_v60 = vpack.c.bf16 %v5136_v34, %v5136_v34 }
 0x4b6   : > { %v15233_v7 = vadd.f32 %v15150_v58, %v3640_v26  ;;  %v4376_v58 = vadd.f32 %v4255_v10, %v14995_v61  ;;  %v5137_v20 = vmul.f32 %v13090_v36, %v4801_v11  ;;  %v4511_v10 = vpop.permute.xlu2 %4510  ;;  %v4378_v26 = vadd.f32 %v4259_v22, %v15020_v35 }
 0x4b8   : > { %4096 = vst.msk [vmem:[#allocation3 + $0xa8] sm:$0xff] %vm1581_vm2, %v15233_v7  ;;  %v4181_v21 = vld [vmem:[#allocation3 + $0x9f] sm:$0xff]  ;;  %v5179_v54 = vpack.c.bf16 %v5137_v20, %v5137_v20 }
 0x4b9   : > { %4139 = vst.msk [vmem:[#allocation3 + $0xa8] sm:$0xff] %vm1632_vm3, %v15233_v7  ;;  %5264 = vrot.lane.b32.xlu2 %v5178_v60, %s13467_s24  ;;  %4284 = vrot.lane.b32.xlu0 %v4181_v21, %s13464_s28  ;;  %v4432_v2 = vld [vmem:[#allocation3 + $0x99] sm:$0xff] }
 0x4ba   : > { %4532 = vrot.lane.b32.xlu1 %v4431_v29, %s13465_s29 }
 0x4bb   : > { %v3641_v1 = vpop.f32.mrf.mxu3  ;;  %v4257_v41 = vpop.permute.xlu1 %4256 }
 0x4bc   : > { %v3642_v46 = vadd.f32 %v3641_v1, %v14877_v62  ;;  %v4507_v53 = vpop.permute.xlu0 %4506  ;;  %v4377_v34 = vadd.f32 %v4257_v41, %v15007_v44  ;;  %v15263_v1 = vpop.f32.mrf.mxu0  ;;  %v13095_v41 = vunpack.i.h.bf16 %v15016_v63 }
 0x4bd   : > { %v4628_v9 = vadd.f32 %v4507_v53, %v4376_v58  ;;  %v4630_v58 = vadd.f32 %v4511_v10, %v4378_v26 }
 0x4be   : > { %v15248_v51 = vadd.f32 %v15169_v43, %v3642_v46  ;;  %v13094_v43 = vunpack.i.l.bf16 %v15016_v63 }
 0x4bf   : > { %v4676_v0 = vadd.f32 %v14999_v19, %v4628_v9 }
 0x4c0   : > { %4097 = vst.msk [vmem:[#allocation3 + $0xb0] sm:$0xff] %vm1581_vm2, %v15248_v51  ;;  %10768 = vmatmul.msk.bf16.gmra.mxu3 %vm3296_vm12, %v12634_v48  ;;  %v4182_v61 = vld [vmem:[#allocation3 + $0xa7] sm:$0xff] }
 0x4c1   : > { %4140 = vst.msk [vmem:[#allocation3 + $0xb0] sm:$0xff] %vm1632_vm3, %v15248_v51  ;;  %vm4718_vm10 = vcmp.gt.f32.partialorder %v4676_v0, 0.0  ;;  %v4760_v62 = vmul.f32 0.2, %v4676_v0  ;;  %4534 = vrot.lane.b32.xlu2 %v4432_v2, %s13465_s29  ;;  %5266 = vrot.lane.b32.xlu0 %v5179_v54, %s13467_s24  ;;  %v12635_v54 = vld [vmem:[#allocation2 + $0xac] sm:$0xff]  }
 0x4c2   : > { %4286 = vrot.lane.b32.xlu1 %v4182_v61, %s13464_s28 }
 0x4c3   : > { %v4802_v39 = vsel %vm4718_vm10, %v4676_v0, %v4760_v62  ;;  %v3644_v60 = vpop.f32.mrf.mxu3  ;;  %v4509_v29 = vpop.permute.xlu1 %4508 }
 0x4c4   : > { %v3645_v21 = vadd.f32 %v3644_v60, %v14879_v6  ;;  %v4629_v11 = vadd.f32 %v4509_v29, %v4377_v34  ;;  %v5138_v36 = vmul.f32 %v13094_v43, %v4802_v39  ;;  %v4678_v6 = vadd.f32 %v14999_v19, %v4630_v58  ;;  %v15282_v43 = vpop.f32.mrf.mxu0  ;;  %v4265_v10 = vpop.permute.xlu2 %4264 }
 0x4c6   : > { %v15266_v46 = vadd.f32 %v15187_v16, %v3645_v21  ;;  %v4677_v53 = vadd.f32 %v14999_v19, %v4629_v11  ;;  %v5180_v44 = vpack.c.bf16 %v5138_v36, %v5138_v36  ;;  %v4433_v16 = vld [vmem:[#allocation3 + $0xa1] sm:$0xff]  ;;  %v4762_v2 = vmul.f32 0.2, %v4678_v6 }
 0x4c7   : > { %vm4720_vm13 = vcmp.gt.f32.partialorder %v4678_v6, 0.0 }
 0x4c8   : > { %4098 = vst.msk [vmem:[#allocation3 + $0xb8] sm:$0xff] %vm1581_vm2, %v15266_v46  ;;  %vm4719_vm11 = vcmp.gt.f32.partialorder %v4677_v53, 0.0  ;;  %v4761_v35 = vmul.f32 0.2, %v4677_v53  ;;  %v4183_v22 = vld [vmem:[#allocation3 + $0xaf] sm:$0xff]  ;;  %v4804_v39 = vsel %vm4720_vm13, %v4678_v6, %v4762_v2  ;;  %vm5386_vm13 = vcmask 257216  }
 0x4c9   : > { %4141 = vst.msk [vmem:[#allocation3 + $0xb8] sm:$0xff] %vm1632_vm3, %v15266_v46  ;;  %4288 = vrot.lane.b32.xlu2 %v4183_v22, %s13464_s28  ;;  %4536 = vrot.lane.b32.xlu0 %v4433_v16, %s13465_s29  ;;  %v4434_v34 = vld [vmem:[#allocation3 + $0xa9] sm:$0xff] }
 0x4ca   : > { %5268 = vrot.lane.b32.xlu1 %v5180_v44, %s13467_s24  ;;  %v4803_v20 = vsel %vm4719_vm11, %v4677_v53, %v4761_v35 }
 0x4cb   : > { %v3646_v9 = vpop.f32.mrf.mxu3  ;;  %v4261_v48 = vpop.permute.xlu0 %4260  ;;  %v5139_v0 = vmul.f32 %v13095_v41, %v4803_v20  ;;  %v11394_v20 = vld [vmem:[%s17564_s3 + $0x8] sm:$0xff] }
 0x4cc   : > { %v3647_v61 = vadd.f32 %v3646_v9, %v14882_v18  ;;  %v13099_v18 = vunpack.i.l.bf16 %v15061_v38  ;;  %v4517_v6 = vpop.permute.xlu2 %4516  ;;  %v4381_v9 = vadd.f32 %v4265_v10, %v15059_v59  ;;  %5829 = vmatpush.bf16.msrb.mxu2 %v11394_v20 }
 0x4cd   : > { %v5181_v62 = vpack.c.bf16 %v5139_v0, %v5139_v0 }
 0x4ce   : > { %v15280_v63 = vadd.f32 %v15209_v30, %v3647_v61  ;;  %v4379_v30 = vadd.f32 %v4261_v48, %v15032_v3  ;;  %v5140_v36 = vmul.f32 %v13099_v18, %v4804_v39  ;;  %v13104_v39 = vunpack.i.l.bf16 %v15076_v4 }
 0x4d0   : > { %4099 = vst.msk [vmem:[#allocation3 + $0xc0] sm:$0xff] %vm1581_vm2, %v15280_v63  ;;  %10769 = vmatmul.msk.bf16.gmra.mxu3 %vm3296_vm12, %v12635_v54  ;;  %v4184_v26 = vld [vmem:[#allocation3 + $0xb7] sm:$0xff]  ;;  %v5182_v41 = vpack.c.bf16 %v5140_v36, %v5140_v36 }
 0x4d1   : > { %4142 = vst.msk [vmem:[#allocation3 + $0xc0] sm:$0xff] %vm1632_vm3, %v15280_v63  ;;  %5270 = vrot.lane.b32.xlu2 %v5181_v62, %s13467_s24  ;;  %4290 = vrot.lane.b32.xlu0 %v4184_v26, %s13464_s28  ;;  %v4435_v22 = vld [vmem:[#allocation3 + $0xb1] sm:$0xff] }
 0x4d2   : > { %4538 = vrot.lane.b32.xlu1 %v4434_v34, %s13465_s29 }
 0x4d3   : > { %v3649_v60 = vpop.f32.mrf.mxu3  ;;  %v4263_v29 = vpop.permute.xlu1 %4262 }
 0x4d4   : > { %v3650_v21 = vadd.f32 %v3649_v60, %v14886_v56  ;;  %v4513_v11 = vpop.permute.xlu0 %4512  ;;  %v15305_v56 = vpop.f32.mrf.mxu0  ;;  %v4380_v16 = vadd.f32 %v4263_v29, %v15045_v23 }
 0x4d5   : > { %v4631_v58 = vadd.f32 %v4513_v11, %v4379_v30 }
 0x4d6   : > { %v15296_v53 = vadd.f32 %v15228_v33, %v3650_v21  ;;  %v13100_v33 = vunpack.i.h.bf16 %v15061_v38  ;;  %v4633_v38 = vadd.f32 %v4517_v6, %v4381_v9 }
 0x4d7   : > { %v4679_v44 = vadd.f32 %v14999_v19, %v4631_v58 }
 0x4d8   : > { %4100 = vst.msk [vmem:[#allocation3 + $0xc8] sm:$0xff] %vm1581_vm2, %v15296_v53  ;;  %v4185_v35 = vld [vmem:[#allocation3 + $0xbf] sm:$0xff] }
 0x4d9   : > { %4143 = vst.msk [vmem:[#allocation3 + $0xc8] sm:$0xff] %vm1632_vm3, %v15296_v53  ;;  %vm4721_vm12 = vcmp.gt.f32.partialorder %v4679_v44, 0.0  ;;  %v4763_v3 = vmul.f32 0.2, %v4679_v44  ;;  %4540 = vrot.lane.b32.xlu2 %v4435_v22, %s13465_s29  ;;  %5272 = vrot.lane.b32.xlu0 %v5182_v41, %s13467_s24 }
 0x4da   : > { %4292 = vrot.lane.b32.xlu1 %v4185_v35, %s13464_s28 }
 0x4db   : > { %v4805_v48 = vsel %vm4721_vm12, %v4679_v44, %v4763_v3  ;;  %v3651_v0 = vpop.f32.mrf.mxu3  ;;  %v4515_v61 = vpop.permute.xlu1 %4514 }
 0x4dc   : > { %v3652_v2 = vadd.f32 %v3651_v0, %v14894_v27  ;;  %v4632_v54 = vadd.f32 %v4515_v61, %v4380_v16  ;;  %v5141_v62 = vmul.f32 %v13100_v33, %v4805_v48  ;;  %v4681_v27 = vadd.f32 %v14999_v19, %v4633_v38  ;;  %v15328_v21 = vpop.f32.mrf.mxu0  ;;  %v4271_v35 = vpop.permute.xlu2 %4270 }
 0x4de   : > { %v15316_v34 = vadd.f32 %v15244_v47, %v3652_v2  ;;  %v4680_v23 = vadd.f32 %v14999_v19, %v4632_v54  ;;  %v5183_v26 = vpack.c.bf16 %v5141_v62, %v5141_v62  ;;  %v4436_v47 = vld [vmem:[#allocation3 + $0xb9] sm:$0xff]  ;;  %v4765_v36 = vmul.f32 0.2, %v4681_v27 }
 0x4df   : > { %vm4723_vm4 = vcmp.gt.f32.partialorder %v4681_v27, 0.0 }
 0x4e0   : > { %4101 = vst.msk [vmem:[#allocation3 + $0xd0] sm:$0xff] %vm1581_vm2, %v15316_v34  ;;  %vm4722_vm14 = vcmp.gt.f32.partialorder %v4680_v23, 0.0  ;;  %v4764_v59 = vmul.f32 0.2, %v4680_v23  ;;  %v4186_v10 = vld [vmem:[#allocation3 + $0xc7] sm:$0xff]  ;;  %v4807_v3 = vsel %vm4723_vm4, %v4681_v27, %v4765_v36  ;;  %v13110_v36 = vunpack.i.h.bf16 %v15029_v17 }
 0x4e1   : > { %4144 = vst.msk [vmem:[#allocation3 + $0xd0] sm:$0xff] %vm1632_vm3, %v15316_v34  ;;  %4294 = vrot.lane.b32.xlu2 %v4186_v10, %s13464_s28  ;;  %4542 = vrot.lane.b32.xlu0 %v4436_v47, %s13465_s29  ;;  %v4437_v22 = vld [vmem:[#allocation3 + $0xc1] sm:$0xff]  ;;  %vm5579_vm4 = vcmask 261120  }
 0x4e2   : > { %5274 = vrot.lane.b32.xlu1 %v5183_v26, %s13467_s24  ;;  %v4806_v18 = vsel %vm4722_vm14, %v4680_v23, %v4764_v59  ;;  %v4384_v23 = vadd.f32 %v4271_v35, %v15107_v37 }
 0x4e3   : > { %v3654_v30 = vpop.f32.mrf.mxu3  ;;  %v4267_v60 = vpop.permute.xlu0 %4266  ;;  %v5142_v29 = vmul.f32 %v13104_v39, %v4806_v18 }
 0x4e4   : > { %v3655_v11 = vadd.f32 %v3654_v30, %v14900_v45  ;;  %v13105_v45 = vunpack.i.h.bf16 %v15076_v4  ;;  %v15344_v0 = vpop.f32.mrf.mxu0  ;;  %v4523_v62 = vpop.permute.xlu2 %4522 }
 0x4e5   : > { %v5184_v44 = vpack.c.bf16 %v5142_v29, %v5142_v29  ;;  %v4636_v18 = vadd.f32 %v4523_v62, %v4384_v23 }
 0x4e6   : > { %v15332_v58 = vadd.f32 %v15263_v1, %v3655_v11  ;;  %v4382_v1 = vadd.f32 %v4267_v60, %v15074_v5  ;;  %v5143_v9 = vmul.f32 %v13105_v45, %v4807_v3 }
 0x4e8   : > { %4102 = vst.msk [vmem:[#allocation3 + $0xd8] sm:$0xff] %vm1581_vm2, %v15332_v58  ;;  %v4187_v41 = vld [vmem:[#allocation3 + $0xcf] sm:$0xff]  ;;  %v5185_v5 = vpack.c.bf16 %v5143_v9, %v5143_v9 }
 0x4e9   : > { %4145 = vst.msk [vmem:[#allocation3 + $0xd8] sm:$0xff] %vm1632_vm3, %v15332_v58  ;;  %5276 = vrot.lane.b32.xlu2 %v5184_v44, %s13467_s24  ;;  %4296 = vrot.lane.b32.xlu0 %v4187_v41, %s13464_s28  ;;  %v4438_v54 = vld [vmem:[#allocation3 + $0xc9] sm:$0xff] }
 0x4ea   : > { %4544 = vrot.lane.b32.xlu1 %v4437_v22, %s13465_s29 }
 0x4eb   : > { %v3656_v33 = vpop.f32.mrf.mxu3  ;;  %v4269_v6 = vpop.permute.xlu1 %4268 }
 0x4ec   : > { %v3657_v16 = vadd.f32 %v3656_v33, %v14907_v57  ;;  %v4519_v20 = vpop.permute.xlu0 %4518  ;;  %v4383_v38 = vadd.f32 %v4269_v6, %v15090_v25  ;;  %v15365_v11 = vpop.f32.mrf.mxu0 }
 0x4ed   : > { %v4634_v48 = vadd.f32 %v4519_v20, %v4382_v1 }
 0x4ee   : > { %v15347_v61 = vadd.f32 %v15282_v43, %v3657_v16  ;;  %v13109_v43 = vunpack.i.l.bf16 %v15029_v17 }
 0x4ef   : > { %v4682_v2 = vadd.f32 %v14999_v19, %v4634_v48 }
 0x4f0   : > { %4103 = vst.msk [vmem:[#allocation3 + $0xe0] sm:$0xff] %vm1581_vm2, %v15347_v61  ;;  %v4188_v4 = vld [vmem:[#allocation3 + $0xd7] sm:$0xff] }
 0x4f1   : > { %4146 = vst.msk [vmem:[#allocation3 + $0xe0] sm:$0xff] %vm1632_vm3, %v15347_v61  ;;  %vm4724_vm15 = vcmp.gt.f32.partialorder %v4682_v2, 0.0  ;;  %v4766_v57 = vmul.f32 0.2, %v4682_v2  ;;  %4546 = vrot.lane.b32.xlu2 %v4438_v54, %s13465_s29  ;;  %5278 = vrot.lane.b32.xlu0 %v5185_v5, %s13467_s24 }
 0x4f2   : > { %4298 = vrot.lane.b32.xlu1 %v4188_v4, %s13464_s28 }
 0x4f3   : > { %v4808_v26 = vsel %vm4724_vm15, %v4682_v2, %v4766_v57  ;;  %v3659_v59 = vpop.f32.mrf.mxu3  ;;  %v4521_v10 = vpop.permute.xlu1 %4520 }
 0x4f4   : > { %v3660_v39 = vadd.f32 %v3659_v59, %v14911_v50  ;;  %v4635_v27 = vadd.f32 %v4521_v10, %v4383_v38  ;;  %v5144_v47 = vmul.f32 %v13109_v43, %v4808_v26  ;;  %v4684_v50 = vadd.f32 %v14999_v19, %v4636_v18  ;;  %v4277_v35 = vpop.permute.xlu2 %4276  ;;  %v4009_v9 = vpop.f32.mrf.mxu0 }
 0x4f6   : > { %v15362_v30 = vadd.f32 %v15305_v56, %v3660_v39  ;;  %v4683_v60 = vadd.f32 %v14999_v19, %v4635_v27  ;;  %v5186_v29 = vpack.c.bf16 %v5144_v47, %v5144_v47  ;;  %v4439_v56 = vld [vmem:[#allocation3 + $0xd1] sm:$0xff]  ;;  %v4768_v17 = vmul.f32 0.2, %v4684_v50 }
 0x4f7   : > { %vm4726_vm9 = vcmp.gt.f32.partialorder %v4684_v50, 0.0  ;;  %v4387_v39 = vadd.f32 %v4277_v35, %v15154_v28  ;;  %v13119_v35 = vunpack.i.l.bf16 %v15099_v13 }
 0x4f8   : > { %4104 = vst.msk [vmem:[#allocation3 + $0xe8] sm:$0xff] %vm1581_vm2, %v15362_v30  ;;  %vm4725_vm8 = vcmp.gt.f32.partialorder %v4683_v60, 0.0  ;;  %v4767_v25 = vmul.f32 0.2, %v4683_v60  ;;  %v4189_v37 = vld [vmem:[#allocation3 + $0xdf] sm:$0xff]  ;;  %v4810_v20 = vsel %vm4726_vm9, %v4684_v50, %v4768_v17 }
 0x4f9   : > { %4147 = vst.msk [vmem:[#allocation3 + $0xe8] sm:$0xff] %vm1632_vm3, %v15362_v30  ;;  %4300 = vrot.lane.b32.xlu2 %v4189_v37, %s13464_s28  ;;  %4548 = vrot.lane.b32.xlu0 %v4439_v56, %s13465_s29  ;;  %v4440_v6 = vld [vmem:[#allocation3 + $0xd9] sm:$0xff] }
 0x4fa   : > { %5280 = vrot.lane.b32.xlu1 %v5186_v29, %s13467_s24  ;;  %v4809_v44 = vsel %vm4725_vm8, %v4683_v60, %v4767_v25 }
 0x4fb   : > { %v3661_v22 = vpop.f32.mrf.mxu3  ;;  %v4273_v41 = vpop.permute.xlu0 %4272  ;;  %v5145_v3 = vmul.f32 %v13110_v36, %v4809_v44 }
 0x4fc   : > { %v3662_v45 = vadd.f32 %v3661_v22, %v14917_v24  ;;  %v13114_v24 = vunpack.i.l.bf16 %v15084_v40  ;;  %v4529_v4 = vpop.permute.xlu2 %4528  ;;  %v4011_v60 = vpop.f32.mrf.mxu0 }
 0x4fd   : > { %v5187_v33 = vpack.c.bf16 %v5145_v3, %v5145_v3  ;;  %v4639_v50 = vadd.f32 %v4529_v4, %v4387_v39 }
 0x4fe   : > { %v15378_v1 = vadd.f32 %v15328_v21, %v3662_v45  ;;  %v4385_v21 = vadd.f32 %v4273_v41, %v15121_v15  ;;  %v5146_v57 = vmul.f32 %v13114_v24, %v4810_v20 }
 0x500   : > { %4105 = vst.msk [vmem:[#allocation3 + $0xf0] sm:$0xff] %vm1581_vm2, %v15378_v1  ;;  %v4190_v16 = vld [vmem:[#allocation3 + $0xe7] sm:$0xff]  ;;  %v5188_v59 = vpack.c.bf16 %v5146_v57, %v5146_v57 }
 0x501   : > { %4148 = vst.msk [vmem:[#allocation3 + $0xf0] sm:$0xff] %vm1632_vm3, %v15378_v1  ;;  %5282 = vrot.lane.b32.xlu2 %v5187_v33, %s13467_s24  ;;  %4302 = vrot.lane.b32.xlu0 %v4190_v16, %s13464_s28  ;;  %v4441_v26 = vld [vmem:[#allocation3 + $0xe1] sm:$0xff] }
 0x502   : > { %4550 = vrot.lane.b32.xlu1 %v4440_v6, %s13465_s29 }
 0x503   : > { %v3664_v48 = vpop.f32.mrf.mxu3  ;;  %v4275_v2 = vpop.permute.xlu1 %4274 }
 0x504   : > { %v3665_v54 = vadd.f32 %v3664_v48, %v14923_v49  ;;  %v4525_v5 = vpop.permute.xlu0 %4524  ;;  %v11393_v49 = vld [vmem:[%s17564_s3] sm:$0xff]  ;;  %v4386_v10 = vadd.f32 %v4275_v2, %v15140_v8  ;;  %v4014_v16 = vpop.f32.mrf.mxu0 }
 0x505   : > { %v4637_v43 = vadd.f32 %v4525_v5, %v4385_v21  ;;  %5830 = vmatpush.bf16.msrb.mxu2 %v11393_v49 }
 0x506   : > { %v15391_v62 = vadd.f32 %v15344_v0, %v3665_v54  ;;  %v13115_v0 = vunpack.i.h.bf16 %v15084_v40 }
 0x507   : > { %v4685_v38 = vadd.f32 %v14999_v19, %v4637_v43 }
 0x508   : > { %4106 = vst.msk [vmem:[#allocation3 + $0xf8] sm:$0xff] %vm1581_vm2, %v15391_v62  ;;  %v4191_v23 = vld [vmem:[#allocation3 + $0xef] sm:$0xff] }
 0x509   : > { %4149 = vst.msk [vmem:[#allocation3 + $0xf8] sm:$0xff] %vm1632_vm3, %v15391_v62  ;;  %vm4727_vm10 = vcmp.gt.f32.partialorder %v4685_v38, 0.0  ;;  %v4769_v15 = vmul.f32 0.2, %v4685_v38  ;;  %4552 = vrot.lane.b32.xlu2 %v4441_v26, %s13465_s29  ;;  %5284 = vrot.lane.b32.xlu0 %v5188_v59, %s13467_s24 }
 0x50a   : > { %4304 = vrot.lane.b32.xlu1 %v4191_v23, %s13464_s28 }
 0x50b   : > { %v4811_v27 = vsel %vm4727_vm10, %v4685_v38, %v4769_v15  ;;  %v3666_v47 = vpop.f32.mrf.mxu3  ;;  %v4527_v18 = vpop.permute.xlu1 %4526  ;;  %v11397_v38 = vld [vmem:[%s17564_s3 + $0x18] sm:$0xff] }
 0x50c   : > { %v3667_v29 = vadd.f32 %v3666_v47, %v14925_v31  ;;  %v4638_v25 = vadd.f32 %v4527_v18, %v4386_v10  ;;  %v4283_v37 = vpop.permute.xlu2 %4282  ;;  %v5147_v36 = vmul.f32 %v13115_v0, %v4811_v27  ;;  %v4687_v31 = vadd.f32 %v14999_v19, %v4639_v50  ;;  %5640 = vmatpush.bf16.msra.mxu1 %v11397_v38  ;;  %v4016_v26 = vpop.f32.mrf.mxu0 }
 0x50d   : > { %v4390_v49 = vadd.f32 %v4283_v37, %v15200_v42 }
 0x50e   : > { %v15409_v56 = vadd.f32 %v15365_v11, %v3667_v29  ;;  %v4686_v8 = vadd.f32 %v14999_v19, %v4638_v25  ;;  %v5189_v40 = vpack.c.bf16 %v5147_v36, %v5147_v36  ;;  %v4442_v11 = vld [vmem:[#allocation3 + $0xe9] sm:$0xff]  ;;  %v4771_v6 = vmul.f32 0.2, %v4687_v31 }
 0x50f   : > { %vm4729_vm12 = vcmp.gt.f32.partialorder %v4687_v31, 0.0 }
 0x510   : > { %4107 = vst.msk [vmem:[#allocation3 + $0x100] sm:$0xff] %vm1581_vm2, %v15409_v56  ;;  %vm4728_vm11 = vcmp.gt.f32.partialorder %v4686_v8, 0.0  ;;  %v4770_v28 = vmul.f32 0.2, %v4686_v8  ;;  %v4192_v44 = vld [vmem:[#allocation3 + $0xf7] sm:$0xff]  ;;  %v4813_v2 = vsel %vm4729_vm12, %v4687_v31, %v4771_v6 }
 0x511   : > { %4150 = vst.msk [vmem:[#allocation3 + $0x100] sm:$0xff] %vm1632_vm3, %v15409_v56  ;;  %4306 = vrot.lane.b32.xlu2 %v4192_v44, %s13464_s28  ;;  %4554 = vrot.lane.b32.xlu0 %v4442_v11, %s13465_s29  ;;  %v4443_v21 = vld [vmem:[#allocation3 + $0xf1] sm:$0xff] }
 0x512   : > { %5286 = vrot.lane.b32.xlu1 %v5189_v40, %s13467_s24  ;;  %v4812_v22 = vsel %vm4728_vm11, %v4686_v8, %v4770_v28  ;;  %v17667_v8 = vld [vmem:[#allocation17_spill] sm:$0xff]  ;;  %v17668_v28 = vld [vmem:[#allocation24_spill] sm:$0xff] }
 0x513   : > { %v3669_v41 = vpop.f32.mrf.mxu3  ;;  %v4279_v3 = vpop.permute.xlu0 %4278  ;;  %v5148_v45 = vmul.f32 %v13119_v35, %v4812_v22  ;;  %v13124_v40 = vunpack.i.l.bf16 %v17667_v8 }
 0x514   : > { %v3670_v17 = vadd.f32 %v3669_v41, %v14928_v32  ;;  %v5265_v33 = vpop.permute.xlu2 %5264  ;;  %v13120_v32 = vunpack.i.h.bf16 %v15099_v13  ;;  %v4388_v0 = vadd.f32 %v4279_v3, %v15172_v12  ;;  %v4019_v50 = vpop.f32.mrf.mxu0  ;;  %v17669_v41 = vld [vmem:[#allocation4_spill] sm:$0xff] }
 0x515   : > { %5389 = vst.msk [vmem:[#allocation2 + $0x20] sm:$0xf] %vm5386_vm13, %v5265_v33  ;;  %v5190_v24 = vpack.c.bf16 %v5148_v45, %v5148_v45 }
 0x516   : > { %v15423_v20 = vadd.f32 %v4009_v9, %v3670_v17  ;;  %v5149_v43 = vmul.f32 %v13120_v32, %v4813_v2 }
 0x518   : > { %4108 = vst.msk [vmem:[#allocation3 + $0x108] sm:$0xff] %vm1581_vm2, %v15423_v20  ;;  %v4193_v48 = vld [vmem:[#allocation3 + $0xff] sm:$0xff]  ;;  %v5191_v15 = vpack.c.bf16 %v5149_v43, %v5149_v43 }
 0x519   : > { %4151 = vst.msk [vmem:[#allocation3 + $0x108] sm:$0xff] %vm1632_vm3, %v15423_v20  ;;  %5288 = vrot.lane.b32.xlu2 %v5190_v24, %s13467_s24  ;;  %4308 = vrot.lane.b32.xlu0 %v4193_v48, %s13464_s28  ;;  %v4444_v59 = vld [vmem:[#allocation3 + $0xf9] sm:$0xff] }
 0x51a   : > { %4556 = vrot.lane.b32.xlu1 %v4443_v21, %s13465_s29 }
 0x51b   : > { %v3671_v9 = vpop.f32.mrf.mxu3  ;;  %v5261_v5 = vpop.permute.xlu0 %5260 }
 0x51c   : > { %v4281_v4 = vpop.permute.xlu1 %4280  ;;  %v3672_v54 = vadd.f32 %v3671_v9, %v14931_v52  ;;  %v4535_v57 = vpop.permute.xlu2 %4534  ;;  %5387 = vst.msk [vmem:[#allocation2 + $0x18] sm:$0xf] %vm5386_vm13, %v5261_v5  ;;  %v11396_v52 = vld [vmem:[%s17564_s3 + $0x10] sm:$0xff]  ;;  %v13125_v9 = vunpack.i.h.bf16 %v17667_v8 }
 0x51d   : > { %5641 = vmatpush.bf16.msra.mxu1 %v11396_v52  ;;  %v4389_v44 = vadd.f32 %v4281_v4, %v17668_v28 }
 0x51e   : > { %v15438_v23 = vadd.f32 %v4011_v60, %v3672_v54  ;;  %v4642_v60 = vadd.f32 %v4535_v57, %v4390_v49  ;;  %v17670_v54 = vld [vmem:[#allocation8_spill] sm:$0xff]  ;;  %v4021_v57 = vpop.f32.mrf.mxu0 }
 0x51f   : > { %v13129_v5 = vunpack.i.l.bf16 %v17670_v54 }
 0x520   : > { %4109 = vst.msk [vmem:[#allocation3 + $0x110] sm:$0xff] %vm1581_vm2, %v15438_v23  ;;  %v4194_v13 = vld [vmem:[#allocation3 + $0x107] sm:$0xff]  ;;  %v4690_v12 = vadd.f32 %v14999_v19, %v4642_v60 }
 0x521   : > { %4152 = vst.msk [vmem:[#allocation3 + $0x110] sm:$0xff] %vm1632_vm3, %v15438_v23  ;;  %4558 = vrot.lane.b32.xlu2 %v4444_v59, %s13465_s29  ;;  %5290 = vrot.lane.b32.xlu0 %v5191_v15, %s13467_s24  ;;  %v4445_v37 = vld [vmem:[#allocation3 + $0x101] sm:$0xff]  ;;  %v11417_v59 = vld [vmem:[%s17564_s3 + $0x28] sm:$0xff]  ;;  %v17671_v15 = vld [vmem:[#allocation5_spill] sm:$0xff] }
 0x522   : > { %4310 = vrot.lane.b32.xlu1 %v4194_v13, %s13464_s28  ;;  %vm4732_vm15 = vcmp.gt.f32.partialorder %v4690_v12, 0.0  ;;  %6125 = vmatpush.bf16.msrb.mxu1 %v11417_v59 }
 0x523   : > { %v3674_v10 = vpop.f32.mrf.mxu3  ;;  %v4531_v47 = vpop.permute.xlu0 %4530 }
 0x524   : > { %v5263_v39 = vpop.permute.xlu1 %5262  ;;  %v3675_v27 = vadd.f32 %v3674_v10, %v14933_v14  ;;  %v15454_v18 = vpop.permute.xlu2 %4288  ;;  %v4640_v29 = vadd.f32 %v4531_v47, %v4388_v0 }
 0x525   : > { %5388 = vst.msk [vmem:[#allocation2 + $0x1c] sm:$0xf] %vm5386_vm13, %v5263_v39 }
 0x526   : > { %v15456_v25 = vadd.f32 %v4014_v16, %v3675_v27  ;;  %v4688_v36 = vadd.f32 %v14999_v19, %v4640_v29  ;;  %v4774_v16 = vmul.f32 0.2, %v4690_v12  ;;  %v4393_v29 = vadd.f32 %v15454_v18, %v15248_v51 }
 0x528   : > { %4110 = vst.msk [vmem:[#allocation3 + $0x118] sm:$0xff] %vm1581_vm2, %v15456_v25  ;;  %v4195_v42 = vld [vmem:[#allocation3 + $0x10f] sm:$0xff]  ;;  %vm4730_vm14 = vcmp.gt.f32.partialorder %v4688_v36, 0.0  ;;  %v4772_v14 = vmul.f32 0.2, %v4688_v36  ;;  %v4816_v4 = vsel %vm4732_vm15, %v4690_v12, %v4774_v16  ;;  %v17672_v12 = vld [vmem:[#allocation6_spill] sm:$0xff] }
 0x529   : > { %4153 = vst.msk [vmem:[#allocation3 + $0x118] sm:$0xff] %vm1632_vm3, %v15456_v25  ;;  %4312 = vrot.lane.b32.xlu2 %v4195_v42, %s13464_s28  ;;  %4560 = vrot.lane.b32.xlu0 %v4445_v37, %s13465_s29  ;;  %v5152_v10 = vmul.f32 %v13129_v5, %v4816_v4  ;;  %v4446_v47 = vld [vmem:[#allocation3 + $0x109] sm:$0xff] }
 0x52a   : > { %v4814_v35 = vsel %vm4730_vm14, %v4688_v36, %v4772_v14 }
 0x52b   : > { %v3676_v31 = vpop.f32.mrf.mxu3  ;;  %v4285_v17 = vpop.permute.xlu0 %4284  ;;  %v5150_v6 = vmul.f32 %v13124_v40, %v4814_v35  ;;  %v5194_v60 = vpack.c.bf16 %v5152_v10, %v5152_v10 }
 0x52c   : > { %v4533_v11 = vpop.permute.xlu1 %4532  ;;  %v11392_v22 = vld [vmem:[#allocation2 + $0x18] sm:$0xff]  ;;  %v3677_v3 = vadd.f32 %v3676_v31, %v17669_v41  ;;  %v5271_v33 = vpop.permute.xlu2 %5270  ;;  %v4391_v36 = vadd.f32 %v4285_v17, %v15216_v55  ;;  %v13130_v17 = vunpack.i.h.bf16 %v17670_v54 }
 0x52d   : > { %v4641_v45 = vadd.f32 %v4533_v11, %v4389_v44  ;;  %5392 = vst.msk [vmem:[#allocation2 + $0x2c] sm:$0xf] %vm5386_vm13, %v5271_v33  ;;  %10928 = vmatmul.msk.bf16.vlgmr.msrb.gmra.mxu2 %vm5579_vm4, %v11392_v22  ;;  %v5192_v48 = vpack.c.bf16 %v5150_v6, %v5150_v6  ;;  %v4024_v35 = vpop.f32.mrf.mxu0  ;;  %v17673_v6 = vmov 0.0  }
 0x52e   : > { %v15471_v24 = vadd.f32 %v4016_v26, %v3677_v3 }
 0x52f   : > { %v4689_v21 = vadd.f32 %v14999_v19, %v4641_v45  ;;  %5292 = vrot.lane.b32.xlu1 %v5192_v48, %s13467_s24 }
 0x530   : > { %4111 = vst.msk [vmem:[#allocation3 + $0x120] sm:$0xff] %vm1581_vm2, %v15471_v24  ;;  %v4196_v32 = vld [vmem:[#allocation3 + $0x117] sm:$0xff] }
 0x531   : > { %vm4731_vm8 = vcmp.gt.f32.partialorder %v4689_v21, 0.0  ;;  %v4773_v2 = vmul.f32 0.2, %v4689_v21  ;;  %4154 = vst.msk [vmem:[#allocation3 + $0x120] sm:$0xff] %vm1632_vm3, %v15471_v24  ;;  %4314 = vrot.lane.b32.xlu0 %v4196_v32, %s13464_s28  ;;  %v4447_v51 = vld [vmem:[#allocation3 + $0x111] sm:$0xff]  ;;  %v17674_v32 = vld [vmem:[#allocation10_spill] sm:$0xff] }
 0x533   : > { %v4815_v43 = vsel %vm4731_vm8, %v4689_v21, %v4773_v2  ;;  %v3679_v38 = vpop.f32.mrf.mxu3  ;;  %v5267_v49 = vpop.permute.xlu0 %5266 }
 0x534   : > { %v4287_v26 = vpop.permute.xlu1 %4286  ;;  %v5151_v13 = vmul.f32 %v13125_v9, %v4815_v43  ;;  %v3680_v52 = vadd.f32 %v3679_v38, %v17671_v15  ;;  %v4541_v0 = vpop.permute.xlu2 %4540  ;;  %5390 = vst.msk [vmem:[#allocation2 + $0x24] sm:$0xf] %vm5386_vm13, %v5267_v49 }
 0x535   : > { %v4645_v28 = vadd.f32 %v4541_v0, %v4393_v29  ;;  %v4392_v33 = vadd.f32 %v4287_v26, %v15233_v7 }
 0x536   : > { %v5193_v39 = vpack.c.bf16 %v5151_v13, %v5151_v13  ;;  %v15487_v27 = vadd.f32 %v4019_v50, %v3680_v52  ;;  %v4026_v13 = vpop.f32.mrf.mxu0  ;;  %v17675_v52 = vld [vmem:[#allocation19_spill] sm:$0xff] }
 0x537   : > { %4562 = vrot.lane.b32.xlu1 %v4446_v47, %s13465_s29  ;;  %v4693_v22 = vadd.f32 %v14999_v19, %v4645_v28  ;;  %v13134_v49 = vunpack.i.l.bf16 %v17675_v52  ;;  %v13135_v10 = vunpack.i.h.bf16 %v17675_v52 }
 0x538   : > { %5294 = vrot.lane.b32.xlu2 %v5193_v39, %s13467_s24  ;;  %4112 = vst.msk [vmem:[#allocation3 + $0x128] sm:$0xff] %vm1581_vm2, %v15487_v27  ;;  %v4197_v18 = vld [vmem:[#allocation3 + $0x11f] sm:$0xff] }
 0x539   : > { %4155 = vst.msk [vmem:[#allocation3 + $0x128] sm:$0xff] %vm1632_vm3, %v15487_v27  ;;  %5296 = vrot.lane.b32.xlu0 %v5194_v60, %s13467_s24  ;;  %v4448_v11 = vld [vmem:[#allocation3 + $0x119] sm:$0xff]  ;;  %v4777_v38 = vmul.f32 0.2, %v4693_v22  ;;  %vm4735_vm10 = vcmp.gt.f32.partialorder %v4693_v22, 0.0 }
 0x53b   : > { %v3681_v50 = vpop.f32.mrf.mxu3  ;;  %v4537_v37 = vpop.permute.xlu0 %4536  ;;  %v12334_v40 = vld [vmem:[#allocation2 + $0x20] sm:$0xff]   ;;  %v4819_v0 = vsel %vm4735_vm10, %v4693_v22, %v4777_v38 }
 0x53c   : > { %v5269_v42 = vpop.permute.xlu1 %5268  ;;  %v3682_v14 = vadd.f32 %v3681_v50, %v17672_v12  ;;  %v15501_v8 = vpop.permute.xlu2 %4294  ;;  %v4643_v44 = vadd.f32 %v4537_v37, %v4391_v36  ;;  %v17676_v36 = vld [vmem:[#allocation7_spill] sm:$0xff]  ;;  %v5155_v37 = vmul.f32 %v13135_v10, %v4819_v0 }
 0x53d   : > { %5391 = vst.msk [vmem:[#allocation2 + $0x28] sm:$0xf] %vm5386_vm13, %v5269_v42  ;;  %10929 = vmatmul.msk.bf16.gmra.mxu2 %vm5579_vm4, %v12334_v40  ;;  %v17677_v22 = vld [vmem:[#allocation15_spill] sm:$0xff] }
 0x53e   : > { %v15504_v31 = vadd.f32 %v4021_v57, %v3682_v14  ;;  %v4691_v55 = vadd.f32 %v14999_v19, %v4643_v44  ;;  %v5197_v44 = vpack.c.bf16 %v5155_v37, %v5155_v37 }
 0x53f   : > { %4316 = vrot.lane.b32.xlu1 %v4197_v18, %s13464_s28 }
 0x540   : > { %4564 = vrot.lane.b32.xlu2 %v4447_v51, %s13465_s29  ;;  %4113 = vst.msk [vmem:[#allocation3 + $0x130] sm:$0xff] %vm1581_vm2, %v15504_v31  ;;  %vm4733_vm9 = vcmp.gt.f32.partialorder %v4691_v55, 0.0  ;;  %v4775_v41 = vmul.f32 0.2, %v4691_v55  ;;  %v4198_v3 = vld [vmem:[#allocation3 + $0x127] sm:$0xff]  ;;  %v4396_v51 = vadd.f32 %v15501_v8, %v15296_v53 }
 0x541   : > { %4156 = vst.msk [vmem:[#allocation3 + $0x130] sm:$0xff] %vm1632_vm3, %v15504_v31  ;;  %v4449_v45 = vld [vmem:[#allocation3 + $0x121] sm:$0xff]  ;;  %4566 = vrot.lane.b32.xlu0 %v4448_v11, %s13465_s29 }
 0x542   : > { %6327 = vst.msk [vmem:[#allocation3 + $0x128] sm:$0x1] %vm1681_vm7, %v17673_v6  ;;  %v4817_v16 = vsel %vm4733_vm9, %v4691_v55, %v4775_v41 }
 0x543   : > { %v3684_v21 = vpop.f32.mrf.mxu3  ;;  %v4291_v5 = vpop.permute.xlu0 %4290  ;;  %v5153_v43 = vmul.f32 %v13130_v17, %v4817_v16 }
 0x544   : > { %v4539_v48 = vpop.permute.xlu1 %4538  ;;  %v12853_v2 = vld [vmem:[#allocation2 + $0x24] sm:$0xff]   ;;  %v3685_v9 = vadd.f32 %v3684_v21, %v17674_v32  ;;  %v5277_v57 = vpop.permute.xlu2 %5276  ;;  %v4394_v55 = vadd.f32 %v4291_v5, %v15266_v46 }
 0x545   : > { %v4644_v4 = vadd.f32 %v4539_v48, %v4392_v33  ;;  %5395 = vst.msk [vmem:[#allocation2 + $0x38] sm:$0xf] %vm5386_vm13, %v5277_v57  ;;  %10898 = vmatmul.msk.bf16.vlgmr.msra.gmra.mxu1 %vm5579_vm4, %v12853_v2  ;;  %v5195_v26 = vpack.c.bf16 %v5153_v43, %v5153_v43  ;;  %v12335_v14 = vld [vmem:[#allocation2 + $0x28] sm:$0xff]  }
 0x546   : > { %v15522_v7 = vadd.f32 %v4024_v35, %v3685_v9  ;;  %v4029_v35 = vpop.f32.mrf.mxu0  ;;  %v17678_v9 = vld [vmem:[#allocation11_spill] sm:$0xff] }
 0x547   : > { %v4692_v54 = vadd.f32 %v14999_v19, %v4644_v4  ;;  %5298 = vrot.lane.b32.xlu1 %v5195_v26, %s13467_s24  ;;  %v13139_v4 = vunpack.i.l.bf16 %v17678_v9  ;;  %v17679_v26 = vld [vmem:[#allocation13_spill] sm:$0xff] }
 0x548   : > { %4318 = vrot.lane.b32.xlu2 %v4198_v3, %s13464_s28  ;;  %4114 = vst.msk [vmem:[#allocation3 + $0x138] sm:$0xff] %vm1581_vm2, %v15522_v7  ;;  %v4199_v15 = vld [vmem:[#allocation3 + $0x12f] sm:$0xff] }
 0x549   : > { %vm4734_vm11 = vcmp.gt.f32.partialorder %v4692_v54, 0.0  ;;  %v4776_v59 = vmul.f32 0.2, %v4692_v54  ;;  %4157 = vst.msk [vmem:[#allocation3 + $0x138] sm:$0xff] %vm1632_vm3, %v15522_v7  ;;  %4320 = vrot.lane.b32.xlu0 %v4199_v15, %s13464_s28  ;;  %v4450_v48 = vld [vmem:[#allocation3 + $0x129] sm:$0xff] }
 0x54b   : > { %v4818_v39 = vsel %vm4734_vm11, %v4692_v54, %v4776_v59  ;;  %v3686_v47 = vpop.f32.mrf.mxu3  ;;  %v5273_v42 = vpop.permute.xlu0 %5272 }
 0x54c   : > { %v4293_v60 = vpop.permute.xlu1 %4292  ;;  %v5154_v29 = vmul.f32 %v13134_v49, %v4818_v39  ;;  %v3687_v50 = vadd.f32 %v3686_v47, %v17676_v36  ;;  %v4547_v12 = vpop.permute.xlu2 %4546  ;;  %5393 = vst.msk [vmem:[#allocation2 + $0x30] sm:$0xf] %vm5386_vm13, %v5273_v42 }
 0x54d   : > { %10930 = vmatmul.msk.bf16.gmra.mxu2 %vm5579_vm4, %v12335_v14  ;;  %v4648_v33 = vadd.f32 %v4547_v12, %v4396_v51  ;;  %v4395_v5 = vadd.f32 %v4293_v60, %v15280_v63  ;;  %v17680_v12 = vld [vmem:[#allocation9_spill] sm:$0xff] }
 0x54e   : > { %v5196_v40 = vpack.c.bf16 %v5154_v29, %v5154_v29  ;;  %v15537_v28 = vadd.f32 %v4026_v13, %v3687_v50  ;;  %v4031_v0 = vpop.f32.mrf.mxu0  ;;  %v13140_v50 = vunpack.i.h.bf16 %v17678_v9  ;;  %v13144_v14 = vunpack.i.l.bf16 %v17680_v12 }
 0x54f   : > { %4568 = vrot.lane.b32.xlu1 %v4449_v45, %s13465_s29  ;;  %v4696_v8 = vadd.f32 %v14999_v19, %v4648_v33 }
 0x550   : > { %5300 = vrot.lane.b32.xlu2 %v5196_v40, %s13467_s24  ;;  %4115 = vst.msk [vmem:[#allocation3 + $0x140] sm:$0xff] %vm1581_vm2, %v15537_v28  ;;  %v4200_v46 = vld [vmem:[#allocation3 + $0x137] sm:$0xff] }
 0x551   : > { %4158 = vst.msk [vmem:[#allocation3 + $0x140] sm:$0xff] %vm1632_vm3, %v15537_v28  ;;  %5302 = vrot.lane.b32.xlu0 %v5197_v44, %s13467_s24  ;;  %v4451_v32 = vld [vmem:[#allocation3 + $0x131] sm:$0xff]  ;;  %v4780_v10 = vmul.f32 0.2, %v4696_v8  ;;  %vm4738_vm14 = vcmp.gt.f32.partialorder %v4696_v8, 0.0 }
 0x553   : > { %v3689_v18 = vpop.f32.mrf.mxu3  ;;  %v4543_v3 = vpop.permute.xlu0 %4542  ;;  %v12855_v17 = vld [vmem:[#allocation2 + $0x2c] sm:$0xff]   ;;  %v4822_v42 = vsel %vm4738_vm14, %v4696_v8, %v4780_v10 }
 0x554   : > { %v5275_v11 = vpop.permute.xlu1 %5274  ;;  %v3690_v41 = vadd.f32 %v3689_v18, %v17677_v22  ;;  %v4301_v45 = vpop.permute.xlu2 %4300  ;;  %v4646_v16 = vadd.f32 %v4543_v3, %v4394_v55 }
 0x555   : > { %5394 = vst.msk [vmem:[#allocation2 + $0x34] sm:$0xf] %vm5386_vm13, %v5275_v11  ;;  %10899 = vmatmul.msk.bf16.gmra.mxu1 %vm5579_vm4, %v12855_v17  ;;  %v4399_v40 = vadd.f32 %v4301_v45, %v15347_v61  ;;  %v5158_v11 = vmul.f32 %v13144_v14, %v4822_v42 }
 0x556   : > { %v15551_v21 = vadd.f32 %v4029_v35, %v3690_v41  ;;  %v4694_v53 = vadd.f32 %v14999_v19, %v4646_v16 }
 0x557   : > { %4322 = vrot.lane.b32.xlu1 %v4200_v46, %s13464_s28  ;;  %v5200_v17 = vpack.c.bf16 %v5158_v11, %v5158_v11 }
 0x558   : > { %4570 = vrot.lane.b32.xlu2 %v4450_v48, %s13465_s29  ;;  %4116 = vst.msk [vmem:[#allocation3 + $0x148] sm:$0xff] %vm1581_vm2, %v15551_v21  ;;  %vm4736_vm12 = vcmp.gt.f32.partialorder %v4694_v53, 0.0  ;;  %v4778_v2 = vmul.f32 0.2, %v4694_v53  ;;  %v4201_v47 = vld [vmem:[#allocation3 + $0x13f] sm:$0xff] }
 0x559   : > { %4159 = vst.msk [vmem:[#allocation3 + $0x148] sm:$0xff] %vm1632_vm3, %v15551_v21  ;;  %4572 = vrot.lane.b32.xlu0 %v4451_v32, %s13465_s29  ;;  %v4452_v3 = vld [vmem:[#allocation3 + $0x139] sm:$0xff] }
 0x55a   : > { %v4820_v57 = vsel %vm4736_vm12, %v4694_v53, %v4778_v2 }
 0x55b   : > { %v3691_v43 = vpop.f32.mrf.mxu3  ;;  %v4297_v15 = vpop.permute.xlu0 %4296  ;;  %v5156_v49 = vmul.f32 %v13139_v4, %v4820_v57 }
 0x55c   : > { %v4545_v38 = vpop.permute.xlu1 %4544  ;;  %v12336_v54 = vld [vmem:[#allocation2 + $0x30] sm:$0xff]   ;;  %v3692_v13 = vadd.f32 %v3691_v43, %v17679_v26  ;;  %v5283_v52 = vpop.permute.xlu2 %5282  ;;  %v4397_v45 = vadd.f32 %v4297_v15, %v15316_v34 }
 0x55d   : > { %v4647_v59 = vadd.f32 %v4545_v38, %v4395_v5  ;;  %5398 = vst.msk [vmem:[#allocation2 + $0x44] sm:$0xf] %vm5386_vm13, %v5283_v52  ;;  %10931 = vmatmul.msk.bf16.gmra.mxu2 %vm5579_vm4, %v12336_v54  ;;  %v5198_v60 = vpack.c.bf16 %v5156_v49, %v5156_v49  ;;  %v12857_v18 = vld [vmem:[#allocation2 + $0x34] sm:$0xff]  }
 0x55e   : > { %v15568_v63 = vadd.f32 %v4031_v0, %v3692_v13  ;;  %v17681_v5 = vld [vmem:[#allocation18_spill] sm:$0xff] }
 0x55f   : > { %v4695_v39 = vadd.f32 %v14999_v19, %v4647_v59  ;;  %5304 = vrot.lane.b32.xlu1 %v5198_v60, %s13467_s24  ;;  %v13150_v57 = vunpack.i.h.bf16 %v17681_v5  ;;  %v13149_v60 = vunpack.i.l.bf16 %v17681_v5 }
 0x560   : > { %4324 = vrot.lane.b32.xlu2 %v4201_v47, %s13464_s28  ;;  %4117 = vst.msk [vmem:[#allocation3 + $0x150] sm:$0xff] %vm1581_vm2, %v15568_v63  ;;  %v4202_v36 = vld [vmem:[#allocation3 + $0x147] sm:$0xff] }
 0x561   : > { %vm4737_vm15 = vcmp.gt.f32.partialorder %v4695_v39, 0.0  ;;  %v4779_v29 = vmul.f32 0.2, %v4695_v39  ;;  %4160 = vst.msk [vmem:[#allocation3 + $0x150] sm:$0xff] %vm1632_vm3, %v15568_v63  ;;  %4326 = vrot.lane.b32.xlu0 %v4202_v36, %s13464_s28  ;;  %v4453_v2 = vld [vmem:[#allocation3 + $0x141] sm:$0xff] }
 0x563   : > { %v4821_v37 = vsel %vm4737_vm15, %v4695_v39, %v4779_v29  ;;  %v5279_v51 = vpop.permute.xlu0 %5278 }
 0x564   : > { %v4299_v44 = vpop.permute.xlu1 %4298  ;;  %v5157_v35 = vmul.f32 %v13140_v50, %v4821_v37  ;;  %v4553_v55 = vpop.permute.xlu2 %4552  ;;  %5396 = vst.msk [vmem:[#allocation2 + $0x3c] sm:$0xf] %vm5386_vm13, %v5279_v51 }
 0x565   : > { %v4651_v22 = vadd.f32 %v4553_v55, %v4399_v40  ;;  %10900 = vmatmul.msk.bf16.gmra.mxu1 %vm5579_vm4, %v12857_v18  ;;  %v4398_v43 = vadd.f32 %v4299_v44, %v15332_v58  ;;  %v13145_v58 = vunpack.i.h.bf16 %v17680_v12  ;;  %v17682_v18 = vld [vmem:[#allocation20_spill] sm:$0xff] }
 0x566   : > { %v5199_v41 = vpack.c.bf16 %v5157_v35, %v5157_v35  ;;  %v13159_v11 = vunpack.i.l.bf16 %v17682_v18 }
 0x567   : > { %4574 = vrot.lane.b32.xlu1 %v4452_v3, %s13465_s29  ;;  %v4699_v61 = vadd.f32 %v14999_v19, %v4651_v22 }
 0x568   : > { %5306 = vrot.lane.b32.xlu2 %v5199_v41, %s13467_s24  ;;  %v4203_v9 = vld [vmem:[#allocation3 + $0x14f] sm:$0xff] }
 0x569   : > { %5308 = vrot.lane.b32.xlu0 %v5200_v17, %s13467_s24  ;;  %v4783_v46 = vmul.f32 0.2, %v4699_v61  ;;  %vm4741_vm8 = vcmp.gt.f32.partialorder %v4699_v61, 0.0  ;;  %v4454_v4 = vld [vmem:[#allocation3 + $0x149] sm:$0xff]  ;;  %v4455_v10 = vld [vmem:[#allocation3 + $0x151] sm:$0xff] }
 0x56b   : > { %v4549_v16 = vpop.permute.xlu0 %4548  ;;  %v12337_v53 = vld [vmem:[#allocation2 + $0x38] sm:$0xff]   ;;  %v4825_v34 = vsel %vm4741_vm8, %v4699_v61, %v4783_v46 }
 0x56c   : > { %v5281_v33 = vpop.permute.xlu1 %5280  ;;  %v4307_v48 = vpop.permute.xlu2 %4306  ;;  %v4649_v8 = vadd.f32 %v4549_v16, %v4397_v45  ;;  %v5161_v52 = vmul.f32 %v13150_v57, %v4825_v34 }
 0x56d   : > { %5397 = vst.msk [vmem:[#allocation2 + $0x40] sm:$0xf] %vm5386_vm13, %v5281_v33  ;;  %10932 = vmatmul.msk.bf16.gmra.mxu2 %vm5579_vm4, %v12337_v53  ;;  %v4402_v50 = vadd.f32 %v4307_v48, %v15391_v62 }
 0x56e   : > { %v4697_v32 = vadd.f32 %v14999_v19, %v4649_v8  ;;  %v5203_v47 = vpack.c.bf16 %v5161_v52, %v5161_v52  ;;  %v17683_v8 = vld [vmem:[#allocation16_spill] sm:$0xff] }
 0x56f   : > { %4328 = vrot.lane.b32.xlu1 %v4203_v9, %s13464_s28 }
 0x570   : > { %4576 = vrot.lane.b32.xlu2 %v4453_v2, %s13465_s29  ;;  %v4781_v38 = vmul.f32 0.2, %v4697_v32  ;;  %vm4739_vm9 = vcmp.gt.f32.partialorder %v4697_v32, 0.0 }
 0x571   : > { %4578 = vrot.lane.b32.xlu0 %v4454_v4, %s13465_s29 }
 0x572   : > { %v4823_v0 = vsel %vm4739_vm9, %v4697_v32, %v4781_v38 }
 0x573   : > { %v4303_v59 = vpop.permute.xlu0 %4302  ;;  %v5159_v36 = vmul.f32 %v13145_v58, %v4823_v0 }
 0x574   : > { %v4551_v54 = vpop.permute.xlu1 %4550  ;;  %v12859_v26 = vld [vmem:[#allocation2 + $0x3c] sm:$0xff]   ;;  %v5289_v15 = vpop.permute.xlu2 %5288  ;;  %v4400_v22 = vadd.f32 %v4303_v59, %v15362_v30  ;;  %v13154_v30 = vunpack.i.l.bf16 %v17683_v8 }
 0x575   : > { %v4650_v13 = vadd.f32 %v4551_v54, %v4398_v43  ;;  %5401 = vst.msk [vmem:[#allocation2 + $0x50] sm:$0xf] %vm5386_vm13, %v5289_v15  ;;  %10901 = vmatmul.msk.bf16.gmra.mxu1 %vm5579_vm4, %v12859_v26  ;;  %v12338_v44 = vld [vmem:[#allocation2 + $0x40] sm:$0xff]   ;;  %v5201_v51 = vpack.c.bf16 %v5159_v36, %v5159_v36  ;;  %v13155_v26 = vunpack.i.h.bf16 %v17683_v8 }
 0x577   : > { %v4698_v49 = vadd.f32 %v14999_v19, %v4650_v13  ;;  %4580 = vrot.lane.b32.xlu1 %v4455_v10, %s13465_s29 }
 0x579   : > { %vm4740_vm10 = vcmp.gt.f32.partialorder %v4698_v49, 0.0  ;;  %v4782_v39 = vmul.f32 0.2, %v4698_v49  ;;  %5314 = vrot.lane.b32.xlu0 %v5203_v47, %s13467_s24 }
 0x57b   : > { %v4824_v29 = vsel %vm4740_vm10, %v4698_v49, %v4782_v39  ;;  %v5285_v37 = vpop.permute.xlu0 %5284 }
 0x57c   : > { %v4305_v42 = vpop.permute.xlu1 %4304  ;;  %v5160_v14 = vmul.f32 %v13149_v60, %v4824_v29  ;;  %v4559_v40 = vpop.permute.xlu2 %4558  ;;  %5399 = vst.msk [vmem:[#allocation2 + $0x48] sm:$0xf] %vm5386_vm13, %v5285_v37 }
 0x57d   : > { %v4654_v12 = vadd.f32 %v4559_v40, %v4402_v50  ;;  %10933 = vmatmul.msk.bf16.gmra.mxu2 %vm5579_vm4, %v12338_v44  ;;  %v4401_v2 = vadd.f32 %v4305_v42, %v15378_v1 }
 0x57e   : > { %v5202_v35 = vpack.c.bf16 %v5160_v14, %v5160_v14  ;;  %v17684_v14 = vld [vmem:[#allocation21_spill] sm:$0xff] }
 0x57f   : > { %v4702_v55 = vadd.f32 %v14999_v19, %v4654_v12  ;;  %5310 = vrot.lane.b32.xlu1 %v5201_v51, %s13467_s24  ;;  %v13165_v37 = vunpack.i.h.bf16 %v17684_v14 }
 0x580   : > { %5312 = vrot.lane.b32.xlu2 %v5202_v35, %s13467_s24 }
 0x581   : > { %vm4744_vm11 = vcmp.gt.f32.partialorder %v4702_v55, 0.0  ;;  %v4786_v62 = vmul.f32 0.2, %v4702_v55 }
 0x583   : > { %v4828_v41 = vsel %vm4744_vm11, %v4702_v55, %v4786_v62  ;;  %v4555_v17 = vpop.permute.xlu0 %4554  ;;  %v12861_v61 = vld [vmem:[#allocation2 + $0x44] sm:$0xff]  }
 0x584   : > { %v5287_v3 = vpop.permute.xlu1 %5286  ;;  %v5164_v45 = vmul.f32 %v13159_v11, %v4828_v41  ;;  %v4652_v33 = vadd.f32 %v4555_v17, %v4400_v22  ;;  %v4313_v46 = vpop.permute.xlu2 %4312 }
 0x585   : > { %5400 = vst.msk [vmem:[#allocation2 + $0x4c] sm:$0xf] %vm5386_vm13, %v5287_v3  ;;  %10902 = vmatmul.msk.bf16.gmra.mxu1 %vm5579_vm4, %v12861_v61  ;;  %v4405_v0 = vadd.f32 %v4313_v46, %v15438_v23 }
 0x586   : > { %v5206_v16 = vpack.c.bf16 %v5164_v45, %v5164_v45  ;;  %v4700_v48 = vadd.f32 %v14999_v19, %v4652_v33 }
 0x588   : > { %5320 = vrot.lane.b32.xlu0 %v5206_v16, %s13467_s24  ;;  %vm4742_vm12 = vcmp.gt.f32.partialorder %v4700_v48, 0.0  ;;  %v4784_v53 = vmul.f32 0.2, %v4700_v48 }
 0x58a   : > { %v4826_v32 = vsel %vm4742_vm12, %v4700_v48, %v4784_v53 }
 0x58b   : > { %v4309_v5 = vpop.permute.xlu0 %4308  ;;  %v5162_v57 = vmul.f32 %v13154_v30, %v4826_v32 }
 0x58c   : > { %v4557_v9 = vpop.permute.xlu1 %4556  ;;  %v12339_v34 = vld [vmem:[#allocation2 + $0x48] sm:$0xff]   ;;  %v4403_v47 = vadd.f32 %v4309_v5, %v15409_v56  ;;  %v13160_v56 = vunpack.i.h.bf16 %v17682_v18 }
 0x58d   : > { %v4653_v4 = vadd.f32 %v4557_v9, %v4401_v2  ;;  %10934 = vmatmul.msk.bf16.gmra.mxu2 %vm5579_vm4, %v12339_v34  ;;  %v5204_v38 = vpack.c.bf16 %v5162_v57, %v5162_v57  ;;  %v12863_v52 = vld [vmem:[#allocation2 + $0x4c] sm:$0xff]  }
 0x58f   : > { %v4701_v43 = vadd.f32 %v14999_v19, %v4653_v4  ;;  %5316 = vrot.lane.b32.xlu1 %v5204_v38, %s13467_s24 }
 0x591   : > { %vm4743_vm14 = vcmp.gt.f32.partialorder %v4701_v43, 0.0  ;;  %v4785_v54 = vmul.f32 0.2, %v4701_v43 }
 0x592   : > { %v5295_v13 = vpop.permute.xlu2 %5294 }
 0x593   : > { %v4827_v59 = vsel %vm4743_vm14, %v4701_v43, %v4785_v54  ;;  %5404 = vst.msk [vmem:[#allocation2 + $0x5c] sm:$0xf] %vm5386_vm13, %v5295_v13  ;;  %v5291_v15 = vpop.permute.xlu0 %5290 }
 0x594   : > { %v5163_v1 = vmul.f32 %v13155_v26, %v4827_v59  ;;  %5402 = vst.msk [vmem:[#allocation2 + $0x54] sm:$0xf] %vm5386_vm13, %v5291_v15  ;;  %v4311_v58 = vpop.permute.xlu1 %4310  ;;  %v17685_v26 = vld [vmem:[#allocation22_spill] sm:$0xff] }
 0x595   : > { %10903 = vmatmul.msk.bf16.gmra.mxu1 %vm5579_vm4, %v12863_v52  ;;  %v4404_v3 = vadd.f32 %v4311_v58, %v15423_v20  ;;  %v13164_v20 = vunpack.i.l.bf16 %v17684_v14  ;;  %v13174_v13 = vunpack.i.l.bf16 %v17685_v26 }
 0x596   : > { %v5205_v49 = vpack.c.bf16 %v5163_v1, %v5163_v1 }
 0x598   : > { %5318 = vrot.lane.b32.xlu2 %v5205_v49, %s13467_s24  ;;  %v17686_v49 = vld [vmem:[#allocation14_spill] sm:$0xff] }
 0x59a   : > { %v4565_v10 = vpop.permute.xlu2 %4564 }
 0x59b   : > { %v4657_v39 = vadd.f32 %v4565_v10, %v4405_v0  ;;  %v4561_v29 = vpop.permute.xlu0 %4560  ;;  %v12340_v36 = vld [vmem:[#allocation2 + $0x50] sm:$0xff]   ;;  %v13169_v0 = vunpack.i.l.bf16 %v17686_v49 }
 0x59c   : > { %v4655_v50 = vadd.f32 %v4561_v29, %v4403_v47 }
 0x59d   : > { %v4705_v60 = vadd.f32 %v14999_v19, %v4657_v39  ;;  %10935 = vmatmul.msk.bf16.gmra.mxu2 %vm5579_vm4, %v12340_v36 }
 0x59e   : > { %v4703_v40 = vadd.f32 %v14999_v19, %v4655_v50 }
 0x59f   : > { %vm4747_vm15 = vcmp.gt.f32.partialorder %v4705_v60, 0.0  ;;  %v4789_v42 = vmul.f32 0.2, %v4705_v60 }
 0x5a0   : > { %vm4745_vm8 = vcmp.gt.f32.partialorder %v4703_v40, 0.0  ;;  %v4787_v23 = vmul.f32 0.2, %v4703_v40 }
 0x5a1   : > { %v4831_v44 = vsel %vm4747_vm15, %v4705_v60, %v4789_v42  ;;  %v5293_v51 = vpop.permute.xlu1 %5292 }
 0x5a2   : > { %v4319_v12 = vpop.permute.xlu2 %4318  ;;  %v5167_v35 = vmul.f32 %v13165_v37, %v4831_v44  ;;  %v4829_v55 = vsel %vm4745_vm8, %v4703_v40, %v4787_v23  ;;  %5403 = vst.msk [vmem:[#allocation2 + $0x58] sm:$0xf] %vm5386_vm13, %v5293_v51  ;;  %v13413_v37 = vld [vmem:[%s17569_s8] ss:$0 sm:$0xff] }
 0x5a3   : > { %v4315_v11 = vpop.permute.xlu0 %4314  ;;  %v5165_v22 = vmul.f32 %v13160_v56, %v4829_v55  ;;  %v4408_v46 = vadd.f32 %v4319_v12, %v15487_v27  ;;  %v11416_v40 = vld [vmem:[%s17564_s3 + $0x20] sm:$0xff]  ;;  %v15669_v56 = vld [vmem:[%s13577_s16 + $0x38] sm:$0xff]  }
 0x5a4   : > { %v5209_v62 = vpack.c.bf16 %v5167_v35, %v5167_v35  ;;  %v4406_v4 = vadd.f32 %v4315_v11, %v15456_v25  ;;  %v15666_v35 = vld [vmem:[%s13577_s16 + $0x30] sm:$0xff]   ;;  %6126 = vmatpush.bf16.msrb.mxu1 %v11416_v40  ;;  %v15717_v40 = vld [vmem:[%s13577_s16 + $0x78] sm:$0xff]  }
 0x5a5   : > { %v5207_v41 = vpack.c.bf16 %v5165_v22, %v5165_v22  ;;  %v11887_v11 = vunpack.c.h.bf16 %v15666_v35  ;;  %v11890_v22 = vunpack.c.l.bf16 %v15669_v56 }
 0x5a6   : > { %5326 = vrot.lane.b32.xlu0 %v5209_v62, %s13467_s24 }
 0x5a7   : > { %5322 = vrot.lane.b32.xlu1 %v5207_v41, %s13467_s24 }
 0x5a9   : > { %v4563_v61 = vpop.permute.xlu1 %4562  ;;  %v12865_v45 = vld [vmem:[#allocation2 + $0x54] sm:$0xff]  }
 0x5aa   : > { %v5301_v17 = vpop.permute.xlu2 %5300  ;;  %v4656_v18 = vadd.f32 %v4563_v61, %v4404_v3  ;;  %10904 = vmatmul.msk.bf16.gmra.mxu1 %vm5579_vm4, %v12865_v45  ;;  %v12341_v16 = vld [vmem:[#allocation2 + $0x58] sm:$0xff]   ;;  %v13170_v3 = vunpack.i.h.bf16 %v17686_v49  ;;  %v13196_v61 = vpack.i.bf16 %v11890_v22, %v11887_v11  ;;  %v11923_v11 = vunpack.c.h.bf16 %v15717_v40 }
 0x5ab   : > { %5407 = vst.msk [vmem:[#allocation2 + $0x68] sm:$0xf] %vm5386_vm13, %v5301_v17  ;;  %v5297_v33 = vpop.permute.xlu0 %5296 }
 0x5ac   : > { %v4704_v48 = vadd.f32 %v14999_v19, %v4656_v18  ;;  %5405 = vst.msk [vmem:[#allocation2 + $0x60] sm:$0xf] %vm5386_vm13, %v5297_v33 }
 0x5ad   : > { %10936 = vmatmul.msk.bf16.gmra.mxu2 %vm5579_vm4, %v12341_v16 }
 0x5ae   : > { %vm4746_vm9 = vcmp.gt.f32.partialorder %v4704_v48, 0.0  ;;  %v4788_v53 = vmul.f32 0.2, %v4704_v48 }
 0x5b0   : > { %v5832_v8 = vpop.f32.mrf.mxu2  ;;  %v4830_v30 = vsel %vm4746_vm9, %v4704_v48, %v4788_v53  ;;  %v15683_v48 = vld [vmem:[%s13577_s16 + $0x48] sm:$0xff]   ;;  %v15686_v53 = vld [vmem:[%s13577_s16 + $0x50] sm:$0xff]  }
 0x5b1   : > { %v4317_v32 = vpop.permute.xlu1 %4316  ;;  %v5166_v34 = vmul.f32 %v13164_v20, %v4830_v30 }
 0x5b2   : > { %v4571_v2 = vpop.permute.xlu2 %4570  ;;  %v4407_v50 = vadd.f32 %v4317_v32, %v15471_v24  ;;  %v11899_v32 = vunpack.c.h.bf16 %v15683_v48 }
 0x5b3   : > { %v4660_v9 = vadd.f32 %v4571_v2, %v4408_v46  ;;  %v4567_v57 = vpop.permute.xlu0 %4566  ;;  %v5208_v43 = vpack.c.bf16 %v5166_v34, %v5166_v34  ;;  %v12867_v58 = vld [vmem:[#allocation2 + $0x5c] sm:$0xff]  }
 0x5b4   : > { %v4658_v38 = vadd.f32 %v4567_v57, %v4406_v4  ;;  %v13175_v57 = vunpack.i.h.bf16 %v17685_v26 }
 0x5b5   : > { %v4708_v5 = vadd.f32 %v14999_v19, %v4660_v9  ;;  %5324 = vrot.lane.b32.xlu2 %v5208_v43, %s13467_s24  ;;  %v11902_v9 = vunpack.c.l.bf16 %v15686_v53 }
 0x5b6   : > { %v4706_v27 = vadd.f32 %v14999_v19, %v4658_v38 }
 0x5b7   : > { %vm4750_vm10 = vcmp.gt.f32.partialorder %v4708_v5, 0.0  ;;  %v4792_v54 = vmul.f32 0.2, %v4708_v5 }
 0x5b8   : > { %v15648_v1 = vpop.f32.mrf.mxu2  ;;  %vm4748_vm11 = vcmp.gt.f32.partialorder %v4706_v27, 0.0  ;;  %v4790_v15 = vmul.f32 0.2, %v4706_v27 }
 0x5b9   : > { %v4834_v59 = vsel %vm4750_vm10, %v4708_v5, %v4792_v54  ;;  %v5299_v10 = vpop.permute.xlu1 %5298  ;;  %v13211_v5 = vpack.i.bf16 %v11902_v9, %v11899_v32  ;;  %v15698_v54 = vld [vmem:[%s13577_s16 + $0x60] sm:$0xff]   ;;  %v15738_v32 = vld [vmem:[%s13577_s16 + $0x90] sm:$0xff]   ;;  %v15741_v9 = vld [vmem:[%s13577_s16 + $0x98] sm:$0xff]  }
 0x5ba   : > { %v15650_v52 = vpop.permute.xlu2 %4324  ;;  %v5170_v25 = vmul.f32 %v13174_v13, %v4834_v59  ;;  %v4832_v39 = vsel %vm4748_vm11, %v4706_v27, %v4790_v15  ;;  %5406 = vst.msk [vmem:[#allocation2 + $0x64] sm:$0xf] %vm5386_vm13, %v5299_v10  ;;  %10905 = vmatmul.msk.bf16.gmra.mxu1 %vm5579_vm4, %v12867_v58  ;;  %v15701_v13 = vld [vmem:[%s13577_s16 + $0x68] sm:$0xff]   ;;  %v6910_v58 = vld [vmem:[%s13577_s16 + $0x24] sm:$0xf] }
 0x5bb   : > { %v4321_v60 = vpop.permute.xlu0 %4320  ;;  %v5168_v29 = vmul.f32 %v13169_v0, %v4832_v39  ;;  %v11911_v0 = vunpack.c.h.bf16 %v15698_v54  ;;  %v11914_v10 = vunpack.c.l.bf16 %v15701_v13  ;;  %v12351_v39 = vld [vmem:[%s13577_s16 + $0x28] sm:$0xff]  }
 0x5bc   : > { %v5212_v47 = vpack.c.bf16 %v5170_v25, %v5170_v25  ;;  %v4409_v20 = vadd.f32 %v4321_v60, %v15504_v31  ;;  %v11882_v60 = vunpack.c.l.bf16 %v12351_v39 }
 0x5bd   : > { %v5210_v36 = vpack.c.bf16 %v5168_v29, %v5168_v29  ;;  %v6946_v29 = vunpack.c.l.bf16 %v6910_v58 }
 0x5be   : > { %5332 = vrot.lane.b32.xlu0 %v5212_v47, %s13467_s24 }
 0x5bf   : > { %5328 = vrot.lane.b32.xlu1 %v5210_v36, %s13467_s24 }
 0x5c0   : > { %v5837_v42 = vpop.f32.mrf.mxu2 }
 0x5c1   : > { %v4569_v44 = vpop.permute.xlu1 %4568  ;;  %v12342_v23 = vld [vmem:[#allocation2 + $0x60] sm:$0xff]  }
 0x5c2   : > { %v5307_v14 = vpop.permute.xlu2 %5306  ;;  %v5643_v12 = vpop.f32.mrf.mxu1  ;;  %v4659_v24 = vadd.f32 %v4569_v44, %v4407_v50  ;;  %10937 = vmatmul.msk.bf16.gmra.mxu2 %vm5579_vm4, %v12342_v23  ;;  %v12869_v33 = vld [vmem:[#allocation2 + $0x64] sm:$0xff]  }
 0x5c3   : > { %5410 = vst.msk [vmem:[#allocation2 + $0x74] sm:$0xf] %vm5386_vm13, %v5307_v14  ;;  %v15672_v51 = vadd.f32 %v5832_v8, %v5643_v12  ;;  %v5303_v55 = vpop.permute.xlu0 %5302  ;;  %v15720_v44 = vld [vmem:[%s13577_s16 + $0x80] sm:$0xff]  }
 0x5c4   : > { %v4707_v62 = vadd.f32 %v14999_v19, %v4659_v24  ;;  %5408 = vst.msk [vmem:[#allocation2 + $0x6c] sm:$0xf] %vm5386_vm13, %v5303_v55  ;;  %v11926_v22 = vunpack.c.l.bf16 %v15720_v44 }
 0x5c6   : > { %6763 = vrot.lane.b32.xlu0 %v13413_v37, %s13464_s28  ;;  %vm4749_vm12 = vcmp.gt.f32.partialorder %v4707_v62, 0.0  ;;  %v4791_v41 = vmul.f32 0.2, %v4707_v62 }
 0x5c8   : > { %v4833_v17 = vsel %vm4749_vm12, %v4707_v62, %v4791_v41  ;;  %v5839_v46 = vpop.f32.mrf.mxu2  ;;  %v13186_v62 = vpack.i.bf16 %v11882_v60, %v6946_v29  ;;  %v15730_v41 = vld [vmem:[%s13577_s16 + $0x40] sm:$0xff]  }
 0x5c9   : > { %v4323_v45 = vpop.permute.xlu1 %4322  ;;  %v5169_v16 = vmul.f32 %v13170_v3, %v4833_v17 }
 0x5ca   : > { %v15680_v18 = vpop.f32.mrf.mxu1  ;;  %10906 = vmatmul.msk.bf16.gmra.mxu1 %vm5579_vm4, %v12869_v33  ;;  %v15694_v4 = vpop.permute.xlu2 %4576  ;;  %v4410_v36 = vadd.f32 %v4323_v45, %v15522_v7  ;;  %v11891_v33 = vunpack.c.h.bf16 %v15669_v56 }
 0x5cb   : > { %v4573_v8 = vpop.permute.xlu0 %4572  ;;  %v5211_v30 = vpack.c.bf16 %v5169_v16, %v5169_v16  ;;  %v12343_v38 = vld [vmem:[#allocation2 + $0x68] sm:$0xff]   ;;  %v11894_v16 = vunpack.c.l.bf16 %v15730_v41 }
 0x5cc   : > { %v4661_v2 = vadd.f32 %v4573_v8, %v4409_v20 }
 0x5cd   : > { %5330 = vrot.lane.b32.xlu2 %v5211_v30, %s13467_s24 }
 0x5ce   : > { %13197 = vperm.xlu0 %12970, %v13196_v61   ;;  %v4709_v34 = vadd.f32 %v14999_v19, %v4661_v2  ;;  %v17687_v61 = vld [vmem:[#allocation23_spill] sm:$0xff] }
 0x5cf   : > { %v13179_v45 = vunpack.i.l.bf16 %v17687_v61 }
 0x5d0   : > { %vm4751_vm14 = vcmp.gt.f32.partialorder %v4709_v34, 0.0  ;;  %v4793_v31 = vmul.f32 0.2, %v4709_v34  ;;  %v5842_v26 = vpop.f32.mrf.mxu2 }
 0x5d1   : > { %v5305_v43 = vpop.permute.xlu1 %5304 }
 0x5d2   : > { %v4835_v27 = vsel %vm4751_vm14, %v4709_v34, %v4793_v31  ;;  %5409 = vst.msk [vmem:[#allocation2 + $0x70] sm:$0xf] %vm5386_vm13, %v5305_v43  ;;  %10938 = vmatmul.msk.bf16.gmra.mxu2 %vm5579_vm4, %v12343_v38  ;;  %v5648_v59 = vpop.f32.mrf.mxu1  ;;  %v11935_v43 = vunpack.c.h.bf16 %v15738_v32  ;;  %v11938_v38 = vunpack.c.l.bf16 %v15741_v9 }
 0x5d3   : > { %v15705_v15 = vadd.f32 %v5837_v42, %v5648_v59  ;;  %v15707_v25 = vpop.permute.xlu0 %4326  ;;  %v5171_v49 = vmul.f32 %v13175_v57, %v4835_v27  ;;  %v13226_v42 = vpack.i.bf16 %v11914_v10, %v11911_v0  ;;  %v13201_v57 = vpack.i.bf16 %v11894_v16, %v11891_v33  ;;  %v12357_v27 = vld [vmem:[%s13577_s16 + $0x58] sm:$0xff]  }
 0x5d4   : > { %v4411_v59 = vadd.f32 %v15650_v52, %v15537_v28  ;;  %v11903_v10 = vunpack.c.h.bf16 %v15686_v53  ;;  %v11906_v58 = vunpack.c.l.bf16 %v12357_v27  ;;  %v13256_v60 = vpack.i.bf16 %v11938_v38, %v11935_v43  ;;  %v6945_v28 = vld [vmem:[%s13577_s16 + $0xb0] sm:$0xf] }
 0x5d5   : > { %v5213_v47 = vpack.c.bf16 %v5171_v49, %v5171_v49  ;;  %v11883_v49 = vunpack.c.h.bf16 %v12351_v39 }
 0x5d6   : > { %13212 = vperm.xlu0 %12970, %v13211_v5   ;;  %v4663_v0 = vadd.f32 %v15694_v4, %v4411_v59  ;;  %v13216_v53 = vpack.i.bf16 %v11906_v58, %v11903_v10  ;;  %v11922_v58 = vunpack.c.l.bf16 %v15717_v40  ;;  %v11934_v40 = vunpack.c.l.bf16 %v15738_v32 }
 0x5d7   : > { %5334 = vrot.lane.b32.xlu1 %v5213_v47, %s13467_s24 }
 0x5d8   : > { %v5844_v17 = vpop.f32.mrf.mxu2  ;;  %v4711_v39 = vadd.f32 %v14999_v19, %v4663_v0 }
 0x5d9   : > { %v4575_v14 = vpop.permute.xlu1 %4574  ;;  %v12871_v37 = vld [vmem:[#allocation2 + $0x6c] sm:$0xff]  }
 0x5da   : > { %v5313_v50 = vpop.permute.xlu2 %5312  ;;  %v4662_v23 = vadd.f32 %v4575_v14, %v4410_v36  ;;  %v5650_v12 = vpop.f32.mrf.mxu1  ;;  %10907 = vmatmul.msk.bf16.gmra.mxu1 %vm5579_vm4, %v12871_v37  ;;  %v12344_v30 = vld [vmem:[#allocation2 + $0x70] sm:$0xff]   ;;  %v6981_v37 = vunpack.c.l.bf16 %v6945_v28  ;;  %vm4753_vm8 = vcmp.gt.f32.partialorder %v4711_v39, 0.0 }
 0x5db   : > { %5413 = vst.msk [vmem:[#allocation2 + $0x80] sm:$0xf] %vm5386_vm13, %v5313_v50  ;;  %v15722_v24 = vadd.f32 %v5839_v46, %v5650_v12  ;;  %v5309_v55 = vpop.permute.xlu0 %5308  ;;  %v13241_v46 = vpack.i.bf16 %v11926_v22, %v11923_v11  ;;  %v11895_v12 = vunpack.c.h.bf16 %v15730_v41 }
 0x5dc   : > { %v4710_v7 = vadd.f32 %v14999_v19, %v4662_v23  ;;  %5411 = vst.msk [vmem:[#allocation2 + $0x78] sm:$0xf] %vm5386_vm13, %v5309_v55  ;;  %v12360_v23 = vld [vmem:[%s13577_s16 + $0x70] sm:$0xff]   ;;  %v11898_v55 = vunpack.c.l.bf16 %v15683_v48 }
 0x5dd   : > { %v11918_v11 = vunpack.c.l.bf16 %v12360_v23  ;;  %v11919_v10 = vunpack.c.h.bf16 %v12360_v23 }
 0x5de   : > { %13227 = vperm.xlu0 %12970, %v13226_v42   ;;  %vm4752_vm15 = vcmp.gt.f32.partialorder %v4710_v7, 0.0  ;;  %v4794_v3 = vmul.f32 0.2, %v4710_v7  ;;  %v15760_v42 = vld [vmem:[%s13577_s16 + $0xa8] sm:$0xff]  }
 0x5df   : > { %13187 = vperm.xlu1 %12958, %v13186_v62   ;;  %v11947_v14 = vunpack.c.h.bf16 %v15760_v42  ;;  %v4795_v62 = vmul.f32 0.2, %v4711_v39  ;;  %v13236_v28 = vpack.i.bf16 %v11922_v58, %v11919_v10 }
 0x5e0   : > { %v4836_v20 = vsel %vm4752_vm15, %v4710_v7, %v4794_v3  ;;  %v5847_v47 = vpop.f32.mrf.mxu2  ;;  %v11915_v7 = vunpack.c.h.bf16 %v15701_v13  ;;  %v12363_v13 = vld [vmem:[%s13577_s16 + $0x88] sm:$0xff]  }
 0x5e1   : > { %v15735_v8 = vpop.permute.xlu1 %4328  ;;  %v5172_v2 = vmul.f32 %v13179_v45, %v4836_v20  ;;  %v13271_v3 = vpack.i.bf16 %v6981_v37, %v11947_v14  ;;  %v13206_v45 = vpack.i.bf16 %v11898_v55, %v11895_v12  ;;  %v4837_v41 = vsel %vm4753_vm8, %v4711_v39, %v4795_v62 }
 0x5e2   : > { %10939 = vmatmul.msk.bf16.gmra.mxu2 %vm5579_vm4, %v12344_v30  ;;  %v5653_v34 = vpop.f32.mrf.mxu1  ;;  %v13231_v48 = vpack.i.bf16 %v11918_v11, %v11915_v7  ;;  %v11907_v30 = vunpack.c.h.bf16 %v12357_v27  ;;  %v11931_v14 = vunpack.c.h.bf16 %v12363_v13 }
 0x5e3   : > { %v15744_v31 = vadd.f32 %v5842_v26, %v5653_v34  ;;  %v15746_v5 = vpop.permute.xlu0 %4578  ;;  %v5214_v56 = vpack.c.bf16 %v5172_v2, %v5172_v2  ;;  %v11886_v26 = vunpack.c.l.bf16 %v15666_v35  ;;  %v12873_v36 = vld [vmem:[#allocation2 + $0x74] sm:$0xff]   ;;  %v11910_v2 = vunpack.c.l.bf16 %v15698_v54 }
 0x5e4   : > { %v13251_v12 = vpack.i.bf16 %v11934_v40, %v11931_v14 }
 0x5e5   : > { %5336 = vrot.lane.b32.xlu2 %v5214_v56, %s13467_s24  ;;  %v13191_v50 = vpack.i.bf16 %v11886_v26, %v11883_v49  ;;  %v11927_v56 = vunpack.c.h.bf16 %v15720_v44  ;;  %v13221_v49 = vpack.i.bf16 %v11910_v2, %v11907_v30  ;;  %v12366_v44 = vld [vmem:[%s13577_s16 + $0xa0] sm:$0xff]  }
 0x5e6   : > { %13242 = vperm.xlu0 %12970, %v13241_v46   ;;  %v13180_v46 = vunpack.i.h.bf16 %v17687_v61  ;;  %v11943_v32 = vunpack.c.h.bf16 %v12366_v44 }
 0x5e7   : > { %13202 = vperm.xlu1 %12958, %v13201_v57   ;;  %v11930_v57 = vunpack.c.l.bf16 %v12363_v13 }
 0x5e8   : > { %v5849_v33 = vpop.f32.mrf.mxu2  ;;  %v5173_v34 = vmul.f32 %v13180_v46, %v4837_v41 }
 0x5e9   : > { %v15757_v29 = vpop.permute.xlu1 %4580  ;;  %v13246_v54 = vpack.i.bf16 %v11930_v57, %v11927_v56 }
 0x5ea   : > { %v5655_v52 = vpop.f32.mrf.mxu1  ;;  %10908 = vmatmul.msk.bf16.gmra.mxu1 %vm5579_vm4, %v12873_v36  ;;  %v5215_v26 = vpack.c.bf16 %v5173_v34, %v5173_v34  ;;  %v4412_v36 = vadd.f32 %v15707_v25, %v15551_v21 }
 0x5eb   : > { %v15764_v35 = vadd.f32 %v5844_v17, %v5655_v52  ;;  %v5315_v4 = vpop.permute.xlu0 %5314 }
 0x5ec   : > { %5414 = vst.msk [vmem:[#allocation2 + $0x84] sm:$0xf] %vm5386_vm13, %v5315_v4  ;;  %v4664_v52 = vadd.f32 %v15746_v5, %v4412_v36 }
 0x5ed   : > { %13192 = vperm.xlu2 %12964, %v13191_v50  }
 0x5ee   : > { %13257 = vperm.xlu0 %12970, %v13256_v60   ;;  %v11942_v60 = vunpack.c.l.bf16 %v12366_v44  ;;  %v4712_v37 = vadd.f32 %v14999_v19, %v4664_v52 }
 0x5ef   : > { %13217 = vperm.xlu1 %12958, %v13216_v53  }
 0x5f0   : > { %v5852_v27 = vpop.f32.mrf.mxu2  ;;  %v4796_v55 = vmul.f32 0.2, %v4712_v37  ;;  %vm4754_vm9 = vcmp.gt.f32.partialorder %v4712_v37, 0.0 }
 0x5f1   : > { %v5311_v17 = vpop.permute.xlu1 %5310 }
 0x5f2   : > { %v5319_v22 = vpop.permute.xlu2 %5318  ;;  %5412 = vst.msk [vmem:[#allocation2 + $0x7c] sm:$0xf] %vm5386_vm13, %v5311_v17  ;;  %v5658_v16 = vpop.f32.mrf.mxu1  ;;  %v4838_v11 = vsel %vm4754_vm9, %v4712_v37, %v4796_v55 }
 0x5f3   : > { %5416 = vst.msk [vmem:[#allocation2 + $0x8c] sm:$0xf] %vm5386_vm13, %v5319_v22  ;;  %v15775_v20 = vadd.f32 %v5847_v47, %v5658_v16  ;;  %v11939_v47 = vunpack.c.h.bf16 %v15741_v9  ;;  %v4413_v9 = vadd.f32 %v15735_v8, %v15568_v63  ;;  %v12346_v5 = vld [vmem:[#allocation2 + $0x80] sm:$0xff]   ;;  %v17688_v22 = vld [vmem:[#allocation12_spill] sm:$0xff] }
 0x5f4   : > { %v13414_v63 = vld [vmem:[%s17570_s9] ss:$0 sm:$0xff]  ;;  %v13185_v13 = vunpack.i.h.bf16 %v17688_v22 }
 0x5f5   : > { %13207 = vperm.xlu2 %12964, %v13206_v45   ;;  %v13261_v53 = vpack.i.bf16 %v11942_v60, %v11939_v47  ;;  %v4665_v25 = vadd.f32 %v15757_v29, %v4413_v9  ;;  %v11946_v29 = vunpack.c.l.bf16 %v15760_v42 }
 0x5f6   : > { %13272 = vperm.xlu0 %12970, %v13271_v3   ;;  %v13184_v3 = vunpack.i.l.bf16 %v17688_v22 }
 0x5f7   : > { %13232 = vperm.xlu1 %12958, %v13231_v48   ;;  %v4713_v8 = vadd.f32 %v14999_v19, %v4665_v25  ;;  %v13266_v16 = vpack.i.bf16 %v11946_v29, %v11943_v32 }
 0x5f8   : > { %v5854_v21 = vpop.f32.mrf.mxu2  ;;  %v5174_v41 = vmul.f32 %v13184_v3, %v4838_v11 }
 0x5f9   : > { %v12345_v38 = vld [vmem:[#allocation2 + $0x78] sm:$0xff]   ;;  %v4797_v45 = vmul.f32 0.2, %v4713_v8  ;;  %vm4755_vm10 = vcmp.gt.f32.partialorder %v4713_v8, 0.0 }
 0x5fa   : > { %v5321_v43 = vpop.permute.xlu0 %5320  ;;  %v12875_v59 = vld [vmem:[#allocation2 + $0x7c] sm:$0xff]   ;;  %10940 = vmatmul.msk.bf16.gmra.mxu2 %vm5579_vm4, %v12345_v38  ;;  %v5660_v61 = vpop.f32.mrf.mxu1  ;;  %v5216_v42 = vpack.c.bf16 %v5174_v41, %v5174_v41  ;;  %v11398_v41 = vld [vmem:[#allocation2 + $0x30] sm:$0xff] }
 0x5fb   : > { %5417 = vst.msk [vmem:[#allocation2 + $0x90] sm:$0xf] %vm5386_vm13, %v5321_v43  ;;  %v15783_v0 = vadd.f32 %v5849_v33, %v5660_v61  ;;  %10909 = vmatmul.msk.bf16.gmra.mxu1 %vm5579_vm4, %v12875_v59  ;;  %v4839_v19 = vsel %vm4755_vm10, %v4713_v8, %v4797_v45 }
 0x5fc   : > { %v5175_v2 = vmul.f32 %v13185_v13, %v4839_v19 }
 0x5fd   : > { %13222 = vperm.xlu2 %12964, %v13221_v49  }
 0x5fe   : > { %5338 = vrot.lane.b32.xlu0 %v5215_v26, %s13467_s24  ;;  %v5217_v49 = vpack.c.bf16 %v5175_v2, %v5175_v2 }
 0x5ff   : > { %13247 = vperm.xlu1 %12958, %v13246_v54  }
 0x600   : > { %v5857_v33 = vpop.f32.mrf.mxu2 }
 0x601   : > { %v5317_v50 = vpop.permute.xlu1 %5316 }
 0x602   : > { %5415 = vst.msk [vmem:[#allocation2 + $0x88] sm:$0xf] %vm5386_vm13, %v5317_v50  ;;  %v5663_v39 = vpop.f32.mrf.mxu1  ;;  %v12879_v57 = vld [vmem:[#allocation2 + $0x8c] sm:$0xff]  }
 0x603   : > { %v15794_v4 = vadd.f32 %v5852_v27, %v5663_v39 }
 0x605   : > { %13237 = vperm.xlu2 %12964, %v13236_v28  }
 0x607   : > { %13262 = vperm.xlu1 %12958, %v13261_v53  }
 0x608   : > { %v5859_v43 = vpop.f32.mrf.mxu2 }
 0x609   : > { %v12877_v23 = vld [vmem:[#allocation2 + $0x84] sm:$0xff]  }
 0x60a   : > { %10941 = vmatmul.msk.bf16.gmra.mxu2 %vm5579_vm4, %v12346_v5  ;;  %v5665_v62 = vpop.f32.mrf.mxu1  ;;  %v12347_v56 = vld [vmem:[#allocation2 + $0x88] sm:$0xff]  }
 0x60b   : > { %v15802_v7 = vadd.f32 %v5854_v21, %v5665_v62  ;;  %10910 = vmatmul.msk.bf16.gmra.mxu1 %vm5579_vm4, %v12877_v23 }
 0x60d   : > { %13252 = vperm.xlu2 %12964, %v13251_v12  }
 0x60f   : > { %8563 = vrot.lane.b32.xlu1 %v13414_v63, %s13464_s28  ;;  %v5325_v17 = vpop.permute.xlu2 %5324 }
 0x610   : > { %5419 = vst.msk [vmem:[#allocation2 + $0x98] sm:$0xf] %vm5386_vm13, %v5325_v17 }
 0x612   : > { %v5668_v48 = vpop.f32.mrf.mxu1 }
 0x613   : > { %v15813_v46 = vadd.f32 %v5857_v33, %v5668_v48 }
 0x615   : > { %13267 = vperm.xlu2 %12964, %v13266_v16  }
 0x617   : > { %5340 = vrot.lane.b32.xlu1 %v5216_v42, %s13467_s24 }
 0x618   : > { %v5327_v30 = vpop.permute.xlu0 %5326 }
 0x619   : > { %5420 = vst.msk [vmem:[#allocation2 + $0x9c] sm:$0xf] %vm5386_vm13, %v5327_v30  ;;  %v5323_v34 = vpop.permute.xlu1 %5322 }
 0x61a   : > { %5418 = vst.msk [vmem:[#allocation2 + $0x94] sm:$0xf] %vm5386_vm13, %v5323_v34  ;;  %10942 = vmatmul.msk.bf16.gmra.mxu2 %vm5579_vm4, %v12347_v56  ;;  %v5670_v38 = vpop.f32.mrf.mxu1  ;;  %v11399_v56 = vld [vmem:[#allocation2 + $0x38] sm:$0xff] }
 0x61b   : > { %v15820_v59 = vadd.f32 %v5859_v43, %v5670_v38  ;;  %10911 = vmatmul.msk.bf16.gmra.mxu1 %vm5579_vm4, %v12879_v57 }
 0x61d   : > { %5342 = vrot.lane.b32.xlu2 %v5217_v49, %s13467_s24 }
 0x620   : > { %v12349_v36 = vld [vmem:[#allocation2 + $0x98] sm:$0xff]  }
 0x621   : > { %v12348_v54 = vld [vmem:[#allocation2 + $0x90] sm:$0xff]  }
 0x622   : > { %v12881_v27 = vld [vmem:[#allocation2 + $0x94] sm:$0xff]  }
 0x627   : > { %v5331_v61 = vpop.permute.xlu2 %5330  ;;  %v15825_v26 = vpop.f32.mrf.mxu1 }
 0x628   : > { %5422 = vst.msk [vmem:[#allocation2 + $0xa4] sm:$0xf] %vm5386_vm13, %v5331_v61  ;;  %v11400_v61 = vld [vmem:[#allocation2 + $0x40] sm:$0xff] }
 0x62a   : > { %10943 = vmatmul.msk.bf16.gmra.mxu2 %vm5579_vm4, %v12348_v54 }
 0x62b   : > { %10912 = vmatmul.msk.bf16.gmra.mxu1 %vm5579_vm4, %v12881_v27 }
 0x62f   : > { %v15830_v10 = vpop.f32.mrf.mxu1 }
 0x630   : > { %v5333_v44 = vpop.permute.xlu0 %5332 }
 0x631   : > { %5423 = vst.msk [vmem:[#allocation2 + $0xa8] sm:$0xf] %vm5386_vm13, %v5333_v44  ;;  %v5329_v58 = vpop.permute.xlu1 %5328  ;;  %v11401_v44 = vld [vmem:[#allocation2 + $0x48] sm:$0xff] }
 0x632   : > { %5421 = vst.msk [vmem:[#allocation2 + $0xa0] sm:$0xf] %vm5386_vm13, %v5329_v58 }
 0x637   : > { %v15835_v60 = vpop.f32.mrf.mxu1 }
 0x638   : > { %v15833_v47 = vpop.permute.xlu0 %6763  ;;  %v12884_v21 = vld [vmem:[#allocation2 + $0xa4] sm:$0xff] }
 0x639   : > { %v12883_v50 = vld [vmem:[#allocation2 + $0x9c] sm:$0xff]  }
 0x63a   : > { %10944 = vmatmul.msk.bf16.gmra.mxu2 %vm5579_vm4, %v12349_v36  ;;  %v12350_v37 = vld [vmem:[#allocation2 + $0xa0] sm:$0xff]  }
 0x63b   : > { %10913 = vmatmul.msk.bf16.gmra.mxu1 %vm5579_vm4, %v12883_v50  ;;  %v11402_v50 = vld [vmem:[#allocation2 + $0x50] sm:$0xff] }
 0x63f   : > { %v5337_v52 = vpop.permute.xlu2 %5336  ;;  %v15842_v39 = vpop.f32.mrf.mxu1 }
 0x640   : > { %v15839_v28 = vpop.permute.xlu0 %13197  ;;  %5425 = vst.msk [vmem:[#allocation2 + $0xb0] sm:$0xf] %vm5386_vm13, %v5337_v52 }
 0x647   : > { %v15846_v14 = vpop.permute.xlu2 %13192  ;;  %v15848_v40 = vpop.f32.mrf.mxu1 }
 0x648   : > { %v15844_v53 = vpop.permute.xlu0 %13212 }
 0x649   : > { %v5335_v9 = vpop.permute.xlu1 %5334 }
 0x64a   : > { %5424 = vst.msk [vmem:[#allocation2 + $0xac] sm:$0xf] %vm5386_vm13, %v5335_v9  ;;  %10945 = vmatmul.msk.bf16.gmra.mxu2 %vm5579_vm4, %v12350_v37  ;;  %v11403_v37 = vld [vmem:[#allocation2 + $0x58] sm:$0xff] }
 0x64b   : > { %10914 = vmatmul.msk.bf16.gmra.mxu1 %vm5579_vm4, %v12884_v21  ;;  %v7449_v21 = vld [vmem:[%s17565_s4 + $0x10] sm:$0xf] }
 0x64f   : > { %v15855_v5 = vpop.permute.xlu2 %13207  ;;  %v15857_v23 = vpop.f32.mrf.mxu1 }
 0x650   : > { %v15853_v25 = vpop.permute.xlu0 %13227 }
 0x651   : > { %17689 = vst [vmem:[#allocation17_spill] sm:$0xff] %v15853_v25  ;;  %v15859_v12 = vpop.permute.xlu1 %13187  ;;  %v11395_v32 = vld [vmem:[#allocation2 + $0xac] sm:$0xff] }
 0x657   : > { %v15863_v62 = vpop.permute.xlu2 %13222  ;;  %v15865_v63 = vpop.f32.mrf.mxu1 }
 0x658   : > { %v15861_v55 = vpop.permute.xlu0 %13242 }
 0x659   : > { %17690 = vst [vmem:[#allocation24_spill] sm:$0xff] %v15861_v55  ;;  %v15867_v8 = vpop.permute.xlu1 %13202 }
 0x65b   : > { %10915 = vmatmul.msk.bf16.gmra.mxu1 %vm5579_vm4, %v11395_v32  ;;  %v7712_v32 = vunpack.c.l.b16 %v7449_v21 }
 0x65f   : > { %v15872_v11 = vpop.permute.xlu2 %13237  ;;  %v15874_v22 = vpop.f32.mrf.mxu1 }
 0x660   : > { %v15870_v29 = vpop.permute.xlu0 %13257  ;;  %17692 = vst [vmem:[#allocation8_spill] sm:$0xff] %v15872_v11 }
 0x661   : > { %17691 = vst [vmem:[#allocation4_spill] sm:$0xff] %v15870_v29  ;;  %v15876_v3 = vpop.permute.xlu1 %13217 }
 0x667   : > { %v15880_v45 = vpop.permute.xlu2 %13252  ;;  %v15882_v33 = vpop.f32.mrf.mxu1 }
 0x668   : > { %v15878_v17 = vpop.permute.xlu0 %13272  ;;  %17694 = vst [vmem:[#allocation6_spill] sm:$0xff] %v15880_v45 }
 0x669   : > { %17693 = vst [vmem:[#allocation5_spill] sm:$0xff] %v15878_v17  ;;  %v15884_v16 = vpop.permute.xlu1 %13232 }
 0x66a   : > { %17695 = vst [vmem:[#allocation10_spill] sm:$0xff] %v15884_v16 }
 0x66b   : > { %11030 = vmatmul.msk.bf16.vlgmr.msrb.gmra.mxu1 %vm5579_vm4, %v11398_v41  ;;  %v7715_v41 = vpack.c.b16 %v7712_v32, %v7712_v32 }
 0x66f   : > { %v15888_v19 = vpop.permute.xlu2 %13267  ;;  %v15890_v13 = vpop.f32.mrf.mxu1 }
 0x670   : > { %v5339_v48 = vpop.permute.xlu0 %5338  ;;  %17696 = vst [vmem:[#allocation19_spill] sm:$0xff] %v15888_v19 }
 0x671   : > { %5426 = vst.msk [vmem:[#allocation2 + $0xb4] sm:$0xf] %vm5386_vm13, %v5339_v48  ;;  %v15892_v42 = vpop.permute.xlu1 %13247 }
 0x672   : > { %17697 = vst [vmem:[#allocation7_spill] sm:$0xff] %v15892_v42 }
 0x677   : > { %v5343_v30 = vpop.permute.xlu2 %5342 }
 0x678   : > { %5428 = vst.msk [vmem:[#allocation2 + $0xbc] sm:$0xf] %vm5386_vm13, %v5343_v30  ;;  %v15895_v2 = vpop.f32.mrf.mxu1  ;;  %v7764_v30 = vsel %vm3360_vm6, %v7715_v41, 0  ;;  %v11405_v41 = vld [vmem:[#allocation2 + $0x68] sm:$0xff] }
 0x679   : > { %v15897_v34 = vpop.permute.xlu1 %13262  ;;  %7771 = vmatpush.bf16.msra.mxu3 %v7764_v30 }
 0x67a   : > { %17698 = vst [vmem:[#allocation15_spill] sm:$0xff] %v15897_v34 }
 0x67b   : > { %11031 = vmatmul.msk.bf16.gmra.mxu1 %vm5579_vm4, %v11399_v56  ;;  %v11111_v56 = vld [vmem:[%s17565_s4 + $0x38] sm:$0xf] }
 0x680   : > { %v15900_v57 = vpop.f32.mrf.mxu1 }
 0x681   : > { %v15902_v43 = vpop.permute.xlu1 %8563 }
 0x682   : > { %17699 = vst [vmem:[#allocation11_spill] sm:$0xff] %v15902_v43 }
 0x688   : > { %v15904_v38 = vpop.f32.mrf.mxu1 }
 0x689   : > { %v5341_v49 = vpop.permute.xlu1 %5340 }
 0x68a   : > { %5427 = vst.msk [vmem:[#allocation2 + $0xb8] sm:$0xf] %vm5386_vm13, %v5341_v49  ;;  %v7970_v49 = vunpack.c.l.b16 %v11111_v56 }
 0x68b   : > { %11032 = vmatmul.msk.bf16.gmra.mxu1 %vm5579_vm4, %v11400_v61 }
 0x68c   : > { %v7973_v61 = vpack.c.b16 %v7970_v49, %v7970_v49  ;;  %v11406_v49 = vld [vmem:[#allocation2 + $0x70] sm:$0xff] }
 0x690   : > { %v15908_v54 = vpop.f32.mrf.mxu1 }
 0x698   : > { %v15910_v27 = vpop.f32.mrf.mxu1 }
 0x69b   : > { %11033 = vmatmul.msk.bf16.gmra.mxu1 %vm5579_vm4, %v11401_v44  ;;  %v8022_v44 = vsel %vm3360_vm6, %v7973_v61, 0  ;;  %v11052_v61 = vld [vmem:[%s17565_s4 + $0x24] sm:$0xf] }
 0x69c   : > { %8029 = vmatpush.bf16.msra.mxu0 %v8022_v44  ;;  %v7543_v44 = vunpack.c.l.b16 %v11052_v61  ;;  %v11407_v61 = vld [vmem:[#allocation2 + $0x78] sm:$0xff] }
 0x6a0   : > { %v15913_v58 = vpop.f32.mrf.mxu1 }
 0x6a8   : > { %v15915_v36 = vpop.f32.mrf.mxu1 }
 0x6ab   : > { %11034 = vmatmul.msk.bf16.gmra.mxu1 %vm5579_vm4, %v11402_v50 }
 0x6b0   : > { %v15918_v52 = vpop.f32.mrf.mxu1 }
 0x6b8   : > { %v15920_v9 = vpop.f32.mrf.mxu1 }
 0x6bb   : > { %11035 = vmatmul.msk.bf16.gmra.mxu1 %vm5579_vm4, %v11403_v37  ;;  %v11404_v37 = vld [vmem:[#allocation2 + $0x60] sm:$0xff] }
 0x6c0   : > { %v15926_v48 = vpop.f32.mrf.mxu1 }
 0x6c8   : > { %v15933_v50 = vpop.f32.mrf.mxu1 }
 0x6cb   : > { %11036 = vmatmul.msk.bf16.gmra.mxu1 %vm5579_vm4, %v11404_v37  ;;  %v5835_v37 = vadd.f32 %v15648_v1, %v15680_v18 }
 0x6d0   : > { %v15936_v21 = vpop.f32.mrf.mxu1 }
 0x6d1   : > { %17700 = vst [vmem:[#allocation13_spill] sm:$0xff] %v15936_v21 }
 0x6d8   : > { %v15938_v32 = vpop.f32.mrf.mxu1 }
 0x6d9   : > { %17701 = vst [vmem:[#allocation9_spill] sm:$0xff] %v15938_v32 }
 0x6db   : > { %11037 = vmatmul.msk.bf16.gmra.mxu1 %vm5579_vm4, %v11405_v41  ;;  %v7546_v41 = vpack.c.b16 %v7543_v44, %v7543_v44 }
 0x6dd   : > { %v7596_v17 = vsel %vm3360_vm6, %v7546_v41, 0 }
 0x6de   : > { %7603 = vmatpush.bf16.msra.mxu2 %v7596_v17 }
 0x6e0   : > { %v15941_v30 = vpop.f32.mrf.mxu1 }
 0x6e1   : > { %17702 = vst [vmem:[#allocation18_spill] sm:$0xff] %v15941_v30 }
 0x6e8   : > { %v6128_v43 = vpop.f32.mrf.mxu1 }
 0x6e9   : > { %v15944_v56 = vadd.f32 %v6128_v43, %v15672_v51 }
 0x6eb   : > { %6254 = vst.msk [vmem:[#allocation3 + $0x8] sm:$0xff] %vm1581_vm2, %v15944_v56  ;;  %11038 = vmatmul.msk.bf16.gmra.mxu1 %vm5579_vm4, %v11406_v49 }
 0x6ec   : > { %6291 = vst.msk [vmem:[#allocation3 + $0x8] sm:$0xff] %vm1632_vm3, %v15944_v56 }
 0x6f0   : > { %v6130_v51 = vpop.f32.mrf.mxu1 }
 0x6f1   : > { %v15956_v43 = vadd.f32 %v6130_v51, %v5835_v37 }
 0x6f3   : > { %6255 = vst.msk [vmem:[#allocation3 + $0x10] sm:$0xff] %vm1581_vm2, %v15956_v43  ;;  %v6328_v49 = vld [vmem:[#allocation3 + $0x7] sm:$0xff] }
 0x6f4   : > { %6292 = vst.msk [vmem:[#allocation3 + $0x10] sm:$0xff] %vm1632_vm3, %v15956_v43  ;;  %6400 = vrot.lane.b32.xlu0 %v6328_v49, %s13464_s28 }
 0x6f5   : > { %8168 = vst.msk [vmem:[#allocation3 + $0x7] sm:$0x1] %vm1630_vm5, %v17673_v6 }
 0x6f8   : > { %v6133_v1 = vpop.f32.mrf.mxu1 }
 0x6f9   : > { %v15967_v18 = vadd.f32 %v6133_v1, %v15705_v15 }
 0x6fb   : > { %6256 = vst.msk [vmem:[#allocation3 + $0x18] sm:$0xff] %vm1581_vm2, %v15967_v18  ;;  %11039 = vmatmul.msk.bf16.gmra.mxu1 %vm5579_vm4, %v11407_v61  ;;  %v6329_v17 = vld [vmem:[#allocation3 + $0xf] sm:$0xff] }
 0x6fc   : > { %v6544_v44 = vld [vmem:[#allocation3 + $0x9] sm:$0xff]  ;;  %6293 = vst.msk [vmem:[#allocation3 + $0x18] sm:$0xff] %vm1632_vm3, %v15967_v18  ;;  %6402 = vrot.lane.b32.xlu1 %v6329_v17, %s13464_s28 }
 0x6fd   : > { %6616 = vrot.lane.b32.xlu0 %v6544_v44, %s13465_s29  ;;  %v11408_v61 = vld [vmem:[#allocation2 + $0x80] sm:$0xff] }
 0x700   : > { %v6135_v37 = vpop.f32.mrf.mxu1 }
 0x701   : > { %v15977_v41 = vadd.f32 %v6135_v37, %v15722_v24 }
 0x703   : > { %6257 = vst.msk [vmem:[#allocation3 + $0x20] sm:$0xff] %vm1581_vm2, %v15977_v41  ;;  %v6545_v15 = vld [vmem:[#allocation3 + $0x11] sm:$0xff] }
 0x704   : > { %v6330_v51 = vld [vmem:[#allocation3 + $0x17] sm:$0xff]  ;;  %6294 = vst.msk [vmem:[#allocation3 + $0x20] sm:$0xff] %vm1632_vm3, %v15977_v41  ;;  %6618 = vrot.lane.b32.xlu1 %v6545_v15, %s13465_s29 }
 0x705   : > { %6404 = vrot.lane.b32.xlu2 %v6330_v51, %s13464_s28 }
 0x708   : > { %v6138_v49 = vpop.f32.mrf.mxu1 }
 0x709   : > { %v15986_v1 = vadd.f32 %v6138_v49, %v15744_v31 }
 0x70b   : > { %6258 = vst.msk [vmem:[#allocation3 + $0x28] sm:$0xff] %vm1581_vm2, %v15986_v1  ;;  %11040 = vmatmul.msk.bf16.gmra.mxu1 %vm5579_vm4, %v11408_v61  ;;  %v6546_v24 = vld [vmem:[#allocation3 + $0x19] sm:$0xff]  ;;  %v11409_v61 = vld [vmem:[#allocation2 + $0x88] sm:$0xff] }
 0x70c   : > { %v6331_v17 = vld [vmem:[#allocation3 + $0x1f] sm:$0xff]  ;;  %6295 = vst.msk [vmem:[#allocation3 + $0x28] sm:$0xff] %vm1632_vm3, %v15986_v1 }
 0x70d   : > { %6620 = vrot.lane.b32.xlu2 %v6546_v24, %s13465_s29  ;;  %6406 = vrot.lane.b32.xlu0 %v6331_v17, %s13464_s28  ;;  %v5862_v24 = vpop.f32.mrf.mxu2 }
 0x710   : > { %v6140_v44 = vpop.f32.mrf.mxu1 }
 0x711   : > { %v15996_v37 = vadd.f32 %v6140_v44, %v15764_v35 }
 0x713   : > { %6259 = vst.msk [vmem:[#allocation3 + $0x30] sm:$0xff] %vm1581_vm2, %v15996_v37  ;;  %v6332_v31 = vld [vmem:[#allocation3 + $0x27] sm:$0xff] }
 0x714   : > { %v6547_v15 = vld [vmem:[#allocation3 + $0x21] sm:$0xff]  ;;  %6296 = vst.msk [vmem:[#allocation3 + $0x30] sm:$0xff] %vm1632_vm3, %v15996_v37  ;;  %6408 = vrot.lane.b32.xlu1 %v6332_v31, %s13464_s28 }
 0x715   : > { %6622 = vrot.lane.b32.xlu0 %v6547_v15, %s13465_s29 }
 0x718   : > { %v6143_v51 = vpop.f32.mrf.mxu1 }
 0x719   : > { %v16005_v49 = vadd.f32 %v6143_v51, %v15775_v20  ;;  %v5864_v51 = vpop.f32.mrf.mxu2 }
 0x71b   : > { %6260 = vst.msk [vmem:[#allocation3 + $0x38] sm:$0xff] %vm1581_vm2, %v16005_v49  ;;  %11041 = vmatmul.msk.bf16.gmra.mxu1 %vm5579_vm4, %v11409_v61  ;;  %v6548_v35 = vld [vmem:[#allocation3 + $0x29] sm:$0xff] }
 0x71c   : > { %v6333_v17 = vld [vmem:[#allocation3 + $0x2f] sm:$0xff]  ;;  %6297 = vst.msk [vmem:[#allocation3 + $0x38] sm:$0xff] %vm1632_vm3, %v16005_v49  ;;  %6624 = vrot.lane.b32.xlu1 %v6548_v35, %s13465_s29 }
 0x71d   : > { %6410 = vrot.lane.b32.xlu2 %v6333_v17, %s13464_s28  ;;  %v11410_v17 = vld [vmem:[#allocation2 + $0x90] sm:$0xff] }
 0x720   : > { %v6145_v44 = vpop.f32.mrf.mxu1 }
 0x721   : > { %v16015_v20 = vadd.f32 %v6145_v44, %v15783_v0 }
 0x723   : > { %6261 = vst.msk [vmem:[#allocation3 + $0x40] sm:$0xff] %vm1581_vm2, %v16015_v20  ;;  %v6549_v31 = vld [vmem:[#allocation3 + $0x31] sm:$0xff] }
 0x724   : > { %v6334_v15 = vld [vmem:[#allocation3 + $0x37] sm:$0xff]  ;;  %6298 = vst.msk [vmem:[#allocation3 + $0x40] sm:$0xff] %vm1632_vm3, %v16015_v20 }
 0x725   : > { %6626 = vrot.lane.b32.xlu2 %v6549_v31, %s13465_s29  ;;  %6412 = vrot.lane.b32.xlu0 %v6334_v15, %s13464_s28  ;;  %v5867_v31 = vpop.f32.mrf.mxu2 }
 0x728   : > { %v6148_v61 = vpop.f32.mrf.mxu1 }
 0x729   : > { %v16024_v35 = vadd.f32 %v6148_v61, %v15794_v4  ;;  %v11420_v4 = vld [vmem:[%s17565_s4 + $0x8] sm:$0xff] }
 0x72a   : > { %7772 = vmatpush.bf16.msra.mxu3 %v11420_v4 }
 0x72b   : > { %6262 = vst.msk [vmem:[#allocation3 + $0x48] sm:$0xff] %vm1581_vm2, %v16024_v35  ;;  %11042 = vmatmul.msk.bf16.gmra.mxu1 %vm5579_vm4, %v11410_v17  ;;  %v6335_v0 = vld [vmem:[#allocation3 + $0x3f] sm:$0xff] }
 0x72c   : > { %v6550_v44 = vld [vmem:[#allocation3 + $0x39] sm:$0xff]  ;;  %6299 = vst.msk [vmem:[#allocation3 + $0x48] sm:$0xff] %vm1632_vm3, %v16024_v35  ;;  %6414 = vrot.lane.b32.xlu1 %v6335_v0, %s13464_s28 }
 0x72d   : > { %6628 = vrot.lane.b32.xlu0 %v6550_v44, %s13465_s29  ;;  %v11440_v0 = vld [vmem:[%s17565_s4 + $0x30] sm:$0xff] }
 0x72e   : > { %8030 = vmatpush.bf16.msra.mxu0 %v11440_v0 }
 0x730   : > { %v6150_v15 = vpop.f32.mrf.mxu1 }
 0x731   : > { %v16037_v61 = vadd.f32 %v6150_v15, %v15802_v7  ;;  %v5869_v7 = vpop.f32.mrf.mxu2  ;;  %v11411_v15 = vld [vmem:[#allocation2 + $0x98] sm:$0xff] }
 0x733   : > { %6263 = vst.msk [vmem:[#allocation3 + $0x50] sm:$0xff] %vm1581_vm2, %v16037_v61  ;;  %v6551_v17 = vld [vmem:[#allocation3 + $0x41] sm:$0xff] }
 0x734   : > { %v6336_v34 = vld [vmem:[#allocation3 + $0x47] sm:$0xff]  ;;  %6300 = vst.msk [vmem:[#allocation3 + $0x50] sm:$0xff] %vm1632_vm3, %v16037_v61  ;;  %6630 = vrot.lane.b32.xlu1 %v6551_v17, %s13465_s29 }
 0x735   : > { %6416 = vrot.lane.b32.xlu2 %v6336_v34, %s13464_s28 }
 0x738   : > { %v6153_v44 = vpop.f32.mrf.mxu1 }
 0x739   : > { %v16049_v4 = vadd.f32 %v6153_v44, %v15813_v46  ;;  %v5872_v46 = vpop.f32.mrf.mxu2 }
 0x73b   : > { %6264 = vst.msk [vmem:[#allocation3 + $0x58] sm:$0xff] %vm1581_vm2, %v16049_v4  ;;  %11043 = vmatmul.msk.bf16.gmra.mxu1 %vm5579_vm4, %v11411_v15  ;;  %v6552_v19 = vld [vmem:[#allocation3 + $0x49] sm:$0xff] }
 0x73c   : > { %v6337_v17 = vld [vmem:[#allocation3 + $0x4f] sm:$0xff]  ;;  %6301 = vst.msk [vmem:[#allocation3 + $0x58] sm:$0xff] %vm1632_vm3, %v16049_v4 }
 0x73d   : > { %6632 = vrot.lane.b32.xlu2 %v6552_v19, %s13465_s29  ;;  %6418 = vrot.lane.b32.xlu0 %v6337_v17, %s13464_s28  ;;  %v5863_v19 = vadd.f32 %v5862_v24, %v15825_v26  ;;  %v5865_v26 = vadd.f32 %v5864_v51, %v15830_v10  ;;  %v11423_v10 = vld [vmem:[%s17565_s4 + $0x1c] sm:$0xff] }
 0x73e   : > { %7604 = vmatpush.bf16.msra.mxu2 %v11423_v10 }
 0x740   : > { %v6155_v34 = vpop.f32.mrf.mxu1 }
 0x741   : > { %v16059_v0 = vadd.f32 %v6155_v34, %v15820_v59  ;;  %v11412_v59 = vld [vmem:[#allocation2 + $0xa0] sm:$0xff] }
 0x743   : > { %6265 = vst.msk [vmem:[#allocation3 + $0x60] sm:$0xff] %vm1581_vm2, %v16059_v0  ;;  %v6338_v44 = vld [vmem:[#allocation3 + $0x57] sm:$0xff] }
 0x744   : > { %v6553_v29 = vld [vmem:[#allocation3 + $0x51] sm:$0xff]  ;;  %6302 = vst.msk [vmem:[#allocation3 + $0x60] sm:$0xff] %vm1632_vm3, %v16059_v0  ;;  %6420 = vrot.lane.b32.xlu1 %v6338_v44, %s13464_s28 }
 0x745   : > { %6634 = vrot.lane.b32.xlu0 %v6553_v29, %s13465_s29  ;;  %v5874_v29 = vpop.f32.mrf.mxu2 }
 0x748   : > { %v6158_v15 = vpop.f32.mrf.mxu1 }
 0x749   : > { %v16068_v17 = vadd.f32 %v6158_v15, %v5863_v19 }
 0x74b   : > { %6266 = vst.msk [vmem:[#allocation3 + $0x68] sm:$0xff] %vm1581_vm2, %v16068_v17  ;;  %11044 = vmatmul.msk.bf16.gmra.mxu1 %vm5579_vm4, %v11412_v59  ;;  %v6554_v34 = vld [vmem:[#allocation3 + $0x59] sm:$0xff] }
 0x74c   : > { %v6339_v42 = vld [vmem:[#allocation3 + $0x5f] sm:$0xff]  ;;  %6303 = vst.msk [vmem:[#allocation3 + $0x68] sm:$0xff] %vm1632_vm3, %v16068_v17  ;;  %6636 = vrot.lane.b32.xlu1 %v6554_v34, %s13465_s29 }
 0x74d   : > { %6422 = vrot.lane.b32.xlu2 %v6339_v42, %s13464_s28  ;;  %v5877_v59 = vpop.f32.mrf.mxu2  ;;  %v5868_v42 = vadd.f32 %v5867_v31, %v15835_v60  ;;  %v5870_v60 = vadd.f32 %v5869_v7, %v15842_v39  ;;  %v5873_v39 = vadd.f32 %v5872_v46, %v15848_v40 }
 0x750   : > { %v6160_v24 = vpop.f32.mrf.mxu1 }
 0x751   : > { %v16078_v44 = vadd.f32 %v6160_v24, %v5865_v26  ;;  %v11413_v26 = vld [vmem:[#allocation2 + $0xa8] sm:$0xff] }
 0x753   : > { %6267 = vst.msk [vmem:[#allocation3 + $0x70] sm:$0xff] %vm1581_vm2, %v16078_v44  ;;  %v6555_v19 = vld [vmem:[#allocation3 + $0x61] sm:$0xff] }
 0x754   : > { %v6340_v15 = vld [vmem:[#allocation3 + $0x67] sm:$0xff]  ;;  %6304 = vst.msk [vmem:[#allocation3 + $0x70] sm:$0xff] %vm1632_vm3, %v16078_v44 }
 0x755   : > { %6638 = vrot.lane.b32.xlu2 %v6555_v19, %s13465_s29  ;;  %6424 = vrot.lane.b32.xlu0 %v6340_v15, %s13464_s28  ;;  %v16100_v31 = vpop.f32.mrf.mxu2 }
 0x758   : > { %v6163_v51 = vpop.f32.mrf.mxu1 }
 0x759   : > { %v16090_v34 = vadd.f32 %v6163_v51, %v5868_v42 }
 0x75b   : > { %6268 = vst.msk [vmem:[#allocation3 + $0x78] sm:$0xff] %vm1581_vm2, %v16090_v34  ;;  %11045 = vmatmul.msk.bf16.gmra.mxu1 %vm5579_vm4, %v11413_v26  ;;  %v6341_v24 = vld [vmem:[#allocation3 + $0x6f] sm:$0xff] }
 0x75c   : > { %v6556_v19 = vld [vmem:[#allocation3 + $0x69] sm:$0xff]  ;;  %6305 = vst.msk [vmem:[#allocation3 + $0x78] sm:$0xff] %vm1632_vm3, %v16090_v34  ;;  %6426 = vrot.lane.b32.xlu1 %v6341_v24, %s13464_s28 }
 0x75d   : > { %6640 = vrot.lane.b32.xlu0 %v6556_v19, %s13465_s29  ;;  %v16111_v24 = vpop.f32.mrf.mxu2 }
 0x760   : > { %v6165_v15 = vpop.f32.mrf.mxu1 }
 0x761   : > { %v16102_v10 = vadd.f32 %v6165_v15, %v5870_v60  ;;  %v11414_v60 = vld [vmem:[#allocation2 + $0xb0] sm:$0xff]  ;;  %v6405_v15 = vpop.permute.xlu2 %6404 }
 0x763   : > { %6269 = vst.msk [vmem:[#allocation3 + $0x80] sm:$0xff] %vm1581_vm2, %v16102_v10  ;;  %v6557_v42 = vld [vmem:[#allocation3 + $0x71] sm:$0xff] }
 0x764   : > { %v6342_v51 = vld [vmem:[#allocation3 + $0x77] sm:$0xff]  ;;  %6306 = vst.msk [vmem:[#allocation3 + $0x80] sm:$0xff] %vm1632_vm3, %v16102_v10  ;;  %6642 = vrot.lane.b32.xlu1 %v6557_v42, %s13465_s29 }
 0x765   : > { %6428 = vrot.lane.b32.xlu2 %v6342_v51, %s13464_s28  ;;  %v5875_v51 = vadd.f32 %v5874_v29, %v15857_v23  ;;  %v16127_v16 = vpop.f32.mrf.mxu2  ;;  %v6510_v23 = vadd.f32 %v6405_v15, %v15967_v18 }
 0x766   : > { %v6401_v26 = vpop.permute.xlu0 %6400 }
 0x767   : > { %v6508_v40 = vadd.f32 %v6401_v26, %v15944_v56  ;;  %v13189_v56 = vunpack.i.l.bf16 %v15859_v12 }
 0x768   : > { %v6168_v7 = vpop.f32.mrf.mxu1 }
 0x769   : > { %v16113_v19 = vadd.f32 %v6168_v7, %v5873_v39  ;;  %v6621_v26 = vpop.permute.xlu2 %6620 }
 0x76b   : > { %17703 = vst [vmem:[#allocation20_spill] sm:$0xff] %v16113_v19  ;;  %11046 = vmatmul.msk.bf16.gmra.mxu1 %vm5579_vm4, %v11414_v60  ;;  %v6558_v45 = vld [vmem:[#allocation3 + $0x79] sm:$0xff] }
 0x76c   : > { %6270 = vst.msk [vmem:[#allocation3 + $0x88] sm:$0xff] %vm1581_vm2, %v16113_v19  ;;  %v6343_v55 = vld [vmem:[#allocation3 + $0x7f] sm:$0xff] }
 0x76d   : > { %6307 = vst.msk [vmem:[#allocation3 + $0x88] sm:$0xff] %vm1632_vm3, %v16113_v19  ;;  %6644 = vrot.lane.b32.xlu2 %v6558_v45, %s13465_s29  ;;  %6430 = vrot.lane.b32.xlu0 %v6343_v55, %s13464_s28 }
 0x76e   : > { %v6403_v46 = vpop.permute.xlu1 %6402 }
 0x76f   : > { %v6617_v42 = vpop.permute.xlu0 %6616  ;;  %v6509_v29 = vadd.f32 %v6403_v46, %v15956_v43 }
 0x770   : > { %v6724_v39 = vadd.f32 %v6617_v42, %v6508_v40  ;;  %v6170_v7 = vpop.f32.mrf.mxu1 }
 0x771   : > { %v16125_v60 = vadd.f32 %v6170_v7, %v5875_v51  ;;  %v6726_v7 = vadd.f32 %v6621_v26, %v6510_v23 }
 0x772   : > { %v6766_v11 = vadd.f32 %v15833_v47, %v6724_v39  ;;  %v5878_v39 = vadd.f32 %v5877_v59, %v15865_v63  ;;  %v13190_v63 = vunpack.i.h.bf16 %v15859_v12  ;;  %v5880_v59 = vadd.f32 %v16100_v31, %v15874_v22 }
 0x773   : > { %17704 = vst [vmem:[#allocation16_spill] sm:$0xff] %v16125_v60 }
 0x774   : > { %vm6802_vm6 = vcmp.gt.f32.partialorder %v6766_v11, 0.0  ;;  %v6838_v30 = vmul.f32 0.2, %v6766_v11  ;;  %6271 = vst.msk [vmem:[#allocation3 + $0x90] sm:$0xff] %vm1581_vm2, %v16125_v60  ;;  %v6344_v55 = vld [vmem:[#allocation3 + $0x87] sm:$0xff] }
 0x775   : > { %v6559_v45 = vld [vmem:[#allocation3 + $0x81] sm:$0xff]  ;;  %6308 = vst.msk [vmem:[#allocation3 + $0x90] sm:$0xff] %vm1632_vm3, %v16125_v60  ;;  %6432 = vrot.lane.b32.xlu1 %v6344_v55, %s13464_s28 }
 0x776   : > { %6646 = vrot.lane.b32.xlu0 %v6559_v45, %s13465_s29  ;;  %v6874_v40 = vsel %vm6802_vm6, %v6766_v11, %v6838_v30  ;;  %v6619_v42 = vpop.permute.xlu1 %6618  ;;  %v11415_v60 = vld [vmem:[#allocation2 + $0xb8] sm:$0xff]  ;;  %v6768_v45 = vadd.f32 %v15833_v47, %v6726_v7 }
 0x777   : > { %v7162_v51 = vmul.f32 %v13189_v56, %v6874_v40  ;;  %v6725_v25 = vadd.f32 %v6619_v42, %v6509_v29  ;;  %v13194_v29 = vunpack.i.l.bf16 %v15846_v14 }
 0x778   : > { %v6173_v32 = vpop.f32.mrf.mxu1  ;;  %v6840_v15 = vmul.f32 0.2, %v6768_v45  ;;  %vm6804_vm13 = vcmp.gt.f32.partialorder %v6768_v45, 0.0 }
 0x779   : > { %v6767_v19 = vadd.f32 %v15833_v47, %v6725_v25  ;;  %v16140_v21 = vadd.f32 %v6173_v32, %v5878_v39  ;;  %v7198_v55 = vpack.c.bf16 %v7162_v51, %v7162_v51  ;;  %v16151_v25 = vpop.f32.mrf.mxu2  ;;  %v5883_v51 = vadd.f32 %v16111_v24, %v15882_v33 }
 0x77a   : > { %v6876_v26 = vsel %vm6804_vm13, %v6768_v45, %v6840_v15  ;;  %v13195_v33 = vunpack.i.h.bf16 %v15846_v14 }
 0x77b   : > { %vm6803_vm5 = vcmp.gt.f32.partialorder %v6767_v19, 0.0  ;;  %v6839_v18 = vmul.f32 0.2, %v6767_v19  ;;  %6272 = vst.msk [vmem:[#allocation3 + $0x98] sm:$0xff] %vm1581_vm2, %v16140_v21  ;;  %11047 = vmatmul.msk.bf16.gmra.mxu1 %vm5579_vm4, %v11415_v60  ;;  %v6411_v60 = vpop.permute.xlu2 %6410  ;;  %v7164_v42 = vmul.f32 %v13194_v29, %v6876_v26 }
 0x77c   : > { %v6345_v11 = vld [vmem:[#allocation3 + $0x8f] sm:$0xff]  ;;  %6309 = vst.msk [vmem:[#allocation3 + $0x98] sm:$0xff] %vm1632_vm3, %v16140_v21  ;;  %v6513_v24 = vadd.f32 %v6411_v60, %v15996_v37 }
 0x77d   : > { %6434 = vrot.lane.b32.xlu2 %v6345_v11, %s13464_s28  ;;  %7270 = vrot.lane.b32.xlu1 %v7198_v55, %s13468_s12  ;;  %v6875_v32 = vsel %vm6803_vm5, %v6767_v19, %v6839_v18  ;;  %v6560_v22 = vld [vmem:[#allocation3 + $0x89] sm:$0xff]  ;;  %v7200_v11 = vpack.c.bf16 %v7164_v42, %v7164_v42 }
 0x77e   : > { %v7163_v43 = vmul.f32 %v13190_v63, %v6875_v32 }
 0x77f   : > { %v6407_v30 = vpop.permute.xlu0 %6406 }
 0x780   : > { %v6175_v46 = vpop.f32.mrf.mxu1  ;;  %v7199_v56 = vpack.c.bf16 %v7163_v43, %v7163_v43  ;;  %v6511_v31 = vadd.f32 %v6407_v30, %v15977_v41 }
 0x781   : > { %v16155_v12 = vadd.f32 %v6175_v46, %v5880_v59  ;;  %v16168_v39 = vpop.f32.mrf.mxu2  ;;  %v5885_v46 = vadd.f32 %v16127_v16, %v15890_v13  ;;  %v13199_v13 = vunpack.i.l.bf16 %v15839_v28 }
 0x783   : > { %6273 = vst.msk [vmem:[#allocation3 + $0xa0] sm:$0xff] %vm1581_vm2, %v16155_v12  ;;  %v6346_v23 = vld [vmem:[#allocation3 + $0x97] sm:$0xff]  ;;  %v6627_v30 = vpop.permute.xlu2 %6626 }
 0x784   : > { %6310 = vst.msk [vmem:[#allocation3 + $0xa0] sm:$0xff] %vm1632_vm3, %v16155_v12  ;;  %6436 = vrot.lane.b32.xlu0 %v6346_v23, %s13464_s28  ;;  %v6561_v41 = vld [vmem:[#allocation3 + $0x91] sm:$0xff]  ;;  %v6729_v26 = vadd.f32 %v6627_v30, %v6513_v24  ;;  %v13200_v24 = vunpack.i.h.bf16 %v15839_v28 }
 0x785   : > { %7272 = vrot.lane.b32.xlu2 %v7199_v56, %s13468_s12  ;;  %6648 = vrot.lane.b32.xlu1 %v6560_v22, %s13465_s29 }
 0x786   : > { %v6409_v19 = vpop.permute.xlu1 %6408  ;;  %v6771_v37 = vadd.f32 %v15833_v47, %v6729_v26 }
 0x787   : > { %v6623_v40 = vpop.permute.xlu0 %6622  ;;  %v6512_v43 = vadd.f32 %v6409_v19, %v15986_v1 }
 0x788   : > { %v6727_v7 = vadd.f32 %v6623_v40, %v6511_v31  ;;  %v6178_v55 = vpop.f32.mrf.mxu1  ;;  %vm6807_vm12 = vcmp.gt.f32.partialorder %v6771_v37, 0.0 }
 0x789   : > { %v16171_v18 = vadd.f32 %v6178_v55, %v5883_v51  ;;  %v16185_v56 = vpop.f32.mrf.mxu2  ;;  %v6843_v55 = vmul.f32 0.2, %v6771_v37 }
 0x78a   : > { %v6769_v45 = vadd.f32 %v15833_v47, %v6727_v7  ;;  %v5888_v7 = vadd.f32 %v16151_v25, %v15895_v2 }
 0x78b   : > { %6274 = vst.msk [vmem:[#allocation3 + $0xa8] sm:$0xff] %vm1581_vm2, %v16171_v18  ;;  %v6347_v32 = vld [vmem:[#allocation3 + $0x9f] sm:$0xff]  ;;  %v6879_v30 = vsel %vm6807_vm12, %v6771_v37, %v6843_v55  ;;  %vm7549_vm12 = vcmask 326656  }
 0x78c   : > { %vm6805_vm4 = vcmp.gt.f32.partialorder %v6769_v45, 0.0  ;;  %v6841_v63 = vmul.f32 0.2, %v6769_v45  ;;  %6311 = vst.msk [vmem:[#allocation3 + $0xa8] sm:$0xff] %vm1632_vm3, %v16171_v18  ;;  %7274 = vrot.lane.b32.xlu0 %v7200_v11, %s13468_s12  ;;  %v6562_v19 = vld [vmem:[#allocation3 + $0x99] sm:$0xff] }
 0x78d   : > { %6650 = vrot.lane.b32.xlu2 %v6561_v41, %s13465_s29  ;;  %6438 = vrot.lane.b32.xlu1 %v6347_v32, %s13464_s28 }
 0x78e   : > { %v6877_v59 = vsel %vm6805_vm4, %v6769_v45, %v6841_v63  ;;  %v6625_v15 = vpop.permute.xlu1 %6624  ;;  %vm7378_vm4 = vcmask 322816  }
 0x78f   : > { %v6728_v23 = vadd.f32 %v6625_v15, %v6512_v43  ;;  %v7165_v29 = vmul.f32 %v13195_v33, %v6877_v59  ;;  %v6417_v41 = vpop.permute.xlu2 %6416  ;;  %v7167_v15 = vmul.f32 %v13200_v24, %v6879_v30 }
 0x790   : > { %v6180_v22 = vpop.f32.mrf.mxu1 }
 0x791   : > { %v6770_v31 = vadd.f32 %v15833_v47, %v6728_v23  ;;  %v16188_v14 = vadd.f32 %v6180_v22, %v5885_v46  ;;  %v7201_v16 = vpack.c.bf16 %v7165_v29, %v7165_v29  ;;  %v16201_v11 = vpop.f32.mrf.mxu2  ;;  %v5890_v46 = vadd.f32 %v16168_v39, %v15900_v57 }
 0x792   : > { %v7203_v22 = vpack.c.bf16 %v7167_v15, %v7167_v15  ;;  %v13204_v57 = vunpack.i.l.bf16 %v15867_v8  ;;  %v6516_v39 = vadd.f32 %v6417_v41, %v16024_v35 }
 0x793   : > { %vm6806_vm11 = vcmp.gt.f32.partialorder %v6770_v31, 0.0  ;;  %v6842_v1 = vmul.f32 0.2, %v6770_v31  ;;  %6275 = vst.msk [vmem:[#allocation3 + $0xb0] sm:$0xff] %vm1581_vm2, %v16188_v14  ;;  %v6348_v60 = vld [vmem:[#allocation3 + $0xa7] sm:$0xff] }
 0x794   : > { %6312 = vst.msk [vmem:[#allocation3 + $0xb0] sm:$0xff] %vm1632_vm3, %v16188_v14  ;;  %6652 = vrot.lane.b32.xlu0 %v6562_v19, %s13465_s29  ;;  %v6563_v2 = vld [vmem:[#allocation3 + $0xa1] sm:$0xff] }
 0x795   : > { %6440 = vrot.lane.b32.xlu2 %v6348_v60, %s13464_s28  ;;  %v6878_v40 = vsel %vm6806_vm11, %v6770_v31, %v6842_v1  ;;  %7276 = vrot.lane.b32.xlu1 %v7201_v16, %s13468_s12 }
 0x796   : > { %v7166_v51 = vmul.f32 %v13199_v13, %v6878_v40  ;;  %v11419_v13 = vld [vmem:[%s17565_s4] sm:$0xff] }
 0x797   : > { %v6413_v42 = vpop.permute.xlu0 %6412  ;;  %v6633_v60 = vpop.permute.xlu2 %6632  ;;  %7773 = vmatpush.bf16.msra.mxu3 %v11419_v13 }
 0x798   : > { %v6183_v45 = vpop.f32.mrf.mxu1  ;;  %v7202_v32 = vpack.c.bf16 %v7166_v51, %v7166_v51  ;;  %v6514_v25 = vadd.f32 %v6413_v42, %v16005_v49  ;;  %v5893_v42 = vadd.f32 %v16185_v56, %v15904_v38  ;;  %v6732_v51 = vadd.f32 %v6633_v60, %v6516_v39 }
 0x799   : > { %v16203_v63 = vadd.f32 %v6183_v45, %v5888_v7  ;;  %v16219_v31 = vpop.f32.mrf.mxu2  ;;  %v13205_v38 = vunpack.i.h.bf16 %v15867_v8  ;;  %v5895_v8 = vadd.f32 %v16201_v11, %v15908_v54 }
 0x79b   : > { %6276 = vst.msk [vmem:[#allocation3 + $0xb8] sm:$0xff] %vm1581_vm2, %v16203_v63  ;;  %v6349_v33 = vld [vmem:[#allocation3 + $0xaf] sm:$0xff] }
 0x79c   : > { %6313 = vst.msk [vmem:[#allocation3 + $0xb8] sm:$0xff] %vm1632_vm3, %v16203_v63  ;;  %6442 = vrot.lane.b32.xlu0 %v6349_v33, %s13464_s28  ;;  %v6564_v49 = vld [vmem:[#allocation3 + $0xa9] sm:$0xff] }
 0x79d   : > { %7278 = vrot.lane.b32.xlu2 %v7202_v32, %s13468_s12  ;;  %6654 = vrot.lane.b32.xlu1 %v6563_v2, %s13465_s29 }
 0x79e   : > { %v6415_v43 = vpop.permute.xlu1 %6414 }
 0x79f   : > { %v6629_v59 = vpop.permute.xlu0 %6628  ;;  %v6515_v19 = vadd.f32 %v6415_v43, %v16015_v20  ;;  %v6774_v20 = vadd.f32 %v15833_v47, %v6732_v51 }
 0x7a0   : > { %v6730_v26 = vadd.f32 %v6629_v59, %v6514_v25  ;;  %v6185_v28 = vpop.f32.mrf.mxu1  ;;  %v11439_v25 = vld [vmem:[%s17565_s4 + $0x28] sm:$0xff] }
 0x7a1   : > { %v16217_v29 = vadd.f32 %v6185_v28, %v5890_v46  ;;  %v5899_v56 = vpop.f32.mrf.mxu2  ;;  %v6846_v15 = vmul.f32 0.2, %v6774_v20  ;;  %8031 = vmatpush.bf16.msra.mxu0 %v11439_v25  ;;  %vm6810_vm8 = vcmp.gt.f32.partialorder %v6774_v20, 0.0 }
 0x7a2   : > { %v6772_v23 = vadd.f32 %v15833_v47, %v6730_v26 }
 0x7a3   : > { %6277 = vst.msk [vmem:[#allocation3 + $0xc0] sm:$0xff] %vm1581_vm2, %v16217_v29  ;;  %v6350_v1 = vld [vmem:[#allocation3 + $0xb7] sm:$0xff] }
 0x7a4   : > { %vm6808_vm14 = vcmp.gt.f32.partialorder %v6772_v23, 0.0  ;;  %v6844_v37 = vmul.f32 0.2, %v6772_v23  ;;  %6314 = vst.msk [vmem:[#allocation3 + $0xc0] sm:$0xff] %vm1632_vm3, %v16217_v29  ;;  %7280 = vrot.lane.b32.xlu0 %v7203_v22, %s13468_s12  ;;  %v6565_v33 = vld [vmem:[#allocation3 + $0xb1] sm:$0xff]  ;;  %v6882_v22 = vsel %vm6810_vm8, %v6774_v20, %v6846_v15 }
 0x7a5   : > { %6656 = vrot.lane.b32.xlu2 %v6564_v49, %s13465_s29  ;;  %6444 = vrot.lane.b32.xlu1 %v6350_v1, %s13464_s28  ;;  %v13209_v49 = vunpack.i.l.bf16 %v15855_v5  ;;  %v11422_v1 = vld [vmem:[%s17565_s4 + $0x14] sm:$0xff] }
 0x7a6   : > { %v6880_v16 = vsel %vm6808_vm14, %v6772_v23, %v6844_v37  ;;  %v6631_v40 = vpop.permute.xlu1 %6630  ;;  %7605 = vmatpush.bf16.msra.mxu2 %v11422_v1 }
 0x7a7   : > { %v6731_v7 = vadd.f32 %v6631_v40, %v6515_v19  ;;  %v7168_v55 = vmul.f32 %v13204_v57, %v6880_v16  ;;  %v6423_v26 = vpop.permute.xlu2 %6422  ;;  %v7170_v39 = vmul.f32 %v13209_v49, %v6882_v22  ;;  %v5898_v19 = vadd.f32 %v16219_v31, %v15910_v27 }
 0x7a8   : > { %v6188_v45 = vpop.f32.mrf.mxu1  ;;  %v13210_v27 = vunpack.i.h.bf16 %v15855_v5  ;;  %v6519_v31 = vadd.f32 %v6423_v26, %v16059_v0 }
 0x7a9   : > { %v6773_v35 = vadd.f32 %v15833_v47, %v6731_v7  ;;  %v16237_v41 = vadd.f32 %v6188_v45, %v5893_v42  ;;  %v7204_v24 = vpack.c.bf16 %v7168_v55, %v7168_v55  ;;  %v5902_v16 = vpop.f32.mrf.mxu2 }
 0x7ab   : > { %vm6809_vm15 = vcmp.gt.f32.partialorder %v6773_v35, 0.0  ;;  %v6845_v32 = vmul.f32 0.2, %v6773_v35  ;;  %6278 = vst.msk [vmem:[#allocation3 + $0xc8] sm:$0xff] %vm1581_vm2, %v16237_v41  ;;  %v6351_v30 = vld [vmem:[#allocation3 + $0xbf] sm:$0xff] }
 0x7ac   : > { %6315 = vst.msk [vmem:[#allocation3 + $0xc8] sm:$0xff] %vm1632_vm3, %v16237_v41  ;;  %6658 = vrot.lane.b32.xlu0 %v6565_v33, %s13465_s29  ;;  %v6566_v54 = vld [vmem:[#allocation3 + $0xb9] sm:$0xff]  ;;  %v5900_v33 = vadd.f32 %v5899_v56, %v15913_v58  ;;  %v13214_v56 = vunpack.i.l.bf16 %v15844_v53 }
 0x7ad   : > { %6446 = vrot.lane.b32.xlu2 %v6351_v30, %s13464_s28  ;;  %v6881_v2 = vsel %vm6809_vm15, %v6773_v35, %v6845_v32  ;;  %7282 = vrot.lane.b32.xlu1 %v7204_v24, %s13468_s12 }
 0x7ae   : > { %v7169_v59 = vmul.f32 %v13205_v38, %v6881_v2 }
 0x7af   : > { %v6419_v43 = vpop.permute.xlu0 %6418  ;;  %v6639_v7 = vpop.permute.xlu2 %6638 }
 0x7b0   : > { %v6190_v46 = vpop.f32.mrf.mxu1  ;;  %v7205_v23 = vpack.c.bf16 %v7169_v59, %v7169_v59  ;;  %v6517_v11 = vadd.f32 %v6419_v43, %v16037_v61  ;;  %v7206_v61 = vpack.c.bf16 %v7170_v39, %v7170_v39  ;;  %v6735_v24 = vadd.f32 %v6639_v7, %v6519_v31 }
 0x7b1   : > { %v16253_v28 = vadd.f32 %v6190_v46, %v5895_v8  ;;  %v5904_v43 = vpop.f32.mrf.mxu2 }
 0x7b2   : > { %v6777_v5 = vadd.f32 %v15833_v47, %v6735_v24  ;;  %v5905_v7 = vadd.f32 %v5904_v43, %v15918_v52  ;;  %v13219_v52 = vunpack.i.l.bf16 %v15876_v3 }
 0x7b3   : > { %6279 = vst.msk [vmem:[#allocation3 + $0xd0] sm:$0xff] %vm1581_vm2, %v16253_v28  ;;  %v6352_v37 = vld [vmem:[#allocation3 + $0xc7] sm:$0xff] }
 0x7b4   : > { %6316 = vst.msk [vmem:[#allocation3 + $0xd0] sm:$0xff] %vm1632_vm3, %v16253_v28  ;;  %6448 = vrot.lane.b32.xlu0 %v6352_v37, %s13464_s28  ;;  %v6567_v45 = vld [vmem:[#allocation3 + $0xc1] sm:$0xff]  ;;  %v5903_v37 = vadd.f32 %v5902_v16, %v15915_v36  ;;  %v6849_v49 = vmul.f32 0.2, %v6777_v5  ;;  %vm6813_vm6 = vcmp.gt.f32.partialorder %v6777_v5, 0.0 }
 0x7b5   : > { %7284 = vrot.lane.b32.xlu2 %v7205_v23, %s13468_s12  ;;  %6660 = vrot.lane.b32.xlu1 %v6566_v54, %s13465_s29 }
 0x7b6   : > { %v6421_v60 = vpop.permute.xlu1 %6420 }
 0x7b7   : > { %v6635_v57 = vpop.permute.xlu0 %6634  ;;  %v6518_v20 = vadd.f32 %v6421_v60, %v16049_v4 }
 0x7b8   : > { %v6733_v13 = vadd.f32 %v6635_v57, %v6517_v11  ;;  %v6193_v40 = vpop.f32.mrf.mxu1  ;;  %v6885_v57 = vsel %vm6813_vm6, %v6777_v5, %v6849_v49 }
 0x7b9   : > { %v16270_v51 = vadd.f32 %v6193_v40, %v5898_v19  ;;  %v5907_v60 = vpop.f32.mrf.mxu2  ;;  %v13215_v19 = vunpack.i.h.bf16 %v15844_v53 }
 0x7ba   : > { %v6775_v42 = vadd.f32 %v15833_v47, %v6733_v13 }
 0x7bb   : > { %6280 = vst.msk [vmem:[#allocation3 + $0xd8] sm:$0xff] %vm1581_vm2, %v16270_v51  ;;  %v6353_v35 = vld [vmem:[#allocation3 + $0xcf] sm:$0xff] }
 0x7bc   : > { %vm6811_vm9 = vcmp.gt.f32.partialorder %v6775_v42, 0.0  ;;  %v6847_v55 = vmul.f32 0.2, %v6775_v42  ;;  %6317 = vst.msk [vmem:[#allocation3 + $0xd8] sm:$0xff] %vm1632_vm3, %v16270_v51  ;;  %7286 = vrot.lane.b32.xlu0 %v7206_v61, %s13468_s12  ;;  %v6568_v46 = vld [vmem:[#allocation3 + $0xc9] sm:$0xff]  ;;  %v7173_v61 = vmul.f32 %v13215_v19, %v6885_v57 }
 0x7bd   : > { %6662 = vrot.lane.b32.xlu2 %v6567_v45, %s13465_s29  ;;  %6450 = vrot.lane.b32.xlu1 %v6353_v35, %s13464_s28 }
 0x7be   : > { %v6883_v32 = vsel %vm6811_vm9, %v6775_v42, %v6847_v55  ;;  %v6637_v30 = vpop.permute.xlu1 %6636 }
 0x7bf   : > { %v6734_v38 = vadd.f32 %v6637_v30, %v6518_v20  ;;  %v7171_v2 = vmul.f32 %v13210_v27, %v6883_v32  ;;  %v6429_v4 = vpop.permute.xlu2 %6428  ;;  %v7209_v27 = vpack.c.bf16 %v7173_v61, %v7173_v61 }
 0x7c0   : > { %v6195_v25 = vpop.f32.mrf.mxu1  ;;  %v6522_v30 = vadd.f32 %v6429_v4, %v16090_v34 }
 0x7c1   : > { %v6776_v59 = vadd.f32 %v15833_v47, %v6734_v38  ;;  %v16284_v8 = vadd.f32 %v6195_v25, %v5900_v33  ;;  %v7207_v58 = vpack.c.bf16 %v7171_v2, %v7171_v2  ;;  %v5909_v32 = vpop.f32.mrf.mxu2  ;;  %v5908_v25 = vadd.f32 %v5907_v60, %v15920_v9 }
 0x7c2   : > { %v13220_v9 = vunpack.i.h.bf16 %v15876_v3 }
 0x7c3   : > { %vm6812_vm10 = vcmp.gt.f32.partialorder %v6776_v59, 0.0  ;;  %v6848_v0 = vmul.f32 0.2, %v6776_v59  ;;  %6281 = vst.msk [vmem:[#allocation3 + $0xe0] sm:$0xff] %vm1581_vm2, %v16284_v8  ;;  %v6354_v15 = vld [vmem:[#allocation3 + $0xd7] sm:$0xff] }
 0x7c4   : > { %6318 = vst.msk [vmem:[#allocation3 + $0xe0] sm:$0xff] %vm1632_vm3, %v16284_v8  ;;  %6664 = vrot.lane.b32.xlu0 %v6568_v46, %s13465_s29  ;;  %v6569_v36 = vld [vmem:[#allocation3 + $0xd1] sm:$0xff] }
 0x7c5   : > { %6452 = vrot.lane.b32.xlu2 %v6354_v15, %s13464_s28  ;;  %v6884_v26 = vsel %vm6812_vm10, %v6776_v59, %v6848_v0  ;;  %7288 = vrot.lane.b32.xlu1 %v7207_v58, %s13468_s12 }
 0x7c6   : > { %v7172_v22 = vmul.f32 %v13214_v56, %v6884_v26 }
 0x7c7   : > { %v6425_v23 = vpop.permute.xlu0 %6424  ;;  %v6645_v16 = vpop.permute.xlu2 %6644 }
 0x7c8   : > { %v6198_v54 = vpop.f32.mrf.mxu1  ;;  %v7208_v1 = vpack.c.bf16 %v7172_v22, %v7172_v22  ;;  %v6520_v13 = vadd.f32 %v6425_v23, %v16068_v17  ;;  %v6738_v43 = vadd.f32 %v6645_v16, %v6522_v30 }
 0x7c9   : > { %v16296_v11 = vadd.f32 %v6198_v54, %v5903_v37  ;;  %v5912_v49 = vpop.f32.mrf.mxu2  ;;  %v5910_v54 = vadd.f32 %v5909_v32, %v15926_v48  ;;  %v17705_v32 = vld [vmem:[#allocation16_spill] sm:$0xff] }
 0x7ca   : > { %v6780_v34 = vadd.f32 %v15833_v47, %v6738_v43 }
 0x7cb   : > { %6282 = vst.msk [vmem:[#allocation3 + $0xe8] sm:$0xff] %vm1581_vm2, %v16296_v11  ;;  %v6355_v39 = vld [vmem:[#allocation3 + $0xdf] sm:$0xff] }
 0x7cc   : > { %6319 = vst.msk [vmem:[#allocation3 + $0xe8] sm:$0xff] %vm1632_vm3, %v16296_v11  ;;  %6454 = vrot.lane.b32.xlu0 %v6355_v39, %s13464_s28  ;;  %v6570_v17 = vld [vmem:[#allocation3 + $0xd9] sm:$0xff]  ;;  %vm6816_vm11 = vcmp.gt.f32.partialorder %v6780_v34, 0.0 }
 0x7cd   : > { %7290 = vrot.lane.b32.xlu2 %v7208_v1, %s13468_s12  ;;  %6666 = vrot.lane.b32.xlu1 %v6569_v36, %s13465_s29  ;;  %v6852_v1 = vmul.f32 0.2, %v6780_v34  ;;  %v13224_v36 = vunpack.i.l.bf16 %v15863_v62 }
 0x7ce   : > { %v6427_v40 = vpop.permute.xlu1 %6426 }
 0x7cf   : > { %v6641_v42 = vpop.permute.xlu0 %6640  ;;  %v6521_v33 = vadd.f32 %v6427_v40, %v16078_v44  ;;  %v6888_v39 = vsel %vm6816_vm11, %v6780_v34, %v6852_v1 }
 0x7d0   : > { %v6736_v55 = vadd.f32 %v6641_v42, %v6520_v13  ;;  %v6200_v53 = vpop.f32.mrf.mxu1  ;;  %v7176_v61 = vmul.f32 %v13224_v36, %v6888_v39 }
 0x7d1   : > { %v16309_v35 = vadd.f32 %v6200_v53, %v5905_v7  ;;  %v5913_v7 = vadd.f32 %v5912_v49, %v15933_v50  ;;  %v13225_v50 = vunpack.i.h.bf16 %v15863_v62 }
 0x7d2   : > { %v6778_v45 = vadd.f32 %v15833_v47, %v6736_v55 }
 0x7d3   : > { %6283 = vst.msk [vmem:[#allocation3 + $0xf0] sm:$0xff] %vm1581_vm2, %v16309_v35  ;;  %v6356_v20 = vld [vmem:[#allocation3 + $0xe7] sm:$0xff] }
 0x7d4   : > { %vm6814_vm5 = vcmp.gt.f32.partialorder %v6778_v45, 0.0  ;;  %v6850_v31 = vmul.f32 0.2, %v6778_v45  ;;  %6320 = vst.msk [vmem:[#allocation3 + $0xf0] sm:$0xff] %vm1632_vm3, %v16309_v35  ;;  %7292 = vrot.lane.b32.xlu0 %v7209_v27, %s13468_s12  ;;  %v6571_v58 = vld [vmem:[#allocation3 + $0xe1] sm:$0xff]  ;;  %v5914_v27 = vpop.f32.mrf.mxu2 }
 0x7d5   : > { %6668 = vrot.lane.b32.xlu2 %v6570_v17, %s13465_s29  ;;  %6456 = vrot.lane.b32.xlu1 %v6356_v20, %s13464_s28  ;;  %v7212_v20 = vpack.c.bf16 %v7176_v61, %v7176_v61 }
 0x7d6   : > { %v6886_v24 = vsel %vm6814_vm5, %v6778_v45, %v6850_v31  ;;  %v6643_v38 = vpop.permute.xlu1 %6642 }
 0x7d7   : > { %v16321_v2 = vpop.permute.xlu2 %6434  ;;  %v6737_v59 = vadd.f32 %v6643_v38, %v6521_v33  ;;  %v7174_v5 = vmul.f32 %v13219_v52, %v6886_v24 }
 0x7d8   : > { %v6203_v0 = vpop.f32.mrf.mxu1  ;;  %v6525_v30 = vadd.f32 %v16321_v2, %v17705_v32 }
 0x7d9   : > { %v6779_v15 = vadd.f32 %v15833_v47, %v6737_v59  ;;  %v16325_v46 = vadd.f32 %v6203_v0, %v5908_v25  ;;  %v7210_v56 = vpack.c.bf16 %v7174_v5, %v7174_v5  ;;  %v17706_v25 = vld [vmem:[#allocation13_spill] sm:$0xff] }
 0x7da   : > { %v5915_v43 = vadd.f32 %v5914_v27, %v17706_v25  ;;  %v17710_v27 = vld [vmem:[#allocation18_spill] sm:$0xff] }
 0x7db   : > { %vm6815_vm13 = vcmp.gt.f32.partialorder %v6779_v15, 0.0  ;;  %v6851_v44 = vmul.f32 0.2, %v6779_v15  ;;  %6284 = vst.msk [vmem:[#allocation3 + $0xf8] sm:$0xff] %vm1581_vm2, %v16325_v46  ;;  %v6357_v4 = vld [vmem:[#allocation3 + $0xef] sm:$0xff] }
 0x7dc   : > { %6321 = vst.msk [vmem:[#allocation3 + $0xf8] sm:$0xff] %vm1632_vm3, %v16325_v46  ;;  %6670 = vrot.lane.b32.xlu0 %v6571_v58, %s13465_s29  ;;  %v6572_v48 = vld [vmem:[#allocation3 + $0xe9] sm:$0xff]  ;;  %v5917_v34 = vpop.f32.mrf.mxu2 }
 0x7dd   : > { %6458 = vrot.lane.b32.xlu2 %v6357_v4, %s13464_s28  ;;  %v6887_v26 = vsel %vm6815_vm13, %v6779_v15, %v6851_v44  ;;  %7294 = vrot.lane.b32.xlu1 %v7210_v56, %s13468_s12  ;;  %v17707_v58 = vld [vmem:[#allocation20_spill] sm:$0xff] }
 0x7de   : > { %v7175_v37 = vmul.f32 %v13220_v9, %v6887_v26 }
 0x7df   : > { %v7273_v23 = vpop.permute.xlu2 %7272  ;;  %v6431_v22 = vpop.permute.xlu0 %6430 }
 0x7e0   : > { %7380 = vst.msk [vmem:[#allocation2 + $0x28] sm:$0xf] %vm7378_vm4, %v7273_v23  ;;  %v6205_v3 = vpop.f32.mrf.mxu1  ;;  %v7211_v57 = vpack.c.bf16 %v7175_v37, %v7175_v37  ;;  %v6523_v13 = vadd.f32 %v6431_v22, %v16102_v10  ;;  %v17708_v22 = vld [vmem:[#allocation9_spill] sm:$0xff] }
 0x7e1   : > { %v16338_v60 = vadd.f32 %v6205_v3, %v5910_v54  ;;  %v5918_v37 = vadd.f32 %v5917_v34, %v17708_v22  ;;  %v16409_v34 = vld [vmem:[%s13577_s16 + $0x38] sm:$0xff]  }
 0x7e3   : > { %6285 = vst.msk [vmem:[#allocation3 + $0x100] sm:$0xff] %vm1581_vm2, %v16338_v60  ;;  %v6358_v19 = vld [vmem:[#allocation3 + $0xf7] sm:$0xff] }
 0x7e4   : > { %6322 = vst.msk [vmem:[#allocation3 + $0x100] sm:$0xff] %vm1632_vm3, %v16338_v60  ;;  %6460 = vrot.lane.b32.xlu0 %v6358_v19, %s13464_s28  ;;  %v6573_v16 = vld [vmem:[#allocation3 + $0xf1] sm:$0xff]  ;;  %v5919_v61 = vpop.f32.mrf.mxu2 }
 0x7e5   : > { %7296 = vrot.lane.b32.xlu2 %v7211_v57, %s13468_s12  ;;  %6672 = vrot.lane.b32.xlu1 %v6572_v48, %s13465_s29  ;;  %8199 = vst.msk [vmem:[#allocation3 + $0xf8] sm:$0x1] %vm1681_vm7, %v17673_v6  ;;  %v17709_v48 = vld [vmem:[#allocation17_spill] sm:$0xff] }
 0x7e7   : > { %v6433_v40 = vpop.permute.xlu1 %6432  ;;  %v6651_v42 = vpop.permute.xlu2 %6650 }
 0x7e8   : > { %v6647_v55 = vpop.permute.xlu0 %6646  ;;  %v6208_v45 = vpop.f32.mrf.mxu1  ;;  %v6741_v59 = vadd.f32 %v6651_v42, %v6525_v30  ;;  %v6524_v56 = vadd.f32 %v6433_v40, %v17707_v58  ;;  %v13229_v42 = vunpack.i.l.bf16 %v17709_v48 }
 0x7e9   : > { %v6739_v53 = vadd.f32 %v6647_v55, %v6523_v13  ;;  %v16352_v31 = vadd.f32 %v6208_v45, %v5913_v7 }
 0x7ea   : > { %v6783_v62 = vadd.f32 %v15833_v47, %v6741_v59 }
 0x7eb   : > { %v6781_v17 = vadd.f32 %v15833_v47, %v6739_v53  ;;  %6286 = vst.msk [vmem:[#allocation3 + $0x108] sm:$0xff] %vm1581_vm2, %v16352_v31  ;;  %v6359_v52 = vld [vmem:[#allocation3 + $0xff] sm:$0xff] }
 0x7ec   : > { %6323 = vst.msk [vmem:[#allocation3 + $0x108] sm:$0xff] %vm1632_vm3, %v16352_v31  ;;  %7298 = vrot.lane.b32.xlu0 %v7212_v20, %s13468_s12  ;;  %v6574_v44 = vld [vmem:[#allocation3 + $0xf9] sm:$0xff]  ;;  %v6855_v49 = vmul.f32 0.2, %v6783_v62  ;;  %vm6819_vm14 = vcmp.gt.f32.partialorder %v6783_v62, 0.0 }
 0x7ed   : > { %vm6817_vm7 = vcmp.gt.f32.partialorder %v6781_v17, 0.0  ;;  %v6853_v10 = vmul.f32 0.2, %v6781_v17  ;;  %6674 = vrot.lane.b32.xlu2 %v6573_v16, %s13465_s29  ;;  %6462 = vrot.lane.b32.xlu1 %v6359_v52, %s13464_s28  ;;  %v13230_v16 = vunpack.i.h.bf16 %v17709_v48 }
 0x7ee   : > { %v6891_v19 = vsel %vm6819_vm14, %v6783_v62, %v6855_v49  ;;  %v16412_v62 = vld [vmem:[%s13577_s16 + $0x40] sm:$0xff]  }
 0x7ef   : > { %v6889_v33 = vsel %vm6817_vm7, %v6781_v17, %v6853_v10  ;;  %v16365_v24 = vpop.permute.xlu2 %6440  ;;  %v7271_v38 = vpop.permute.xlu1 %7270  ;;  %v7179_v45 = vmul.f32 %v13230_v16, %v6891_v19  ;;  %v5920_v17 = vadd.f32 %v5919_v61, %v17710_v27 }
 0x7f0   : > { %7379 = vst.msk [vmem:[#allocation2 + $0x24] sm:$0xf] %vm7378_vm4, %v7271_v38  ;;  %v7177_v5 = vmul.f32 %v13225_v50, %v6889_v33  ;;  %v6210_v0 = vpop.f32.mrf.mxu1 }
 0x7f1   : > { %v16369_v15 = vadd.f32 %v6210_v0, %v5915_v43  ;;  %v7215_v30 = vpack.c.bf16 %v7179_v45, %v7179_v45 }
 0x7f2   : > { %v7213_v4 = vpack.c.bf16 %v7177_v5, %v7177_v5 }
 0x7f3   : > { %6287 = vst.msk [vmem:[#allocation3 + $0x110] sm:$0xff] %vm1581_vm2, %v16369_v15  ;;  %v6360_v2 = vld [vmem:[#allocation3 + $0x107] sm:$0xff] }
 0x7f4   : > { %6324 = vst.msk [vmem:[#allocation3 + $0x110] sm:$0xff] %vm1632_vm3, %v16369_v15  ;;  %6676 = vrot.lane.b32.xlu0 %v6574_v44, %s13465_s29  ;;  %v6575_v40 = vld [vmem:[#allocation3 + $0x101] sm:$0xff] }
 0x7f5   : > { %6464 = vrot.lane.b32.xlu2 %v6360_v2, %s13464_s28  ;;  %7300 = vrot.lane.b32.xlu1 %v7213_v4, %s13468_s12  ;;  %v17711_v4 = vld [vmem:[#allocation10_spill] sm:$0xff] }
 0x7f6   : > { %v6437_v26 = vpop.permute.xlu0 %6436  ;;  %v13234_v58 = vunpack.i.l.bf16 %v17711_v4 }
 0x7f7   : > { %v7279_v9 = vpop.permute.xlu2 %7278  ;;  %v11418_v23 = vld [vmem:[#allocation2 + $0x24] sm:$0xff]  ;;  %v6649_v54 = vpop.permute.xlu1 %6648  ;;  %v6526_v38 = vadd.f32 %v6437_v26, %v16140_v21  ;;  %v6528_v26 = vadd.f32 %v16365_v24, %v16171_v18  ;;  %v12449_v18 = vld [vmem:[%s13577_s16 + $0x50] sm:$0xff]  }
 0x7f8   : > { %7383 = vst.msk [vmem:[#allocation2 + $0x34] sm:$0xf] %vm7378_vm4, %v7279_v9  ;;  %v6740_v1 = vadd.f32 %v6649_v54, %v6524_v56  ;;  %v6213_v3 = vpop.f32.mrf.mxu1  ;;  %11092 = vmatmul.msk.bf16.vlgmr.msra.gmra.mxu3 %vm7549_vm12, %v11418_v23  ;;  %v12007_v56 = vunpack.c.h.bf16 %v16409_v34  ;;  %v12010_v9 = vunpack.c.l.bf16 %v16412_v62 }
 0x7f9   : > { %v16383_v57 = vadd.f32 %v6213_v3, %v5918_v37 }
 0x7fa   : > { %v6782_v39 = vadd.f32 %v15833_v47, %v6740_v1  ;;  %v13281_v16 = vpack.i.bf16 %v12010_v9, %v12007_v56 }
 0x7fb   : > { %6288 = vst.msk [vmem:[#allocation3 + $0x118] sm:$0xff] %vm1581_vm2, %v16383_v57  ;;  %v6361_v36 = vld [vmem:[#allocation3 + $0x10f] sm:$0xff] }
 0x7fc   : > { %vm6818_vm15 = vcmp.gt.f32.partialorder %v6782_v39, 0.0  ;;  %v6854_v13 = vmul.f32 0.2, %v6782_v39  ;;  %6325 = vst.msk [vmem:[#allocation3 + $0x118] sm:$0xff] %vm1632_vm3, %v16383_v57  ;;  %6466 = vrot.lane.b32.xlu0 %v6361_v36, %s13464_s28  ;;  %v6576_v2 = vld [vmem:[#allocation3 + $0x109] sm:$0xff] }
 0x7fd   : > { %6678 = vrot.lane.b32.xlu1 %v6575_v40, %s13465_s29  ;;  %v12018_v40 = vunpack.c.l.bf16 %v12449_v18 }
 0x7fe   : > { %v6890_v7 = vsel %vm6818_vm15, %v6782_v39, %v6854_v13  ;;  %v7275_v53 = vpop.permute.xlu0 %7274 }
 0x7ff   : > { %v6657_v55 = vpop.permute.xlu2 %6656  ;;  %v6439_v20 = vpop.permute.xlu1 %6438  ;;  %7381 = vst.msk [vmem:[#allocation2 + $0x2c] sm:$0xf] %vm7378_vm4, %v7275_v53  ;;  %v7178_v52 = vmul.f32 %v13229_v42, %v6890_v7  ;;  %v12019_v42 = vunpack.c.h.bf16 %v12449_v18 }
 0x800   : > { %v6215_v10 = vpop.f32.mrf.mxu1  ;;  %v6527_v22 = vadd.f32 %v6439_v20, %v16155_v12  ;;  %v6744_v1 = vadd.f32 %v6657_v55, %v6528_v26  ;;  %v12448_v20 = vld [vmem:[%s13577_s16 + $0x48] sm:$0xff]  }
 0x801   : > { %v16396_v50 = vadd.f32 %v6215_v10, %v5920_v17  ;;  %v7214_v32 = vpack.c.bf16 %v7178_v52, %v7178_v52  ;;  %v13296_v52 = vpack.i.bf16 %v12019_v42, %v12018_v40 }
 0x802   : > { %v6786_v13 = vadd.f32 %v15833_v47, %v6744_v1 }
 0x803   : > { %6289 = vst.msk [vmem:[#allocation3 + $0x120] sm:$0xff] %vm1581_vm2, %v16396_v50  ;;  %7302 = vrot.lane.b32.xlu2 %v7214_v32, %s13468_s12  ;;  %v6362_v33 = vld [vmem:[#allocation3 + $0x117] sm:$0xff] }
 0x804   : > { %6326 = vst.msk [vmem:[#allocation3 + $0x120] sm:$0xff] %vm1632_vm3, %v16396_v50  ;;  %7304 = vrot.lane.b32.xlu0 %v7215_v30, %s13468_s12  ;;  %v6577_v21 = vld [vmem:[#allocation3 + $0x111] sm:$0xff]  ;;  %v6858_v45 = vmul.f32 0.2, %v6786_v13  ;;  %vm6822_vm10 = vcmp.gt.f32.partialorder %v6786_v13, 0.0 }
 0x805   : > { %6468 = vrot.lane.b32.xlu1 %v6362_v33, %s13464_s28  ;;  %v12014_v33 = vunpack.c.l.bf16 %v12448_v20 }
 0x806   : > { %v6653_v43 = vpop.permute.xlu0 %6652 }
 0x807   : > { %v6447_v25 = vpop.permute.xlu2 %6446  ;;  %v7277_v59 = vpop.permute.xlu1 %7276  ;;  %v6742_v5 = vadd.f32 %v6653_v43, %v6526_v38  ;;  %v13235_v38 = vunpack.i.h.bf16 %v17711_v4 }
 0x808   : > { %7382 = vst.msk [vmem:[#allocation2 + $0x30] sm:$0xf] %vm7378_vm4, %v7277_v59  ;;  %v6531_v61 = vadd.f32 %v6447_v25, %v16217_v29  ;;  %v12015_v29 = vunpack.c.h.bf16 %v12448_v20  ;;  %v6894_v25 = vsel %vm6822_vm10, %v6786_v13, %v6858_v45  ;;  %v17712_v59 = vld [vmem:[#allocation8_spill] sm:$0xff] }
 0x809   : > { %v6784_v0 = vadd.f32 %v15833_v47, %v6742_v5  ;;  %v13239_v5 = vunpack.i.l.bf16 %v17712_v59 }
 0x80a   : > { %v13286_v56 = vpack.i.bf16 %v12015_v29, %v12014_v33 }
 0x80b   : > { %vm6820_vm8 = vcmp.gt.f32.partialorder %v6784_v0, 0.0  ;;  %v6856_v44 = vmul.f32 0.2, %v6784_v0  ;;  %6680 = vrot.lane.b32.xlu2 %v6576_v2, %s13465_s29  ;;  %v6363_v12 = vld [vmem:[#allocation3 + $0x11f] sm:$0xff]  ;;  %v7182_v9 = vmul.f32 %v13239_v5, %v6894_v25 }
 0x80c   : > { %6682 = vrot.lane.b32.xlu0 %v6577_v21, %s13465_s29  ;;  %v6578_v10 = vld [vmem:[#allocation3 + $0x119] sm:$0xff]  ;;  %v6579_v30 = vld [vmem:[#allocation3 + $0x121] sm:$0xff] }
 0x80d   : > { %v6892_v23 = vsel %vm6820_vm8, %v6784_v0, %v6856_v44 }
 0x80e   : > { %v6443_v49 = vpop.permute.xlu0 %6442  ;;  %v7180_v54 = vmul.f32 %v13234_v58, %v6892_v23 }
 0x80f   : > { %v7285_v37 = vpop.permute.xlu2 %7284  ;;  %v6655_v3 = vpop.permute.xlu1 %6654  ;;  %v12368_v39 = vld [vmem:[#allocation2 + $0x30] sm:$0xff]   ;;  %v6529_v0 = vadd.f32 %v6443_v49, %v16188_v14  ;;  %v7218_v14 = vpack.c.bf16 %v7182_v9, %v7182_v9 }
 0x810   : > { %7386 = vst.msk [vmem:[#allocation2 + $0x40] sm:$0xf] %vm7378_vm4, %v7285_v37  ;;  %v12722_v19 = vld [vmem:[#allocation2 + $0x2c] sm:$0xff]   ;;  %v6743_v36 = vadd.f32 %v6655_v3, %v6527_v22  ;;  %11065 = vmatmul.msk.bf16.vlgmr.msra.gmra.mxu2 %vm7549_vm12, %v12368_v39  ;;  %v7216_v48 = vpack.c.bf16 %v7180_v54, %v7180_v54 }
 0x811   : > { %11093 = vmatmul.msk.bf16.gmra.mxu3 %vm7549_vm12, %v12722_v19  ;;  %v12445_v22 = vld [vmem:[%s13577_s16 + $0x30] sm:$0xff]   ;;  %v17713_v19 = vld [vmem:[#allocation24_spill] sm:$0xff] }
 0x812   : > { %v6785_v24 = vadd.f32 %v15833_v47, %v6743_v36  ;;  %7306 = vrot.lane.b32.xlu1 %v7216_v48, %s13468_s12  ;;  %v12002_v49 = vunpack.c.l.bf16 %v12445_v22  ;;  %v12003_v39 = vunpack.c.h.bf16 %v12445_v22  ;;  %v13245_v36 = vunpack.i.h.bf16 %v17713_v19 }
 0x813   : > { %6470 = vrot.lane.b32.xlu2 %v6363_v12, %s13464_s28  ;;  %v13240_v48 = vunpack.i.h.bf16 %v17712_v59 }
 0x814   : > { %13282 = vperm.xlu0 %12970, %v13281_v16   ;;  %v6857_v7 = vmul.f32 0.2, %v6785_v24  ;;  %vm6821_vm9 = vcmp.gt.f32.partialorder %v6785_v24, 0.0 }
 0x816   : > { %v7281_v53 = vpop.permute.xlu0 %7280  ;;  %v6893_v32 = vsel %vm6821_vm9, %v6785_v24, %v6857_v7  ;;  %v13276_v7 = vpack.i.bf16 %v12003_v39, %v12002_v49 }
 0x817   : > { %v6663_v55 = vpop.permute.xlu2 %6662  ;;  %v16431_v17 = vpop.permute.xlu1 %6444  ;;  %7384 = vst.msk [vmem:[#allocation2 + $0x38] sm:$0xf] %vm7378_vm4, %v7281_v53  ;;  %v7181_v2 = vmul.f32 %v13235_v38, %v6893_v32 }
 0x818   : > { %v6747_v27 = vadd.f32 %v6663_v55, %v6531_v61  ;;  %v12450_v55 = vld [vmem:[%s13577_s16 + $0x58] sm:$0xff]   ;;  %v6530_v32 = vadd.f32 %v16431_v17, %v16203_v63 }
 0x819   : > { %v7217_v54 = vpack.c.bf16 %v7181_v2, %v7181_v2  ;;  %v12023_v20 = vunpack.c.h.bf16 %v12450_v55 }
 0x81a   : > { %6684 = vrot.lane.b32.xlu1 %v6578_v10, %s13465_s29  ;;  %v6789_v43 = vadd.f32 %v15833_v47, %v6747_v27  ;;  %v12022_v27 = vunpack.c.l.bf16 %v12450_v55  ;;  %v12011_v10 = vunpack.c.h.bf16 %v16412_v62 }
 0x81b   : > { %6686 = vrot.lane.b32.xlu2 %v6579_v30, %s13465_s29 }
 0x81c   : > { %13297 = vperm.xlu0 %12970, %v13296_v52   ;;  %v6861_v26 = vmul.f32 0.2, %v6789_v43  ;;  %vm6825_vm6 = vcmp.gt.f32.partialorder %v6789_v43, 0.0  ;;  %v12006_v52 = vunpack.c.l.bf16 %v16409_v34  ;;  %v13301_v25 = vpack.i.bf16 %v12023_v20, %v12022_v27  ;;  %v12451_v34 = vld [vmem:[%s13577_s16 + $0x60] sm:$0xff]  }
 0x81d   : > { %v12026_v17 = vunpack.c.l.bf16 %v12451_v34  ;;  %v12027_v2 = vunpack.c.h.bf16 %v12451_v34 }
 0x81e   : > { %v6659_v21 = vpop.permute.xlu0 %6658  ;;  %v12724_v58 = vld [vmem:[#allocation2 + $0x34] sm:$0xff]   ;;  %v6897_v1 = vsel %vm6825_vm6, %v6789_v43, %v6861_v26 }
 0x81f   : > { %v6453_v44 = vpop.permute.xlu2 %6452  ;;  %v7283_v23 = vpop.permute.xlu1 %7282  ;;  %v6745_v4 = vadd.f32 %v6659_v21, %v6529_v0  ;;  %v7185_v13 = vmul.f32 %v13245_v36, %v6897_v1  ;;  %v13291_v0 = vpack.i.bf16 %v12006_v52, %v12011_v10  ;;  %v17715_v36 = vld [vmem:[#allocation7_spill] sm:$0xff] }
 0x820   : > { %7385 = vst.msk [vmem:[#allocation2 + $0x3c] sm:$0xf] %vm7378_vm4, %v7283_v23  ;;  %v6534_v30 = vadd.f32 %v6453_v44, %v16270_v51  ;;  %v17714_v44 = vld [vmem:[#allocation6_spill] sm:$0xff]  ;;  %v13250_v27 = vunpack.i.h.bf16 %v17715_v36 }
 0x821   : > { %v6787_v37 = vadd.f32 %v15833_v47, %v6745_v4  ;;  %11094 = vmatmul.msk.bf16.gmra.mxu3 %vm7549_vm12, %v12724_v58  ;;  %v7221_v45 = vpack.c.bf16 %v7185_v13, %v7185_v13  ;;  %v13254_v21 = vunpack.i.l.bf16 %v17714_v44 }
 0x822   : > { %13287 = vperm.xlu1 %12958, %v13286_v56  }
 0x823   : > { %vm6823_vm5 = vcmp.gt.f32.partialorder %v6787_v37, 0.0  ;;  %v6859_v3 = vmul.f32 0.2, %v6787_v37  ;;  %7308 = vrot.lane.b32.xlu2 %v7217_v54, %s13468_s12 }
 0x824   : > { %7310 = vrot.lane.b32.xlu0 %v7218_v14, %s13468_s12  ;;  %v13306_v14 = vpack.i.bf16 %v12027_v2, %v12026_v17 }
 0x825   : > { %v6895_v16 = vsel %vm6823_vm5, %v6787_v37, %v6859_v3 }
 0x826   : > { %v6449_v24 = vpop.permute.xlu0 %6448  ;;  %v7183_v12 = vmul.f32 %v13240_v48, %v6895_v16  ;;  %v13249_v48 = vunpack.i.l.bf16 %v17715_v36 }
 0x827   : > { %v7291_v18 = vpop.permute.xlu2 %7290  ;;  %v6661_v40 = vpop.permute.xlu1 %6660  ;;  %v12369_v42 = vld [vmem:[#allocation2 + $0x38] sm:$0xff]   ;;  %v6532_v58 = vadd.f32 %v6449_v24, %v16237_v41  ;;  %v13244_v41 = vunpack.i.l.bf16 %v17713_v19 }
 0x828   : > { %7389 = vst.msk [vmem:[#allocation2 + $0x4c] sm:$0xf] %vm7378_vm4, %v7291_v18  ;;  %v11424_v61 = vld [vmem:[#allocation2 + $0x3c] sm:$0xff]  ;;  %11066 = vmatmul.msk.bf16.gmra.mxu2 %vm7549_vm12, %v12369_v42  ;;  %v7219_v53 = vpack.c.bf16 %v7183_v12, %v7183_v12  ;;  %v6746_v33 = vadd.f32 %v6661_v40, %v6530_v32 }
 0x829   : > { %11180 = vmatmul.msk.bf16.vlgmr.msra.gmra.mxu0 %vm7549_vm12, %v11424_v61  ;;  %v12726_v5 = vld [vmem:[#allocation2 + $0x3c] sm:$0xff]  }
 0x82a   : > { %7312 = vrot.lane.b32.xlu1 %v7219_v53, %s13468_s12  ;;  %v6788_v63 = vadd.f32 %v15833_v47, %v6746_v33 }
 0x82b   : > { %13277 = vperm.xlu2 %12964, %v13276_v7  }
 0x82c   : > { %7316 = vrot.lane.b32.xlu0 %v7221_v45, %s13468_s12  ;;  %v6860_v9 = vmul.f32 0.2, %v6788_v63  ;;  %vm6824_vm11 = vcmp.gt.f32.partialorder %v6788_v63, 0.0 }
 0x82e   : > { %v7287_v38 = vpop.permute.xlu0 %7286  ;;  %v6896_v3 = vsel %vm6824_vm11, %v6788_v63, %v6860_v9  ;;  %v13255_v9 = vunpack.i.h.bf16 %v17714_v44 }
 0x82f   : > { %v6669_v29 = vpop.permute.xlu2 %6668  ;;  %v6451_v59 = vpop.permute.xlu1 %6450  ;;  %7387 = vst.msk [vmem:[#allocation2 + $0x44] sm:$0xf] %vm7378_vm4, %v7287_v38  ;;  %v7184_v18 = vmul.f32 %v13244_v41, %v6896_v3 }
 0x830   : > { %v6750_v43 = vadd.f32 %v6669_v29, %v6534_v30  ;;  %v6533_v24 = vadd.f32 %v6451_v59, %v16253_v28 }
 0x831   : > { %11095 = vmatmul.msk.bf16.gmra.mxu3 %vm7549_vm12, %v12726_v5  ;;  %v7220_v19 = vpack.c.bf16 %v7184_v18, %v7184_v18  ;;  %v17716_v5 = vld [vmem:[#allocation4_spill] sm:$0xff] }
 0x832   : > { %v6792_v62 = vadd.f32 %v15833_v47, %v6750_v43  ;;  %13302 = vperm.xlu1 %12958, %v13301_v25   ;;  %v13259_v44 = vunpack.i.l.bf16 %v17716_v5 }
 0x833   : > { %13292 = vperm.xlu2 %12964, %v13291_v0  }
 0x834   : > { %vm6828_vm13 = vcmp.gt.f32.partialorder %v6792_v62, 0.0  ;;  %v6864_v51 = vmul.f32 0.2, %v6792_v62 }
 0x836   : > { %v6900_v56 = vsel %vm6828_vm13, %v6792_v62, %v6864_v51  ;;  %v6665_v23 = vpop.permute.xlu0 %6664  ;;  %v12370_v4 = vld [vmem:[#allocation2 + $0x40] sm:$0xff]  }
 0x837   : > { %v6459_v26 = vpop.permute.xlu2 %6458  ;;  %v7188_v22 = vmul.f32 %v13254_v21, %v6900_v56  ;;  %v7289_v37 = vpop.permute.xlu1 %7288  ;;  %v6748_v54 = vadd.f32 %v6665_v23, %v6532_v58 }
 0x838   : > { %7388 = vst.msk [vmem:[#allocation2 + $0x48] sm:$0xf] %vm7378_vm4, %v7289_v37  ;;  %11067 = vmatmul.msk.bf16.gmra.mxu2 %vm7549_vm12, %v12370_v4  ;;  %v6537_v20 = vadd.f32 %v6459_v26, %v16309_v35  ;;  %v13260_v35 = vunpack.i.h.bf16 %v17716_v5 }
 0x839   : > { %v7224_v49 = vpack.c.bf16 %v7188_v22, %v7188_v22  ;;  %v6790_v1 = vadd.f32 %v15833_v47, %v6748_v54 }
 0x83b   : > { %7322 = vrot.lane.b32.xlu0 %v7224_v49, %s13468_s12  ;;  %vm6826_vm7 = vcmp.gt.f32.partialorder %v6790_v1, 0.0  ;;  %v6862_v39 = vmul.f32 0.2, %v6790_v1  ;;  %13307 = vperm.xlu2 %12964, %v13306_v14  }
 0x83d   : > { %v6898_v16 = vsel %vm6826_vm7, %v6790_v1, %v6862_v39 }
 0x83e   : > { %v6455_v13 = vpop.permute.xlu0 %6454  ;;  %v7186_v40 = vmul.f32 %v13249_v48, %v6898_v16 }
 0x83f   : > { %v7297_v12 = vpop.permute.xlu2 %7296  ;;  %v6667_v42 = vpop.permute.xlu1 %6666  ;;  %v12728_v61 = vld [vmem:[#allocation2 + $0x44] sm:$0xff]   ;;  %v6535_v0 = vadd.f32 %v6455_v13, %v16284_v8 }
 0x840   : > { %7392 = vst.msk [vmem:[#allocation2 + $0x58] sm:$0xf] %vm7378_vm4, %v7297_v12  ;;  %v11425_v7 = vld [vmem:[#allocation2 + $0x44] sm:$0xff]  ;;  %v6749_v55 = vadd.f32 %v6667_v42, %v6533_v24  ;;  %v7222_v53 = vpack.c.bf16 %v7186_v40, %v7186_v40 }
 0x841   : > { %11096 = vmatmul.msk.bf16.gmra.mxu3 %vm7549_vm12, %v12728_v61  ;;  %11181 = vmatmul.msk.bf16.gmra.mxu0 %vm7549_vm12, %v11425_v7  ;;  %v12371_v29 = vld [vmem:[#allocation2 + $0x48] sm:$0xff]  }
 0x842   : > { %v6791_v45 = vadd.f32 %v15833_v47, %v6749_v55  ;;  %7318 = vrot.lane.b32.xlu1 %v7222_v53, %s13468_s12 }
 0x843   : > { %7314 = vrot.lane.b32.xlu2 %v7220_v19, %s13468_s12 }
 0x844   : > { %vm6827_vm14 = vcmp.gt.f32.partialorder %v6791_v45, 0.0  ;;  %v6863_v28 = vmul.f32 0.2, %v6791_v45 }
 0x846   : > { %v6899_v52 = vsel %vm6827_vm14, %v6791_v45, %v6863_v28  ;;  %v7293_v32 = vpop.permute.xlu0 %7292  ;;  %vm9734_vm14 = vcmask 122880  }
 0x847   : > { %v6675_v10 = vpop.permute.xlu2 %6674  ;;  %v6457_v33 = vpop.permute.xlu1 %6456  ;;  %7390 = vst.msk [vmem:[#allocation2 + $0x50] sm:$0xf] %vm7378_vm4, %v7293_v32  ;;  %v7187_v38 = vmul.f32 %v13250_v27, %v6899_v52  ;;  %v17718_v52 = vld [vmem:[#allocation15_spill] sm:$0xff] }
 0x848   : > { %v6753_v30 = vadd.f32 %v6675_v10, %v6537_v20  ;;  %11068 = vmatmul.msk.bf16.gmra.mxu2 %vm7549_vm12, %v12371_v29  ;;  %v6536_v4 = vadd.f32 %v6457_v33, %v16296_v11  ;;  %v17717_v20 = vld [vmem:[#allocation19_spill] sm:$0xff]  ;;  %v13264_v10 = vunpack.i.l.bf16 %v17718_v52 }
 0x849   : > { %v7223_v43 = vpack.c.bf16 %v7187_v38, %v7187_v38 }
 0x84a   : > { %v6795_v25 = vadd.f32 %v15833_v47, %v6753_v30 }
 0x84b   : > { %7320 = vrot.lane.b32.xlu2 %v7223_v43, %s13468_s12 }
 0x84c   : > { %vm6831_vm15 = vcmp.gt.f32.partialorder %v6795_v25, 0.0  ;;  %v6867_v59 = vmul.f32 0.2, %v6795_v25 }
 0x84e   : > { %v6903_v34 = vsel %vm6831_vm15, %v6795_v25, %v6867_v59  ;;  %v6671_v62 = vpop.permute.xlu0 %6670  ;;  %v12730_v63 = vld [vmem:[#allocation2 + $0x4c] sm:$0xff]  }
 0x84f   : > { %v11426_v51 = vld [vmem:[#allocation2 + $0x4c] sm:$0xff]  ;;  %v7191_v17 = vmul.f32 %v13260_v35, %v6903_v34  ;;  %v7295_v2 = vpop.permute.xlu1 %7294  ;;  %v6751_v21 = vadd.f32 %v6671_v62, %v6535_v0  ;;  %v6465_v26 = vpop.permute.xlu2 %6464 }
 0x850   : > { %7391 = vst.msk [vmem:[#allocation2 + $0x54] sm:$0xf] %vm7378_vm4, %v7295_v2  ;;  %v6540_v13 = vadd.f32 %v6465_v26, %v16352_v31  ;;  %v13269_v31 = vunpack.i.l.bf16 %v17717_v20 }
 0x851   : > { %v7227_v58 = vpack.c.bf16 %v7191_v17, %v7191_v17  ;;  %v6793_v56 = vadd.f32 %v15833_v47, %v6751_v21  ;;  %11097 = vmatmul.msk.bf16.gmra.mxu3 %vm7549_vm12, %v12730_v63  ;;  %11182 = vmatmul.msk.bf16.gmra.mxu0 %vm7549_vm12, %v11426_v51  ;;  %v13265_v17 = vunpack.i.h.bf16 %v17718_v52 }
 0x853   : > { %7328 = vrot.lane.b32.xlu0 %v7227_v58, %s13468_s12  ;;  %vm6829_vm8 = vcmp.gt.f32.partialorder %v6793_v56, 0.0  ;;  %v6865_v8 = vmul.f32 0.2, %v6793_v56 }
 0x855   : > { %v6901_v23 = vsel %vm6829_vm8, %v6793_v56, %v6865_v8 }
 0x856   : > { %v6461_v22 = vpop.permute.xlu0 %6460  ;;  %v7189_v37 = vmul.f32 %v13255_v9, %v6901_v23 }
 0x857   : > { %v6673_v54 = vpop.permute.xlu1 %6672  ;;  %v12372_v14 = vld [vmem:[#allocation2 + $0x50] sm:$0xff]   ;;  %v6538_v40 = vadd.f32 %v6461_v22, %v16325_v46 }
 0x858   : > { %v6752_v49 = vadd.f32 %v6673_v54, %v6536_v4  ;;  %11069 = vmatmul.msk.bf16.gmra.mxu2 %vm7549_vm12, %v12372_v14  ;;  %v7225_v1 = vpack.c.bf16 %v7189_v37, %v7189_v37  ;;  %v12732_v16 = vld [vmem:[#allocation2 + $0x54] sm:$0xff]  }
 0x859   : > { %v11427_v18 = vld [vmem:[#allocation2 + $0x54] sm:$0xff] }
 0x85a   : > { %v6794_v3 = vadd.f32 %v15833_v47, %v6752_v49  ;;  %7324 = vrot.lane.b32.xlu1 %v7225_v1, %s13468_s12 }
 0x85c   : > { %vm6830_vm9 = vcmp.gt.f32.partialorder %v6794_v3, 0.0  ;;  %v6866_v41 = vmul.f32 0.2, %v6794_v3 }
 0x85d   : > { %v7303_v39 = vpop.permute.xlu2 %7302 }
 0x85e   : > { %v6902_v36 = vsel %vm6830_vm9, %v6794_v3, %v6866_v41  ;;  %7395 = vst.msk [vmem:[#allocation2 + $0x64] sm:$0xf] %vm7378_vm4, %v7303_v39  ;;  %v7299_v11 = vpop.permute.xlu0 %7298 }
 0x85f   : > { %v6463_v48 = vpop.permute.xlu1 %6462  ;;  %7393 = vst.msk [vmem:[#allocation2 + $0x5c] sm:$0xf] %vm7378_vm4, %v7299_v11  ;;  %v7190_v24 = vmul.f32 %v13259_v44, %v6902_v36 }
 0x860   : > { %v6539_v38 = vadd.f32 %v6463_v48, %v16338_v60 }
 0x861   : > { %11098 = vmatmul.msk.bf16.gmra.mxu3 %vm7549_vm12, %v12732_v16  ;;  %11183 = vmatmul.msk.bf16.gmra.mxu0 %vm7549_vm12, %v11427_v18  ;;  %v7226_v12 = vpack.c.bf16 %v7190_v24, %v7190_v24  ;;  %v13270_v16 = vunpack.i.h.bf16 %v17717_v20 }
 0x863   : > { %7326 = vrot.lane.b32.xlu2 %v7226_v12, %s13468_s12 }
 0x865   : > { %v6681_v42 = vpop.permute.xlu2 %6680 }
 0x866   : > { %v6756_v61 = vadd.f32 %v6681_v42, %v6540_v13  ;;  %v6677_v7 = vpop.permute.xlu0 %6676  ;;  %v12373_v55 = vld [vmem:[#allocation2 + $0x58] sm:$0xff]  }
 0x867   : > { %v7301_v53 = vpop.permute.xlu1 %7300  ;;  %v6754_v19 = vadd.f32 %v6677_v7, %v6538_v40 }
 0x868   : > { %v6798_v45 = vadd.f32 %v15833_v47, %v6756_v61  ;;  %7394 = vst.msk [vmem:[#allocation2 + $0x60] sm:$0xf] %vm7378_vm4, %v7301_v53  ;;  %11070 = vmatmul.msk.bf16.gmra.mxu2 %vm7549_vm12, %v12373_v55 }
 0x869   : > { %v6796_v28 = vadd.f32 %v15833_v47, %v6754_v19 }
 0x86a   : > { %vm6834_vm10 = vcmp.gt.f32.partialorder %v6798_v45, 0.0  ;;  %v6870_v27 = vmul.f32 0.2, %v6798_v45 }
 0x86b   : > { %vm6832_vm6 = vcmp.gt.f32.partialorder %v6796_v28, 0.0  ;;  %v6868_v46 = vmul.f32 0.2, %v6796_v28 }
 0x86c   : > { %v6906_v32 = vsel %vm6834_vm10, %v6798_v45, %v6870_v27 }
 0x86d   : > { %v6904_v30 = vsel %vm6832_vm6, %v6796_v28, %v6868_v46  ;;  %v6471_v33 = vpop.permute.xlu2 %6470  ;;  %v7194_v29 = vmul.f32 %v13269_v31, %v6906_v32 }
 0x86e   : > { %v6467_v25 = vpop.permute.xlu0 %6466  ;;  %v7192_v43 = vmul.f32 %v13264_v10, %v6904_v30  ;;  %v6543_v60 = vadd.f32 %v6471_v33, %v16396_v50  ;;  %v17719_v50 = vld [vmem:[#allocation5_spill] sm:$0xff] }
 0x86f   : > { %v6679_v59 = vpop.permute.xlu1 %6678  ;;  %v7230_v5 = vpack.c.bf16 %v7194_v29, %v7194_v29  ;;  %v12734_v35 = vld [vmem:[#allocation2 + $0x5c] sm:$0xff]   ;;  %v13275_v22 = vunpack.i.h.bf16 %v17719_v50  ;;  %v6541_v14 = vadd.f32 %v6467_v25, %v16369_v15 }
 0x870   : > { %v11428_v0 = vld [vmem:[#allocation2 + $0x5c] sm:$0xff]  ;;  %v6755_v34 = vadd.f32 %v6679_v59, %v6539_v38  ;;  %v7228_v62 = vpack.c.bf16 %v7192_v43, %v7192_v43 }
 0x871   : > { %7334 = vrot.lane.b32.xlu0 %v7230_v5, %s13468_s12  ;;  %11099 = vmatmul.msk.bf16.gmra.mxu3 %vm7549_vm12, %v12734_v35  ;;  %v12374_v8 = vld [vmem:[#allocation2 + $0x60] sm:$0xff]  }
 0x872   : > { %v6797_v63 = vadd.f32 %v15833_v47, %v6755_v34  ;;  %11184 = vmatmul.msk.bf16.gmra.mxu0 %vm7549_vm12, %v11428_v0  ;;  %7330 = vrot.lane.b32.xlu1 %v7228_v62, %s13468_s12 }
 0x874   : > { %vm6833_vm5 = vcmp.gt.f32.partialorder %v6797_v63, 0.0  ;;  %v6869_v51 = vmul.f32 0.2, %v6797_v63 }
 0x875   : > { %v6687_v2 = vpop.permute.xlu2 %6686 }
 0x876   : > { %v6905_v21 = vsel %vm6833_vm5, %v6797_v63, %v6869_v51  ;;  %v6759_v58 = vadd.f32 %v6687_v2, %v6543_v60  ;;  %v7305_v56 = vpop.permute.xlu0 %7304 }
 0x877   : > { %7396 = vst.msk [vmem:[#allocation2 + $0x68] sm:$0xf] %vm7378_vm4, %v7305_v56  ;;  %v7193_v9 = vmul.f32 %v13265_v17, %v6905_v21  ;;  %v6469_v54 = vpop.permute.xlu1 %6468 }
 0x878   : > { %v6801_v26 = vadd.f32 %v15833_v47, %v6759_v58  ;;  %11071 = vmatmul.msk.bf16.gmra.mxu2 %vm7549_vm12, %v12374_v8  ;;  %v6542_v61 = vadd.f32 %v6469_v54, %v16383_v57  ;;  %v13274_v57 = vunpack.i.l.bf16 %v17719_v50 }
 0x879   : > { %v7229_v23 = vpack.c.bf16 %v7193_v9, %v7193_v9 }
 0x87a   : > { %vm6837_vm13 = vcmp.gt.f32.partialorder %v6801_v26, 0.0  ;;  %v6873_v4 = vmul.f32 0.2, %v6801_v26 }
 0x87b   : > { %7332 = vrot.lane.b32.xlu2 %v7229_v23, %s13468_s12  ;;  %v7775_v48 = vpop.f32.mrf.mxu3 }
 0x87c   : > { %v6909_v37 = vsel %vm6837_vm13, %v6801_v26, %v6873_v4 }
 0x87d   : > { %v7309_v49 = vpop.permute.xlu2 %7308  ;;  %v7197_v1 = vmul.f32 %v13275_v22, %v6909_v37 }
 0x87e   : > { %7398 = vst.msk [vmem:[#allocation2 + $0x70] sm:$0xf] %vm7378_vm4, %v7309_v49  ;;  %v6683_v3 = vpop.permute.xlu0 %6682  ;;  %v12736_v41 = vld [vmem:[#allocation2 + $0x64] sm:$0xff]  }
 0x87f   : > { %v11429_v44 = vld [vmem:[#allocation2 + $0x64] sm:$0xff]  ;;  %v6757_v39 = vadd.f32 %v6683_v3, %v6541_v14  ;;  %v7233_v36 = vpack.c.bf16 %v7197_v1, %v7197_v1 }
 0x881   : > { %v6799_v11 = vadd.f32 %v15833_v47, %v6757_v39  ;;  %7340 = vrot.lane.b32.xlu0 %v7233_v36, %s13468_s12  ;;  %11100 = vmatmul.msk.bf16.gmra.mxu3 %vm7549_vm12, %v12736_v41 }
 0x882   : > { %11185 = vmatmul.msk.bf16.gmra.mxu0 %vm7549_vm12, %v11429_v44 }
 0x883   : > { %vm6835_vm11 = vcmp.gt.f32.partialorder %v6799_v11, 0.0  ;;  %v6871_v15 = vmul.f32 0.2, %v6799_v11  ;;  %v7777_v7 = vpop.f32.mrf.mxu3 }
 0x884   : > { %v7307_v18 = vpop.permute.xlu1 %7306 }
 0x885   : > { %v6907_v24 = vsel %vm6835_vm11, %v6799_v11, %v6871_v15  ;;  %v16532_v12 = vpop.permute.xlu2 %13277  ;;  %7397 = vst.msk [vmem:[#allocation2 + $0x6c] sm:$0xf] %vm7378_vm4, %v7307_v18  ;;  %vm9857_vm11 = vcmask 254080  }
 0x886   : > { %v16535_v13 = vpop.permute.xlu0 %13282  ;;  %v7195_v40 = vmul.f32 %v13270_v16, %v6907_v24 }
 0x888   : > { %v7231_v42 = vpack.c.bf16 %v7195_v40, %v7195_v40 }
 0x88a   : > { %7336 = vrot.lane.b32.xlu1 %v7231_v42, %s13468_s12 }
 0x88c   : > { %v6685_v55 = vpop.permute.xlu1 %6684  ;;  %v12375_v53 = vld [vmem:[#allocation2 + $0x68] sm:$0xff]  }
 0x88d   : > { %v16539_v19 = vpop.permute.xlu2 %13292  ;;  %v6758_v45 = vadd.f32 %v6685_v55, %v6542_v61  ;;  %11072 = vmatmul.msk.bf16.gmra.mxu2 %vm7549_vm12, %v12375_v53  ;;  %v12738_v20 = vld [vmem:[#allocation2 + $0x6c] sm:$0xff]  }
 0x88e   : > { %v16542_v28 = vpop.permute.xlu0 %13297  ;;  %v11430_v31 = vld [vmem:[#allocation2 + $0x6c] sm:$0xff] }
 0x88f   : > { %v6800_v27 = vadd.f32 %v15833_v47, %v6758_v45 }
 0x891   : > { %vm6836_vm7 = vcmp.gt.f32.partialorder %v6800_v27, 0.0  ;;  %v6872_v46 = vmul.f32 0.2, %v6800_v27  ;;  %11101 = vmatmul.msk.bf16.gmra.mxu3 %vm7549_vm12, %v12738_v20 }
 0x892   : > { %11186 = vmatmul.msk.bf16.gmra.mxu0 %vm7549_vm12, %v11430_v31 }
 0x893   : > { %v6908_v52 = vsel %vm6836_vm7, %v6800_v27, %v6872_v46  ;;  %v7607_v47 = vpop.f32.mrf.mxu2 }
 0x894   : > { %v7780_v10 = vpop.f32.mrf.mxu3  ;;  %v16548_v32 = vpop.permute.xlu1 %13287  ;;  %v7196_v30 = vmul.f32 %v13274_v57, %v6908_v52  ;;  %v7776_v60 = vadd.f32 %v7775_v48, %v7607_v47 }
 0x895   : > { %v16550_v33 = vpop.permute.xlu2 %13307 }
 0x896   : > { %v7311_v29 = vpop.permute.xlu0 %7310  ;;  %v7232_v38 = vpack.c.bf16 %v7196_v30, %v7196_v30 }
 0x897   : > { %7399 = vst.msk [vmem:[#allocation2 + $0x74] sm:$0xf] %vm7378_vm4, %v7311_v29 }
 0x898   : > { %7338 = vrot.lane.b32.xlu2 %v7232_v38, %s13468_s12 }
 0x89b   : > { %v7609_v0 = vpop.f32.mrf.mxu2 }
 0x89c   : > { %v16554_v25 = vpop.f32.mrf.mxu3  ;;  %v7313_v43 = vpop.permute.xlu1 %7312  ;;  %v7778_v8 = vadd.f32 %v7777_v7, %v7609_v0 }
 0x89d   : > { %v7315_v59 = vpop.permute.xlu2 %7314  ;;  %7400 = vst.msk [vmem:[#allocation2 + $0x78] sm:$0xf] %vm7378_vm4, %v7313_v43 }
 0x89e   : > { %7401 = vst.msk [vmem:[#allocation2 + $0x7c] sm:$0xf] %vm7378_vm4, %v7315_v59  ;;  %v7317_v5 = vpop.permute.xlu0 %7316  ;;  %v12376_v35 = vld [vmem:[#allocation2 + $0x70] sm:$0xff]  }
 0x89f   : > { %7402 = vst.msk [vmem:[#allocation2 + $0x80] sm:$0xf] %vm7378_vm4, %v7317_v5  ;;  %11073 = vmatmul.msk.bf16.gmra.mxu2 %vm7549_vm12, %v12376_v35 }
 0x8a4   : > { %v16560_v34 = vpop.f32.mrf.mxu3  ;;  %v12740_v62 = vld [vmem:[#allocation2 + $0x74] sm:$0xff]   ;;  %v16571_v58 = vpop.permute.xlu1 %13302 }
 0x8a5   : > { %v11431_v63 = vld [vmem:[#allocation2 + $0x74] sm:$0xff]  ;;  %v7321_v51 = vpop.permute.xlu2 %7320  ;;  %11102 = vmatmul.msk.bf16.gmra.mxu3 %vm7549_vm12, %v12740_v62 }
 0x8a6   : > { %7404 = vst.msk [vmem:[#allocation2 + $0x88] sm:$0xf] %vm7378_vm4, %v7321_v51  ;;  %v8033_v17 = vpop.f32.mrf.mxu0  ;;  %11187 = vmatmul.msk.bf16.gmra.mxu0 %vm7549_vm12, %v11431_v63  ;;  %v12377_v23 = vld [vmem:[#allocation2 + $0x78] sm:$0xff]  }
 0x8a7   : > { %v16565_v2 = vadd.f32 %v8033_v17, %v7776_v60  ;;  %v12742_v54 = vld [vmem:[#allocation2 + $0x7c] sm:$0xff]  }
 0x8a8   : > { %v11432_v14 = vld [vmem:[#allocation2 + $0x7c] sm:$0xff] }
 0x8a9   : > { %8138 = vst.msk [vmem:[#allocation3 + $0x8] sm:$0xff] %vm1581_vm2, %v16565_v2 }
 0x8aa   : > { %8169 = vst.msk [vmem:[#allocation3 + $0x8] sm:$0xff] %vm1632_vm3, %v16565_v2 }
 0x8ab   : > { %v7612_v21 = vpop.f32.mrf.mxu2 }
 0x8ac   : > { %v16573_v9 = vpop.f32.mrf.mxu3  ;;  %v7781_v44 = vadd.f32 %v7780_v10, %v7612_v21 }
 0x8ad   : > { %v7323_v56 = vpop.permute.xlu0 %7322 }
 0x8ae   : > { %7405 = vst.msk [vmem:[#allocation2 + $0x8c] sm:$0xf] %vm7378_vm4, %v7323_v56  ;;  %v8035_v26 = vpop.f32.mrf.mxu0 }
 0x8af   : > { %v16576_v4 = vadd.f32 %v8035_v26, %v7778_v8  ;;  %11074 = vmatmul.msk.bf16.gmra.mxu2 %vm7549_vm12, %v12377_v23 }
 0x8b1   : > { %8139 = vst.msk [vmem:[#allocation3 + $0x10] sm:$0xff] %vm1581_vm2, %v16576_v4  ;;  %v8200_v50 = vld [vmem:[#allocation3 + $0x7] sm:$0xff] }
 0x8b2   : > { %8170 = vst.msk [vmem:[#allocation3 + $0x10] sm:$0xff] %vm1632_vm3, %v16576_v4  ;;  %8260 = vrot.lane.b32.xlu1 %v8200_v50, %s13464_s28 }
 0x8b3   : > { %v7614_v22 = vpop.f32.mrf.mxu2  ;;  %9735 = vst.msk [vmem:[#allocation3 + $0x7] sm:$0x1] %vm9734_vm14, %v17673_v6 }
 0x8b4   : > { %v7319_v37 = vpop.permute.xlu1 %7318  ;;  %v16588_v49 = vpop.f32.mrf.mxu3  ;;  %v7783_v42 = vadd.f32 %v16554_v25, %v7614_v22 }
 0x8b5   : > { %7403 = vst.msk [vmem:[#allocation2 + $0x84] sm:$0xf] %vm7378_vm4, %v7319_v37  ;;  %11103 = vmatmul.msk.bf16.gmra.mxu3 %vm7549_vm12, %v12742_v54  ;;  %v12379_v57 = vld [vmem:[#allocation2 + $0x88] sm:$0xff]  }
 0x8b6   : > { %11188 = vmatmul.msk.bf16.gmra.mxu0 %vm7549_vm12, %v11432_v14 }
 0x8b9   : > { %v8201_v1 = vld [vmem:[#allocation3 + $0xf] sm:$0xff] }
 0x8ba   : > { %v8380_v3 = vld [vmem:[#allocation3 + $0x9] sm:$0xff]  ;;  %8262 = vrot.lane.b32.xlu2 %v8201_v1, %s13464_s28 }
 0x8bb   : > { %8440 = vrot.lane.b32.xlu1 %v8380_v3, %s13465_s29  ;;  %v7617_v41 = vpop.f32.mrf.mxu2 }
 0x8bc   : > { %v12378_v11 = vld [vmem:[#allocation2 + $0x80] sm:$0xff]   ;;  %v16596_v15 = vpop.f32.mrf.mxu3  ;;  %v7786_v31 = vadd.f32 %v16560_v34, %v7617_v41 }
 0x8bd   : > { %v7327_v39 = vpop.permute.xlu2 %7326  ;;  %v12744_v24 = vld [vmem:[#allocation2 + $0x84] sm:$0xff]  }
 0x8be   : > { %7407 = vst.msk [vmem:[#allocation2 + $0x94] sm:$0xf] %vm7378_vm4, %v7327_v39  ;;  %v8038_v36 = vpop.f32.mrf.mxu0  ;;  %v11433_v40 = vld [vmem:[#allocation2 + $0x84] sm:$0xff] }
 0x8bf   : > { %v16593_v48 = vadd.f32 %v8038_v36, %v7781_v44  ;;  %11075 = vmatmul.msk.bf16.gmra.mxu2 %vm7549_vm12, %v12378_v11 }
 0x8c1   : > { %8140 = vst.msk [vmem:[#allocation3 + $0x18] sm:$0xff] %vm1581_vm2, %v16593_v48 }
 0x8c2   : > { %8171 = vst.msk [vmem:[#allocation3 + $0x18] sm:$0xff] %vm1632_vm3, %v16593_v48 }
 0x8c3   : > { %v7619_v16 = vpop.f32.mrf.mxu2 }
 0x8c4   : > { %v16614_v45 = vpop.f32.mrf.mxu3  ;;  %v7788_v25 = vadd.f32 %v16573_v9, %v7619_v16 }
 0x8c5   : > { %v7329_v18 = vpop.permute.xlu0 %7328  ;;  %11104 = vmatmul.msk.bf16.gmra.mxu3 %vm7549_vm12, %v12744_v24  ;;  %v13441_v17 = vld [vmem:[#allocation2 + $0x94] sm:$0xf] }
 0x8c6   : > { %7408 = vst.msk [vmem:[#allocation2 + $0x98] sm:$0xf] %vm7378_vm4, %v7329_v18  ;;  %v8040_v61 = vpop.f32.mrf.mxu0  ;;  %11189 = vmatmul.msk.bf16.gmra.mxu0 %vm7549_vm12, %v11433_v40 }
 0x8c7   : > { %v16606_v7 = vadd.f32 %v8040_v61, %v7783_v42 }
 0x8c9   : > { %8141 = vst.msk [vmem:[#allocation3 + $0x20] sm:$0xff] %vm1581_vm2, %v16606_v7  ;;  %v8381_v55 = vld [vmem:[#allocation3 + $0x11] sm:$0xff] }
 0x8ca   : > { %v8202_v53 = vld [vmem:[#allocation3 + $0x17] sm:$0xff]  ;;  %8172 = vst.msk [vmem:[#allocation3 + $0x20] sm:$0xff] %vm1632_vm3, %v16606_v7  ;;  %8442 = vrot.lane.b32.xlu2 %v8381_v55, %s13465_s29 }
 0x8cb   : > { %8264 = vrot.lane.b32.xlu0 %v8202_v53, %s13464_s28  ;;  %v7622_v27 = vpop.f32.mrf.mxu2 }
 0x8cc   : > { %v7325_v20 = vpop.permute.xlu1 %7324  ;;  %v16628_v43 = vpop.f32.mrf.mxu3  ;;  %v7791_v63 = vadd.f32 %v16588_v49, %v7622_v27 }
 0x8cd   : > { %7406 = vst.msk [vmem:[#allocation2 + $0x90] sm:$0xf] %vm7378_vm4, %v7325_v20  ;;  %v11435_v22 = vld [vmem:[#allocation2 + $0x94] sm:$0xff] }
 0x8ce   : > { %v8043_v46 = vpop.f32.mrf.mxu0  ;;  %v13442_v39 = vld [vmem:[#allocation2 + $0x94] sm:$0xf0]  }
 0x8cf   : > { %v16618_v52 = vadd.f32 %v8043_v46, %v7786_v31  ;;  %11076 = vmatmul.msk.bf16.gmra.mxu2 %vm7549_vm12, %v12379_v57  ;;  %v13440_v11 = vor.u32 %v13442_v39, %v13441_v17 }
 0x8d1   : > { %8142 = vst.msk [vmem:[#allocation3 + $0x28] sm:$0xff] %vm1581_vm2, %v16618_v52  ;;  %v8382_v10 = vld [vmem:[#allocation3 + $0x19] sm:$0xff] }
 0x8d2   : > { %v8203_v30 = vld [vmem:[#allocation3 + $0x1f] sm:$0xff]  ;;  %8173 = vst.msk [vmem:[#allocation3 + $0x28] sm:$0xff] %vm1632_vm3, %v16618_v52 }
 0x8d3   : > { %8444 = vrot.lane.b32.xlu0 %v8382_v10, %s13465_s29  ;;  %8266 = vrot.lane.b32.xlu1 %v8203_v30, %s13464_s28  ;;  %v7624_v29 = vpop.f32.mrf.mxu2 }
 0x8d4   : > { %v12745_v38 = vld [vmem:[#allocation2 + $0x8c] sm:$0xff]   ;;  %v7800_v21 = vpop.f32.mrf.mxu3  ;;  %v7793_v37 = vadd.f32 %v16596_v15, %v7624_v29 }
 0x8d5   : > { %v11434_v47 = vld [vmem:[#allocation2 + $0x8c] sm:$0xff]  ;;  %v7333_v59 = vpop.permute.xlu2 %7332  ;;  %11105 = vmatmul.msk.bf16.gmra.mxu3 %vm7549_vm12, %v12745_v38 }
 0x8d6   : > { %7410 = vst.msk [vmem:[#allocation2 + $0xa0] sm:$0xf] %vm7378_vm4, %v7333_v59  ;;  %v8045_v5 = vpop.f32.mrf.mxu0  ;;  %11190 = vmatmul.msk.bf16.gmra.mxu0 %vm7549_vm12, %v11434_v47  ;;  %v12380_v51 = vld [vmem:[#allocation2 + $0x90] sm:$0xff]  }
 0x8d7   : > { %v16633_v35 = vadd.f32 %v8045_v5, %v7788_v25 }
 0x8d9   : > { %8143 = vst.msk [vmem:[#allocation3 + $0x30] sm:$0xff] %vm1581_vm2, %v16633_v35  ;;  %v8204_v0 = vld [vmem:[#allocation3 + $0x27] sm:$0xff] }
 0x8da   : > { %v8383_v34 = vld [vmem:[#allocation3 + $0x21] sm:$0xff]  ;;  %8174 = vst.msk [vmem:[#allocation3 + $0x30] sm:$0xff] %vm1632_vm3, %v16633_v35  ;;  %8268 = vrot.lane.b32.xlu2 %v8204_v0, %s13464_s28 }
 0x8db   : > { %8446 = vrot.lane.b32.xlu1 %v8383_v34, %s13465_s29  ;;  %v7627_v62 = vpop.f32.mrf.mxu2 }
 0x8dc   : > { %v7802_v49 = vpop.f32.mrf.mxu3  ;;  %v7796_v36 = vadd.f32 %v16614_v45, %v7627_v62 }
 0x8de   : > { %v8048_v60 = vpop.f32.mrf.mxu0 }
 0x8df   : > { %v16642_v56 = vadd.f32 %v8048_v60, %v7791_v63  ;;  %11077 = vmatmul.msk.bf16.gmra.mxu2 %vm7549_vm12, %v12380_v51 }
 0x8e1   : > { %8144 = vst.msk [vmem:[#allocation3 + $0x38] sm:$0xff] %vm1581_vm2, %v16642_v56  ;;  %v8384_v8 = vld [vmem:[#allocation3 + $0x29] sm:$0xff] }
 0x8e2   : > { %v8205_v9 = vld [vmem:[#allocation3 + $0x2f] sm:$0xff]  ;;  %8175 = vst.msk [vmem:[#allocation3 + $0x38] sm:$0xff] %vm1632_vm3, %v16642_v56  ;;  %8448 = vrot.lane.b32.xlu2 %v8384_v8, %s13465_s29 }
 0x8e3   : > { %8270 = vrot.lane.b32.xlu0 %v8205_v9, %s13464_s28  ;;  %v7629_v26 = vpop.f32.mrf.mxu2  ;;  %v7335_v23 = vpop.permute.xlu0 %7334 }
 0x8e4   : > { %7411 = vst.msk [vmem:[#allocation2 + $0xa4] sm:$0xf] %vm7378_vm4, %v7335_v23  ;;  %v7331_v50 = vpop.permute.xlu1 %7330  ;;  %v7805_v42 = vpop.f32.mrf.mxu3  ;;  %v7798_v45 = vadd.f32 %v16628_v43, %v7629_v26 }
 0x8e5   : > { %7409 = vst.msk [vmem:[#allocation2 + $0x9c] sm:$0xf] %vm7378_vm4, %v7331_v50  ;;  %11106 = vmatmul.msk.bf16.gmra.mxu3 %vm7549_vm12, %v13440_v11 }
 0x8e6   : > { %v8050_v54 = vpop.f32.mrf.mxu0  ;;  %11191 = vmatmul.msk.bf16.gmra.mxu0 %vm7549_vm12, %v11435_v22 }
 0x8e7   : > { %v16655_v14 = vadd.f32 %v8050_v54, %v7793_v37 }
 0x8e9   : > { %8145 = vst.msk [vmem:[#allocation3 + $0x40] sm:$0xff] %vm1581_vm2, %v16655_v14  ;;  %v8385_v1 = vld [vmem:[#allocation3 + $0x31] sm:$0xff] }
 0x8ea   : > { %v8206_v3 = vld [vmem:[#allocation3 + $0x37] sm:$0xff]  ;;  %8176 = vst.msk [vmem:[#allocation3 + $0x40] sm:$0xff] %vm1632_vm3, %v16655_v14 }
 0x8eb   : > { %8450 = vrot.lane.b32.xlu0 %v8385_v1, %s13465_s29  ;;  %8272 = vrot.lane.b32.xlu1 %v8206_v3, %s13464_s28  ;;  %v7632_v41 = vpop.f32.mrf.mxu2  ;;  %v11421_v47 = vld [vmem:[#allocation2 + $0xa0] sm:$0xff] }
 0x8ec   : > { %v7444_v44 = vld [vmem:[#allocation2 + $0x98] sm:$0xff]   ;;  %v7807_v10 = vpop.f32.mrf.mxu3  ;;  %v7801_v30 = vadd.f32 %v7800_v21, %v7632_v41 }
 0x8ed   : > { %v11436_v53 = vld [vmem:[#allocation2 + $0x9c] sm:$0xff] }
 0x8ef   : > { %v8053_v15 = vpop.f32.mrf.mxu0  ;;  %11078 = vmatmul.msk.bf16.gmra.mxu2 %vm7549_vm12, %v7444_v44 }
 0x8f0   : > { %v16664_v16 = vadd.f32 %v8053_v15, %v7796_v36 }
 0x8f1   : > { %v8207_v18 = vld [vmem:[#allocation3 + $0x3f] sm:$0xff] }
 0x8f2   : > { %v8386_v24 = vld [vmem:[#allocation3 + $0x39] sm:$0xff]  ;;  %8146 = vst.msk [vmem:[#allocation3 + $0x48] sm:$0xff] %vm1581_vm2, %v16664_v16  ;;  %v7339_v40 = vpop.permute.xlu2 %7338  ;;  %8274 = vrot.lane.b32.xlu2 %v8207_v18, %s13464_s28 }
 0x8f3   : > { %8452 = vrot.lane.b32.xlu1 %v8386_v24, %s13465_s29  ;;  %8177 = vst.msk [vmem:[#allocation3 + $0x48] sm:$0xff] %vm1632_vm3, %v16664_v16  ;;  %v7341_v61 = vpop.permute.xlu0 %7340  ;;  %v7634_v55 = vpop.f32.mrf.mxu2 }
 0x8f4   : > { %7413 = vst.msk [vmem:[#allocation2 + $0xac] sm:$0xf] %vm7378_vm4, %v7339_v40  ;;  %v7803_v0 = vadd.f32 %v7802_v49, %v7634_v55  ;;  %v7810_v34 = vpop.f32.mrf.mxu3 }
 0x8f5   : > { %7414 = vst.msk [vmem:[#allocation2 + $0xb0] sm:$0xf] %vm7378_vm4, %v7341_v61 }
 0x8f6   : > { %11192 = vmatmul.msk.bf16.gmra.mxu0 %vm7549_vm12, %v11436_v53 }
 0x8f7   : > { %v8055_v27 = vpop.f32.mrf.mxu0 }
 0x8f8   : > { %v16678_v20 = vadd.f32 %v8055_v27, %v7798_v45 }
 0x8fa   : > { %8147 = vst.msk [vmem:[#allocation3 + $0x50] sm:$0xff] %vm1581_vm2, %v16678_v20  ;;  %v8387_v31 = vld [vmem:[#allocation3 + $0x41] sm:$0xff] }
 0x8fb   : > { %v8208_v46 = vld [vmem:[#allocation3 + $0x47] sm:$0xff]  ;;  %8178 = vst.msk [vmem:[#allocation3 + $0x50] sm:$0xff] %vm1632_vm3, %v16678_v20  ;;  %8454 = vrot.lane.b32.xlu2 %v8387_v31, %s13465_s29  ;;  %v7637_v29 = vpop.f32.mrf.mxu2 }
 0x8fc   : > { %8276 = vrot.lane.b32.xlu0 %v8208_v46, %s13464_s28  ;;  %v7337_v57 = vpop.permute.xlu1 %7336  ;;  %v7806_v21 = vadd.f32 %v7805_v42, %v7637_v29  ;;  %v7812_v23 = vpop.f32.mrf.mxu3  ;;  %v11438_v37 = vld [vmem:[#allocation2 + $0xac] sm:$0xff] }
 0x8fd   : > { %7412 = vst.msk [vmem:[#allocation2 + $0xa8] sm:$0xf] %vm7378_vm4, %v7337_v57 }
 0x8ff   : > { %v8058_v38 = vpop.f32.mrf.mxu0  ;;  %11079 = vmatmul.msk.bf16.gmra.mxu2 %vm7549_vm12, %v11421_v47 }
 0x900   : > { %v16687_v25 = vadd.f32 %v8058_v38, %v7801_v30 }
 0x902   : > { %8148 = vst.msk [vmem:[#allocation3 + $0x58] sm:$0xff] %vm1581_vm2, %v16687_v25  ;;  %v8388_v43 = vld [vmem:[#allocation3 + $0x49] sm:$0xff] }
 0x903   : > { %v8209_v59 = vld [vmem:[#allocation3 + $0x4f] sm:$0xff]  ;;  %8179 = vst.msk [vmem:[#allocation3 + $0x58] sm:$0xff] %vm1632_vm3, %v16687_v25  ;;  %v7639_v63 = vpop.f32.mrf.mxu2 }
 0x904   : > { %8456 = vrot.lane.b32.xlu0 %v8388_v43, %s13465_s29  ;;  %8278 = vrot.lane.b32.xlu1 %v8209_v59, %s13464_s28  ;;  %v11437_v5 = vld [vmem:[#allocation2 + $0xa4] sm:$0xff]  ;;  %v7808_v54 = vadd.f32 %v7807_v10, %v7639_v63  ;;  %v7815_v39 = vpop.f32.mrf.mxu3 }
 0x906   : > { %11193 = vmatmul.msk.bf16.gmra.mxu0 %vm7549_vm12, %v11437_v5 }
 0x907   : > { %v8060_v62 = vpop.f32.mrf.mxu0 }
 0x908   : > { %v16697_v60 = vadd.f32 %v8060_v62, %v7803_v0  ;;  %v17720_v0 = vld [vmem:[#allocation11_spill] sm:$0xff] }
 0x90a   : > { %8149 = vst.msk [vmem:[#allocation3 + $0x60] sm:$0xff] %vm1581_vm2, %v16697_v60  ;;  %v8210_v51 = vld [vmem:[#allocation3 + $0x57] sm:$0xff] }
 0x90b   : > { %v8389_v17 = vld [vmem:[#allocation3 + $0x51] sm:$0xff]  ;;  %8180 = vst.msk [vmem:[#allocation3 + $0x60] sm:$0xff] %vm1632_vm3, %v16697_v60  ;;  %8280 = vrot.lane.b32.xlu2 %v8210_v51, %s13464_s28 }
 0x90c   : > { %8458 = vrot.lane.b32.xlu1 %v8389_v17, %s13465_s29  ;;  %v7817_v42 = vpop.f32.mrf.mxu3 }
 0x90f   : > { %v8063_v8 = vpop.f32.mrf.mxu0 }
 0x910   : > { %v16705_v9 = vadd.f32 %v8063_v8, %v7806_v21  ;;  %v7642_v26 = vpop.f32.mrf.mxu2 }
 0x911   : > { %v7811_v36 = vadd.f32 %v7810_v34, %v7642_v26 }
 0x912   : > { %8150 = vst.msk [vmem:[#allocation3 + $0x68] sm:$0xff] %vm1581_vm2, %v16705_v9  ;;  %v8390_v50 = vld [vmem:[#allocation3 + $0x59] sm:$0xff] }
 0x913   : > { %v8211_v22 = vld [vmem:[#allocation3 + $0x5f] sm:$0xff]  ;;  %8181 = vst.msk [vmem:[#allocation3 + $0x68] sm:$0xff] %vm1632_vm3, %v16705_v9  ;;  %8460 = vrot.lane.b32.xlu2 %v8390_v50, %s13465_s29 }
 0x914   : > { %8282 = vrot.lane.b32.xlu0 %v8211_v22, %s13464_s28  ;;  %v8263_v31 = vpop.permute.xlu2 %8262  ;;  %v7820_v10 = vpop.f32.mrf.mxu3 }
 0x916   : > { %11194 = vmatmul.msk.bf16.gmra.mxu0 %vm7549_vm12, %v11438_v37 }
 0x917   : > { %v8065_v49 = vpop.f32.mrf.mxu0 }
 0x918   : > { %v16714_v1 = vadd.f32 %v8065_v49, %v7808_v54  ;;  %v7644_v3 = vpop.f32.mrf.mxu2  ;;  %v11448_v54 = vld [vmem:[%s17566_s5 + $0x28] sm:$0xff]  ;;  %v11444_v49 = vld [vmem:[%s17566_s5 + $0x10] sm:$0xff] }
 0x919   : > { %v7813_v55 = vadd.f32 %v7812_v23, %v7644_v3  ;;  %9267 = vmatpush.bf16.msrb.mxu2 %v11448_v54  ;;  %9408 = vmatpush.bf16.msrb.mxu3 %v11444_v49 }
 0x91a   : > { %8151 = vst.msk [vmem:[#allocation3 + $0x70] sm:$0xff] %vm1581_vm2, %v16714_v1  ;;  %v8391_v41 = vld [vmem:[#allocation3 + $0x61] sm:$0xff] }
 0x91b   : > { %v8212_v44 = vld [vmem:[#allocation3 + $0x67] sm:$0xff]  ;;  %8182 = vst.msk [vmem:[#allocation3 + $0x70] sm:$0xff] %vm1632_vm3, %v16714_v1 }
 0x91c   : > { %8462 = vrot.lane.b32.xlu0 %v8391_v41, %s13465_s29  ;;  %8284 = vrot.lane.b32.xlu1 %v8212_v44, %s13464_s28  ;;  %v7822_v17 = vpop.f32.mrf.mxu3 }
 0x922   : > { %v8213_v11 = vld [vmem:[#allocation3 + $0x6f] sm:$0xff]  ;;  %v7647_v15 = vpop.f32.mrf.mxu2 }
 0x923   : > { %v8392_v18 = vld [vmem:[#allocation3 + $0x69] sm:$0xff]  ;;  %8286 = vrot.lane.b32.xlu2 %v8213_v11, %s13464_s28  ;;  %v8068_v24 = vpop.f32.mrf.mxu0  ;;  %v7816_v38 = vadd.f32 %v7815_v39, %v7647_v15  ;;  %v13279_v39 = vunpack.i.l.bf16 %v16532_v12 }
 0x924   : > { %8464 = vrot.lane.b32.xlu1 %v8392_v18, %s13465_s29  ;;  %v16724_v40 = vadd.f32 %v8068_v24, %v7811_v36  ;;  %v8261_v61 = vpop.permute.xlu1 %8260  ;;  %v8443_v51 = vpop.permute.xlu2 %8442 }
 0x925   : > { %v8350_v29 = vadd.f32 %v8261_v61, %v16565_v2  ;;  %v8351_v2 = vadd.f32 %v8263_v31, %v16576_v4 }
 0x926   : > { %8152 = vst.msk [vmem:[#allocation3 + $0x78] sm:$0xff] %vm1581_vm2, %v16724_v40 }
 0x927   : > { %8183 = vst.msk [vmem:[#allocation3 + $0x78] sm:$0xff] %vm1632_vm3, %v16724_v40  ;;  %v8531_v21 = vadd.f32 %v8443_v51, %v8351_v2 }
 0x928   : > { %v7825_v36 = vpop.f32.mrf.mxu3 }
 0x929   : > { %v8567_v4 = vadd.f32 %v17720_v0, %v8531_v21 }
 0x92a   : > { %v7649_v53 = vpop.f32.mrf.mxu2 }
 0x92b   : > { %v8070_v45 = vpop.f32.mrf.mxu0  ;;  %v7818_v8 = vadd.f32 %v7817_v42, %v7649_v53  ;;  %v8627_v15 = vmul.f32 0.2, %v8567_v4  ;;  %vm8597_vm12 = vcmp.gt.f32.partialorder %v8567_v4, 0.0 }
 0x92c   : > { %v16730_v27 = vadd.f32 %v8070_v45, %v7813_v55  ;;  %v11463_v55 = vld [vmem:[%s17566_s5 + $0x40] sm:$0xff] }
 0x92d   : > { %v8441_v30 = vpop.permute.xlu1 %8440  ;;  %9622 = vmatpush.bf16.msrb.mxu0 %v11463_v55 }
 0x92e   : > { %8153 = vst.msk [vmem:[#allocation3 + $0x80] sm:$0xff] %vm1581_vm2, %v16730_v27  ;;  %v8393_v46 = vld [vmem:[#allocation3 + $0x71] sm:$0xff]  ;;  %v8530_v47 = vadd.f32 %v8441_v30, %v8350_v29  ;;  %v8657_v30 = vsel %vm8597_vm12, %v8567_v4, %v8627_v15 }
 0x92f   : > { %v8214_v57 = vld [vmem:[#allocation3 + $0x77] sm:$0xff]  ;;  %8184 = vst.msk [vmem:[#allocation3 + $0x80] sm:$0xff] %vm1632_vm3, %v16730_v27  ;;  %8466 = vrot.lane.b32.xlu2 %v8393_v46, %s13465_s29 }
 0x930   : > { %8288 = vrot.lane.b32.xlu0 %v8214_v57, %s13464_s28  ;;  %v8566_v34 = vadd.f32 %v17720_v0, %v8530_v47 }
 0x932   : > { %v7652_v43 = vpop.f32.mrf.mxu2  ;;  %v8626_v26 = vmul.f32 0.2, %v8566_v34  ;;  %vm8596_vm4 = vcmp.gt.f32.partialorder %v8566_v34, 0.0 }
 0x933   : > { %v8073_v59 = vpop.f32.mrf.mxu0  ;;  %v7821_v18 = vadd.f32 %v7820_v10, %v7652_v43 }
 0x934   : > { %v16739_v5 = vadd.f32 %v8073_v59, %v7816_v38  ;;  %v8656_v3 = vsel %vm8596_vm4, %v8566_v34, %v8626_v26  ;;  %v8269_v29 = vpop.permute.xlu2 %8268 }
 0x935   : > { %v8896_v11 = vmul.f32 %v13279_v39, %v8656_v3 }
 0x936   : > { %8154 = vst.msk [vmem:[#allocation3 + $0x88] sm:$0xff] %vm1581_vm2, %v16739_v5  ;;  %v8394_v62 = vld [vmem:[#allocation3 + $0x79] sm:$0xff] }
 0x937   : > { %v8215_v63 = vld [vmem:[#allocation3 + $0x7f] sm:$0xff]  ;;  %8185 = vst.msk [vmem:[#allocation3 + $0x88] sm:$0xff] %vm1632_vm3, %v16739_v5  ;;  %v8926_v57 = vpack.c.bf16 %v8896_v11, %v8896_v11 }
 0x938   : > { %8468 = vrot.lane.b32.xlu0 %v8394_v62, %s13465_s29  ;;  %8290 = vrot.lane.b32.xlu1 %v8215_v63, %s13464_s28  ;;  %v7827_v62 = vpop.f32.mrf.mxu3 }
 0x93a   : > { %v7654_v23 = vpop.f32.mrf.mxu2 }
 0x93b   : > { %v8075_v50 = vpop.f32.mrf.mxu0  ;;  %v7823_v43 = vadd.f32 %v7822_v17, %v7654_v23 }
 0x93c   : > { %v16749_v22 = vadd.f32 %v8075_v50, %v7818_v8  ;;  %v13295_v8 = vunpack.i.h.bf16 %v16539_v19  ;;  %v8449_v23 = vpop.permute.xlu2 %8448 }
 0x93d   : > { %v8265_v37 = vpop.permute.xlu0 %8264 }
 0x93e   : > { %8155 = vst.msk [vmem:[#allocation3 + $0x90] sm:$0xff] %vm1581_vm2, %v16749_v22  ;;  %v8216_v41 = vld [vmem:[#allocation3 + $0x87] sm:$0xff]  ;;  %v8352_v42 = vadd.f32 %v8265_v37, %v16593_v48  ;;  %v13280_v48 = vunpack.i.h.bf16 %v16532_v12  ;;  %v8354_v37 = vadd.f32 %v8269_v29, %v16618_v52 }
 0x93f   : > { %v8395_v44 = vld [vmem:[#allocation3 + $0x81] sm:$0xff]  ;;  %8186 = vst.msk [vmem:[#allocation3 + $0x90] sm:$0xff] %vm1632_vm3, %v16749_v22  ;;  %8292 = vrot.lane.b32.xlu2 %v8216_v41, %s13464_s28 }
 0x940   : > { %8470 = vrot.lane.b32.xlu1 %v8395_v44, %s13465_s29  ;;  %v8897_v47 = vmul.f32 %v13280_v48, %v8657_v30  ;;  %v8534_v3 = vadd.f32 %v8449_v23, %v8354_v37  ;;  %v7830_v15 = vpop.f32.mrf.mxu3 }
 0x942   : > { %v7657_v24 = vpop.f32.mrf.mxu2  ;;  %v8927_v12 = vpack.c.bf16 %v8897_v47, %v8897_v47  ;;  %v8570_v52 = vadd.f32 %v17720_v0, %v8534_v3 }
 0x943   : > { %v8078_v61 = vpop.f32.mrf.mxu0  ;;  %v7826_v49 = vadd.f32 %v7825_v36, %v7657_v24 }
 0x944   : > { %v16769_v53 = vadd.f32 %v8078_v61, %v7821_v18  ;;  %v8630_v55 = vmul.f32 0.2, %v8570_v52  ;;  %vm8600_vm9 = vcmp.gt.f32.partialorder %v8570_v52, 0.0 }
 0x945   : > { %v8445_v45 = vpop.permute.xlu0 %8444  ;;  %v8267_v46 = vpop.permute.xlu1 %8266 }
 0x946   : > { %v8532_v31 = vadd.f32 %v8445_v45, %v8352_v42  ;;  %8156 = vst.msk [vmem:[#allocation3 + $0x98] sm:$0xff] %vm1581_vm2, %v16769_v53  ;;  %v8217_v10 = vld [vmem:[#allocation3 + $0x8f] sm:$0xff]  ;;  %v8353_v50 = vadd.f32 %v8267_v46, %v16606_v7 }
 0x947   : > { %8187 = vst.msk [vmem:[#allocation3 + $0x98] sm:$0xff] %vm1632_vm3, %v16769_v53  ;;  %8294 = vrot.lane.b32.xlu0 %v8217_v10, %s13464_s28  ;;  %8986 = vrot.lane.b32.xlu2 %v8926_v57, %s13469_s26  ;;  %v8396_v17 = vld [vmem:[#allocation3 + $0x89] sm:$0xff] }
 0x948   : > { %v8568_v38 = vadd.f32 %v17720_v0, %v8532_v31 }
 0x94a   : > { %v8628_v59 = vmul.f32 0.2, %v8568_v38  ;;  %v7659_v34 = vpop.f32.mrf.mxu2  ;;  %vm8598_vm15 = vcmp.gt.f32.partialorder %v8568_v38, 0.0 }
 0x94b   : > { %v8080_v63 = vpop.f32.mrf.mxu0  ;;  %v7828_v36 = vadd.f32 %v7827_v62, %v7659_v34  ;;  %v13284_v34 = vunpack.i.l.bf16 %v16535_v13  ;;  %v8660_v62 = vsel %vm8600_vm9, %v8570_v52, %v8630_v55 }
 0x94c   : > { %v16779_v51 = vadd.f32 %v8080_v63, %v7823_v43  ;;  %v8658_v2 = vsel %vm8598_vm15, %v8568_v38, %v8628_v59  ;;  %v8275_v29 = vpop.permute.xlu2 %8274  ;;  %vm9076_vm15 = vcmask 388416  }
 0x94d   : > { %v8447_v26 = vpop.permute.xlu1 %8446  ;;  %v8898_v54 = vmul.f32 %v13295_v8, %v8658_v2 }
 0x94e   : > { %8157 = vst.msk [vmem:[#allocation3 + $0xa0] sm:$0xff] %vm1581_vm2, %v16779_v51  ;;  %v8218_v21 = vld [vmem:[#allocation3 + $0x97] sm:$0xff]  ;;  %v8533_v4 = vadd.f32 %v8447_v26, %v8353_v50 }
 0x94f   : > { %8188 = vst.msk [vmem:[#allocation3 + $0xa0] sm:$0xff] %vm1632_vm3, %v16779_v51  ;;  %8988 = vrot.lane.b32.xlu0 %v8927_v12, %s13469_s26  ;;  %8296 = vrot.lane.b32.xlu1 %v8218_v21, %s13464_s28  ;;  %v8928_v18 = vpack.c.bf16 %v8898_v54, %v8898_v54  ;;  %v8397_v7 = vld [vmem:[#allocation3 + $0x91] sm:$0xff]  ;;  %v13285_v12 = vunpack.i.h.bf16 %v16535_v13 }
 0x950   : > { %8472 = vrot.lane.b32.xlu2 %v8396_v17, %s13465_s29  ;;  %v8569_v42 = vadd.f32 %v17720_v0, %v8533_v4 }
 0x951   : > { %v8900_v26 = vmul.f32 %v13285_v12, %v8660_v62 }
 0x952   : > { %v7662_v41 = vpop.f32.mrf.mxu2  ;;  %v8629_v24 = vmul.f32 0.2, %v8569_v42  ;;  %vm8599_vm8 = vcmp.gt.f32.partialorder %v8569_v42, 0.0 }
 0x953   : > { %v8083_v44 = vpop.f32.mrf.mxu0  ;;  %v7831_v21 = vadd.f32 %v7830_v15, %v7662_v41  ;;  %v8930_v3 = vpack.c.bf16 %v8900_v26, %v8900_v26  ;;  %v13290_v26 = vunpack.i.h.bf16 %v16548_v32 }
 0x954   : > { %v16791_v39 = vadd.f32 %v8083_v44, %v7826_v49  ;;  %v8659_v38 = vsel %vm8599_vm8, %v8569_v42, %v8629_v24  ;;  %v13294_v44 = vunpack.i.l.bf16 %v16539_v19 }
 0x955   : > { %v8271_v11 = vpop.permute.xlu0 %8270  ;;  %v8899_v2 = vmul.f32 %v13284_v34, %v8659_v38  ;;  %v8455_v41 = vpop.permute.xlu2 %8454 }
 0x956   : > { %8158 = vst.msk [vmem:[#allocation3 + $0xa8] sm:$0xff] %vm1581_vm2, %v16791_v39  ;;  %v8219_v61 = vld [vmem:[#allocation3 + $0x9f] sm:$0xff]  ;;  %v8355_v45 = vadd.f32 %v8271_v11, %v16633_v35  ;;  %v7832_v35 = vpop.f32.mrf.mxu3 }
 0x957   : > { %8189 = vst.msk [vmem:[#allocation3 + $0xa8] sm:$0xff] %vm1632_vm3, %v16791_v39  ;;  %8474 = vrot.lane.b32.xlu0 %v8397_v7, %s13465_s29  ;;  %8990 = vrot.lane.b32.xlu1 %v8928_v18, %s13469_s26  ;;  %v8398_v43 = vld [vmem:[#allocation3 + $0x99] sm:$0xff]  ;;  %v8929_v49 = vpack.c.bf16 %v8899_v2, %v8899_v2 }
 0x958   : > { %8298 = vrot.lane.b32.xlu2 %v8219_v61, %s13464_s28 }
 0x95a   : > { %v7664_v10 = vpop.f32.mrf.mxu2 }
 0x95b   : > { %v8085_v31 = vpop.f32.mrf.mxu0  ;;  %v7833_v61 = vadd.f32 %v7832_v35, %v7664_v10 }
 0x95c   : > { %v16803_v46 = vadd.f32 %v8085_v31, %v7828_v36 }
 0x95d   : > { %v8451_v57 = vpop.permute.xlu0 %8450  ;;  %v8273_v30 = vpop.permute.xlu1 %8272 }
 0x95e   : > { %v8535_v48 = vadd.f32 %v8451_v57, %v8355_v45  ;;  %8159 = vst.msk [vmem:[#allocation3 + $0xb0] sm:$0xff] %vm1581_vm2, %v16803_v46  ;;  %v8220_v47 = vld [vmem:[#allocation3 + $0xa7] sm:$0xff]  ;;  %v8356_v17 = vadd.f32 %v8273_v30, %v16642_v56  ;;  %v8357_v56 = vadd.f32 %v8275_v29, %v16655_v14  ;;  %v7835_v18 = vpop.f32.mrf.mxu3  ;;  %v13289_v30 = vunpack.i.l.bf16 %v16548_v32 }
 0x95f   : > { %v8399_v59 = vld [vmem:[#allocation3 + $0xa1] sm:$0xff]  ;;  %8190 = vst.msk [vmem:[#allocation3 + $0xb0] sm:$0xff] %vm1632_vm3, %v16803_v46  ;;  %8300 = vrot.lane.b32.xlu0 %v8220_v47, %s13464_s28  ;;  %8476 = vrot.lane.b32.xlu1 %v8398_v43, %s13465_s29  ;;  %v13299_v32 = vunpack.i.l.bf16 %v16542_v28 }
 0x960   : > { %v8571_v63 = vadd.f32 %v17720_v0, %v8535_v48  ;;  %8478 = vrot.lane.b32.xlu2 %v8399_v59, %s13465_s29  ;;  %v8537_v7 = vadd.f32 %v8455_v41, %v8357_v56  ;;  %v12452_v41 = vld [vmem:[%s13577_s16 + $0x68] sm:$0xff]  }
 0x962   : > { %v8631_v8 = vmul.f32 0.2, %v8571_v63  ;;  %vm8601_vm10 = vcmp.gt.f32.partialorder %v8571_v63, 0.0  ;;  %v7667_v11 = vpop.f32.mrf.mxu2  ;;  %v8573_v45 = vadd.f32 %v17720_v0, %v8537_v7 }
 0x963   : > { %v8088_v23 = vpop.f32.mrf.mxu0  ;;  %v7836_v38 = vadd.f32 %v7835_v18, %v7667_v11 }
 0x964   : > { %v16816_v50 = vadd.f32 %v8088_v23, %v7831_v21  ;;  %v8661_v4 = vsel %vm8601_vm10, %v8571_v63, %v8631_v8  ;;  %v8633_v48 = vmul.f32 0.2, %v8573_v45  ;;  %vm8603_vm5 = vcmp.gt.f32.partialorder %v8573_v45, 0.0 }
 0x965   : > { %v8453_v37 = vpop.permute.xlu1 %8452  ;;  %v8901_v42 = vmul.f32 %v13294_v44, %v8661_v4 }
 0x966   : > { %v8536_v54 = vadd.f32 %v8453_v37, %v8356_v17  ;;  %8160 = vst.msk [vmem:[#allocation3 + $0xb8] sm:$0xff] %vm1581_vm2, %v16816_v50  ;;  %v8400_v13 = vld [vmem:[#allocation3 + $0xa9] sm:$0xff]  ;;  %v7837_v47 = vpop.f32.mrf.mxu3  ;;  %v8663_v12 = vsel %vm8603_vm5, %v8573_v45, %v8633_v48  ;;  %v8281_v17 = vpop.permute.xlu2 %8280 }
 0x967   : > { %8191 = vst.msk [vmem:[#allocation3 + $0xb8] sm:$0xff] %vm1632_vm3, %v16816_v50  ;;  %8480 = vrot.lane.b32.xlu0 %v8400_v13, %s13465_s29  ;;  %8992 = vrot.lane.b32.xlu1 %v8929_v49, %s13469_s26  ;;  %v8931_v55 = vpack.c.bf16 %v8901_v42, %v8901_v42  ;;  %v8221_v57 = vld [vmem:[#allocation3 + $0xaf] sm:$0xff]  ;;  %v8903_v37 = vmul.f32 %v13290_v26, %v8663_v12 }
 0x968   : > { %v8572_v15 = vadd.f32 %v17720_v0, %v8536_v54  ;;  %8994 = vrot.lane.b32.xlu2 %v8930_v3, %s13469_s26 }
 0x969   : > { %v8933_v18 = vpack.c.bf16 %v8903_v37, %v8903_v37 }
 0x96a   : > { %v8632_v19 = vmul.f32 0.2, %v8572_v15  ;;  %vm8602_vm6 = vcmp.gt.f32.partialorder %v8572_v15, 0.0  ;;  %v7669_v29 = vpop.f32.mrf.mxu2 }
 0x96b   : > { %v8090_v52 = vpop.f32.mrf.mxu0  ;;  %v7838_v54 = vadd.f32 %v7837_v47, %v7669_v29  ;;  %v11443_v29 = vld [vmem:[%s17566_s5 + $0x8] sm:$0xff] }
 0x96c   : > { %v16828_v36 = vadd.f32 %v8090_v52, %v7833_v61  ;;  %v8662_v31 = vsel %vm8602_vm6, %v8572_v15, %v8632_v19  ;;  %v12031_v19 = vunpack.c.h.bf16 %v12452_v41  ;;  %9409 = vmatpush.bf16.msrb.mxu3 %v11443_v29 }
 0x96d   : > { %v8902_v10 = vmul.f32 %v13289_v30, %v8662_v31  ;;  %v8360_v31 = vadd.f32 %v8281_v17, %v16687_v25  ;;  %v11447_v30 = vld [vmem:[%s17566_s5 + $0x20] sm:$0xff] }
 0x96e   : > { %v8277_v24 = vpop.permute.xlu0 %8276  ;;  %8161 = vst.msk [vmem:[#allocation3 + $0xc0] sm:$0xff] %vm1581_vm2, %v16828_v36  ;;  %v8222_v14 = vld [vmem:[#allocation3 + $0xb7] sm:$0xff]  ;;  %v7840_v11 = vpop.f32.mrf.mxu3  ;;  %9268 = vmatpush.bf16.msrb.mxu2 %v11447_v30 }
 0x96f   : > { %8192 = vst.msk [vmem:[#allocation3 + $0xc0] sm:$0xff] %vm1632_vm3, %v16828_v36  ;;  %8996 = vrot.lane.b32.xlu0 %v8931_v55, %s13469_s26  ;;  %8302 = vrot.lane.b32.xlu1 %v8221_v57, %s13464_s28  ;;  %v8358_v59 = vadd.f32 %v8277_v24, %v16664_v16  ;;  %v8932_v63 = vpack.c.bf16 %v8902_v10, %v8902_v10  ;;  %v8401_v8 = vld [vmem:[#allocation3 + $0xb1] sm:$0xff]  ;;  %v8461_v45 = vpop.permute.xlu2 %8460 }
 0x970   : > { %8304 = vrot.lane.b32.xlu2 %v8222_v14, %s13464_s28 }
 0x972   : > { %v7672_v23 = vpop.f32.mrf.mxu2 }
 0x973   : > { %v8093_v43 = vpop.f32.mrf.mxu0  ;;  %v7841_v14 = vadd.f32 %v7840_v11, %v7672_v23 }
 0x974   : > { %v16840_v34 = vadd.f32 %v8093_v43, %v7836_v38  ;;  %v12453_v43 = vld [vmem:[%s13577_s16 + $0x70] sm:$0xff]  }
 0x975   : > { %v12034_v12 = vunpack.c.l.bf16 %v12453_v43 }
 0x976   : > { %v8457_v62 = vpop.permute.xlu0 %8456  ;;  %v8279_v35 = vpop.permute.xlu1 %8278  ;;  %8162 = vst.msk [vmem:[#allocation3 + $0xc8] sm:$0xff] %vm1581_vm2, %v16840_v34  ;;  %v8402_v21 = vld [vmem:[#allocation3 + $0xb9] sm:$0xff] }
 0x977   : > { %v8538_v2 = vadd.f32 %v8457_v62, %v8358_v59  ;;  %8193 = vst.msk [vmem:[#allocation3 + $0xc8] sm:$0xff] %vm1632_vm3, %v16840_v34  ;;  %8482 = vrot.lane.b32.xlu1 %v8401_v8, %s13465_s29  ;;  %8998 = vrot.lane.b32.xlu0 %v8932_v63, %s13469_s26  ;;  %v8359_v3 = vadd.f32 %v8279_v35, %v16678_v20  ;;  %v8223_v7 = vld [vmem:[#allocation3 + $0xbf] sm:$0xff]  ;;  %v12030_v20 = vunpack.c.l.bf16 %v12452_v41  ;;  %v13300_v35 = vunpack.i.h.bf16 %v16542_v28  ;;  %v7842_v63 = vpop.f32.mrf.mxu3 }
 0x978   : > { %8484 = vrot.lane.b32.xlu2 %v8402_v21, %s13465_s29  ;;  %v11462_v41 = vld [vmem:[%s17566_s5 + $0x38] sm:$0xff] }
 0x979   : > { %v8574_v16 = vadd.f32 %v17720_v0, %v8538_v2  ;;  %v13311_v38 = vpack.i.bf16 %v12031_v19, %v12030_v20  ;;  %v12035_v2 = vunpack.c.h.bf16 %v12453_v43  ;;  %9623 = vmatpush.bf16.msrb.mxu0 %v11462_v41 }
 0x97a   : > { %v7674_v10 = vpop.f32.mrf.mxu2 }
 0x97b   : > { %vm8604_vm13 = vcmp.gt.f32.partialorder %v8574_v16, 0.0  ;;  %v8634_v49 = vmul.f32 0.2, %v8574_v16  ;;  %v8095_v4 = vpop.f32.mrf.mxu0  ;;  %v7843_v17 = vadd.f32 %v7842_v63, %v7674_v10  ;;  %v13316_v23 = vpack.i.bf16 %v12035_v2, %v12034_v12 }
 0x97c   : > { %v16853_v44 = vadd.f32 %v8095_v4, %v7838_v54  ;;  %v13309_v12 = vunpack.i.l.bf16 %v16550_v33 }
 0x97d   : > { %v8664_v13 = vsel %vm8604_vm13, %v8574_v16, %v8634_v49  ;;  %v16884_v8 = vpop.permute.xlu2 %8286 }
 0x97e   : > { %v8459_v15 = vpop.permute.xlu1 %8458  ;;  %v8904_v56 = vmul.f32 %v13299_v32, %v8664_v13  ;;  %8163 = vst.msk [vmem:[#allocation3 + $0xd0] sm:$0xff] %vm1581_vm2, %v16853_v44  ;;  %v8403_v52 = vld [vmem:[#allocation3 + $0xc1] sm:$0xff] }
 0x97f   : > { %v8539_v42 = vadd.f32 %v8459_v15, %v8359_v3  ;;  %8194 = vst.msk [vmem:[#allocation3 + $0xd0] sm:$0xff] %vm1632_vm3, %v16853_v44  ;;  %9000 = vrot.lane.b32.xlu1 %v8933_v18, %s13469_s26  ;;  %8306 = vrot.lane.b32.xlu0 %v8223_v7, %s13464_s28  ;;  %v16862_v24 = vld [vmem:[#allocation3 + $0xc7] sm:$0xff]  ;;  %v7845_v13 = vpop.f32.mrf.mxu3 }
 0x980   : > { %v8934_v61 = vpack.c.bf16 %v8904_v56, %v8904_v56  ;;  %9858 = vst.msk [vmem:[#allocation3 + $0xc8] sm:$0x1] %vm9857_vm11, %v17673_v6  ;;  %v8540_v6 = vadd.f32 %v8461_v45, %v8360_v31  ;;  %v13304_v56 = vunpack.i.l.bf16 %v16571_v58 }
 0x981   : > { %v8575_v55 = vadd.f32 %v17720_v0, %v8539_v42 }
 0x982   : > { %9002 = vrot.lane.b32.xlu2 %v8934_v61, %s13469_s26  ;;  %v8576_v21 = vadd.f32 %v17720_v0, %v8540_v6  ;;  %v7677_v54 = vpop.f32.mrf.mxu2 }
 0x983   : > { %v8635_v57 = vmul.f32 0.2, %v8575_v55  ;;  %vm8605_vm7 = vcmp.gt.f32.partialorder %v8575_v55, 0.0  ;;  %v8098_v48 = vpop.f32.mrf.mxu0  ;;  %v7846_v42 = vadd.f32 %v7845_v13, %v7677_v54  ;;  %v8363_v54 = vadd.f32 %v16884_v8, %v16714_v1 }
 0x984   : > { %v16874_v47 = vadd.f32 %v8098_v48, %v7841_v14  ;;  %v8636_v28 = vmul.f32 0.2, %v8576_v21  ;;  %vm8606_vm14 = vcmp.gt.f32.partialorder %v8576_v21, 0.0 }
 0x985   : > { %v8665_v59 = vsel %vm8605_vm7, %v8575_v55, %v8635_v57 }
 0x986   : > { %v8283_v25 = vpop.permute.xlu0 %8282  ;;  %8164 = vst.msk [vmem:[#allocation3 + $0xd8] sm:$0xff] %vm1581_vm2, %v16874_v47  ;;  %v8225_v62 = vld [vmem:[#allocation3 + $0xcf] sm:$0xff]  ;;  %v8905_v26 = vmul.f32 %v13300_v35, %v8665_v59  ;;  %v8666_v11 = vsel %vm8606_vm14, %v8576_v21, %v8636_v28  ;;  %v13305_v35 = vunpack.i.h.bf16 %v16571_v58 }
 0x987   : > { %8195 = vst.msk [vmem:[#allocation3 + $0xd8] sm:$0xff] %vm1632_vm3, %v16874_v47  ;;  %13312 = vperm.xlu1 %12958, %v13311_v38   ;;  %8486 = vrot.lane.b32.xlu0 %v8403_v52, %s13465_s29  ;;  %v8361_v15 = vadd.f32 %v8283_v25, %v16697_v60  ;;  %v8906_v20 = vmul.f32 %v13304_v56, %v8666_v11  ;;  %v7847_v30 = vpop.f32.mrf.mxu3  ;;  %v8404_v59 = vld [vmem:[#allocation3 + $0xc9] sm:$0xff] }
 0x988   : > { %v8935_v32 = vpack.c.bf16 %v8905_v26, %v8905_v26  ;;  %v11442_v28 = vld [vmem:[%s17566_s5] sm:$0xff] }
 0x989   : > { %v8467_v18 = vpop.permute.xlu2 %8466  ;;  %v8936_v57 = vpack.c.bf16 %v8906_v20, %v8906_v20  ;;  %9410 = vmatpush.bf16.msrb.mxu3 %v11442_v28  ;;  %v12458_v28 = vld [vmem:[%s13577_s16 + $0x98] sm:$0xff]  }
 0x98a   : > { %8310 = vrot.lane.b32.xlu2 %v8225_v62, %s13464_s28  ;;  %v7679_v14 = vpop.f32.mrf.mxu2 }
 0x98b   : > { %v8100_v16 = vpop.f32.mrf.mxu0  ;;  %v7848_v10 = vadd.f32 %v7847_v30, %v7679_v14 }
 0x98c   : > { %v16887_v37 = vadd.f32 %v8100_v16, %v7843_v17 }
 0x98e   : > { %v8285_v49 = vpop.permute.xlu1 %8284  ;;  %8165 = vst.msk [vmem:[#allocation3 + $0xe0] sm:$0xff] %vm1581_vm2, %v16887_v37  ;;  %v8405_v4 = vld [vmem:[#allocation3 + $0xd1] sm:$0xff]  ;;  %v8463_v3 = vpop.permute.xlu0 %8462 }
 0x98f   : > { %8196 = vst.msk [vmem:[#allocation3 + $0xe0] sm:$0xff] %vm1632_vm3, %v16887_v37  ;;  %13317 = vperm.xlu1 %12958, %v13316_v23   ;;  %9004 = vrot.lane.b32.xlu0 %v8935_v32, %s13469_s26  ;;  %v8541_v7 = vadd.f32 %v8463_v3, %v8361_v15  ;;  %v8362_v19 = vadd.f32 %v8285_v49, %v16705_v9  ;;  %v8226_v31 = vld [vmem:[#allocation3 + $0xd7] sm:$0xff] }
 0x990   : > { %v8543_v49 = vadd.f32 %v8467_v18, %v8363_v54  ;;  %v12054_v54 = vunpack.c.l.bf16 %v12458_v28 }
 0x991   : > { %v8577_v45 = vadd.f32 %v17720_v0, %v8541_v7 }
 0x992   : > { %8490 = vrot.lane.b32.xlu2 %v8405_v4, %s13465_s29  ;;  %v12454_v4 = vld [vmem:[%s13577_s16 + $0x78] sm:$0xff]   ;;  %v8579_v13 = vadd.f32 %v17720_v0, %v8543_v49  ;;  %v12055_v49 = vunpack.c.h.bf16 %v12458_v28 }
 0x993   : > { %v8103_v61 = vpop.f32.mrf.mxu0  ;;  %v8637_v48 = vmul.f32 0.2, %v8577_v45  ;;  %vm8607_vm4 = vcmp.gt.f32.partialorder %v8577_v45, 0.0  ;;  %v12038_v15 = vunpack.c.l.bf16 %v12454_v4  ;;  %v12039_v1 = vunpack.c.h.bf16 %v12454_v4 }
 0x994   : > { %v16901_v52 = vadd.f32 %v8103_v61, %v7846_v42  ;;  %v8639_v18 = vmul.f32 0.2, %v8579_v13  ;;  %v12455_v61 = vld [vmem:[%s13577_s16 + $0x80] sm:$0xff]  }
 0x995   : > { %v8667_v25 = vsel %vm8607_vm4, %v8577_v45, %v8637_v48  ;;  %v13321_v7 = vpack.i.bf16 %v12039_v1, %v12038_v15  ;;  %v12042_v45 = vunpack.c.l.bf16 %v12455_v61 }
 0x996   : > { %v8465_v55 = vpop.permute.xlu1 %8464  ;;  %8166 = vst.msk [vmem:[#allocation3 + $0xe8] sm:$0xff] %vm1581_vm2, %v16901_v52  ;;  %v8406_v62 = vld [vmem:[#allocation3 + $0xd9] sm:$0xff]  ;;  %v8907_v21 = vmul.f32 %v13305_v35, %v8667_v25 }
 0x997   : > { %v8542_v60 = vadd.f32 %v8465_v55, %v8362_v19  ;;  %8197 = vst.msk [vmem:[#allocation3 + $0xe8] sm:$0xff] %vm1632_vm3, %v16901_v52  ;;  %8308 = vrot.lane.b32.xlu1 %v16862_v24, %s13464_s28  ;;  %8312 = vrot.lane.b32.xlu0 %v8226_v31, %s13464_s28  ;;  %v8227_v17 = vld [vmem:[#allocation3 + $0xdf] sm:$0xff]  ;;  %v13310_v55 = vunpack.i.h.bf16 %v16550_v33 }
 0x998   : > { %v8937_v58 = vpack.c.bf16 %v8907_v21, %v8907_v21 }
 0x999   : > { %v8578_v9 = vadd.f32 %v17720_v0, %v8542_v60  ;;  %v16913_v29 = vpop.permute.xlu2 %8292  ;;  %v12043_v60 = vunpack.c.h.bf16 %v12455_v61 }
 0x99a   : > { %9006 = vrot.lane.b32.xlu2 %v8936_v57, %s13469_s26 }
 0x99b   : > { %v8105_v38 = vpop.f32.mrf.mxu0  ;;  %v8638_v6 = vmul.f32 0.2, %v8578_v9  ;;  %vm8608_vm12 = vcmp.gt.f32.partialorder %v8578_v9, 0.0  ;;  %v13326_v48 = vpack.i.bf16 %v12043_v60, %v12042_v45 }
 0x99c   : > { %v16915_v43 = vadd.f32 %v8105_v38, %v7848_v10  ;;  %v12456_v38 = vld [vmem:[%s13577_s16 + $0x88] sm:$0xff]  }
 0x99d   : > { %v8668_v63 = vsel %vm8608_vm12, %v8578_v9, %v8638_v6  ;;  %v12046_v33 = vunpack.c.l.bf16 %v12456_v38  ;;  %v12047_v25 = vunpack.c.h.bf16 %v12456_v38 }
 0x99e   : > { %8167 = vst.msk [vmem:[#allocation3 + $0xf0] sm:$0xff] %vm1581_vm2, %v16915_v43  ;;  %v8228_v24 = vld [vmem:[#allocation3 + $0xe7] sm:$0xff]  ;;  %v8908_v26 = vmul.f32 %v13309_v12, %v8668_v63  ;;  %vm8609_vm2 = vcmp.gt.f32.partialorder %v8579_v13, 0.0  ;;  %v12457_v63 = vld [vmem:[%s13577_s16 + $0x90] sm:$0xff]  }
 0x99f   : > { %8198 = vst.msk [vmem:[#allocation3 + $0xf0] sm:$0xff] %vm1632_vm3, %v16915_v43  ;;  %8488 = vrot.lane.b32.xlu1 %v8404_v59, %s13465_s29  ;;  %8492 = vrot.lane.b32.xlu0 %v8406_v62, %s13465_s29  ;;  %v8407_v3 = vld [vmem:[#allocation3 + $0xe1] sm:$0xff]  ;;  %v8669_v20 = vsel %vm8609_vm2, %v8579_v13, %v8639_v18  ;;  %v13331_v35 = vpack.i.bf16 %v12047_v25, %v12046_v33  ;;  %v12050_v12 = vunpack.c.l.bf16 %v12457_v63  ;;  %vm9225_vm3 = vcmask 392192  }
 0x9a0   : > { %v8938_v23 = vpack.c.bf16 %v8908_v26, %v8908_v26  ;;  %v8909_v9 = vmul.f32 %v13310_v55, %v8669_v20  ;;  %v13341_v18 = vpack.i.bf16 %v12055_v49, %v12054_v54 }
 0x9a1   : > { %v8987_v2 = vpop.permute.xlu2 %8986 }
 0x9a2   : > { %8316 = vrot.lane.b32.xlu2 %v8228_v24, %s13464_s28  ;;  %9077 = vst.msk [vmem:[#allocation2 + $0x30] sm:$0xf] %vm9076_vm15, %v8987_v2  ;;  %v16927_v16 = vpop.permute.xlu0 %8288  ;;  %v8939_v6 = vpack.c.bf16 %v8909_v9, %v8909_v9  ;;  %v12051_v2 = vunpack.c.h.bf16 %v12457_v63 }
 0x9a6   : > { %v8229_v41 = vld [vmem:[#allocation3 + $0xef] sm:$0xff] }
 0x9a7   : > { %8314 = vrot.lane.b32.xlu1 %v8227_v17, %s13464_s28  ;;  %9008 = vrot.lane.b32.xlu0 %v8937_v58, %s13469_s26  ;;  %v8408_v8 = vld [vmem:[#allocation3 + $0xe9] sm:$0xff]  ;;  %v8409_v19 = vld [vmem:[#allocation3 + $0xf1] sm:$0xff] }
 0x9aa   : > { %9010 = vrot.lane.b32.xlu2 %v8938_v23, %s13469_s26  ;;  %v16937_v32 = vpop.permute.xlu2 %8472  ;;  %v16941_v11 = vpop.permute.xlu1 %8290  ;;  %v13336_v23 = vpack.i.bf16 %v12051_v2, %v12050_v12 }
 0x9ab   : > { %v16945_v56 = vpop.permute.xlu0 %8468 }
 0x9af   : > { %8494 = vrot.lane.b32.xlu1 %v8407_v3, %s13465_s29  ;;  %8318 = vrot.lane.b32.xlu0 %v8229_v41, %s13464_s28 }
 0x9b2   : > { %8496 = vrot.lane.b32.xlu2 %v8408_v8, %s13465_s29  ;;  %v8299_v42 = vpop.permute.xlu2 %8298  ;;  %v16952_v14 = vpop.permute.xlu1 %8470 }
 0x9b3   : > { %v8369_v31 = vadd.f32 %v8299_v42, %v16779_v51  ;;  %v11446_v51 = vld [vmem:[%s17566_s5 + $0x18] sm:$0xff]  ;;  %v12459_v42 = vld [vmem:[%s13577_s16 + $0xa0] sm:$0xff]  }
 0x9b4   : > { %9269 = vmatpush.bf16.msrb.mxu2 %v11446_v51  ;;  %v12058_v61 = vunpack.c.l.bf16 %v12459_v42  ;;  %v12059_v20 = vunpack.c.h.bf16 %v12459_v42 }
 0x9b6   : > { %v13346_v60 = vpack.i.bf16 %v12059_v20, %v12058_v61 }
 0x9b7   : > { %13322 = vperm.xlu1 %12958, %v13321_v7   ;;  %8498 = vrot.lane.b32.xlu0 %v8409_v19, %s13465_s29  ;;  %v11461_v7 = vld [vmem:[%s17566_s5 + $0x30] sm:$0xff] }
 0x9b8   : > { %9624 = vmatpush.bf16.msrb.mxu0 %v11461_v7 }
 0x9b9   : > { %v16954_v57 = vpop.permute.xlu0 %8294 }
 0x9ba   : > { %v8479_v30 = vpop.permute.xlu2 %8478 }
 0x9bb   : > { %v16956_v10 = vadd.f32 %v8479_v30, %v8369_v31 }
 0x9bf   : > { %13327 = vperm.xlu1 %12958, %v13326_v48   ;;  %9012 = vrot.lane.b32.xlu0 %v8939_v6, %s13469_s26 }
 0x9c1   : > { %v8989_v24 = vpop.permute.xlu0 %8988  ;;  %v8297_v59 = vpop.permute.xlu1 %8296 }
 0x9c2   : > { %9078 = vst.msk [vmem:[#allocation2 + $0x34] sm:$0xf] %vm9076_vm15, %v8989_v24  ;;  %v8995_v62 = vpop.permute.xlu2 %8994  ;;  %v8368_v4 = vadd.f32 %v8297_v59, %v16769_v53 }
 0x9c3   : > { %9081 = vst.msk [vmem:[#allocation2 + $0x40] sm:$0xf] %vm9076_vm15, %v8995_v62  ;;  %v8364_v62 = vadd.f32 %v16927_v16, %v16724_v40 }
 0x9c5   : > { %v8544_v63 = vadd.f32 %v16945_v56, %v8364_v62  ;;  %v8367_v56 = vadd.f32 %v16954_v57, %v16749_v22 }
 0x9c7   : > { %13332 = vperm.xlu1 %12958, %v13331_v35   ;;  %v8365_v35 = vadd.f32 %v16941_v11, %v16730_v27  ;;  %v8580_v40 = vadd.f32 %v17720_v0, %v8544_v63  ;;  %v8366_v11 = vadd.f32 %v16913_v29, %v16739_v5 }
 0x9c9   : > { %v16966_v21 = vpop.permute.xlu0 %8474  ;;  %v8991_v26 = vpop.permute.xlu1 %8990  ;;  %v11441_v58 = vld [vmem:[#allocation2 + $0x30] sm:$0xff]  ;;  %vm8610_vm8 = vcmp.gt.f32.partialorder %v8580_v40, 0.0 }
 0x9ca   : > { %v8305_v17 = vpop.permute.xlu2 %8304  ;;  %9079 = vst.msk [vmem:[#allocation2 + $0x38] sm:$0xf] %vm9076_vm15, %v8991_v26  ;;  %11245 = vmatmul.msk.bf16.vlgmr.msrb.gmra.mxu3 %vm9225_vm3, %v11441_v58  ;;  %v8640_v58 = vmul.f32 0.2, %v8580_v40 }
 0x9cb   : > { %v8372_v13 = vadd.f32 %v8305_v17, %v16816_v50 }
 0x9cf   : > { %13337 = vperm.xlu1 %12958, %v13336_v23   ;;  %v8547_v23 = vadd.f32 %v16966_v21, %v8367_v56 }
 0x9d1   : > { %v8301_v3 = vpop.permute.xlu0 %8300  ;;  %v8477_v41 = vpop.permute.xlu1 %8476  ;;  %v8583_v22 = vadd.f32 %v17720_v0, %v8547_v23 }
 0x9d2   : > { %v8485_v15 = vpop.permute.xlu2 %8484  ;;  %v16973_v1 = vadd.f32 %v8477_v41, %v8368_v4  ;;  %v8370_v53 = vadd.f32 %v8301_v3, %v16791_v39 }
 0x9d3   : > { %v16975_v8 = vadd.f32 %v8485_v15, %v8372_v13  ;;  %vm8613_vm6 = vcmp.gt.f32.partialorder %v8583_v22, 0.0 }
 0x9d7   : > { %13342 = vperm.xlu1 %12958, %v13341_v18  }
 0x9d9   : > { %v8481_v50 = vpop.permute.xlu0 %8480  ;;  %v8993_v19 = vpop.permute.xlu1 %8992 }
 0x9da   : > { %v16982_v55 = vadd.f32 %v8481_v50, %v8370_v53  ;;  %9080 = vst.msk [vmem:[#allocation2 + $0x3c] sm:$0xf] %vm9076_vm15, %v8993_v19  ;;  %v8643_v53 = vmul.f32 0.2, %v8583_v22 }
 0x9dc   : > { %v9003_v45 = vpop.permute.xlu2 %9002 }
 0x9dd   : > { %9085 = vst.msk [vmem:[#allocation2 + $0x50] sm:$0xf] %vm9076_vm15, %v9003_v45 }
 0x9df   : > { %13347 = vperm.xlu1 %12958, %v13346_v60  }
 0x9e1   : > { %v8997_v31 = vpop.permute.xlu0 %8996  ;;  %v8303_v9 = vpop.permute.xlu1 %8302  ;;  %v12460_v30 = vld [vmem:[#allocation2 + $0x38] sm:$0xff]  }
 0x9e2   : > { %v12887_v48 = vld [vmem:[#allocation2 + $0x3c] sm:$0xff]   ;;  %9082 = vst.msk [vmem:[#allocation2 + $0x44] sm:$0xf] %vm9076_vm15, %v8997_v31  ;;  %11246 = vmatmul.msk.bf16.gmra.mxu3 %vm9225_vm3, %v12460_v30  ;;  %v8371_v38 = vadd.f32 %v8303_v9, %v16803_v46  ;;  %v8545_v46 = vadd.f32 %v16952_v14, %v8365_v35  ;;  %v8546_v14 = vadd.f32 %v16937_v32, %v8366_v11 }
 0x9e3   : > { %11217 = vmatmul.msk.bf16.vlgmr.msrb.gmra.mxu2 %vm9225_vm3, %v12887_v48  ;;  %v8670_v32 = vsel %vm8610_vm8, %v8580_v40, %v8640_v58  ;;  %v8673_v48 = vsel %vm8613_vm6, %v8583_v22, %v8643_v53 }
 0x9e4   : > { %v8311_v39 = vpop.permute.xlu2 %8310  ;;  %v8581_v16 = vadd.f32 %v17720_v0, %v8545_v46  ;;  %v8582_v5 = vadd.f32 %v17720_v0, %v8546_v14 }
 0x9e5   : > { %v8375_v25 = vadd.f32 %v8311_v39, %v16853_v44 }
 0x9e6   : > { %v8641_v17 = vmul.f32 0.2, %v8581_v16  ;;  %vm8611_vm9 = vcmp.gt.f32.partialorder %v8581_v16, 0.0  ;;  %v8642_v20 = vmul.f32 0.2, %v8582_v5  ;;  %vm8612_vm10 = vcmp.gt.f32.partialorder %v8582_v5, 0.0 }
 0x9e8   : > { %v8671_v41 = vsel %vm8611_vm9, %v8581_v16, %v8641_v17  ;;  %v8672_v30 = vsel %vm8612_vm10, %v8582_v5, %v8642_v20  ;;  %v8584_v5 = vadd.f32 %v17720_v0, %v16973_v1 }
 0x9e9   : > { %v8999_v6 = vpop.permute.xlu0 %8998  ;;  %v8483_v33 = vpop.permute.xlu1 %8482  ;;  %v17004_v2 = vld [vmem:[#allocation2 + $0x40] sm:$0xff]  }
 0x9ea   : > { %9083 = vst.msk [vmem:[#allocation2 + $0x48] sm:$0xf] %vm9076_vm15, %v8999_v6  ;;  %v16992_v51 = vadd.f32 %v8483_v33, %v8371_v38  ;;  %v12107_v21 = vunpack.c.h.bf16 %v17004_v2  ;;  %vm8614_vm5 = vcmp.gt.f32.partialorder %v8584_v5, 0.0 }
 0x9ec   : > { %v8491_v24 = vpop.permute.xlu2 %8490  ;;  %v8587_v1 = vadd.f32 %v17720_v0, %v16992_v51 }
 0x9ed   : > { %v16994_v59 = vadd.f32 %v8491_v24, %v8375_v25 }
 0x9ee   : > { %vm8617_vm7 = vcmp.gt.f32.partialorder %v8587_v1, 0.0 }
 0x9f1   : > { %v17002_v12 = vpop.permute.xlu0 %8306  ;;  %v9001_v44 = vpop.permute.xlu1 %9000  ;;  %v12889_v26 = vld [vmem:[#allocation2 + $0x44] sm:$0xff]  }
 0x9f2   : > { %9084 = vst.msk [vmem:[#allocation2 + $0x4c] sm:$0xf] %vm9076_vm15, %v9001_v44  ;;  %11247 = vmatmul.msk.bf16.gmra.mxu3 %vm9225_vm3, %v17004_v2  ;;  %v8373_v20 = vadd.f32 %v17002_v12, %v16828_v36  ;;  %v8588_v36 = vadd.f32 %v17720_v0, %v16975_v8 }
 0x9f3   : > { %11218 = vmatmul.msk.bf16.gmra.mxu2 %vm9225_vm3, %v12889_v26 }
 0x9f4   : > { %v9007_v27 = vpop.permute.xlu2 %9006  ;;  %vm8618_vm14 = vcmp.gt.f32.partialorder %v8588_v36, 0.0 }
 0x9f5   : > { %9087 = vst.msk [vmem:[#allocation2 + $0x58] sm:$0xf] %vm9076_vm15, %v9007_v27 }
 0x9f9   : > { %v17019_v28 = vpop.permute.xlu0 %8486  ;;  %v13313_v54 = vpop.permute.xlu1 %13312  ;;  %v11449_v49 = vld [vmem:[#allocation2 + $0x48] sm:$0xff] }
 0x9fa   : > { %v12462_v4 = vld [vmem:[#allocation2 + $0x48] sm:$0xff]   ;;  %v13315_v29 = vunpack.i.h.bf16 %v13313_v54  ;;  %v13314_v13 = vunpack.i.l.bf16 %v13313_v54  ;;  %11323 = vmatmul.msk.bf16.vlgmr.msrb.gmra.mxu0 %vm9225_vm3, %v11449_v49 }
 0x9fb   : > { %v12110_v3 = vunpack.c.l.bf16 %v12462_v4  ;;  %v12891_v45 = vld [vmem:[#allocation2 + $0x4c] sm:$0xff]   ;;  %v12111_v63 = vunpack.c.h.bf16 %v12462_v4 }
 0x9fc   : > { %v17023_v57 = vpop.permute.xlu2 %8316  ;;  %v8911_v15 = vmul.f32 %v13315_v29, %v8671_v41  ;;  %v8910_v18 = vmul.f32 %v13314_v13, %v8670_v32 }
 0x9fd   : > { %v17027_v42 = vpack.i.bf16 %v12110_v3, %v12107_v21  ;;  %v8644_v3 = vmul.f32 0.2, %v8584_v5 }
 0x9fe   : > { %v8941_v7 = vpack.c.bf16 %v8911_v15, %v8911_v15  ;;  %v8940_v61 = vpack.c.bf16 %v8910_v18, %v8910_v18 }
 0x9ff   : > { %v8674_v15 = vsel %vm8614_vm5, %v8584_v5, %v8644_v3 }
 0xa00   : > { %9016 = vrot.lane.b32.xlu0 %v8941_v7, %s13469_s26  ;;  %9014 = vrot.lane.b32.xlu2 %v8940_v61, %s13469_s26 }
 0xa01   : > { %v9005_v50 = vpop.permute.xlu0 %9004  ;;  %v13318_v19 = vpop.permute.xlu1 %13317 }
 0xa02   : > { %9086 = vst.msk [vmem:[#allocation2 + $0x54] sm:$0xf] %vm9076_vm15, %v9005_v50  ;;  %v13320_v60 = vunpack.i.h.bf16 %v13318_v19  ;;  %v13319_v31 = vunpack.i.l.bf16 %v13318_v19  ;;  %11248 = vmatmul.msk.bf16.gmra.mxu3 %vm9225_vm3, %v12462_v4  ;;  %v8585_v4 = vadd.f32 %v17720_v0, %v16956_v10  ;;  %v8586_v10 = vadd.f32 %v17720_v0, %v16982_v55 }
 0xa03   : > { %11219 = vmatmul.msk.bf16.gmra.mxu2 %vm9225_vm3, %v12891_v45  ;;  %v8647_v45 = vmul.f32 0.2, %v8587_v1 }
 0xa04   : > { %v9011_v9 = vpop.permute.xlu2 %9010  ;;  %v8913_v39 = vmul.f32 %v13320_v60, %v8673_v48  ;;  %v8912_v38 = vmul.f32 %v13319_v31, %v8672_v30  ;;  %v8645_v13 = vmul.f32 0.2, %v8585_v4  ;;  %vm8615_vm13 = vcmp.gt.f32.partialorder %v8585_v4, 0.0 }
 0xa05   : > { %9089 = vst.msk [vmem:[#allocation2 + $0x60] sm:$0xf] %vm9076_vm15, %v9011_v9  ;;  %v8646_v19 = vmul.f32 0.2, %v8586_v10  ;;  %v8553_v60 = vadd.f32 %v17019_v28, %v8373_v20  ;;  %vm8616_vm11 = vcmp.gt.f32.partialorder %v8586_v10, 0.0  ;;  %v8677_v48 = vsel %vm8617_vm7, %v8587_v1, %v8647_v45 }
 0xa06   : > { %v8943_v6 = vpack.c.bf16 %v8913_v39, %v8913_v39  ;;  %v8942_v33 = vpack.c.bf16 %v8912_v38, %v8912_v38  ;;  %v8675_v18 = vsel %vm8615_vm13, %v8585_v4, %v8645_v13 }
 0xa07   : > { %v8589_v12 = vadd.f32 %v17720_v0, %v8553_v60  ;;  %v8676_v30 = vsel %vm8616_vm11, %v8586_v10, %v8646_v19 }
 0xa08   : > { %9020 = vrot.lane.b32.xlu0 %v8943_v6, %s13469_s26  ;;  %9018 = vrot.lane.b32.xlu2 %v8942_v33, %s13469_s26 }
 0xa09   : > { %v17037_v25 = vpop.permute.xlu0 %8312  ;;  %v17039_v24 = vpop.permute.xlu1 %8308  ;;  %v11450_v62 = vld [vmem:[#allocation2 + $0x50] sm:$0xff]  ;;  %vm8619_vm4 = vcmp.gt.f32.partialorder %v8589_v12, 0.0 }
 0xa0a   : > { %v12463_v35 = vld [vmem:[#allocation2 + $0x50] sm:$0xff]   ;;  %11324 = vmatmul.msk.bf16.gmra.mxu0 %vm9225_vm3, %v11450_v62  ;;  %v8374_v38 = vadd.f32 %v17039_v24, %v16840_v34  ;;  %v8648_v62 = vmul.f32 0.2, %v8588_v36  ;;  %v8591_v34 = vadd.f32 %v17720_v0, %v16994_v59  ;;  %v8376_v4 = vadd.f32 %v17037_v25, %v16874_v47 }
 0xa0b   : > { %v12114_v46 = vunpack.c.l.bf16 %v12463_v35  ;;  %v12893_v16 = vld [vmem:[#allocation2 + $0x54] sm:$0xff]   ;;  %v12115_v54 = vunpack.c.h.bf16 %v12463_v35 }
 0xa0c   : > { %vm8621_vm2 = vcmp.gt.f32.partialorder %v8591_v34, 0.0 }
 0xa0d   : > { %v17042_v44 = vpack.i.bf16 %v12114_v46, %v12111_v63 }
 0xa11   : > { %v17044_v26 = vpop.permute.xlu0 %8492  ;;  %v8489_v40 = vpop.permute.xlu1 %8488 }
 0xa12   : > { %11249 = vmatmul.msk.bf16.gmra.mxu3 %vm9225_vm3, %v12463_v35  ;;  %v8649_v35 = vmul.f32 0.2, %v8589_v12  ;;  %v8554_v63 = vadd.f32 %v8489_v40, %v8374_v38  ;;  %v8678_v40 = vsel %vm8618_vm14, %v8588_v36, %v8648_v62 }
 0xa13   : > { %11220 = vmatmul.msk.bf16.gmra.mxu2 %vm9225_vm3, %v12893_v16 }
 0xa14   : > { %v8590_v24 = vadd.f32 %v17720_v0, %v8554_v63 }
 0xa16   : > { %v8650_v59 = vmul.f32 0.2, %v8590_v24  ;;  %vm8620_vm12 = vcmp.gt.f32.partialorder %v8590_v24, 0.0 }
 0xa19   : > { %v9009_v27 = vpop.permute.xlu0 %9008  ;;  %v17048_v11 = vpop.permute.xlu1 %8314 }
 0xa1a   : > { %9088 = vst.msk [vmem:[#allocation2 + $0x5c] sm:$0xf] %vm9076_vm15, %v9009_v27  ;;  %v8377_v5 = vadd.f32 %v17048_v11, %v16887_v37  ;;  %v8680_v11 = vsel %vm8620_vm12, %v8590_v24, %v8650_v59 }
 0xa21   : > { %v17051_v56 = vpop.permute.xlu0 %8318  ;;  %v17053_v14 = vpop.permute.xlu1 %8494  ;;  %v17055_v58 = vld [vmem:[#allocation2 + $0x58] sm:$0xff]  }
 0xa22   : > { %v12895_v17 = vld [vmem:[#allocation2 + $0x5c] sm:$0xff]   ;;  %11250 = vmatmul.msk.bf16.gmra.mxu3 %vm9225_vm3, %v17055_v58  ;;  %v12118_v49 = vunpack.c.l.bf16 %v17055_v58 }
 0xa23   : > { %v11451_v23 = vld [vmem:[#allocation2 + $0x58] sm:$0xff]  ;;  %11221 = vmatmul.msk.bf16.gmra.mxu2 %vm9225_vm3, %v12895_v17 }
 0xa24   : > { %11325 = vmatmul.msk.bf16.gmra.mxu0 %vm9225_vm3, %v11451_v23  ;;  %v17066_v29 = vpack.i.bf16 %v12118_v49, %v12115_v54  ;;  %v8679_v23 = vsel %vm8619_vm4, %v8589_v12, %v8649_v35  ;;  %v13415_v35 = vld [vmem:[%s17571_s10] ss:$0 sm:$0xff] }
 0xa29   : > { %v17068_v22 = vpop.permute.xlu0 %8498  ;;  %v13323_v32 = vpop.permute.xlu1 %13322 }
 0xa2a   : > { %v13325_v41 = vunpack.i.h.bf16 %v13323_v32  ;;  %v13324_v21 = vunpack.i.l.bf16 %v13323_v32  ;;  %v8651_v32 = vmul.f32 0.2, %v8591_v34 }
 0xa2c   : > { %v8915_v7 = vmul.f32 %v13325_v41, %v8675_v18  ;;  %v8914_v61 = vmul.f32 %v13324_v21, %v8674_v15  ;;  %v8556_v41 = vadd.f32 %v17044_v26, %v8376_v4  ;;  %v8557_v21 = vadd.f32 %v17053_v14, %v8377_v5  ;;  %v8497_v18 = vpop.permute.xlu2 %8496 }
 0xa2d   : > { %v8681_v15 = vsel %vm8621_vm2, %v8591_v34, %v8651_v32  ;;  %v8378_v14 = vadd.f32 %v17023_v57, %v16901_v52 }
 0xa2e   : > { %v8945_v53 = vpack.c.bf16 %v8915_v7, %v8915_v7  ;;  %v8944_v50 = vpack.c.bf16 %v8914_v61, %v8914_v61  ;;  %v8592_v25 = vadd.f32 %v17720_v0, %v8556_v41  ;;  %v8593_v37 = vadd.f32 %v17720_v0, %v8557_v21 }
 0xa2f   : > { %v8379_v61 = vadd.f32 %v17051_v56, %v16915_v43 }
 0xa30   : > { %9024 = vrot.lane.b32.xlu0 %v8945_v53, %s13469_s26  ;;  %9022 = vrot.lane.b32.xlu2 %v8944_v50, %s13469_s26  ;;  %v8558_v50 = vadd.f32 %v8497_v18, %v8378_v14  ;;  %v8652_v19 = vmul.f32 0.2, %v8592_v25  ;;  %v8653_v45 = vmul.f32 0.2, %v8593_v37  ;;  %vm8622_vm8 = vcmp.gt.f32.partialorder %v8592_v25, 0.0 }
 0xa31   : > { %v9013_v55 = vpop.permute.xlu0 %9012  ;;  %v13328_v51 = vpop.permute.xlu1 %13327  ;;  %v8559_v60 = vadd.f32 %v17068_v22, %v8379_v61  ;;  %vm8623_vm9 = vcmp.gt.f32.partialorder %v8593_v37, 0.0 }
 0xa32   : > { %9090 = vst.msk [vmem:[#allocation2 + $0x64] sm:$0xf] %vm9076_vm15, %v9013_v55  ;;  %v13330_v31 = vunpack.i.h.bf16 %v13328_v51  ;;  %v13329_v9 = vunpack.i.l.bf16 %v13328_v51  ;;  %v8594_v52 = vadd.f32 %v17720_v0, %v8558_v50  ;;  %v8682_v57 = vsel %vm8622_vm8, %v8592_v25, %v8652_v19 }
 0xa33   : > { %v8595_v43 = vadd.f32 %v17720_v0, %v8559_v60  ;;  %v8683_v56 = vsel %vm8623_vm9, %v8593_v37, %v8653_v45 }
 0xa34   : > { %v8917_v28 = vmul.f32 %v13330_v31, %v8677_v48  ;;  %v8916_v39 = vmul.f32 %v13329_v9, %v8676_v30  ;;  %v8654_v22 = vmul.f32 0.2, %v8594_v52  ;;  %vm8624_vm10 = vcmp.gt.f32.partialorder %v8594_v52, 0.0 }
 0xa35   : > { %v8655_v48 = vmul.f32 0.2, %v8595_v43  ;;  %vm8625_vm6 = vcmp.gt.f32.partialorder %v8595_v43, 0.0 }
 0xa36   : > { %v8947_v6 = vpack.c.bf16 %v8917_v28, %v8917_v28  ;;  %v8946_v33 = vpack.c.bf16 %v8916_v39, %v8916_v39 }
 0xa38   : > { %9028 = vrot.lane.b32.xlu0 %v8947_v6, %s13469_s26  ;;  %9026 = vrot.lane.b32.xlu2 %v8946_v33, %s13469_s26  ;;  %v8684_v6 = vsel %vm8624_vm10, %v8594_v52, %v8654_v22  ;;  %v8685_v33 = vsel %vm8625_vm6, %v8595_v43, %v8655_v48 }
 0xa39   : > { %v13333_v8 = vpop.permute.xlu1 %13332  ;;  %v17087_v46 = vld [vmem:[#allocation2 + $0x60] sm:$0xff]  }
 0xa3a   : > { %v11452_v16 = vld [vmem:[#allocation2 + $0x60] sm:$0xff]  ;;  %v13335_v27 = vunpack.i.h.bf16 %v13333_v8  ;;  %v13334_v17 = vunpack.i.l.bf16 %v13333_v8  ;;  %11251 = vmatmul.msk.bf16.gmra.mxu3 %vm9225_vm3, %v17087_v46 }
 0xa3b   : > { %11326 = vmatmul.msk.bf16.gmra.mxu0 %vm9225_vm3, %v11452_v16  ;;  %v10081_v16 = vld [vmem:[#allocation2 + $0x3c] sm:$0xf] }
 0xa3c   : > { %v8919_v54 = vmul.f32 %v13335_v27, %v8679_v23  ;;  %v8918_v49 = vmul.f32 %v13334_v17, %v8678_v40  ;;  %v12106_v17 = vunpack.c.l.bf16 %v17004_v2  ;;  %v10105_v34 = vunpack.c.l.bf16 %v10081_v16 }
 0xa3d   : > { %v12119_v2 = vunpack.c.h.bf16 %v17055_v58 }
 0xa3e   : > { %v8949_v13 = vpack.c.bf16 %v8919_v54, %v8919_v54  ;;  %v8948_v3 = vpack.c.bf16 %v8918_v49, %v8918_v49  ;;  %v13351_v24 = vpack.i.bf16 %v12106_v17, %v10105_v34  ;;  %v12122_v54 = vunpack.c.l.bf16 %v17087_v46 }
 0xa40   : > { %9032 = vrot.lane.b32.xlu0 %v8949_v13, %s13469_s26  ;;  %9030 = vrot.lane.b32.xlu2 %v8948_v3, %s13469_s26  ;;  %v13371_v49 = vpack.i.bf16 %v12122_v54, %v12119_v2 }
 0xa41   : > { %v13338_v10 = vpop.permute.xlu1 %13337 }
 0xa42   : > { %v13340_v1 = vunpack.i.h.bf16 %v13338_v10  ;;  %v13339_v47 = vunpack.i.l.bf16 %v13338_v10 }
 0xa44   : > { %v8921_v26 = vmul.f32 %v13340_v1, %v8681_v15  ;;  %v8920_v7 = vmul.f32 %v13339_v47, %v8680_v11 }
 0xa46   : > { %v8951_v20 = vpack.c.bf16 %v8921_v26, %v8921_v26  ;;  %v8950_v53 = vpack.c.bf16 %v8920_v7, %v8920_v7 }
 0xa48   : > { %9036 = vrot.lane.b32.xlu0 %v8951_v20, %s13469_s26  ;;  %9034 = vrot.lane.b32.xlu2 %v8950_v53, %s13469_s26 }
 0xa49   : > { %v13343_v55 = vpop.permute.xlu1 %13342 }
 0xa4a   : > { %v13345_v51 = vunpack.i.h.bf16 %v13343_v55  ;;  %v13344_v31 = vunpack.i.l.bf16 %v13343_v55 }
 0xa4c   : > { %v8923_v9 = vmul.f32 %v13345_v51, %v8683_v56  ;;  %v8922_v36 = vmul.f32 %v13344_v31, %v8682_v57 }
 0xa4d   : > { %v9412_v4 = vpop.f32.mrf.mxu3 }
 0xa4e   : > { %v8953_v12 = vpack.c.bf16 %v8923_v9, %v8923_v9  ;;  %v8952_v30 = vpack.c.bf16 %v8922_v36, %v8922_v36 }
 0xa50   : > { %9038 = vrot.lane.b32.xlu1 %v8952_v30, %s13469_s26  ;;  %9040 = vrot.lane.b32.xlu2 %v8953_v12, %s13469_s26 }
 0xa51   : > { %v13348_v28 = vpop.permute.xlu1 %13347 }
 0xa52   : > { %v13350_v39 = vunpack.i.h.bf16 %v13348_v28  ;;  %v13349_v38 = vunpack.i.l.bf16 %v13348_v28 }
 0xa54   : > { %v8925_v0 = vmul.f32 %v13350_v39, %v8685_v33  ;;  %v8924_v62 = vmul.f32 %v13349_v38, %v8684_v6 }
 0xa55   : > { %v9414_v1 = vpop.f32.mrf.mxu3 }
 0xa56   : > { %v8955_v63 = vpack.c.bf16 %v8925_v0, %v8925_v0  ;;  %v8954_v8 = vpack.c.bf16 %v8924_v62, %v8924_v62 }
 0xa58   : > { %9044 = vrot.lane.b32.xlu1 %v8955_v63, %s13469_s26  ;;  %9042 = vrot.lane.b32.xlu0 %v8954_v8, %s13469_s26  ;;  %s13470_s26 = smov 112  }
 0xa59   : > { %10054 = vrot.lane.b32.xlu2 %v13415_v35, %s13467_s24 }
 0xa5a   : > { %v9015_v27 = vpop.permute.xlu2 %9014 }
 0xa5b   : > { %9091 = vst.msk [vmem:[#allocation2 + $0x68] sm:$0xf] %vm9076_vm15, %v9015_v27 }
 0xa60   : > { %13357 = vrot.lane.b32.xlu1 %v17027_v42, %s13467_s24  ;;  %13352 = vrot.lane.b32.xlu0 %v13351_v24, %s13467_s24 }
 0xa61   : > { %13362 = vrot.lane.b32.xlu2 %v17042_v44, %s13467_s24 }
 0xa62   : > { %v9019_v40 = vpop.permute.xlu2 %9018  ;;  %v12897_v23 = vld [vmem:[#allocation2 + $0x64] sm:$0xff]  }
 0xa63   : > { %9093 = vst.msk [vmem:[#allocation2 + $0x70] sm:$0xf] %vm9076_vm15, %v9019_v40  ;;  %11222 = vmatmul.msk.bf16.gmra.mxu2 %vm9225_vm3, %v12897_v23 }
 0xa65   : > { %v9417_v18 = vpop.f32.mrf.mxu3 }
 0xa66   : > { %v9271_v42 = vpop.f32.mrf.mxu2 }
 0xa67   : > { %v9413_v44 = vadd.f32 %v9412_v4, %v9271_v42 }
 0xa68   : > { %13372 = vrot.lane.b32.xlu1 %v13371_v49, %s13467_s24  ;;  %13367 = vrot.lane.b32.xlu0 %v17066_v29, %s13467_s24  ;;  %v12123_v29 = vunpack.c.h.bf16 %v17087_v46 }
 0xa6d   : > { %v9419_v60 = vpop.f32.mrf.mxu3 }
 0xa6e   : > { %v9273_v13 = vpop.f32.mrf.mxu2 }
 0xa6f   : > { %v9415_v25 = vadd.f32 %v9414_v1, %v9273_v13 }
 0xa72   : > { %v9017_v5 = vpop.permute.xlu0 %9016 }
 0xa73   : > { %9092 = vst.msk [vmem:[#allocation2 + $0x6c] sm:$0xf] %vm9076_vm15, %v9017_v5 }
 0xa75   : > { %v9422_v9 = vpop.f32.mrf.mxu3 }
 0xa76   : > { %v9276_v15 = vpop.f32.mrf.mxu2 }
 0xa77   : > { %v9626_v3 = vpop.f32.mrf.mxu0  ;;  %v9418_v61 = vadd.f32 %v9417_v18, %v9276_v15 }
 0xa78   : > { %v17137_v32 = vadd.f32 %v9626_v3, %v9413_v44 }
 0xa7a   : > { %v9021_v41 = vpop.permute.xlu0 %9020  ;;  %v12466_v59 = vld [vmem:[#allocation2 + $0x68] sm:$0xff]   ;;  %9710 = vst.msk [vmem:[#allocation3 + $0x8] sm:$0xff] %vm716_vm1, %v17137_v32 }
 0xa7b   : > { %v12899_v21 = vld [vmem:[#allocation2 + $0x6c] sm:$0xff]   ;;  %11252 = vmatmul.msk.bf16.gmra.mxu3 %vm9225_vm3, %v12466_v59  ;;  %v12126_v10 = vunpack.c.l.bf16 %v12466_v59  ;;  %9094 = vst.msk [vmem:[#allocation2 + $0x74] sm:$0xf] %vm9076_vm15, %v9021_v41  ;;  %v12127_v26 = vunpack.c.h.bf16 %v12466_v59 }
 0xa7c   : > { %v11453_v58 = vld [vmem:[#allocation2 + $0x68] sm:$0xff]  ;;  %11223 = vmatmul.msk.bf16.gmra.mxu2 %vm9225_vm3, %v12899_v21 }
 0xa7d   : > { %11327 = vmatmul.msk.bf16.gmra.mxu0 %vm9225_vm3, %v11453_v58  ;;  %v13376_v47 = vpack.i.bf16 %v12126_v10, %v12123_v29  ;;  %v9424_v39 = vpop.f32.mrf.mxu3 }
 0xa7e   : > { %v9278_v45 = vpop.f32.mrf.mxu2 }
 0xa7f   : > { %13377 = vrot.lane.b32.xlu2 %v13376_v47, %s13467_s24  ;;  %v9628_v37 = vpop.f32.mrf.mxu0  ;;  %v9420_v55 = vadd.f32 %v9419_v60, %v9278_v45 }
 0xa80   : > { %v17147_v11 = vadd.f32 %v9628_v37, %v9415_v25 }
 0xa82   : > { %9711 = vst.msk [vmem:[#allocation3 + $0x10] sm:$0xff] %vm716_vm1, %v17147_v11  ;;  %v12477_v46 = vld [vmem:[#allocation2 + $0x70] sm:$0xff]  }
 0xa83   : > { %v12130_v7 = vunpack.c.l.bf16 %v12477_v46  ;;  %v11454_v19 = vld [vmem:[#allocation2 + $0x70] sm:$0xff]  ;;  %v12131_v16 = vunpack.c.h.bf16 %v12477_v46 }
 0xa85   : > { %v13381_v14 = vpack.i.bf16 %v12130_v7, %v12127_v26  ;;  %v9427_v23 = vpop.f32.mrf.mxu3 }
 0xa86   : > { %v9281_v57 = vpop.f32.mrf.mxu2 }
 0xa87   : > { %13382 = vrot.lane.b32.xlu0 %v13381_v14, %s13467_s24  ;;  %v9631_v20 = vpop.f32.mrf.mxu0  ;;  %v9423_v36 = vadd.f32 %v9422_v9, %v9281_v57 }
 0xa88   : > { %v17152_v53 = vadd.f32 %v9631_v20, %v9418_v61 }
 0xa8a   : > { %v9023_v50 = vpop.permute.xlu2 %9022  ;;  %9712 = vst.msk [vmem:[#allocation3 + $0x18] sm:$0xff] %vm716_vm1, %v17152_v53 }
 0xa8b   : > { %11253 = vmatmul.msk.bf16.gmra.mxu3 %vm9225_vm3, %v12477_v46  ;;  %9095 = vst.msk [vmem:[#allocation2 + $0x78] sm:$0xf] %vm9076_vm15, %v9023_v50 }
 0xa8d   : > { %11328 = vmatmul.msk.bf16.gmra.mxu0 %vm9225_vm3, %v11454_v19  ;;  %v9429_v10 = vpop.f32.mrf.mxu3 }
 0xa8e   : > { %v9283_v28 = vpop.f32.mrf.mxu2 }
 0xa8f   : > { %v9633_v51 = vpop.f32.mrf.mxu0  ;;  %v9425_v38 = vadd.f32 %v9424_v39, %v9283_v28 }
 0xa90   : > { %v17159_v31 = vadd.f32 %v9633_v51, %v9420_v55 }
 0xa92   : > { %v9027_v52 = vpop.permute.xlu2 %9026  ;;  %9713 = vst.msk [vmem:[#allocation3 + $0x20] sm:$0xff] %vm716_vm1, %v17159_v31  ;;  %v12901_v43 = vld [vmem:[#allocation2 + $0x74] sm:$0xff]  }
 0xa93   : > { %9097 = vst.msk [vmem:[#allocation2 + $0x80] sm:$0xf] %vm9076_vm15, %v9027_v52  ;;  %11224 = vmatmul.msk.bf16.gmra.mxu2 %vm9225_vm3, %v12901_v43 }
 0xa95   : > { %v9432_v43 = vpop.f32.mrf.mxu3 }
 0xa96   : > { %v9286_v34 = vpop.f32.mrf.mxu2 }
 0xa97   : > { %v9428_v42 = vadd.f32 %v9427_v23, %v9286_v34 }
 0xa9a   : > { %v9031_v56 = vpop.permute.xlu2 %9030 }
 0xa9b   : > { %9099 = vst.msk [vmem:[#allocation2 + $0x88] sm:$0xf] %vm9076_vm15, %v9031_v56 }
 0xa9e   : > { %v9288_v58 = vpop.f32.mrf.mxu2 }
 0xa9f   : > { %v9430_v1 = vadd.f32 %v9429_v10, %v9288_v58 }
 0xaa1   : > { %v9636_v12 = vpop.f32.mrf.mxu0 }
 0xaa2   : > { %v17166_v30 = vadd.f32 %v9636_v12, %v9423_v36  ;;  %v9025_v22 = vpop.permute.xlu0 %9024  ;;  %v9035_v48 = vpop.permute.xlu2 %9034 }
 0xaa3   : > { %9096 = vst.msk [vmem:[#allocation2 + $0x7c] sm:$0xf] %vm9076_vm15, %v9025_v22  ;;  %v9434_v22 = vpop.f32.mrf.mxu3 }
 0xaa4   : > { %9714 = vst.msk [vmem:[#allocation3 + $0x28] sm:$0xff] %vm716_vm1, %v17166_v30 }
 0xaa5   : > { %9101 = vst.msk [vmem:[#allocation2 + $0x90] sm:$0xf] %vm9076_vm15, %v9035_v48 }
 0xaa6   : > { %v9291_v57 = vpop.f32.mrf.mxu2 }
 0xaa7   : > { %v9433_v56 = vadd.f32 %v9432_v43, %v9291_v57 }
 0xaa9   : > { %v9638_v6 = vpop.f32.mrf.mxu0 }
 0xaaa   : > { %v17172_v33 = vadd.f32 %v9638_v6, %v9425_v38  ;;  %v9029_v0 = vpop.permute.xlu0 %9028  ;;  %v9041_v62 = vpop.permute.xlu2 %9040  ;;  %v12468_v35 = vld [vmem:[#allocation2 + $0x78] sm:$0xff]  }
 0xaab   : > { %v12903_v63 = vld [vmem:[#allocation2 + $0x7c] sm:$0xff]   ;;  %9098 = vst.msk [vmem:[#allocation2 + $0x84] sm:$0xf] %vm9076_vm15, %v9029_v0  ;;  %11254 = vmatmul.msk.bf16.gmra.mxu3 %vm9225_vm3, %v12468_v35  ;;  %v12134_v27 = vunpack.c.l.bf16 %v12468_v35  ;;  %v12135_v54 = vunpack.c.h.bf16 %v12468_v35  ;;  %v9437_v35 = vpop.f32.mrf.mxu3 }
 0xaac   : > { %9715 = vst.msk [vmem:[#allocation3 + $0x30] sm:$0xff] %vm716_vm1, %v17172_v33  ;;  %v11455_v8 = vld [vmem:[#allocation2 + $0x78] sm:$0xff]  ;;  %11225 = vmatmul.msk.bf16.gmra.mxu2 %vm9225_vm3, %v12903_v63 }
 0xaad   : > { %9104 = vst.msk [vmem:[#allocation2 + $0x9c] sm:$0xf] %vm9076_vm15, %v9041_v62  ;;  %11329 = vmatmul.msk.bf16.gmra.mxu0 %vm9225_vm3, %v11455_v8  ;;  %v13386_v17 = vpack.i.bf16 %v12134_v27, %v12131_v16 }
 0xaae   : > { %v9293_v48 = vpop.f32.mrf.mxu2 }
 0xaaf   : > { %13387 = vrot.lane.b32.xlu1 %v13386_v17, %s13467_s24  ;;  %v9435_v39 = vadd.f32 %v9434_v22, %v9293_v48 }
 0xab2   : > { %v9033_v24 = vpop.permute.xlu0 %9032  ;;  %v12479_v40 = vld [vmem:[#allocation2 + $0x80] sm:$0xff]  }
 0xab3   : > { %9100 = vst.msk [vmem:[#allocation2 + $0x8c] sm:$0xf] %vm9076_vm15, %v9033_v24  ;;  %v12138_v2 = vunpack.c.l.bf16 %v12479_v40  ;;  %v12905_v3 = vld [vmem:[#allocation2 + $0x84] sm:$0xff]   ;;  %v12139_v59 = vunpack.c.h.bf16 %v12479_v40  ;;  %v17224_v9 = vpop.permute.xlu2 %10054  ;;  %v9439_v34 = vpop.f32.mrf.mxu3 }
 0xab4   : > { %v11456_v41 = vld [vmem:[#allocation2 + $0x80] sm:$0xff] }
 0xab5   : > { %v13391_v49 = vpack.i.bf16 %v12138_v2, %v12135_v54 }
 0xab7   : > { %9764 = vrot.lane.b32.xlu1 %v17152_v53, %s13470_s26  ;;  %13392 = vrot.lane.b32.xlu2 %v13391_v49, %s13467_s24 }
 0xab8   : > { %v9641_v4 = vpop.f32.mrf.mxu0 }
 0xab9   : > { %v17186_v5 = vadd.f32 %v9641_v4, %v9428_v42 }
 0xaba   : > { %v9037_v44 = vpop.permute.xlu0 %9036  ;;  %v12480_v13 = vld [vmem:[#allocation2 + $0x88] sm:$0xff]  }
 0xabb   : > { %9716 = vst.msk [vmem:[#allocation3 + $0x38] sm:$0xff] %vm716_vm1, %v17186_v5  ;;  %v12142_v21 = vunpack.c.l.bf16 %v12480_v13  ;;  %11255 = vmatmul.msk.bf16.gmra.mxu3 %vm9225_vm3, %v12479_v40  ;;  %v12143_v46 = vunpack.c.h.bf16 %v12480_v13  ;;  %v12906_v61 = vld [vmem:[#allocation2 + $0x8c] sm:$0xff]  ;;  %v17233_v6 = vpop.permute.xlu2 %13362 }
 0xabc   : > { %9102 = vst.msk [vmem:[#allocation2 + $0x94] sm:$0xf] %vm9076_vm15, %v9037_v44  ;;  %11226 = vmatmul.msk.bf16.gmra.mxu2 %vm9225_vm3, %v12905_v3  ;;  %v11457_v20 = vld [vmem:[#allocation2 + $0x88] sm:$0xff] }
 0xabd   : > { %11330 = vmatmul.msk.bf16.gmra.mxu0 %vm9225_vm3, %v11456_v41  ;;  %v13396_v29 = vpack.i.bf16 %v12142_v21, %v12139_v59  ;;  %v9442_v42 = vpop.f32.mrf.mxu3 }
 0xabf   : > { %13397 = vrot.lane.b32.xlu0 %v13396_v29, %s13467_s24  ;;  %9760 = vrot.lane.b32.xlu2 %v17137_v32, %s13470_s26 }
 0xac0   : > { %v9643_v47 = vpop.f32.mrf.mxu0 }
 0xac1   : > { %v17197_v25 = vadd.f32 %v9643_v47, %v9430_v1 }
 0xac2   : > { %v9039_v37 = vpop.permute.xlu1 %9038 }
 0xac3   : > { %9717 = vst.msk [vmem:[#allocation3 + $0x40] sm:$0xff] %vm716_vm1, %v17197_v25  ;;  %v12481_v15 = vld [vmem:[#allocation2 + $0x90] sm:$0xff]  }
 0xac4   : > { %9103 = vst.msk [vmem:[#allocation2 + $0x98] sm:$0xf] %vm9076_vm15, %v9039_v37  ;;  %v12146_v18 = vunpack.c.l.bf16 %v12481_v15  ;;  %v12147_v19 = vunpack.c.h.bf16 %v12481_v15  ;;  %v11458_v51 = vld [vmem:[#allocation2 + $0x90] sm:$0xff] }
 0xac5   : > { %v9444_v41 = vpop.f32.mrf.mxu3 }
 0xac6   : > { %v13401_v26 = vpack.i.bf16 %v12146_v18, %v12143_v46 }
 0xac7   : > { %9762 = vrot.lane.b32.xlu0 %v17147_v11, %s13470_s26  ;;  %9766 = vrot.lane.b32.xlu2 %v17159_v31, %s13470_s26 }
 0xac8   : > { %13402 = vrot.lane.b32.xlu1 %v13401_v26, %s13467_s24 }
 0xaca   : > { %v9045_v7 = vpop.permute.xlu1 %9044  ;;  %v9043_v14 = vpop.permute.xlu0 %9042 }
 0xacb   : > { %9106 = vst.msk [vmem:[#allocation2 + $0xa4] sm:$0xf] %vm9076_vm15, %v9045_v7  ;;  %v10104_v50 = vld [vmem:[#allocation2 + $0x98] sm:$0xf]  ;;  %11256 = vmatmul.msk.bf16.gmra.mxu3 %vm9225_vm3, %v12480_v13 }
 0xacc   : > { %9105 = vst.msk [vmem:[#allocation2 + $0xa0] sm:$0xf] %vm9076_vm15, %v9043_v14  ;;  %v10128_v45 = vunpack.c.l.bf16 %v10104_v50  ;;  %11227 = vmatmul.msk.bf16.gmra.mxu2 %vm9225_vm3, %v12906_v61  ;;  %v11445_v55 = vld [vmem:[#allocation2 + $0x94] sm:$0xff]  ;;  %vm9832_vm15 = vcmask 261248  }
 0xacd   : > { %11331 = vmatmul.msk.bf16.gmra.mxu0 %vm9225_vm3, %v11457_v20  ;;  %v11459_v52 = vld [vmem:[#allocation2 + $0x98] sm:$0xff] }
 0xace   : > { %v13406_v60 = vpack.i.bf16 %v10128_v45, %v12147_v19 }
 0xacf   : > { %9768 = vrot.lane.b32.xlu0 %v17166_v30, %s13470_s26 }
 0xad0   : > { %13407 = vrot.lane.b32.xlu2 %v13406_v60, %s13467_s24  ;;  %9770 = vrot.lane.b32.xlu1 %v17172_v33, %s13470_s26 }
 0xad2   : > { %v17249_v24 = vpop.permute.xlu1 %13357  ;;  %v17259_v4 = vpop.permute.xlu0 %13352 }
 0xad3   : > { %v11460_v28 = vld [vmem:[#allocation2 + $0xa0] sm:$0xff] }
 0xad7   : > { %9774 = vrot.lane.b32.xlu0 %v17197_v25, %s13470_s26 }
 0xad8   : > { %9772 = vrot.lane.b32.xlu2 %v17186_v5, %s13470_s26 }
 0xad9   : > { %v17241_v16 = vpop.permute.xlu2 %13377 }
 0xada   : > { %v17261_v44 = vpop.permute.xlu1 %13372  ;;  %v17264_v59 = vpop.permute.xlu0 %13367 }
 0xadc   : > { %11228 = vmatmul.msk.bf16.gmra.mxu2 %vm9225_vm3, %v11445_v55 }
 0xadd   : > { %11332 = vmatmul.msk.bf16.gmra.mxu0 %vm9225_vm3, %v11458_v51 }
 0xae6   : > { %v9296_v62 = vpop.f32.mrf.mxu2 }
 0xae7   : > { %v9438_v63 = vadd.f32 %v9437_v35, %v9296_v62 }
 0xaed   : > { %11333 = vmatmul.msk.bf16.gmra.mxu0 %vm9225_vm3, %v11459_v52 }
 0xaee   : > { %v9298_v17 = vpop.f32.mrf.mxu2 }
 0xaef   : > { %v9440_v40 = vadd.f32 %v9439_v34, %v9298_v17 }
 0xaf9   : > { %v17269_v10 = vpop.permute.xlu0 %13382 }
 0xafa   : > { %v9646_v36 = vpop.f32.mrf.mxu0 }
 0xafb   : > { %v17226_v12 = vadd.f32 %v9646_v36, %v9433_v56 }
 0xafd   : > { %9718 = vst.msk [vmem:[#allocation3 + $0x48] sm:$0xff] %vm716_vm1, %v17226_v12  ;;  %9776 = vrot.lane.b32.xlu1 %v17226_v12, %s13470_s26  ;;  %11334 = vmatmul.msk.bf16.gmra.mxu0 %vm9225_vm3, %v11460_v28 }
 0xafe   : > { %v9447_v1 = vpop.f32.mrf.mxu3 }
 0xaff   : > { %v9301_v49 = vpop.f32.mrf.mxu2 }
 0xb00   : > { %v9443_v47 = vadd.f32 %v9442_v42, %v9301_v49 }
 0xb02   : > { %v9648_v38 = vpop.f32.mrf.mxu0 }
 0xb03   : > { %v17235_v0 = vadd.f32 %v9648_v38, %v9435_v39 }
 0xb05   : > { %9719 = vst.msk [vmem:[#allocation3 + $0x50] sm:$0xff] %vm716_vm1, %v17235_v0  ;;  %9778 = vrot.lane.b32.xlu2 %v17235_v0, %s13470_s26 }
 0xb06   : > { %v9449_v20 = vpop.f32.mrf.mxu3 }
 0xb07   : > { %v9303_v3 = vpop.f32.mrf.mxu2 }
 0xb08   : > { %v9445_v14 = vadd.f32 %v9444_v41, %v9303_v3 }
 0xb0a   : > { %v9651_v8 = vpop.f32.mrf.mxu0 }
 0xb0b   : > { %v17243_v27 = vadd.f32 %v9651_v8, %v9438_v63 }
 0xb0d   : > { %9720 = vst.msk [vmem:[#allocation3 + $0x58] sm:$0xff] %vm716_vm1, %v17243_v27  ;;  %9780 = vrot.lane.b32.xlu0 %v17243_v27, %s13470_s26 }
 0xb0e   : > { %v9452_v57 = vpop.f32.mrf.mxu3 }
 0xb11   : > { %v17251_v54 = vpop.permute.xlu2 %13392 }
 0xb12   : > { %v9653_v23 = vpop.f32.mrf.mxu0 }
 0xb13   : > { %v17253_v2 = vadd.f32 %v9653_v23, %v9440_v40 }
 0xb15   : > { %9721 = vst.msk [vmem:[#allocation3 + $0x60] sm:$0xff] %vm716_vm1, %v17253_v2  ;;  %9782 = vrot.lane.b32.xlu1 %v17253_v2, %s13470_s26 }
 0xb16   : > { %v9306_v29 = vpop.f32.mrf.mxu2  ;;  %v9454_v38 = vpop.f32.mrf.mxu3 }
 0xb17   : > { %v9448_v55 = vadd.f32 %v9447_v1, %v9306_v29 }
 0xb19   : > { %v9761_v13 = vpop.permute.xlu2 %9760 }
 0xb1a   : > { %9833 = vst.msk [vmem:[#allocation3 + $0x8] sm:$0xff] %vm9832_vm15, %v9761_v13 }
 0xb1e   : > { %v9308_v26 = vpop.f32.mrf.mxu2 }
 0xb1f   : > { %v9450_v36 = vadd.f32 %v9449_v20, %v9308_v26 }
 0xb21   : > { %v17266_v21 = vpop.permute.xlu1 %13387  ;;  %v9767_v58 = vpop.permute.xlu2 %9766  ;;  %v9859_v34 = vld [vmem:[#allocation3 + $0x7] sm:$0xff] }
 0xb22   : > { %9836 = vst.msk [vmem:[#allocation3 + $0x20] sm:$0xff] %vm9832_vm15, %v9767_v58 }
 0xb29   : > { %v9765_v37 = vpop.permute.xlu1 %9764 }
 0xb2a   : > { %v17271_v15 = vpop.permute.xlu2 %13407  ;;  %v9656_v46 = vpop.f32.mrf.mxu0  ;;  %9835 = vst.msk [vmem:[#allocation3 + $0x18] sm:$0xff] %vm9832_vm15, %v9765_v37 }
 0xb2b   : > { %v17274_v18 = vadd.f32 %v9656_v46, %v9443_v47 }
 0xb2d   : > { %9722 = vst.msk [vmem:[#allocation3 + $0x68] sm:$0xff] %vm716_vm1, %v17274_v18  ;;  %9784 = vrot.lane.b32.xlu2 %v17274_v18, %s13470_s26 }
 0xb2e   : > { %v9457_v40 = vpop.f32.mrf.mxu3 }
 0xb2f   : > { %v9311_v45 = vpop.f32.mrf.mxu2 }
 0xb30   : > { %v9453_v35 = vadd.f32 %v9452_v57, %v9311_v45 }
 0xb31   : > { %v17280_v7 = vpop.permute.xlu0 %13397 }
 0xb32   : > { %v9773_v61 = vpop.permute.xlu2 %9772  ;;  %v9658_v50 = vpop.f32.mrf.mxu0 }
 0xb33   : > { %9839 = vst.msk [vmem:[#allocation3 + $0x38] sm:$0xff] %vm9832_vm15, %v9773_v61  ;;  %v17283_v19 = vadd.f32 %v9658_v50, %v9445_v14  ;;  %v9862_v50 = vld [vmem:[#allocation3 + $0x1f] sm:$0xff] }
 0xb35   : > { %9723 = vst.msk [vmem:[#allocation3 + $0x70] sm:$0xff] %vm716_vm1, %v17283_v19  ;;  %9786 = vrot.lane.b32.xlu0 %v17283_v19, %s13470_s26 }
 0xb36   : > { %v9459_v41 = vpop.f32.mrf.mxu3 }
 0xb37   : > { %v9313_v48 = vpop.f32.mrf.mxu2 }
 0xb38   : > { %v9455_v23 = vadd.f32 %v9454_v38, %v9313_v48 }
 0xb39   : > { %v9763_v60 = vpop.permute.xlu0 %9762 }
 0xb3a   : > { %v17289_v51 = vpop.permute.xlu1 %13402  ;;  %9834 = vst.msk [vmem:[#allocation3 + $0x10] sm:$0xff] %vm9832_vm15, %v9763_v60  ;;  %v9661_v52 = vpop.f32.mrf.mxu0 }
 0xb3b   : > { %v17292_v43 = vadd.f32 %v9661_v52, %v9448_v55 }
 0xb3d   : > { %9724 = vst.msk [vmem:[#allocation3 + $0x78] sm:$0xff] %vm716_vm1, %v17292_v43  ;;  %9788 = vrot.lane.b32.xlu1 %v17292_v43, %s13470_s26 }
 0xb3e   : > { %v9462_v14 = vpop.f32.mrf.mxu3 }
 0xb3f   : > { %v9316_v17 = vpop.f32.mrf.mxu2 }
 0xb40   : > { %v9458_v58 = vadd.f32 %v9457_v40, %v9316_v17 }
 0xb41   : > { %v9769_v56 = vpop.permute.xlu0 %9768  ;;  %v9860_v13 = vld [vmem:[#allocation3 + $0xf] sm:$0xff]  ;;  %v9861_v47 = vld [vmem:[#allocation3 + $0x17] sm:$0xff] }
 0xb42   : > { %v9771_v22 = vpop.permute.xlu1 %9770  ;;  %9837 = vst.msk [vmem:[#allocation3 + $0x28] sm:$0xff] %vm9832_vm15, %v9769_v56  ;;  %v9663_v28 = vpop.f32.mrf.mxu0 }
 0xb43   : > { %9838 = vst.msk [vmem:[#allocation3 + $0x30] sm:$0xff] %vm9832_vm15, %v9771_v22  ;;  %v17300_v39 = vadd.f32 %v9663_v28, %v9450_v36 }
 0xb45   : > { %9725 = vst.msk [vmem:[#allocation3 + $0x80] sm:$0xff] %vm716_vm1, %v17300_v39  ;;  %9790 = vrot.lane.b32.xlu2 %v17300_v39, %s13470_s26 }
 0xb46   : > { %v9464_v57 = vpop.f32.mrf.mxu3 }
 0xb47   : > { %v9318_v3 = vpop.f32.mrf.mxu2 }
 0xb48   : > { %v9460_v26 = vadd.f32 %v9459_v41, %v9318_v3 }
 0xb49   : > { %v9775_v62 = vpop.permute.xlu0 %9774  ;;  %v9863_v56 = vld [vmem:[#allocation3 + $0x27] sm:$0xff] }
 0xb4a   : > { %9840 = vst.msk [vmem:[#allocation3 + $0x40] sm:$0xff] %vm9832_vm15, %v9775_v62  ;;  %v9666_v63 = vpop.f32.mrf.mxu0  ;;  %v9864_v62 = vld [vmem:[#allocation3 + $0x2f] sm:$0xff]  ;;  %v9865_v40 = vld [vmem:[#allocation3 + $0x37] sm:$0xff] }
 0xb4b   : > { %v17307_v8 = vadd.f32 %v9666_v63, %v9453_v35 }
 0xb4d   : > { %9726 = vst.msk [vmem:[#allocation3 + $0x88] sm:$0xff] %vm716_vm1, %v17307_v8  ;;  %9792 = vrot.lane.b32.xlu0 %v17307_v8, %s13470_s26  ;;  %9907 = vrot.lane.b32.xlu2 %v9859_v34, %s13467_s24 }
 0xb4e   : > { %v9467_v35 = vpop.f32.mrf.mxu3 }
 0xb4f   : > { %v9321_v46 = vpop.f32.mrf.mxu2 }
 0xb50   : > { %v9463_v45 = vadd.f32 %v9462_v14, %v9321_v46 }
 0xb52   : > { %v9668_v49 = vpop.f32.mrf.mxu0 }
 0xb53   : > { %v17314_v42 = vadd.f32 %v9668_v49, %v9455_v23 }
 0xb55   : > { %9727 = vst.msk [vmem:[#allocation3 + $0x90] sm:$0xff] %vm716_vm1, %v17314_v42  ;;  %9794 = vrot.lane.b32.xlu1 %v17314_v42, %s13470_s26  ;;  %9909 = vrot.lane.b32.xlu0 %v9860_v13, %s13467_s24 }
 0xb56   : > { %v9469_v13 = vpop.f32.mrf.mxu3 }
 0xb57   : > { %v9323_v60 = vpop.f32.mrf.mxu2 }
 0xb58   : > { %v9465_v22 = vadd.f32 %v9464_v57, %v9323_v60 }
 0xb5a   : > { %v9671_v29 = vpop.f32.mrf.mxu0 }
 0xb5b   : > { %v17321_v1 = vadd.f32 %v9671_v29, %v9458_v58  ;;  %v9866_v29 = vld [vmem:[#allocation3 + $0x3f] sm:$0xff] }
 0xb5d   : > { %9728 = vst.msk [vmem:[#allocation3 + $0x98] sm:$0xff] %vm716_vm1, %v17321_v1  ;;  %9911 = vrot.lane.b32.xlu1 %v9861_v47, %s13467_s24  ;;  %9796 = vrot.lane.b32.xlu2 %v17321_v1, %s13470_s26 }
 0xb5f   : > { %v9779_v37 = vpop.permute.xlu2 %9778  ;;  %v9326_v38 = vpop.f32.mrf.mxu2 }
 0xb60   : > { %9842 = vst.msk [vmem:[#allocation3 + $0x50] sm:$0xff] %vm9832_vm15, %v9779_v37  ;;  %v9468_v63 = vadd.f32 %v9467_v35, %v9326_v38  ;;  %v13354_v35 = vunpack.i.l.bf16 %v17259_v4 }
 0xb62   : > { %v9673_v61 = vpop.f32.mrf.mxu0 }
 0xb63   : > { %v17329_v20 = vadd.f32 %v9673_v61, %v9460_v26 }
 0xb65   : > { %9729 = vst.msk [vmem:[#allocation3 + $0xa0] sm:$0xff] %vm716_vm1, %v17329_v20  ;;  %9798 = vrot.lane.b32.xlu0 %v17329_v20, %s13470_s26  ;;  %9913 = vrot.lane.b32.xlu2 %v9862_v50, %s13467_s24 }
 0xb67   : > { %v9328_v49 = vpop.f32.mrf.mxu2 }
 0xb68   : > { %v9470_v3 = vadd.f32 %v9469_v13, %v9328_v49 }
 0xb6a   : > { %v9676_v55 = vpop.f32.mrf.mxu0 }
 0xb6b   : > { %v17336_v52 = vadd.f32 %v9676_v55, %v9463_v45 }
 0xb6d   : > { %9730 = vst.msk [vmem:[#allocation3 + $0xa8] sm:$0xff] %vm716_vm1, %v17336_v52  ;;  %9800 = vrot.lane.b32.xlu1 %v17336_v52, %s13470_s26  ;;  %9915 = vrot.lane.b32.xlu0 %v9863_v56, %s13467_s24  ;;  %v10003_v56 = vld [vmem:[#allocation3 + $0x9] sm:$0xff] }
 0xb6f   : > { %v9777_v36 = vpop.permute.xlu1 %9776 }
 0xb70   : > { %9841 = vst.msk [vmem:[#allocation3 + $0x48] sm:$0xff] %vm9832_vm15, %v9777_v36 }
 0xb72   : > { %v9678_v48 = vpop.f32.mrf.mxu0 }
 0xb73   : > { %v17344_v28 = vadd.f32 %v9678_v48, %v9465_v22 }
 0xb75   : > { %9731 = vst.msk [vmem:[#allocation3 + $0xb0] sm:$0xff] %vm716_vm1, %v17344_v28  ;;  %9917 = vrot.lane.b32.xlu1 %v9864_v62, %s13467_s24  ;;  %9802 = vrot.lane.b32.xlu2 %v17344_v28, %s13470_s26 }
 0xb77   : > { %v9868_v47 = vld [vmem:[#allocation3 + $0x4f] sm:$0xff]  ;;  %v9867_v26 = vld [vmem:[#allocation3 + $0x47] sm:$0xff] }
 0xb7a   : > { %v9681_v17 = vpop.f32.mrf.mxu0 }
 0xb7b   : > { %v17351_v34 = vadd.f32 %v9681_v17, %v9468_v63 }
 0xb7d   : > { %9732 = vst.msk [vmem:[#allocation3 + $0xb8] sm:$0xff] %vm716_vm1, %v17351_v34  ;;  %9804 = vrot.lane.b32.xlu0 %v17351_v34, %s13470_s26  ;;  %9919 = vrot.lane.b32.xlu2 %v9865_v40, %s13467_s24 }
 0xb7f   : > { %v9781_v23 = vpop.permute.xlu0 %9780 }
 0xb80   : > { %9843 = vst.msk [vmem:[#allocation3 + $0x58] sm:$0xff] %vm9832_vm15, %v9781_v23 }
 0xb82   : > { %v9683_v41 = vpop.f32.mrf.mxu0 }
 0xb83   : > { %v17359_v58 = vadd.f32 %v9683_v41, %v9470_v3 }
 0xb85   : > { %9733 = vst.msk [vmem:[#allocation3 + $0xc0] sm:$0xff] %vm716_vm1, %v17359_v58  ;;  %9806 = vrot.lane.b32.xlu1 %v17359_v58, %s13470_s26  ;;  %9921 = vrot.lane.b32.xlu0 %v9866_v29, %s13467_s24 }
 0xb86   : > { %9925 = vrot.lane.b32.xlu2 %v9868_v47, %s13467_s24 }
 0xb87   : > { %v9783_v37 = vpop.permute.xlu1 %9782  ;;  %v9785_v46 = vpop.permute.xlu2 %9784  ;;  %v9869_v14 = vld [vmem:[#allocation3 + $0x57] sm:$0xff] }
 0xb88   : > { %9844 = vst.msk [vmem:[#allocation3 + $0x60] sm:$0xff] %vm9832_vm15, %v9783_v37  ;;  %v10004_v37 = vld [vmem:[#allocation3 + $0x11] sm:$0xff] }
 0xb89   : > { %9845 = vst.msk [vmem:[#allocation3 + $0x68] sm:$0xff] %vm9832_vm15, %v9785_v46 }
 0xb8d   : > { %9923 = vrot.lane.b32.xlu1 %v9867_v26, %s13467_s24  ;;  %9927 = vrot.lane.b32.xlu0 %v9869_v14, %s13467_s24  ;;  %v13355_v14 = vunpack.i.h.bf16 %v17259_v4 }
 0xb8f   : > { %v9870_v50 = vld [vmem:[#allocation3 + $0x5f] sm:$0xff] }
 0xb90   : > { %v9871_v61 = vld [vmem:[#allocation3 + $0x67] sm:$0xff] }
 0xb91   : > { %9931 = vrot.lane.b32.xlu2 %v9871_v61, %s13467_s24 }
 0xb95   : > { %9929 = vrot.lane.b32.xlu1 %v9870_v50, %s13467_s24 }
 0xb9f   : > { %v9791_v45 = vpop.permute.xlu2 %9790 }
 0xba0   : > { %9848 = vst.msk [vmem:[#allocation3 + $0x80] sm:$0xff] %vm9832_vm15, %v9791_v45 }
 0xba7   : > { %v9787_v60 = vpop.permute.xlu0 %9786  ;;  %v9908_v55 = vpop.permute.xlu2 %9907 }
 0xba8   : > { %9846 = vst.msk [vmem:[#allocation3 + $0x70] sm:$0xff] %vm9832_vm15, %v9787_v60  ;;  %v9979_v57 = vadd.f32 %v9908_v55, %v17137_v32 }
 0xbaa   : > { %v10027_v36 = vadd.f32 %v10003_v56, %v9979_v57  ;;  %v10005_v57 = vld [vmem:[#allocation3 + $0x19] sm:$0xff] }
 0xbac   : > { %v10057_v22 = vadd.f32 %v17224_v9, %v10027_v36 }
 0xbae   : > { %v10129_v48 = vmul.f32 0.2, %v10057_v22  ;;  %v13359_v22 = vunpack.i.l.bf16 %v17249_v24 }
 0xbaf   : > { %v9789_v38 = vpop.permute.xlu1 %9788  ;;  %v9872_v62 = vld [vmem:[#allocation3 + $0x6f] sm:$0xff] }
 0xbb0   : > { %9847 = vst.msk [vmem:[#allocation3 + $0x78] sm:$0xff] %vm9832_vm15, %v9789_v38  ;;  %9933 = vrot.lane.b32.xlu0 %v9872_v62, %s13467_s24  ;;  %v10249_v63 = vadd.f32 %v13354_v35, %v10129_v48 }
 0xbb2   : > { %v10273_v49 = vpack.c.bf16 %v10249_v63, %v10249_v63 }
 0xbb7   : > { %v9797_v17 = vpop.permute.xlu2 %9796  ;;  %v9873_v40 = vld [vmem:[#allocation3 + $0x77] sm:$0xff]  ;;  %v9874_v23 = vld [vmem:[#allocation3 + $0x7f] sm:$0xff] }
 0xbb8   : > { %9851 = vst.msk [vmem:[#allocation3 + $0x98] sm:$0xff] %vm9832_vm15, %v9797_v17  ;;  %9935 = vrot.lane.b32.xlu1 %v9873_v40, %s13467_s24  ;;  %9937 = vrot.lane.b32.xlu2 %v9874_v23, %s13467_s24 }
 0xbb9   : > { %10321 = vrot.lane.b32.xlu0 %v10273_v49, %s13470_s26 }
 0xbbf   : > { %v9793_v32 = vpop.permute.xlu0 %9792  ;;  %v9914_v13 = vpop.permute.xlu2 %9913 }
 0xbc0   : > { %9849 = vst.msk [vmem:[#allocation3 + $0x88] sm:$0xff] %vm9832_vm15, %v9793_v32 }
 0xbc7   : > { %v9795_v3 = vpop.permute.xlu1 %9794  ;;  %v9910_v41 = vpop.permute.xlu0 %9909  ;;  %v9875_v29 = vld [vmem:[#allocation3 + $0x87] sm:$0xff] }
 0xbc8   : > { %9850 = vst.msk [vmem:[#allocation3 + $0x90] sm:$0xff] %vm9832_vm15, %v9795_v3  ;;  %v9980_v47 = vadd.f32 %v9910_v41, %v17147_v11  ;;  %9939 = vrot.lane.b32.xlu0 %v9875_v29, %s13467_s24  ;;  %v10008_v3 = vld [vmem:[#allocation3 + $0x31] sm:$0xff]  ;;  %v9982_v41 = vadd.f32 %v9914_v13, %v17159_v31 }
 0xbca   : > { %v10028_v46 = vadd.f32 %v10004_v37, %v9980_v47 }
 0xbcc   : > { %v10058_v26 = vadd.f32 %v17224_v9, %v10028_v46 }
 0xbce   : > { %v10130_v61 = vmul.f32 0.2, %v10058_v26  ;;  %v10006_v26 = vld [vmem:[#allocation3 + $0x21] sm:$0xff] }
 0xbcf   : > { %v9912_v50 = vpop.permute.xlu1 %9911  ;;  %v9803_v45 = vpop.permute.xlu2 %9802  ;;  %v9876_v35 = vld [vmem:[#allocation3 + $0x8f] sm:$0xff]  ;;  %v9877_v17 = vld [vmem:[#allocation3 + $0x97] sm:$0xff] }
 0xbd0   : > { %v10250_v60 = vadd.f32 %v13355_v14, %v10130_v61  ;;  %v9981_v55 = vadd.f32 %v9912_v50, %v17152_v53  ;;  %9854 = vst.msk [vmem:[#allocation3 + $0xb0] sm:$0xff] %vm9832_vm15, %v9803_v45  ;;  %v13365_v14 = vunpack.i.h.bf16 %v17233_v6  ;;  %v10030_v61 = vadd.f32 %v10006_v26, %v9982_v41 }
 0xbd2   : > { %v10029_v56 = vadd.f32 %v10005_v57, %v9981_v55  ;;  %v10274_v36 = vpack.c.bf16 %v10250_v60, %v10250_v60  ;;  %v10060_v31 = vadd.f32 %v17224_v9, %v10030_v61  ;;  %v10009_v57 = vld [vmem:[#allocation3 + $0x39] sm:$0xff] }
 0xbd4   : > { %v10059_v11 = vadd.f32 %v17224_v9, %v10029_v56  ;;  %10323 = vrot.lane.b32.xlu1 %v10274_v36, %s13470_s26  ;;  %v10007_v36 = vld [vmem:[#allocation3 + $0x29] sm:$0xff] }
 0xbd6   : > { %v10131_v48 = vmul.f32 0.2, %v10059_v11  ;;  %v10132_v11 = vmul.f32 0.2, %v10060_v31 }
 0xbd7   : > { %v9799_v38 = vpop.permute.xlu0 %9798  ;;  %v9920_v37 = vpop.permute.xlu2 %9919 }
 0xbd8   : > { %v10251_v4 = vadd.f32 %v13359_v22, %v10131_v48  ;;  %9852 = vst.msk [vmem:[#allocation3 + $0xa0] sm:$0xff] %vm9832_vm15, %v9799_v38 }
 0xbda   : > { %v10275_v62 = vpack.c.bf16 %v10251_v4, %v10251_v4 }
 0xbdc   : > { %9941 = vrot.lane.b32.xlu1 %v9876_v35, %s13467_s24  ;;  %10325 = vrot.lane.b32.xlu2 %v10275_v62, %s13470_s26  ;;  %v13360_v35 = vunpack.i.h.bf16 %v17249_v24 }
 0xbdf   : > { %v9801_v53 = vpop.permute.xlu1 %9800  ;;  %v9878_v63 = vld [vmem:[#allocation3 + $0x9f] sm:$0xff]  ;;  %v9916_v40 = vpop.permute.xlu0 %9915 }
 0xbe0   : > { %9853 = vst.msk [vmem:[#allocation3 + $0xa8] sm:$0xff] %vm9832_vm15, %v9801_v53  ;;  %9945 = vrot.lane.b32.xlu0 %v9878_v63, %s13467_s24  ;;  %v9983_v13 = vadd.f32 %v9916_v40, %v17166_v30  ;;  %v9926_v48 = vpop.permute.xlu2 %9925  ;;  %v10252_v53 = vadd.f32 %v13360_v35, %v10132_v11  ;;  %v10012_v40 = vld [vmem:[#allocation3 + $0x51] sm:$0xff]  ;;  %v13370_v35 = vunpack.i.h.bf16 %v17264_v59 }
 0xbe2   : > { %v10031_v22 = vadd.f32 %v10007_v36, %v9983_v13  ;;  %v10013_v36 = vld [vmem:[#allocation3 + $0x59] sm:$0xff] }
 0xbe4   : > { %9943 = vrot.lane.b32.xlu2 %v9877_v17, %s13467_s24  ;;  %v10061_v63 = vadd.f32 %v17224_v9, %v10031_v22 }
 0xbe7   : > { %v9918_v23 = vpop.permute.xlu1 %9917  ;;  %v9879_v49 = vld [vmem:[#allocation3 + $0xa7] sm:$0xff]  ;;  %v9880_v47 = vld [vmem:[#allocation3 + $0xaf] sm:$0xff] }
 0xbe8   : > { %v9984_v32 = vadd.f32 %v9918_v23, %v17172_v33  ;;  %9947 = vrot.lane.b32.xlu1 %v9879_v49, %s13467_s24  ;;  %v9985_v33 = vadd.f32 %v9920_v37, %v17186_v5  ;;  %v9988_v5 = vadd.f32 %v9926_v48, %v17235_v0  ;;  %v13364_v0 = vunpack.i.l.bf16 %v17233_v6 }
 0xbea   : > { %v10032_v29 = vadd.f32 %v10008_v3, %v9984_v32  ;;  %v10033_v56 = vadd.f32 %v10009_v57, %v9985_v33  ;;  %v10036_v49 = vadd.f32 %v10012_v40, %v9988_v5  ;;  %v10010_v32 = vld [vmem:[#allocation3 + $0x41] sm:$0xff]  ;;  %v10133_v3 = vmul.f32 0.2, %v10061_v63 }
 0xbeb   : > { %v9932_v41 = vpop.permute.xlu2 %9931  ;;  %v10014_v63 = vld [vmem:[#allocation3 + $0x61] sm:$0xff] }
 0xbec   : > { %v10062_v46 = vadd.f32 %v17224_v9, %v10032_v29  ;;  %9949 = vrot.lane.b32.xlu2 %v9880_v47, %s13467_s24  ;;  %v10063_v30 = vadd.f32 %v17224_v9, %v10033_v56  ;;  %v10276_v29 = vpack.c.bf16 %v10252_v53, %v10252_v53  ;;  %v13369_v47 = vunpack.i.l.bf16 %v17264_v59 }
 0xbed   : > { %v10066_v61 = vadd.f32 %v17224_v9, %v10036_v49  ;;  %v13380_v59 = vunpack.i.h.bf16 %v17241_v16 }
 0xbee   : > { %v10134_v50 = vmul.f32 0.2, %v10062_v46  ;;  %v10135_v23 = vmul.f32 0.2, %v10063_v30 }
 0xbef   : > { %v9805_v45 = vpop.permute.xlu0 %9804  ;;  %v10138_v57 = vmul.f32 0.2, %v10066_v61  ;;  %v10018_v61 = vld [vmem:[#allocation3 + $0x81] sm:$0xff] }
 0xbf0   : > { %v10254_v60 = vadd.f32 %v13365_v14, %v10134_v50  ;;  %9855 = vst.msk [vmem:[#allocation3 + $0xb8] sm:$0xff] %vm9832_vm15, %v9805_v45  ;;  %v9991_v50 = vadd.f32 %v9932_v41, %v17274_v18  ;;  %v10011_v45 = vld [vmem:[#allocation3 + $0x49] sm:$0xff] }
 0xbf2   : > { %v10278_v55 = vpack.c.bf16 %v10254_v60, %v10254_v60  ;;  %v10253_v60 = vadd.f32 %v13364_v0, %v10133_v3 }
 0xbf4   : > { %10331 = vrot.lane.b32.xlu2 %v10278_v55, %s13470_s26  ;;  %v10015_v55 = vld [vmem:[#allocation3 + $0x69] sm:$0xff]  ;;  %v10277_v18 = vpack.c.bf16 %v10253_v60, %v10253_v60 }
 0xbf5   : > { %v10039_v56 = vadd.f32 %v10015_v55, %v9991_v50 }
 0xbf7   : > { %v9807_v38 = vpop.permute.xlu1 %9806  ;;  %v9922_v4 = vpop.permute.xlu0 %9921  ;;  %v9881_v62 = vld [vmem:[#allocation3 + $0xb7] sm:$0xff]  ;;  %v10069_v53 = vadd.f32 %v17224_v9, %v10039_v56 }
 0xbf8   : > { %9856 = vst.msk [vmem:[#allocation3 + $0xc0] sm:$0xff] %vm9832_vm15, %v9807_v38  ;;  %9951 = vrot.lane.b32.xlu0 %v9881_v62, %s13467_s24  ;;  %v9986_v17 = vadd.f32 %v9922_v4, %v17197_v25  ;;  %v10255_v25 = vadd.f32 %v13369_v47, %v10135_v23  ;;  %v13375_v4 = vunpack.i.h.bf16 %v17261_v44  ;;  %v13384_v47 = vunpack.i.l.bf16 %v17269_v10 }
 0xbfa   : > { %v10034_v24 = vadd.f32 %v10010_v32, %v9986_v17  ;;  %v10279_v11 = vpack.c.bf16 %v10255_v25, %v10255_v25  ;;  %v10258_v5 = vadd.f32 %v13375_v4, %v10138_v57  ;;  %v10141_v32 = vmul.f32 0.2, %v10069_v53 }
 0xbfc   : > { %v10064_v33 = vadd.f32 %v17224_v9, %v10034_v24 }
 0xbfe   : > { %v10136_v22 = vmul.f32 0.2, %v10064_v33  ;;  %v13390_v33 = vunpack.i.h.bf16 %v17266_v21 }
 0xbff   : > { %v9924_v37 = vpop.permute.xlu1 %9923  ;;  %v9928_v46 = vpop.permute.xlu0 %9927  ;;  %v9882_v26 = vld [vmem:[#allocation3 + $0xbf] sm:$0xff] }
 0xc00   : > { %v9987_v14 = vadd.f32 %v9924_v37, %v17226_v12  ;;  %9953 = vrot.lane.b32.xlu1 %v9882_v26, %s13467_s24  ;;  %10327 = vrot.lane.b32.xlu0 %v10276_v29, %s13470_s26  ;;  %v9989_v13 = vadd.f32 %v9928_v46, %v17243_v27  ;;  %v13374_v12 = vunpack.i.l.bf16 %v17261_v44  ;;  %v10256_v17 = vadd.f32 %v13370_v35, %v10136_v22  ;;  %s414_s24 = smul.u32 24, %s13445_s17 }
 0xc01   : > { %v13379_v29 = vunpack.i.l.bf16 %v17241_v16  ;;  %v10261_v46 = vadd.f32 %v13384_v47, %v10141_v32  ;;  %v13389_v35 = vunpack.i.l.bf16 %v17266_v21  ;;  %v10021_v21 = vld [vmem:[#allocation3 + $0x99] sm:$0xff] }
 0xc02   : > { %v10035_v31 = vadd.f32 %v10011_v45, %v9987_v14  ;;  %v10037_v38 = vadd.f32 %v10013_v36, %v9989_v13  ;;  %v10280_v24 = vpack.c.bf16 %v10256_v17, %v10256_v17  ;;  %p417_p7 = scmp.lt.s32.totalorder %s414_s24, 47  ;;  %v13385_v36 = vunpack.i.h.bf16 %v17269_v10  ;;  %v10019_v17 = vld [vmem:[#allocation3 + $0x89] sm:$0xff] }
 0xc03   : > { %v10285_v16 = vpack.c.bf16 %v10261_v46, %v10261_v46 }
 0xc04   : > { %v10065_v6 = vadd.f32 %v17224_v9, %v10035_v31  ;;  %v10067_v40 = vadd.f32 %v17224_v9, %v10037_v38  ;;  %s17734_s24 = smov (!%p417_p7, %s414_s24), 47 }
 0xc05   : > { %s420_s17 = sadd.s32 %s12909_s14, %s17734_s24 }
 0xc06   : > { %v10137_v48 = vmul.f32 0.2, %v10065_v6  ;;  %v10139_v3 = vmul.f32 0.2, %v10067_v40  ;;  %s10516_s15 = sshll.u32 %s420_s17, 2 }
 0xc07   : > { %v9930_v62 = vpop.permute.xlu1 %9929  ;;  %s17459_s28 = scalar_lea.vmem %s17572_s11, %s10516_s15 }
 0xc08   : > { %v10257_v30 = vadd.f32 %v13374_v12, %v10137_v48  ;;  %v9990_v27 = vadd.f32 %v9930_v62, %v17253_v2  ;;  %10329 = vrot.lane.b32.xlu1 %v10277_v18, %s13470_s26  ;;  %10333 = vrot.lane.b32.xlu0 %v10279_v11, %s13470_s26  ;;  %v10282_v2 = vpack.c.bf16 %v10258_v5, %v10258_v5  ;;  %v10016_v12 = vld [vmem:[#allocation3 + $0x71] sm:$0xff]  ;;  %v10017_v18 = vld [vmem:[#allocation3 + $0x79] sm:$0xff] }
 0xc09   : > { %v10259_v26 = vadd.f32 %v13379_v29, %v10139_v3 }
 0xc0a   : > { %v10038_v23 = vadd.f32 %v10014_v63, %v9990_v27  ;;  %v10281_v49 = vpack.c.bf16 %v10257_v30, %v10257_v30 }
 0xc0b   : > { %v10283_v45 = vpack.c.bf16 %v10259_v26, %v10259_v26  ;;  %v10024_v26 = vld [vmem:[#allocation3 + $0xb1] sm:$0xff] }
 0xc0c   : > { %v10068_v44 = vadd.f32 %v17224_v9, %v10038_v23  ;;  %10337 = vrot.lane.b32.xlu2 %v10281_v49, %s13470_s26 }
 0xc0e   : > { %v10140_v41 = vmul.f32 0.2, %v10068_v44 }
 0xc10   : > { %v10260_v37 = vadd.f32 %v13380_v59, %v10140_v41  ;;  %10335 = vrot.lane.b32.xlu1 %v10280_v24, %s13470_s26  ;;  %10339 = vrot.lane.b32.xlu0 %v10282_v2, %s13470_s26  ;;  %v13394_v59 = vunpack.i.l.bf16 %v17251_v54  ;;  %v13399_v24 = vunpack.i.l.bf16 %v17280_v7 }
 0xc12   : > { %v9938_v0 = vpop.permute.xlu2 %9937  ;;  %v10284_v14 = vpack.c.bf16 %v10260_v37, %v10260_v37 }
 0xc13   : > { %v9994_v25 = vadd.f32 %v9938_v0, %v17300_v39 }
 0xc14   : > { %10343 = vrot.lane.b32.xlu2 %v10284_v14, %s13470_s26 }
 0xc15   : > { %v10042_v50 = vadd.f32 %v10018_v61, %v9994_v25  ;;  %v13405_v61 = vunpack.i.h.bf16 %v17289_v51 }
 0xc17   : > { %v10072_v60 = vadd.f32 %v17224_v9, %v10042_v50 }
 0xc18   : > { %10341 = vrot.lane.b32.xlu1 %v10283_v45, %s13470_s26  ;;  %10345 = vrot.lane.b32.xlu0 %v10285_v16, %s13470_s26 }
 0xc19   : > { %v10144_v31 = vmul.f32 0.2, %v10072_v60 }
 0xc1b   : > { %v10264_v13 = vadd.f32 %v13390_v33, %v10144_v31 }
 0xc1d   : > { %v10288_v39 = vpack.c.bf16 %v10264_v13, %v10264_v13 }
 0xc20   : > { %10351 = vrot.lane.b32.xlu0 %v10288_v39, %s13470_s26 }
 0xc22   : > { %v9934_v55 = vpop.permute.xlu0 %9933 }
 0xc23   : > { %v9992_v6 = vadd.f32 %v9934_v55, %v17283_v19 }
 0xc25   : > { %v10040_v57 = vadd.f32 %v10016_v12, %v9992_v6  ;;  %v10022_v12 = vld [vmem:[#allocation3 + $0xa1] sm:$0xff] }
 0xc27   : > { %v10070_v56 = vadd.f32 %v17224_v9, %v10040_v57  ;;  %v13395_v57 = vunpack.i.h.bf16 %v17251_v54 }
 0xc29   : > { %v10142_v11 = vmul.f32 0.2, %v10070_v56 }
 0xc2a   : > { %v9936_v22 = vpop.permute.xlu1 %9935 }
 0xc2b   : > { %v10262_v48 = vadd.f32 %v13385_v36, %v10142_v11  ;;  %v9993_v19 = vadd.f32 %v9936_v22, %v17292_v43  ;;  %v10322_v38 = vpop.permute.xlu0 %10321  ;;  %v13400_v22 = vunpack.i.h.bf16 %v17280_v7 }
 0xc2c   : > { %10393 = vst.msk [vmem:[%s17459_s28] sm:$0xf] %vm479_vm0, %v10322_v38 }
 0xc2d   : > { %v10041_v4 = vadd.f32 %v10017_v18, %v9993_v19  ;;  %v10286_v62 = vpack.c.bf16 %v10262_v48, %v10262_v48 }
 0xc2f   : > { %v10071_v10 = vadd.f32 %v17224_v9, %v10041_v4  ;;  %10347 = vrot.lane.b32.xlu1 %v10286_v62, %s13470_s26 }
 0xc31   : > { %v10143_v30 = vmul.f32 0.2, %v10071_v10 }
 0xc33   : > { %v10263_v27 = vadd.f32 %v13389_v35, %v10143_v30  ;;  %v13404_v35 = vunpack.i.l.bf16 %v17289_v51  ;;  %v13409_v51 = vunpack.i.l.bf16 %v17271_v15 }
 0xc35   : > { %v10287_v5 = vpack.c.bf16 %v10263_v27, %v10263_v27 }
 0xc36   : > { %v10326_v53 = vpop.permute.xlu2 %10325 }
 0xc37   : > { %10395 = vst.msk [vmem:[%s17459_s28 + $0x8] sm:$0xf] %vm479_vm0, %v10326_v53  ;;  %10349 = vrot.lane.b32.xlu2 %v10287_v5, %s13470_s26 }
 0xc3a   : > { %v9940_v43 = vpop.permute.xlu0 %9939 }
 0xc3b   : > { %v9995_v63 = vadd.f32 %v9940_v43, %v17307_v8  ;;  %v10025_v43 = vld [vmem:[#allocation3 + $0xb9] sm:$0xff] }
 0xc3d   : > { %v10043_v40 = vadd.f32 %v10019_v17, %v9995_v63 }
 0xc3e   : > { %v9944_v23 = vpop.permute.xlu2 %9943 }
 0xc3f   : > { %v10073_v49 = vadd.f32 %v17224_v9, %v10043_v40  ;;  %v9997_v44 = vadd.f32 %v9944_v23, %v17321_v1 }
 0xc41   : > { %v10145_v2 = vmul.f32 0.2, %v10073_v49  ;;  %v10045_v32 = vadd.f32 %v10021_v21, %v9997_v44 }
 0xc43   : > { %v10265_v3 = vadd.f32 %v13394_v59, %v10145_v2  ;;  %v10075_v41 = vadd.f32 %v17224_v9, %v10045_v32 }
 0xc45   : > { %v10147_v29 = vmul.f32 0.2, %v10075_v41  ;;  %v10289_v8 = vpack.c.bf16 %v10265_v3, %v10265_v3  ;;  %v13410_v41 = vunpack.i.h.bf16 %v17271_v15 }
 0xc46   : > { %v10324_v47 = vpop.permute.xlu1 %10323  ;;  %v9950_v37 = vpop.permute.xlu2 %9949 }
 0xc47   : > { %v10267_v46 = vadd.f32 %v13399_v24, %v10147_v29  ;;  %10394 = vst.msk [vmem:[%s17459_s28 + $0x4] sm:$0xf] %vm479_vm0, %v10324_v47  ;;  %v10000_v1 = vadd.f32 %v9950_v37, %v17344_v28  ;;  %10353 = vrot.lane.b32.xlu1 %v10289_v8, %s13470_s26  ;;  %v10020_v28 = vld [vmem:[#allocation3 + $0x91] sm:$0xff] }
 0xc49   : > { %v10048_v0 = vadd.f32 %v10024_v26, %v10000_v1  ;;  %v10291_v14 = vpack.c.bf16 %v10267_v46, %v10267_v46 }
 0xc4b   : > { %v10078_v25 = vadd.f32 %v17224_v9, %v10048_v0  ;;  %10357 = vrot.lane.b32.xlu0 %v10291_v14, %s13470_s26 }
 0xc4d   : > { %v10150_v50 = vmul.f32 0.2, %v10078_v25 }
 0xc4e   : > { %v9942_v45 = vpop.permute.xlu1 %9941  ;;  %v10332_v16 = vpop.permute.xlu2 %10331 }
 0xc4f   : > { %v10270_v60 = vadd.f32 %v13405_v61, %v10150_v50  ;;  %v9996_v33 = vadd.f32 %v9942_v45, %v17314_v42  ;;  %10398 = vst.msk [vmem:[%s17459_s28 + $0x14] sm:$0xf] %vm479_vm0, %v10332_v16 }
 0xc51   : > { %v10044_v31 = vadd.f32 %v10020_v28, %v9996_v33  ;;  %v10294_v13 = vpack.c.bf16 %v10270_v60, %v10270_v60 }
 0xc52   : > { %v9946_v39 = vpop.permute.xlu0 %9945 }
 0xc53   : > { %v10074_v55 = vadd.f32 %v17224_v9, %v10044_v31  ;;  %v9998_v6 = vadd.f32 %v9946_v39, %v17329_v20  ;;  %10363 = vrot.lane.b32.xlu0 %v10294_v13, %s13470_s26  ;;  %v10023_v20 = vld [vmem:[#allocation3 + $0xa9] sm:$0xff] }
 0xc55   : > { %v10146_v56 = vmul.f32 0.2, %v10074_v55  ;;  %v10046_v36 = vadd.f32 %v10022_v12, %v9998_v6 }
 0xc57   : > { %v10266_v11 = vadd.f32 %v13395_v57, %v10146_v56  ;;  %v10076_v42 = vadd.f32 %v17224_v9, %v10046_v36 }
 0xc59   : > { %v10148_v48 = vmul.f32 0.2, %v10076_v42  ;;  %v10290_v19 = vpack.c.bf16 %v10266_v11, %v10266_v11 }
 0xc5a   : > { %v9948_v38 = vpop.permute.xlu1 %9947 }
 0xc5b   : > { %v10268_v18 = vadd.f32 %v13400_v22, %v10148_v48  ;;  %v9999_v4 = vadd.f32 %v9948_v38, %v17336_v52  ;;  %10355 = vrot.lane.b32.xlu2 %v10290_v19, %s13470_s26 }
 0xc5d   : > { %v10047_v62 = vadd.f32 %v10023_v20, %v9999_v4  ;;  %v10292_v10 = vpack.c.bf16 %v10268_v18, %v10268_v18 }
 0xc5f   : > { %v10077_v54 = vadd.f32 %v17224_v9, %v10047_v62  ;;  %10359 = vrot.lane.b32.xlu1 %v10292_v10, %s13470_s26 }
 0xc61   : > { %v10149_v7 = vmul.f32 0.2, %v10077_v54 }
 0xc63   : > { %v10269_v30 = vadd.f32 %v13404_v35, %v10149_v7 }
 0xc65   : > { %v10293_v27 = vpack.c.bf16 %v10269_v30, %v10269_v30 }
 0xc66   : > { %v10338_v5 = vpop.permute.xlu2 %10337 }
 0xc67   : > { %10401 = vst.msk [vmem:[%s17459_s28 + $0x20] sm:$0xf] %vm479_vm0, %v10338_v5  ;;  %10361 = vrot.lane.b32.xlu2 %v10293_v27, %s13470_s26 }
 0xc6a   : > { %v9952_v52 = vpop.permute.xlu0 %9951 }
 0xc6b   : > { %v10001_v53 = vadd.f32 %v9952_v52, %v17351_v34  ;;  %v10026_v34 = vld [vmem:[#allocation3 + $0xc1] sm:$0xff] }
 0xc6d   : > { %v10049_v63 = vadd.f32 %v10025_v43, %v10001_v53 }
 0xc6e   : > { %v10344_v17 = vpop.permute.xlu2 %10343 }
 0xc6f   : > { %v10079_v40 = vadd.f32 %v17224_v9, %v10049_v63  ;;  %10404 = vst.msk [vmem:[%s17459_s28 + $0x2c] sm:$0xf] %vm479_vm0, %v10344_v17 }
 0xc71   : > { %v10151_v23 = vmul.f32 0.2, %v10079_v40 }
 0xc72   : > { %v9954_v49 = vpop.permute.xlu1 %9953  ;;  %v10328_v44 = vpop.permute.xlu0 %10327 }
 0xc73   : > { %v10271_v21 = vadd.f32 %v13409_v51, %v10151_v23  ;;  %v10002_v59 = vadd.f32 %v9954_v49, %v17359_v58  ;;  %10396 = vst.msk [vmem:[%s17459_s28 + $0xc] sm:$0xf] %vm479_vm0, %v10328_v44 }
 0xc75   : > { %v10050_v2 = vadd.f32 %v10026_v34, %v10002_v59  ;;  %v10295_v32 = vpack.c.bf16 %v10271_v21, %v10271_v21 }
 0xc77   : > { %v10080_v3 = vadd.f32 %v17224_v9, %v10050_v2  ;;  %10365 = vrot.lane.b32.xlu1 %v10295_v32, %s13470_s26 }
 0xc79   : > { %v10152_v24 = vmul.f32 0.2, %v10080_v3 }
 0xc7a   : > { %v10330_v29 = vpop.permute.xlu1 %10329  ;;  %v10334_v8 = vpop.permute.xlu0 %10333 }
 0xc7b   : > { %v10272_v58 = vadd.f32 %v13410_v41, %v10152_v24  ;;  %10397 = vst.msk [vmem:[%s17459_s28 + $0x10] sm:$0xf] %vm479_vm0, %v10330_v29 }
 0xc7c   : > { %10399 = vst.msk [vmem:[%s17459_s28 + $0x18] sm:$0xf] %vm479_vm0, %v10334_v8 }
 0xc7d   : > { %v10296_v47 = vpack.c.bf16 %v10272_v58, %v10272_v58 }
 0xc7f   : > { %10367 = vrot.lane.b32.xlu2 %v10296_v47, %s13470_s26 }
 0xc82   : > { %v10336_v9 = vpop.permute.xlu1 %10335  ;;  %v10340_v37 = vpop.permute.xlu0 %10339 }
 0xc83   : > { %10400 = vst.msk [vmem:[%s17459_s28 + $0x1c] sm:$0xf] %vm479_vm0, %v10336_v9 }
 0xc84   : > { %10402 = vst.msk [vmem:[%s17459_s28 + $0x24] sm:$0xf] %vm479_vm0, %v10340_v37 }
 0xc8a   : > { %v10342_v15 = vpop.permute.xlu1 %10341  ;;  %v10346_v46 = vpop.permute.xlu0 %10345 }
 0xc8b   : > { %10403 = vst.msk [vmem:[%s17459_s28 + $0x28] sm:$0xf] %vm479_vm0, %v10342_v15 }
 0xc8c   : > { %10405 = vst.msk [vmem:[%s17459_s28 + $0x30] sm:$0xf] %vm479_vm0, %v10346_v46 }
 0xc91   : > { %v10350_v1 = vpop.permute.xlu2 %10349 }
 0xc92   : > { %10407 = vst.msk [vmem:[%s17459_s28 + $0x38] sm:$0xf] %vm479_vm0, %v10350_v1  ;;  %v10352_v26 = vpop.permute.xlu0 %10351 }
 0xc93   : > { %10408 = vst.msk [vmem:[%s17459_s28 + $0x3c] sm:$0xf] %vm479_vm0, %v10352_v26 }
 0xca1   : > { %v10348_v0 = vpop.permute.xlu1 %10347 }
 0xca2   : > { %10406 = vst.msk [vmem:[%s17459_s28 + $0x34] sm:$0xf] %vm479_vm0, %v10348_v0 }
 0xcb5   : > { %v10356_v14 = vpop.permute.xlu2 %10355 }
 0xcb6   : > { %10410 = vst.msk [vmem:[%s17459_s28 + $0x44] sm:$0xf] %vm479_vm0, %v10356_v14 }
 0xcb9   : > { %v10354_v25 = vpop.permute.xlu1 %10353 }
 0xcba   : > { %10409 = vst.msk [vmem:[%s17459_s28 + $0x40] sm:$0xf] %vm479_vm0, %v10354_v25 }
 0xcbd   : > { %v10358_v61 = vpop.permute.xlu0 %10357 }
 0xcbe   : > { %10411 = vst.msk [vmem:[%s17459_s28 + $0x48] sm:$0xf] %vm479_vm0, %v10358_v61 }
 0xcc1   : > { %v10362_v50 = vpop.permute.xlu2 %10361 }
 0xcc2   : > { %10413 = vst.msk [vmem:[%s17459_s28 + $0x50] sm:$0xf] %vm479_vm0, %v10362_v50 }
 0xcc5   : > { %v10364_v45 = vpop.permute.xlu0 %10363 }
 0xcc6   : > { %10414 = vst.msk [vmem:[%s17459_s28 + $0x54] sm:$0xf] %vm479_vm0, %v10364_v45 }
 0xcd1   : > { %v10360_v16 = vpop.permute.xlu1 %10359 }
 0xcd2   : > { %10412 = vst.msk [vmem:[%s17459_s28 + $0x4c] sm:$0xf] %vm479_vm0, %v10360_v16 }
 0xcd9   : > { %v10368_v60 = vpop.permute.xlu2 %10367 }
 0xcda   : > { %10416 = vst.msk [vmem:[%s17459_s28 + $0x5c] sm:$0xf] %vm479_vm0, %v10368_v60 }
 0xce9   : > { %v10366_v33 = vpop.permute.xlu1 %10365 }
 0xcea   : > { %10415 = vst.msk [vmem:[%s17459_s28 + $0x58] sm:$0xf] %vm479_vm0, %v10366_v33 }
 0xceb PF: > { %s21_s21 = sadd.s32 1, %s13461_s21   ;;  %s17721_s17 = smov %s13453_s19 }
 0xcec   : > { %p18_p8 = scmp.ge.s32.totalorder %s21_s21, 6   ;;  %s17722_s18 = smov %s13457_s20 }
 0xced   : > { %s17723_s19 = smov %s17726_s22  ;;  %s17724_s20 = smov %s17730_s23 }
 0xcee   :  { %20 = sbr.rel (!%p18_p8) target bundleno = 3 (0x3), region = 104 }

</bundles_post_ra>
